<compile_context>
chip_gen: v5e
topology: v5e:2x2
jax: 0.10.0
libtpu: 0.0.40
codegen_flags: <defaults>
</compile_context>

<pallas_src>
import functools

import jax
import jax.numpy as jnp
import numpy as np
from jax.experimental import pallas as pl
from jax.experimental.pallas import tpu as pltpu

_NEG_BIG = -1e30


def _round_up(v, m):
    return ((v + m - 1) // m) * m


# ---------------------------------------------------------------------------
# Pass 1: projection.
#   hp[:, :od]   = relu(x@W1.T + b1) @ Wg.T          (stored bf16 on fast path)
#   scores[:,0]  = h2 · a_src ,  scores[:,1] = h2 · a_dst   (narrow f32 slab)
# ---------------------------------------------------------------------------
def _project_kernel(x_ref, w1t_ref, b1_ref, wge_ref, wgs_ref, hp_ref, sc_ref,
                    *, use_bf16):
    h = jnp.dot(x_ref[...], w1t_ref[...],
                preferred_element_type=jnp.float32) + b1_ref[...]
    h = jnp.maximum(h, jnp.float32(0.0))
    # TODO(synk): F.dropout (training-mode stochastic dropout) skipped; identity (eval mode).
    h_mm = h.astype(jnp.bfloat16) if use_bf16 else h
    hp = jnp.dot(h_mm, wge_ref[...], preferred_element_type=jnp.float32)
    hp_ref[...] = hp.astype(hp_ref.dtype)
    # attention scores kept f32 (tiny, 2 lanes) for softmax accuracy
    sc_ref[...] = jnp.dot(h, wgs_ref[...], preferred_element_type=jnp.float32)


# ---------------------------------------------------------------------------
# Pass 2: GAT attention, flash-style online softmax over (sparsity-compacted)
#         src tiles.  Row tiles parallel, src axis is the "arbitrary" reduction.
# ---------------------------------------------------------------------------
def _attn_kernel(counts_ref, kidx_ref, hp_row_ref, sc_row_ref, hp_col_ref,
                 sc_col_ref, mask_ref, bg_ref, embed_ref,
                 m_sc, l_sc, acc_sc, *, use_bf16):
    i = pl.program_id(0)
    k = pl.program_id(1)

    @pl.when(k == 0)
    def _():
        m_sc[...] = jnp.full_like(m_sc, _NEG_BIG)
        l_sc[...] = jnp.zeros_like(l_sc)
        acc_sc[...] = jnp.zeros_like(acc_sc)

    # only non-empty adjacency tiles do work (compacted k index via scalar prefetch)
    @pl.when(k < counts_ref[i])
    def _():
        hp_col = hp_col_ref[...]                          # (TK, DP)   bf16 / f32
        s_dst = sc_row_ref[:, 1:2]                        # (TM, 1)    f32
        s_src = sc_col_ref[:, 0:1]                        # (TK, 1)    f32

        e = s_dst + s_src.T                               # (TM, TK)
        e = jnp.where(e > 0, e, jnp.float32(0.2) * e)     # LeakyReLU(0.2)
        mask = mask_ref[...] != 0                         # int8 adjacency -> bool
        e = jnp.where(mask, e, jnp.float32(_NEG_BIG))

        m_new = jnp.maximum(m_sc[...], jnp.max(e, axis=-1, keepdims=True))
        alpha = jnp.exp(m_sc[...] - m_new)
        em = e - m_new
        if use_bf16:
            p = jnp.exp(em.astype(jnp.bfloat16))          # bf16 EUP, feeds MXU directly
        else:
            p = jnp.exp(em)
        # load-bearing: rows with no neighbor in this tile give exp(0)=1 above
        p = jnp.where(mask, p, jnp.zeros_like(p))

        l_sc[...] = alpha * l_sc[...] + jnp.sum(
            p.astype(jnp.float32), axis=-1, keepdims=True)
        acc_sc[...] = alpha * acc_sc[...] + jnp.dot(
            p, hp_col, preferred_element_type=jnp.float32)
        m_sc[...] = m_new

    @pl.when(k == pl.num_programs(1) - 1)
    def _():
        inv_l = pl.reciprocal(l_sc[...], approx=use_bf16)
        # padded lanes of acc are exactly zero (wg_embed zero-padded), bg padded lanes zero
        embed = acc_sc[...] * inv_l + bg_ref[...]
        embed_ref[...] = embed.astype(embed_ref.dtype)


# ---------------------------------------------------------------------------
# Pass 3: structure reconstruction  recon = sigmoid(embed @ embed.T)
# ---------------------------------------------------------------------------
def _recon_kernel(er_ref, ec_ref, recon_ref):
    logits = jax.lax.dot_general(
        er_ref[...], ec_ref[...],
        dimension_numbers=(((1,), (1,)), ((), ())),
        preferred_element_type=jnp.float32)               # (TM, TN) = row @ col.T
    recon_ref[...] = jax.nn.sigmoid(logits).astype(recon_ref.dtype)


# ---------------------------------------------------------------------------
# Wrapper
# ---------------------------------------------------------------------------
@functools.partial(jax.jit, static_argnames=("use_bf16", "block_rows", "block_k"))
def structure_ae_forward(x, adj_mask, params, *, use_bf16=True,
                         block_rows=256, block_k=512):
    f32 = jnp.float32
    cdt = jnp.bfloat16 if use_bf16 else f32       # storage dtype for large tensors

    n, in_dim = x.shape
    ed = params["w1"].shape[0]
    od = params["wg"].shape[0]
    assert block_k % block_rows == 0
    d_pad = _round_up(od, 128)                    # lane-dense embed width (no score cols)
    n_pad = _round_up(n, block_k)
    nb_r = n_pad // block_rows
    nb_k = n_pad // block_k

    # ---- host-side glue: pre-cast operands, fold attention vectors into Wg ----
    x_pad = jnp.zeros((n_pad, in_dim), cdt).at[:n].set(x.astype(cdt))
    w1t = params["w1"].astype(cdt).T                              # (in_dim, ed)
    b1 = params["b1"].astype(f32).reshape(1, ed)
    wgt = params["wg"].astype(f32).T                              # (ed, od)
    wg_embed = jnp.zeros((ed, d_pad), f32).at[:, :od].set(wgt).astype(cdt)
    wg_score = jnp.stack([wgt @ params["att_src"].astype(f32),
                          wgt @ params["att_dst"].astype(f32)], axis=1)  # (ed, 2) f32
    bg = jnp.zeros((1, d_pad), f32).at[0, :od].set(params["bias_g"].astype(f32))

    # adjacency: use pre-padded mask when possible (avoids an extra N^2 pad copy)
    if adj_mask.shape[0] == n_pad:
        mask = adj_mask.astype(jnp.int8)
    else:
        mask = jnp.zeros((n_pad, n_pad), jnp.int8).at[:n, :n].set(
            adj_mask.astype(jnp.int8))
        if n_pad > n:   # self-loops on padded rows -> non-zero softmax denominator
            pad_idx = jnp.arange(n, n_pad)
            mask = mask.at[pad_idx, pad_idx].set(1)

    # per-(row-tile, src-tile) occupancy, compacted per row tile (scalar prefetch)
    ne = (mask != 0).reshape(nb_r, block_rows, nb_k, block_k).any(axis=(1, 3))
    counts = jnp.maximum(ne.sum(axis=1), 1).astype(jnp.int32)      # (nb_r,)
    kidx = jnp.argsort(jnp.where(ne, 0, 1), axis=1).astype(jnp.int32)  # nonempty first

    # ---- pass 1: projection ------------------------------------------------
    hp, scores = pl.pallas_call(
        functools.partial(_project_kernel, use_bf16=use_bf16),
        out_shape=(jax.ShapeDtypeStruct((n_pad, d_pad), cdt),
                   jax.ShapeDtypeStruct((n_pad, 2), f32)),
        grid_spec=pltpu.PrefetchScalarGridSpec(
            num_scalar_prefetch=0,
            grid=(nb_r,),
            in_specs=[
                pl.BlockSpec((block_rows, in_dim), lambda i: (i, 0)),
                pl.BlockSpec((in_dim, ed), lambda i: (0, 0)),
                pl.BlockSpec((1, ed), lambda i: (0, 0)),
                pl.BlockSpec((ed, d_pad), lambda i: (0, 0)),
                pl.BlockSpec((ed, 2), lambda i: (0, 0)),
            ],
            out_specs=[
                pl.BlockSpec((block_rows, d_pad), lambda i: (i, 0)),
                pl.BlockSpec((block_rows, 2), lambda i: (i, 0)),
            ],
        ),
        compiler_params=pltpu.CompilerParams(dimension_semantics=("parallel",)),
    )(x_pad, w1t, b1, wg_embed, wg_score)

    # ---- pass 2: attention (rows parallel, compacted src tiles = reduction) ----
    def _kid(i, k, counts_ref, kidx_ref):
        # clamp to last non-empty tile: repeated index => no new DMA, compute skipped
        return kidx_ref[i, jnp.minimum(k, jnp.maximum(counts_ref[i] - 1, 0))]

    embed_pad = pl.pallas_call(
        functools.partial(_attn_kernel, use_bf16=use_bf16),
        out_shape=jax.ShapeDtypeStruct((n_pad, d_pad), cdt),
        grid_spec=pltpu.PrefetchScalarGridSpec(
            num_scalar_prefetch=2,
            grid=(nb_r, nb_k),
            in_specs=[
                pl.BlockSpec((block_rows, d_pad), lambda i, k, c, kx: (i, 0)),
                pl.BlockSpec((block_rows, 2), lambda i, k, c, kx: (i, 0)),
                pl.BlockSpec((block_k, d_pad),
                             lambda i, k, c, kx: (_kid(i, k, c, kx), 0)),
                pl.BlockSpec((block_k, 2),
                             lambda i, k, c, kx: (_kid(i, k, c, kx), 0)),
                pl.BlockSpec((block_rows, block_k),
                             lambda i, k, c, kx: (i, _kid(i, k, c, kx))),
                pl.BlockSpec((1, d_pad), lambda i, k, c, kx: (0, 0)),
            ],
            out_specs=pl.BlockSpec((block_rows, d_pad),
                                   lambda i, k, c, kx: (i, 0)),
            scratch_shapes=[
                pltpu.VMEM((block_rows, 1), f32),       # running max
                pltpu.VMEM((block_rows, 1), f32),       # running denominator
                pltpu.VMEM((block_rows, d_pad), f32),   # weighted-sum accumulator
            ],
        ),
        compiler_params=pltpu.CompilerParams(
            dimension_semantics=("parallel", "arbitrary")),
    )(counts, kidx, hp, scores, hp, scores, mask, bg)

    # ---- pass 3: recon = sigmoid(embed @ embed.T) --------------------------
    recon_pad = pl.pallas_call(
        _recon_kernel,
        out_shape=jax.ShapeDtypeStruct((n_pad, n_pad), cdt),
        grid_spec=pltpu.PrefetchScalarGridSpec(
            num_scalar_prefetch=0,
            grid=(nb_r, nb_k),
            in_specs=[
                pl.BlockSpec((block_rows, d_pad), lambda i, j: (i, 0)),
                pl.BlockSpec((block_k, d_pad), lambda i, j: (j, 0)),
            ],
            out_specs=pl.BlockSpec((block_rows, block_k), lambda i, j: (i, j)),
        ),
        compiler_params=pltpu.CompilerParams(
            dimension_semantics=("parallel", "parallel")),
    )(embed_pad, embed_pad)

    return recon_pad[:n, :n], embed_pad[:n, :od]


# ---------------------------------------------------------------------------
# Pure-JAX reference with the module's semantics
# ---------------------------------------------------------------------------
def _reference_forward(x, adj, params):
    h = jnp.maximum(x @ params["w1"].T + params["b1"], 0.0)
    h2 = h @ params["wg"].T
    s_src = h2 @ params["att_src"]
    s_dst = h2 @ params["att_dst"]
    e = s_dst[:, None] + s_src[None, :]
    e = jnp.where(e > 0, e, 0.2 * e)
    mask = adj > 0
    e = jnp.where(mask, e, _NEG_BIG)
    e = e - jnp.max(e, axis=-1, keepdims=True)
    p = jnp.where(mask, jnp.exp(e), 0.0)
    attn = p / jnp.sum(p, axis=-1, keepdims=True)
    embed = attn @ h2 + params["bias_g"]
    recon = jax.nn.sigmoid(embed @ embed.T)
    return recon, embed


def _edge_index_to_adj(edge_index, n):
    """adj[dst, src] = 1 for each edge src->dst, plus self-loops; int8."""
    src, dst = edge_index[0], edge_index[1]
    adj = jnp.zeros((n, n), jnp.int8).at[dst, src].set(1)
    return jnp.maximum(adj, jnp.eye(n, dtype=jnp.int8))


if __name__ == "__main__":
    N, IN_DIM, EMBED_DIM, OUT_DIM = 1000, 64, 64, 16   # ragged tail + multi-tile grids

    key = jax.random.PRNGKey(0)
    kx, k1, k2, k3, k4, k5, k6 = jax.random.split(key, 7)

    x = jax.random.normal(kx, (N, IN_DIM), jnp.float32)
    params = {
        "w1": 0.1 * jax.random.normal(k1, (EMBED_DIM, IN_DIM), jnp.float32),
        "b1": 0.1 * jax.random.normal(k2, (EMBED_DIM,), jnp.float32),
        "wg": 0.1 * jax.random.normal(k3, (OUT_DIM, EMBED_DIM), jnp.float32),
        "att_src": 0.1 * jax.random.normal(k4, (OUT_DIM,), jnp.float32),
        "att_dst": 0.1 * jax.random.normal(k5, (OUT_DIM,), jnp.float32),
        "bias_g": 0.1 * jax.random.normal(k6, (OUT_DIM,), jnp.float32),
    }

    # deterministic sparse graph: bidirectional ring + bidirectional skip-37 edges
    idx = jnp.arange(N, dtype=jnp.int32)
    nbr1 = (idx + 1) % N
    nbr2 = (idx + 37) % N
    src_nodes = jnp.concatenate([idx, nbr1, idx, nbr2])
    dst_nodes = jnp.concatenate([nbr1, idx, nbr2, idx])
    edge_index = jnp.stack([src_nodes, dst_nodes], axis=0)   # (2, E) like PyG
    adj = _edge_index_to_adj(edge_index, N)

    # fast path: bf16 operands/storage, f32 accumulation, approx reciprocal,
    # sparse src-tile skipping (block_k=256 so some adjacency tiles are empty)
    recon, embed = structure_ae_forward(x, adj, params, use_bf16=True,
                                        block_rows=256, block_k=256)
    jax.block_until_ready((recon, embed))

    recon_ref, embed_ref = _reference_forward(x, adj, params)
    np.testing.assert_allclose(np.asarray(recon).astype(np.float32),
                               np.asarray(recon_ref), rtol=3e-2, atol=3e-2)
    np.testing.assert_allclose(np.asarray(embed).astype(np.float32),
                               np.asarray(embed_ref), rtol=3e-2, atol=3e-2)

    # exact path: f32 storage/matmuls, exact reciprocal
    recon32, embed32 = structure_ae_forward(x, adj, params, use_bf16=False,
                                            block_rows=256, block_k=256)
    jax.block_until_ready((recon32, embed32))
    np.testing.assert_allclose(np.asarray(recon32), np.asarray(recon_ref),
                               rtol=1e-4, atol=1e-4)
    np.testing.assert_allclose(np.asarray(embed32), np.asarray(embed_ref),
                               rtol=1e-4, atol=1e-4)

    print("KERNEL_OK")
</pallas_src>

<mosaic_0001>
module attributes {stable_mosaic.version = 11 : i64} {
  func.func @_project_kernel(%arg0: i32, %arg1: memref<256x64xbf16, #tpu.memory_space<vmem>>, %arg2: memref<64x64xbf16, #tpu.memory_space<vmem>>, %arg3: memref<1x64xf32, #tpu.memory_space<vmem>>, %arg4: memref<64x128xbf16, #tpu.memory_space<vmem>>, %arg5: memref<64x2xf32, #tpu.memory_space<vmem>>, %arg6: memref<256x128xbf16, #tpu.memory_space<vmem>>, %arg7: memref<256x2xf32, #tpu.memory_space<vmem>>) attributes {dimension_semantics = [#tpu.dimension_semantics<parallel>], iteration_bounds = array<i64: 4>, scalar_prefetch = 0 : i64, scratch_operands = 0 : i64, tpu.core_type = #tpu.core_type<tc>, window_params = [{transform_indices = @transform_0, window_bounds = array<i64: 256, 64>}, {pipeline_mode = #tpu.pipeline_mode<synchronous>, transform_indices = @transform_1, window_bounds = array<i64: 64, 64>}, {pipeline_mode = #tpu.pipeline_mode<synchronous>, transform_indices = @transform_2, window_bounds = array<i64: 1, 64>}, {pipeline_mode = #tpu.pipeline_mode<synchronous>, transform_indices = @transform_3, window_bounds = array<i64: 64, 128>}, {pipeline_mode = #tpu.pipeline_mode<synchronous>, transform_indices = @transform_4, window_bounds = array<i64: 64, 2>}, {transform_indices = @transform_5, window_bounds = array<i64: 256, 128>}, {transform_indices = @transform_6, window_bounds = array<i64: 256, 2>}]} {
    %c0 = arith.constant 0 : index
    %c0_0 = arith.constant 0 : index
    %0 = vector.load %arg1[%c0, %c0_0] : memref<256x64xbf16, #tpu.memory_space<vmem>>, vector<256x64xbf16>
    %c0_1 = arith.constant 0 : index
    %c0_2 = arith.constant 0 : index
    %1 = vector.load %arg2[%c0_1, %c0_2] : memref<64x64xbf16, #tpu.memory_space<vmem>>, vector<64x64xbf16>
    %cst = arith.constant dense<0.000000e+00> : vector<256x64xf32>
    %2 = tpu.matmul %0, %1, %cst {dimension_numbers = #tpu.dot_dimension_numbers<[1], [0], [0], [1], [0, 0, 1, 1], [], []>} : vector<256x64xbf16>, vector<64x64xbf16>, vector<256x64xf32> -> vector<256x64xf32>
    %c0_3 = arith.constant 0 : index
    %c0_4 = arith.constant 0 : index
    %3 = vector.load %arg3[%c0_3, %c0_4] : memref<1x64xf32, #tpu.memory_space<vmem>>, vector<1x64xf32>
    %4 = vector.broadcast %3 : vector<1x64xf32> to vector<256x64xf32>
    %5 = arith.addf %2, %4 : vector<256x64xf32>
    %cst_5 = arith.constant 0.000000e+00 : f32
    %6 = vector.broadcast %cst_5 : f32 to vector<256x64xf32>
    %7 = arith.maximumf %5, %6 : vector<256x64xf32>
    %8 = arith.truncf %7 : vector<256x64xf32> to vector<256x64xbf16>
    %c0_6 = arith.constant 0 : index
    %c0_7 = arith.constant 0 : index
    %9 = vector.load %arg4[%c0_6, %c0_7] : memref<64x128xbf16, #tpu.memory_space<vmem>>, vector<64x128xbf16>
    %cst_8 = arith.constant dense<0.000000e+00> : vector<256x128xf32>
    %10 = tpu.matmul %8, %9, %cst_8 {dimension_numbers = #tpu.dot_dimension_numbers<[1], [0], [0], [1], [0, 0, 1, 1], [], []>} : vector<256x64xbf16>, vector<64x128xbf16>, vector<256x128xf32> -> vector<256x128xf32>
    %11 = arith.truncf %10 : vector<256x128xf32> to vector<256x128xbf16>
    %c0_9 = arith.constant 0 : index
    %c0_10 = arith.constant 0 : index
    %12 = vector.load %arg6[%c0_9, %c0_10] : memref<256x128xbf16, #tpu.memory_space<vmem>>, vector<256x128xbf16>
    tpu.vector_store %arg6[%c0_9, %c0_10], %11 {strides = array<i32>} : memref<256x128xbf16, #tpu.memory_space<vmem>>, vector<256x128xbf16>,
    %c0_11 = arith.constant 0 : index
    %c0_12 = arith.constant 0 : index
    %13 = vector.load %arg5[%c0_11, %c0_12] : memref<64x2xf32, #tpu.memory_space<vmem>>, vector<64x2xf32>
    %cst_13 = arith.constant dense<0.000000e+00> : vector<256x2xf32>
    %14 = tpu.matmul %7, %13, %cst_13 {dimension_numbers = #tpu.dot_dimension_numbers<[1], [0], [0], [1], [0, 0, 1, 1], [], []>} : vector<256x64xf32>, vector<64x2xf32>, vector<256x2xf32> -> vector<256x2xf32>
    %c0_14 = arith.constant 0 : index
    %c0_15 = arith.constant 0 : index
    %15 = vector.load %arg7[%c0_14, %c0_15] : memref<256x2xf32, #tpu.memory_space<vmem>>, vector<256x2xf32>
    tpu.vector_store %arg7[%c0_14, %c0_15], %14 {strides = array<i32>} : memref<256x2xf32, #tpu.memory_space<vmem>>, vector<256x2xf32>,
    return
  }
  func.func @transform_0(%arg0: i32) -> (i32, i32) {
    %c0_i32 = arith.constant 0 : i32
    %c0_i32_0 = arith.constant 0 : i32
    return %arg0, %c0_i32 : i32, i32
  }
  func.func @transform_1(%arg0: i32) -> (i32, i32) {
    %c0_i32 = arith.constant 0 : i32
    %c0_i32_0 = arith.constant 0 : i32
    %c0_i32_1 = arith.constant 0 : i32
    return %c0_i32, %c0_i32_0 : i32, i32
  }
  func.func @transform_2(%arg0: i32) -> (i32, i32) {
    %c0_i32 = arith.constant 0 : i32
    %c0_i32_0 = arith.constant 0 : i32
    %c0_i32_1 = arith.constant 0 : i32
    return %c0_i32, %c0_i32_0 : i32, i32
  }
  func.func @transform_3(%arg0: i32) -> (i32, i32) {
    %c0_i32 = arith.constant 0 : i32
    %c0_i32_0 = arith.constant 0 : i32
    %c0_i32_1 = arith.constant 0 : i32
    return %c0_i32, %c0_i32_0 : i32, i32
  }
  func.func @transform_4(%arg0: i32) -> (i32, i32) {
    %c0_i32 = arith.constant 0 : i32
    %c0_i32_0 = arith.constant 0 : i32
    %c0_i32_1 = arith.constant 0 : i32
    return %c0_i32, %c0_i32_0 : i32, i32
  }
  func.func @transform_5(%arg0: i32) -> (i32, i32) {
    %c0_i32 = arith.constant 0 : i32
    %c0_i32_0 = arith.constant 0 : i32
    return %arg0, %c0_i32 : i32, i32
  }
  func.func @transform_6(%arg0: i32) -> (i32, i32) {
    %c0_i32 = arith.constant 0 : i32
    %c0_i32_0 = arith.constant 0 : i32
    return %arg0, %c0_i32 : i32, i32
  }
}

module attributes {stable_mosaic.version = 11 : i64} {
  func.func @_attn_kernel(%arg0: i32, %arg1: i32, %arg2: memref<4xi32, #tpu.memory_space<smem>>, %arg3: memref<4x4xi32, #tpu.memory_space<smem>>, %arg4: memref<256x128xbf16, #tpu.memory_space<vmem>>, %arg5: memref<256x2xf32, #tpu.memory_space<vmem>>, %arg6: memref<256x128xbf16, #tpu.memory_space<vmem>>, %arg7: memref<256x2xf32, #tpu.memory_space<vmem>>, %arg8: memref<256x256xi8, #tpu.memory_space<vmem>>, %arg9: memref<1x128xf32, #tpu.memory_space<vmem>>, %arg10: memref<256x128xbf16, #tpu.memory_space<vmem>>, %arg11: memref<256x1xf32, #tpu.memory_space<vmem>>, %arg12: memref<256x1xf32, #tpu.memory_space<vmem>>, %arg13: memref<256x128xf32, #tpu.memory_space<vmem>>) attributes {dimension_semantics = [#tpu.dimension_semantics<parallel>, #tpu.dimension_semantics<arbitrary>], iteration_bounds = array<i64: 4, 4>, scalar_prefetch = 2 : i64, scratch_operands = 3 : i64, tpu.core_type = #tpu.core_type<tc>, window_params = [{transform_indices = @transform_0, window_bounds = array<i64: 256, 128>}, {transform_indices = @transform_1, window_bounds = array<i64: 256, 2>}, {transform_indices = @transform_2, window_bounds = array<i64: 256, 128>}, {transform_indices = @transform_3, window_bounds = array<i64: 256, 2>}, {transform_indices = @transform_4, window_bounds = array<i64: 256, 256>}, {pipeline_mode = #tpu.pipeline_mode<synchronous>, transform_indices = @transform_5, window_bounds = array<i64: 1, 128>}, {transform_indices = @transform_6, window_bounds = array<i64: 256, 128>}]} {
    %c0_i32 = arith.constant 0 : i32
    %0 = arith.cmpi eq, %arg1, %c0_i32 : i32
    %1 = arith.extui %0 : i1 to i32
    %c0_i32_0 = arith.constant 0 : i32
    %2 = arith.cmpi ne, %1, %c0_i32_0 : i32
    scf.if %2 {
      %cst = arith.constant -1.000000e+30 : f32
      %11 = vector.broadcast %cst : f32 to vector<256x1xf32>
      %c0 = arith.constant 0 : index
      %c0_3 = arith.constant 0 : index
      %12 = vector.load %arg11[%c0, %c0_3] : memref<256x1xf32, #tpu.memory_space<vmem>>, vector<256x1xf32>
      tpu.vector_store %arg11[%c0, %c0_3], %11 {strides = array<i32>} : memref<256x1xf32, #tpu.memory_space<vmem>>, vector<256x1xf32>,
      %cst_4 = arith.constant 0.000000e+00 : f32
      %13 = vector.broadcast %cst_4 : f32 to vector<256x1xf32>
      %c0_5 = arith.constant 0 : index
      %c0_6 = arith.constant 0 : index
      %14 = vector.load %arg12[%c0_5, %c0_6] : memref<256x1xf32, #tpu.memory_space<vmem>>, vector<256x1xf32>
      tpu.vector_store %arg12[%c0_5, %c0_6], %13 {strides = array<i32>} : memref<256x1xf32, #tpu.memory_space<vmem>>, vector<256x1xf32>,
      %cst_7 = arith.constant 0.000000e+00 : f32
      %15 = vector.broadcast %cst_7 : f32 to vector<256x128xf32>
      %c0_8 = arith.constant 0 : index
      %c0_9 = arith.constant 0 : index
      %16 = vector.load %arg13[%c0_8, %c0_9] : memref<256x128xf32, #tpu.memory_space<vmem>>, vector<256x128xf32>
      tpu.vector_store %arg13[%c0_8, %c0_9], %15 {strides = array<i32>} : memref<256x128xf32, #tpu.memory_space<vmem>>, vector<256x128xf32>,
    } else {
    }
    %3 = arith.index_cast %arg0 : i32 to index
    %4 = memref.load %arg2[%3] : memref<4xi32, #tpu.memory_space<smem>>
    %5 = arith.cmpi slt, %arg1, %4 : i32
    %6 = arith.extui %5 : i1 to i32
    %c0_i32_1 = arith.constant 0 : i32
    %7 = arith.cmpi ne, %6, %c0_i32_1 : i32
    scf.if %7 {
      %c0 = arith.constant 0 : index
      %c0_3 = arith.constant 0 : index
      %11 = vector.load %arg6[%c0, %c0_3] : memref<256x128xbf16, #tpu.memory_space<vmem>>, vector<256x128xbf16>
      %c0_4 = arith.constant 0 : index
      %c1 = arith.constant 1 : index
      %12 = vector.load %arg5[%c0_4, %c1] : memref<256x2xf32, #tpu.memory_space<vmem>>, vector<256x1xf32>
      %c0_5 = arith.constant 0 : index
      %c0_6 = arith.constant 0 : index
      %13 = vector.load %arg7[%c0_5, %c0_6] : memref<256x2xf32, #tpu.memory_space<vmem>>, vector<256x1xf32>
      %14 = tpu.transpose %13, [1, 0] : vector<256x1xf32> -> vector<1x256xf32>
      %15 = vector.broadcast %12 : vector<256x1xf32> to vector<256x256xf32>
      %16 = vector.broadcast %14 : vector<1x256xf32> to vector<256x256xf32>
      %17 = arith.addf %15, %16 : vector<256x256xf32>
      %cst = arith.constant 0.000000e+00 : f32
      %18 = vector.broadcast %cst : f32 to vector<256x256xf32>
      %19 = arith.cmpf ogt, %17, %18 : vector<256x256xf32>
      %cst_7 = arith.constant 2.000000e-01 : f32
      %20 = vector.broadcast %cst_7 : f32 to vector<256x256xf32>
      %21 = arith.mulf %20, %17 : vector<256x256xf32>
      %22 = arith.select %19, %17, %21 : vector<256x256xi1>, vector<256x256xf32>
      %c0_8 = arith.constant 0 : index
      %c0_9 = arith.constant 0 : index
      %23 = vector.load %arg8[%c0_8, %c0_9] : memref<256x256xi8, #tpu.memory_space<vmem>>, vector<256x256xi8>
      %c0_i8 = arith.constant 0 : i8
      %24 = vector.broadcast %c0_i8 : i8 to vector<256x256xi8>
      %25 = arith.cmpi ne, %23, %24 : vector<256x256xi8>
      %cst_10 = arith.constant -1.000000e+30 : f32
      %26 = vector.broadcast %cst_10 : f32 to vector<256x256xf32>
      %27 = arith.select %25, %22, %26 : vector<256x256xi1>, vector<256x256xf32>
      %c0_11 = arith.constant 0 : index
      %c0_12 = arith.constant 0 : index
      %28 = vector.load %arg11[%c0_11, %c0_12] : memref<256x1xf32, #tpu.memory_space<vmem>>, vector<256x1xf32>
      %cst_13 = arith.constant dense<0xFF800000> : vector<256xf32>
      %29 = vector.multi_reduction <maximumf>, %27, %cst_13 [1] : vector<256x256xf32> to vector<256xf32>
      %30 = vector.shape_cast %29 : vector<256xf32> to vector<256x1xf32>
      %31 = arith.maximumf %28, %30 : vector<256x1xf32>
      %c0_14 = arith.constant 0 : index
      %c0_15 = arith.constant 0 : index
      %32 = vector.load %arg11[%c0_14, %c0_15] : memref<256x1xf32, #tpu.memory_space<vmem>>, vector<256x1xf32>
      %33 = arith.subf %32, %31 : vector<256x1xf32>
      %34 = math.exp %33 : vector<256x1xf32>
      %35 = vector.broadcast %31 : vector<256x1xf32> to vector<256x256xf32>
      %36 = arith.subf %27, %35 : vector<256x256xf32>
      %37 = arith.truncf %36 : vector<256x256xf32> to vector<256x256xbf16>
      %38 = math.exp %37 : vector<256x256xbf16>
      %cst_16 = arith.constant 0.000000e+00 : bf16
      %39 = vector.broadcast %cst_16 : bf16 to vector<256x256xbf16>
      %40 = arith.select %25, %38, %39 : vector<256x256xi1>, vector<256x256xbf16>
      %c0_17 = arith.constant 0 : index
      %c0_18 = arith.constant 0 : index
      %41 = vector.load %arg12[%c0_17, %c0_18] : memref<256x1xf32, #tpu.memory_space<vmem>>, vector<256x1xf32>
      %42 = arith.mulf %34, %41 : vector<256x1xf32>
      %43 = arith.extf %40 : vector<256x256xbf16> to vector<256x256xf32>
      %cst_19 = arith.constant dense<0.000000e+00> : vector<256xf32>
      %44 = vector.multi_reduction <add>, %43, %cst_19 [1] : vector<256x256xf32> to vector<256xf32>
      %45 = vector.shape_cast %44 : vector<256xf32> to vector<256x1xf32>
      %46 = arith.addf %42, %45 : vector<256x1xf32>
      %c0_20 = arith.constant 0 : index
      %c0_21 = arith.constant 0 : index
      %47 = vector.load %arg12[%c0_20, %c0_21] : memref<256x1xf32, #tpu.memory_space<vmem>>, vector<256x1xf32>
      tpu.vector_store %arg12[%c0_20, %c0_21], %46 {strides = array<i32>} : memref<256x1xf32, #tpu.memory_space<vmem>>, vector<256x1xf32>,
      %c0_22 = arith.constant 0 : index
      %c0_23 = arith.constant 0 : index
      %48 = vector.load %arg13[%c0_22, %c0_23] : memref<256x128xf32, #tpu.memory_space<vmem>>, vector<256x128xf32>
      %49 = vector.broadcast %34 : vector<256x1xf32> to vector<256x128xf32>
      %50 = arith.mulf %49, %48 : vector<256x128xf32>
      %cst_24 = arith.constant dense<0.000000e+00> : vector<256x128xf32>
      %51 = tpu.matmul %40, %11, %cst_24 {dimension_numbers = #tpu.dot_dimension_numbers<[1], [0], [0], [1], [0, 0, 1, 1], [], []>} : vector<256x256xbf16>, vector<256x128xbf16>, vector<256x128xf32> -> vector<256x128xf32>
      %52 = arith.addf %50, %51 : vector<256x128xf32>
      %c0_25 = arith.constant 0 : index
      %c0_26 = arith.constant 0 : index
      %53 = vector.load %arg13[%c0_25, %c0_26] : memref<256x128xf32, #tpu.memory_space<vmem>>, vector<256x128xf32>
      tpu.vector_store %arg13[%c0_25, %c0_26], %52 {strides = array<i32>} : memref<256x128xf32, #tpu.memory_space<vmem>>, vector<256x128xf32>,
      %c0_27 = arith.constant 0 : index
      %c0_28 = arith.constant 0 : index
      %54 = vector.load %arg11[%c0_27, %c0_28] : memref<256x1xf32, #tpu.memory_space<vmem>>, vector<256x1xf32>
      tpu.vector_store %arg11[%c0_27, %c0_28], %31 {strides = array<i32>} : memref<256x1xf32, #tpu.memory_space<vmem>>, vector<256x1xf32>,
    } else {
    }
    %c3_i32 = arith.constant 3 : i32
    %8 = arith.cmpi eq, %arg1, %c3_i32 : i32
    %9 = arith.extui %8 : i1 to i32
    %c0_i32_2 = arith.constant 0 : i32
    %10 = arith.cmpi ne, %9, %c0_i32_2 : i32
    scf.if %10 {
      %c0 = arith.constant 0 : index
      %c0_3 = arith.constant 0 : index
      %11 = vector.load %arg12[%c0, %c0_3] : memref<256x1xf32, #tpu.memory_space<vmem>>, vector<256x1xf32>
      %12 = tpu.reciprocal %11 {approx = true} : vector<256x1xf32> -> vector<256x1xf32>
      %c0_4 = arith.constant 0 : index
      %c0_5 = arith.constant 0 : index
      %13 = vector.load %arg13[%c0_4, %c0_5] : memref<256x128xf32, #tpu.memory_space<vmem>>, vector<256x128xf32>
      %14 = vector.broadcast %12 : vector<256x1xf32> to vector<256x128xf32>
      %15 = arith.mulf %13, %14 : vector<256x128xf32>
      %c0_6 = arith.constant 0 : index
      %c0_7 = arith.constant 0 : index
      %16 = vector.load %arg9[%c0_6, %c0_7] : memref<1x128xf32, #tpu.memory_space<vmem>>, vector<1x128xf32>
      %17 = vector.broadcast %16 : vector<1x128xf32> to vector<256x128xf32>
      %18 = arith.addf %15, %17 : vector<256x128xf32>
      %19 = arith.truncf %18 : vector<256x128xf32> to vector<256x128xbf16>
      %c0_8 = arith.constant 0 : index
      %c0_9 = arith.constant 0 : index
      %20 = vector.load %arg10[%c0_8, %c0_9] : memref<256x128xbf16, #tpu.memory_space<vmem>>, vector<256x128xbf16>
      tpu.vector_store %arg10[%c0_8, %c0_9], %19 {strides = array<i32>} : memref<256x128xbf16, #tpu.memory_space<vmem>>, vector<256x128xbf16>,
    } else {
    }
    return
  }
  func.func @transform_0(%arg0: i32, %arg1: i32, %arg2: memref<4xi32, #tpu.memory_space<smem>>, %arg3: memref<4x4xi32, #tpu.memory_space<smem>>) -> (i32, i32) {
    %c0_i32 = arith.constant 0 : i32
    %c0_i32_0 = arith.constant 0 : i32
    return %arg0, %c0_i32 : i32, i32
  }
  func.func @transform_1(%arg0: i32, %arg1: i32, %arg2: memref<4xi32, #tpu.memory_space<smem>>, %arg3: memref<4x4xi32, #tpu.memory_space<smem>>) -> (i32, i32) {
    %c0_i32 = arith.constant 0 : i32
    %c0_i32_0 = arith.constant 0 : i32
    return %arg0, %c0_i32 : i32, i32
  }
  func.func @transform_2(%arg0: i32, %arg1: i32, %arg2: memref<4xi32, #tpu.memory_space<smem>>, %arg3: memref<4x4xi32, #tpu.memory_space<smem>>) -> (i32, i32) {
    %0 = arith.index_cast %arg0 : i32 to index
    %1 = memref.load %arg2[%0] : memref<4xi32, #tpu.memory_space<smem>>
    %c1_i32 = arith.constant 1 : i32
    %2 = arith.subi %1, %c1_i32 : i32
    %c0_i32 = arith.constant 0 : i32
    %3 = arith.maxsi %2, %c0_i32 : i32
    %4 = arith.minsi %arg1, %3 : i32
    %5 = arith.index_cast %arg0 : i32 to index
    %6 = arith.index_cast %4 : i32 to index
    %7 = memref.load %arg3[%5, %6] : memref<4x4xi32, #tpu.memory_space<smem>>
    %c0_i32_0 = arith.constant 0 : i32
    %c0_i32_1 = arith.constant 0 : i32
    return %7, %c0_i32_0 : i32, i32
  }
  func.func @transform_3(%arg0: i32, %arg1: i32, %arg2: memref<4xi32, #tpu.memory_space<smem>>, %arg3: memref<4x4xi32, #tpu.memory_space<smem>>) -> (i32, i32) {
    %0 = arith.index_cast %arg0 : i32 to index
    %1 = memref.load %arg2[%0] : memref<4xi32, #tpu.memory_space<smem>>
    %c1_i32 = arith.constant 1 : i32
    %2 = arith.subi %1, %c1_i32 : i32
    %c0_i32 = arith.constant 0 : i32
    %3 = arith.maxsi %2, %c0_i32 : i32
    %4 = arith.minsi %arg1, %3 : i32
    %5 = arith.index_cast %arg0 : i32 to index
    %6 = arith.index_cast %4 : i32 to index
    %7 = memref.load %arg3[%5, %6] : memref<4x4xi32, #tpu.memory_space<smem>>
    %c0_i32_0 = arith.constant 0 : i32
    %c0_i32_1 = arith.constant 0 : i32
    return %7, %c0_i32_0 : i32, i32
  }
  func.func @transform_4(%arg0: i32, %arg1: i32, %arg2: memref<4xi32, #tpu.memory_space<smem>>, %arg3: memref<4x4xi32, #tpu.memory_space<smem>>) -> (i32, i32) {
    %0 = arith.index_cast %arg0 : i32 to index
    %1 = memref.load %arg2[%0] : memref<4xi32, #tpu.memory_space<smem>>
    %c1_i32 = arith.constant 1 : i32
    %2 = arith.subi %1, %c1_i32 : i32
    %c0_i32 = arith.constant 0 : i32
    %3 = arith.maxsi %2, %c0_i32 : i32
    %4 = arith.minsi %arg1, %3 : i32
    %5 = arith.index_cast %arg0 : i32 to index
    %6 = arith.index_cast %4 : i32 to index
    %7 = memref.load %arg3[%5, %6] : memref<4x4xi32, #tpu.memory_space<smem>>
    %c0_i32_0 = arith.constant 0 : i32
    return %arg0, %7 : i32, i32
  }
  func.func @transform_5(%arg0: i32, %arg1: i32, %arg2: memref<4xi32, #tpu.memory_space<smem>>, %arg3: memref<4x4xi32, #tpu.memory_space<smem>>) -> (i32, i32) {
    %c0_i32 = arith.constant 0 : i32
    %c0_i32_0 = arith.constant 0 : i32
    %c0_i32_1 = arith.constant 0 : i32
    return %c0_i32, %c0_i32_0 : i32, i32
  }
  func.func @transform_6(%arg0: i32, %arg1: i32, %arg2: memref<4xi32, #tpu.memory_space<smem>>, %arg3: memref<4x4xi32, #tpu.memory_space<smem>>) -> (i32, i32) {
    %c0_i32 = arith.constant 0 : i32
    %c0_i32_0 = arith.constant 0 : i32
    return %arg0, %c0_i32 : i32, i32
  }
}

module attributes {stable_mosaic.version = 11 : i64} {
  func.func @_recon_kernel(%arg0: i32, %arg1: i32, %arg2: memref<256x128xbf16, #tpu.memory_space<vmem>>, %arg3: memref<256x128xbf16, #tpu.memory_space<vmem>>, %arg4: memref<256x256xbf16, #tpu.memory_space<vmem>>) attributes {dimension_semantics = [#tpu.dimension_semantics<parallel>, #tpu.dimension_semantics<parallel>], iteration_bounds = array<i64: 4, 4>, scalar_prefetch = 0 : i64, scratch_operands = 0 : i64, tpu.core_type = #tpu.core_type<tc>, window_params = [{transform_indices = @transform_0, window_bounds = array<i64: 256, 128>}, {transform_indices = @transform_1, window_bounds = array<i64: 256, 128>}, {transform_indices = @transform_2, window_bounds = array<i64: 256, 256>}]} {
    %c0 = arith.constant 0 : index
    %c0_0 = arith.constant 0 : index
    %0 = vector.load %arg2[%c0, %c0_0] : memref<256x128xbf16, #tpu.memory_space<vmem>>, vector<256x128xbf16>
    %c0_1 = arith.constant 0 : index
    %c0_2 = arith.constant 0 : index
    %1 = vector.load %arg3[%c0_1, %c0_2] : memref<256x128xbf16, #tpu.memory_space<vmem>>, vector<256x128xbf16>
    %cst = arith.constant dense<0.000000e+00> : vector<256x256xf32>
    %2 = tpu.matmul %0, %1, %cst {dimension_numbers = #tpu.dot_dimension_numbers<[1], [1], [0], [0], [0, 0, 1, 0], [], []>} : vector<256x128xbf16>, vector<256x128xbf16>, vector<256x256xf32> -> vector<256x256xf32>
    %3 = arith.negf %2 : vector<256x256xf32>
    %4 = math.exp %3 : vector<256x256xf32>
    %cst_3 = arith.constant 1.000000e+00 : f32
    %5 = vector.broadcast %cst_3 : f32 to vector<256x256xf32>
    %6 = arith.addf %5, %4 : vector<256x256xf32>
    %7 = arith.divf %5, %6 : vector<256x256xf32>
    %8 = arith.truncf %7 : vector<256x256xf32> to vector<256x256xbf16>
    %c0_4 = arith.constant 0 : index
    %c0_5 = arith.constant 0 : index
    %9 = vector.load %arg4[%c0_4, %c0_5] : memref<256x256xbf16, #tpu.memory_space<vmem>>, vector<256x256xbf16>
    tpu.vector_store %arg4[%c0_4, %c0_5], %8 {strides = array<i32>} : memref<256x256xbf16, #tpu.memory_space<vmem>>, vector<256x256xbf16>,
    return
  }
  func.func @transform_0(%arg0: i32, %arg1: i32) -> (i32, i32) {
    %c0_i32 = arith.constant 0 : i32
    %c0_i32_0 = arith.constant 0 : i32
    return %arg0, %c0_i32 : i32, i32
  }
  func.func @transform_1(%arg0: i32, %arg1: i32) -> (i32, i32) {
    %c0_i32 = arith.constant 0 : i32
    %c0_i32_0 = arith.constant 0 : i32
    return %arg1, %c0_i32 : i32, i32
  }
  func.func @transform_2(%arg0: i32, %arg1: i32) -> (i32, i32) {
    %c0_i32 = arith.constant 0 : i32
    return %arg0, %arg1 : i32, i32
  }
}

</mosaic_0001>

<bundles_post_ra>
// kernel: structure_ae_forward.3
= control target key start
LH: loop header
LB: loop body
LE: loop exit
PB: predicated region body
PF: predicated region fallthrough
CT: control target
= control target key end

     0   :  { %12 = vsyncpa [#allocation3], 0  ;;  %s1612_s21 = smov 0   ;;  %s1943_s0 = inlined_call_operand.vmem [shape: bf16[1024,64], index: 0, kind: input, shape index: {}]   ;;  %s1944_s1 = inlined_call_operand.vmem [shape: bf16[64,64], index: 1, kind: input, shape index: {}]   ;;  %s1945_s2 = inlined_call_operand.hbm [shape: f32[1,64], index: 2, kind: input, shape index: {}]   ;;  %s1946_s3 = inlined_call_operand.vmem [shape: bf16[64,128], index: 3, kind: input, shape index: {}]   ;;  %s1947_s4 = inlined_call_operand.vmem [shape: f32[64,2], index: 4, kind: input, shape index: {}]   ;;  %s1948_s5 = inlined_call_operand.vmem [shape: bf16[1024,128], index: 5, kind: output, shape index: {0}]   ;;  %s1949_s6 = inlined_call_operand.vmem [shape: f32[1024,2], index: 6, kind: output, shape index: {1}]  }
   0x1 LB: > { %s1204_s22 = sadd.s32 4294967295, %s1574_s21   ;;  %p1206_p0 = scmp.ge.s32.totalorder %s1574_s21, 1  ;;  %s1574_s21 = sphi %s1612_s21, %s18_s21  }
   0x2   : > { %p185_p1 = scmp.lt.s32.totalorder %s1574_s21, 5  ;;  %s200_s25 = sshll.u32 %s1945_s2, 4  ;;  %s201_s25 = int_to_ptr.hbm [resolvable:$true] %s200_s25 }
   0x3   : > { %p1522_p3 = scmp.eq.s32.totalorder %s1204_s22, 0  ;;  %s1576_s26 = smov [#allocation2]  }
   0x4   : > { %p186_p2 = pnand %p1206_p0, %p185_p1  ;;  %s202_s27 = sshll.u32 %s1576_s26, 4  ;;  %s203_s27 = int_to_ptr.vmem [resolvable:$true] %s202_s27 }
   0x6   : > { %p1518_p4 = pneg %p186_p2  ;;  %230 = sbr.rel (%p186_p2) target bundleno = 481 (0x1e1), region = 40 }
   0x8   : > { %p1519_p5 = pnand %p1522_p3, %p1518_p4 }
   0xa   : > { %1521 = dma.hbm_to_vmem [thread:$0]  (!%p1519_p5), %s201_s25, 16, %s203_s27, [#allocation3]  }
   0xb   : > { %1569 = dma.done.wait (%p1522_p3), [#allocation3], 16  }
   0xc   : > { %1571 = vsyncadd (%p1522_p3), [#allocation3], 4294967280  ;;  %s1211_s28 = sshll.u32 %s1204_s22, 5  ;;  %v1398_v0 = vld [vmem:[%s1944_s1 + $0x18] sm:$0xff]  ;;  %v1397_v1 = vld [vmem:[%s1944_s1 + $0x10] sm:$0xff]  ;;  %vm433_vm0 = vcmask 523264  }
   0xd   : > { %p267_p6 = scmp.lt.s32.totalorder %s1211_s28, 127  ;;  %486 = vmatpush.bf16.msra.mxu0 %v1398_v0  ;;  %1498 = vmatpush.bf16.msra.mxu3 %v1398_v0  ;;  %v1396_v2 = vld [vmem:[%s1944_s1 + $0x8] sm:$0xff]  ;;  %v1395_v3 = vld [vmem:[%s1944_s1] sm:$0xff]  ;;  %v859_v14 = vld [vmem:[%s1947_s4 + $0x38] sm:$0xff]  ;;  %vm1069_vm1 = vcmask 15360  }
   0xe   : > { %v858_v15 = vld [vmem:[%s1947_s4 + $0x30] sm:$0xff]  ;;  %964 = vmatpush.msra.mxu2 %v859_v14  ;;  %v857_v16 = vld [vmem:[%s1947_s4 + $0x28] sm:$0xff]  ;;  %v856_v17 = vld [vmem:[%s1947_s4 + $0x20] sm:$0xff] }
   0xf   : > { %s1951_s28 = smov (!%p267_p6, %s1211_s28), 127  ;;  %v855_v18 = vld [vmem:[%s1947_s4 + $0x18] sm:$0xff]  ;;  %v854_v21 = vld [vmem:[%s1947_s4 + $0x10] sm:$0xff]  ;;  %v853_v22 = vld [vmem:[%s1947_s4 + $0x8] sm:$0xff] }
  0x10   : > { %s1212_s11 = sshll.u32 %s1951_s28, 2  ;;  %965 = vmatpush.msra.mxu2 %v858_v15  ;;  %v1402_v19 = vld [vmem:[%s1946_s3 + $0x18] sm:$0xff]  ;;  %v1401_v23 = vld [vmem:[%s1946_s3 + $0x10] sm:$0xff]  ;;  %v852_v24 = vld [vmem:[%s1947_s4] sm:$0xff] }
  0x11   : > { %487 = vmatpush.bf16.msra.mxu0 %v1397_v1  ;;  %1499 = vmatpush.bf16.msra.mxu3 %v1397_v1  ;;  %s1643_s16 = scalar_lea.vmem %s1943_s0, %s1212_s11  ;;  %v1400_v25 = vld [vmem:[%s1946_s3 + $0x8] sm:$0xff]  ;;  %v1399_v26 = vld [vmem:[%s1946_s3] sm:$0xff]  ;;  %s1848_s27 = scalar_lea.vmem %s1948_s5, %s1212_s11 }
  0x12   : > { %v1379_v4 = vld [vmem:[%s1643_s16] sm:$0xff]  ;;  %v1380_v6 = vld [vmem:[%s1643_s16 + $0x8] sm:$0xff]  ;;  %v1381_v8 = vld [vmem:[%s1643_s16 + $0x10] sm:$0xff]  ;;  %966 = vmatpush.msra.mxu2 %v857_v16  ;;  %703 = vmatpush.bf16.msra.mxu1 %v1402_v19 }
  0x13   : > { %v1391_v5 = vld [vmem:[%s1643_s16 + $0x60] sm:$0xff]  ;;  %v1392_v7 = vld [vmem:[%s1643_s16 + $0x68] sm:$0xff]  ;;  %v1393_v9 = vld [vmem:[%s1643_s16 + $0x70] sm:$0xff] }
  0x14   : > { %v1382_v10 = vld [vmem:[%s1643_s16 + $0x18] sm:$0xff]  ;;  %v1383_v12 = vld [vmem:[%s1643_s16 + $0x20] sm:$0xff]  ;;  %v1384_v13 = vld [vmem:[%s1643_s16 + $0x28] sm:$0xff]  ;;  %967 = vmatpush.msra.mxu2 %v856_v17 }
  0x15   : > { %488 = vmatpush.bf16.msra.mxu0 %v1396_v2  ;;  %1500 = vmatpush.bf16.msra.mxu3 %v1396_v2  ;;  %v1394_v11 = vld [vmem:[%s1643_s16 + $0x78] sm:$0xff]  ;;  %v1385_v20 = vld [vmem:[%s1643_s16 + $0x30] sm:$0xff]  ;;  %v1705_v28 = vld [vmem:[#allocation2] ss:$0 sm:$0xff] }
  0x16   : > { %968 = vmatpush.msra.mxu2 %v855_v18  ;;  %704 = vmatpush.bf16.msra.mxu1 %v1401_v23  ;;  %v1386_v27 = vld [vmem:[%s1643_s16 + $0x38] sm:$0xff]  ;;  %v1387_v29 = vld [vmem:[%s1643_s16 + $0x40] sm:$0xff]  ;;  %v1388_v42 = vld [vmem:[%s1643_s16 + $0x48] sm:$0xff] }
  0x17   : > { %v1389_v57 = vld [vmem:[%s1643_s16 + $0x50] sm:$0xff] }
  0x18   : > { %969 = vmatpush.msra.mxu2 %v854_v21 }
  0x19   : > { %489 = vmatpush.bf16.msra.mxu0 %v1395_v3  ;;  %1501 = vmatpush.bf16.msra.mxu3 %v1395_v3 }
  0x1a   : > { %970 = vmatpush.msra.mxu2 %v853_v22  ;;  %705 = vmatpush.bf16.msra.mxu1 %v1400_v25 }
  0x1c   : > { %1297 = vmatmul.msk.bf16.vlgmr.msra.gmra.mxu0 %vm433_vm0, %v1379_v4  ;;  %1309 = vmatmul.msk.bf16.vlgmr.msra.gmra.mxu3 %vm433_vm0, %v1391_v5 }
  0x1d   : > { %1502 = vmatpush.bf16.msrb.mxu3 %v1402_v19  ;;  %971 = vmatpush.msra.mxu2 %v852_v24 }
  0x1e   : > { %706 = vmatpush.bf16.msra.mxu1 %v1399_v26 }
  0x21   : > { %1503 = vmatpush.bf16.msrb.mxu3 %v1401_v23 }
  0x25   : > { %1504 = vmatpush.bf16.msrb.mxu3 %v1400_v25 }
  0x29   : > { %1505 = vmatpush.bf16.msrb.mxu3 %v1399_v26 }
  0x2c   : > { %1298 = vmatmul.msk.bf16.gmra.mxu0 %vm433_vm0, %v1380_v6  ;;  %1310 = vmatmul.msk.bf16.gmra.mxu3 %vm433_vm0, %v1392_v7 }
  0x2d   : > { %1506 = vmatpush.msra.mxu3 %v859_v14 }
  0x2f   : > { %1507 = vmatpush.msra.mxu3 %v858_v15 }
  0x31   : > { %1508 = vmatpush.msra.mxu3 %v857_v16 }
  0x33   : > { %1509 = vmatpush.msra.mxu3 %v856_v17 }
  0x35   : > { %1510 = vmatpush.msra.mxu3 %v855_v18 }
  0x37   : > { %1511 = vmatpush.msra.mxu3 %v854_v21 }
  0x39   : > { %1512 = vmatpush.msra.mxu3 %v853_v22 }
  0x3b   : > { %1513 = vmatpush.msra.mxu3 %v852_v24 }
  0x3c   : > { %1299 = vmatmul.msk.bf16.gmra.mxu0 %vm433_vm0, %v1381_v8  ;;  %1311 = vmatmul.msk.bf16.gmra.mxu3 %vm433_vm0, %v1393_v9  ;;  %v1390_v8 = vld [vmem:[%s1643_s16 + $0x58] sm:$0xff]  ;;  %s1216_s16 = sshll.u32 %s1951_s28, 3 }
  0x3d   : > { %s1830_s24 = scalar_lea.vmem %s1949_s6, %s1216_s16 }
  0x4c   : > { %1300 = vmatmul.msk.bf16.gmra.mxu0 %vm433_vm0, %v1382_v10  ;;  %1312 = vmatmul.msk.bf16.gmra.mxu3 %vm433_vm0, %v1394_v11 }
  0x5c   : > { %1301 = vmatmul.msk.bf16.gmra.mxu0 %vm433_vm0, %v1383_v12 }
  0x6c   : > { %1302 = vmatmul.msk.bf16.gmra.mxu0 %vm433_vm0, %v1384_v13 }
  0x7c   : > { %1303 = vmatmul.msk.bf16.gmra.mxu0 %vm433_vm0, %v1385_v20 }
  0x8c   : > { %1304 = vmatmul.msk.bf16.gmra.mxu0 %vm433_vm0, %v1386_v27 }
  0x99   : > { %v491_v30 = vpop.f32.mrf.mxu0 }
  0x9a   : > { %v492_v31 = vadd.f32 %v1705_v28, %v491_v30 }
  0x9c   : > { %v571_v32 = vmax.f32 %v492_v31, 0.0  ;;  %1305 = vmatmul.msk.bf16.gmra.mxu0 %vm433_vm0, %v1387_v29 }
  0x9e   : > { %1345 = vmatmul.msk.f32.vlgmr.msra.gmra.mxu2 %vm433_vm0, %v571_v32 }
  0x9f   : > { %v551_v33 = vpop.f32.mrf.mxu3 }
  0xa0   : > { %v1713_v36 = vadd.f32 %v1705_v28, %v551_v33 }
  0xa1   : > { %v493_v34 = vpop.f32.mrf.mxu0 }
  0xa2   : > { %v494_v35 = vadd.f32 %v1705_v28, %v493_v34  ;;  %v595_v40 = vmax.f32 %v1713_v36, 0.0 }
  0xa4   : > { %v572_v37 = vmax.f32 %v494_v35, 0.0 }
  0xa6   : > { %v603_v38 = vpack.c.bf16 %v572_v37, %v571_v32  ;;  %1346 = vmatmul.msk.f32.gmra.mxu2 %vm433_vm0, %v572_v37 }
  0xa7   : > { %v553_v39 = vpop.f32.mrf.mxu3 }
  0xa8   : > { %v1718_v41 = vadd.f32 %v1705_v28, %v553_v39  ;;  %1329 = vmatmul.msk.bf16.vlgmr.msra.gmra.mxu1 %vm433_vm0, %v603_v38 }
  0xa9   : > { %v496_v43 = vpop.f32.mrf.mxu0 }
  0xaa   : > { %v596_v44 = vmax.f32 %v1718_v41, 0.0  ;;  %v497_v45 = vadd.f32 %v1705_v28, %v496_v43 }
  0xac   : > { %v615_v46 = vpack.c.bf16 %v596_v44, %v595_v40  ;;  %v573_v47 = vmax.f32 %v497_v45, 0.0  ;;  %1306 = vmatmul.msk.bf16.gmra.mxu0 %vm433_vm0, %v1388_v42 }
  0xae   : > { %1341 = vmatmul.msk.bf16.vlgmr.msrb.gmra.mxu3 %vm433_vm0, %v615_v46  ;;  %1347 = vmatmul.msk.f32.gmra.mxu2 %vm433_vm0, %v573_v47 }
  0xaf   : > { %v556_v48 = vpop.f32.mrf.mxu3 }
  0xb0   : > { %v1733_v51 = vadd.f32 %v1705_v28, %v556_v48 }
  0xb1   : > { %v498_v49 = vpop.f32.mrf.mxu0 }
  0xb2   : > { %v499_v50 = vadd.f32 %v1705_v28, %v498_v49  ;;  %v597_v55 = vmax.f32 %v1733_v51, 0.0 }
  0xb4   : > { %v574_v52 = vmax.f32 %v499_v50, 0.0 }
  0xb6   : > { %v604_v53 = vpack.c.bf16 %v574_v52, %v573_v47  ;;  %1348 = vmatmul.msk.f32.gmra.mxu2 %vm433_vm0, %v574_v52 }
  0xb7   : > { %v558_v54 = vpop.f32.mrf.mxu3 }
  0xb8   : > { %v1738_v56 = vadd.f32 %v1705_v28, %v558_v54  ;;  %1330 = vmatmul.msk.bf16.gmra.mxu1 %vm433_vm0, %v604_v53 }
  0xb9   : > { %v501_v58 = vpop.f32.mrf.mxu0 }
  0xba   : > { %v598_v59 = vmax.f32 %v1738_v56, 0.0  ;;  %v502_v60 = vadd.f32 %v1705_v28, %v501_v58 }
  0xbc   : > { %v616_v61 = vpack.c.bf16 %v598_v59, %v597_v55  ;;  %v575_v62 = vmax.f32 %v502_v60, 0.0  ;;  %1307 = vmatmul.msk.bf16.gmra.mxu0 %vm433_vm0, %v1389_v57 }
  0xbe   : > { %1342 = vmatmul.msk.bf16.gmra.mxu3 %vm433_vm0, %v616_v61  ;;  %1349 = vmatmul.msk.f32.gmra.mxu2 %vm433_vm0, %v575_v62 }
  0xbf   : > { %v561_v63 = vpop.f32.mrf.mxu3 }
  0xc0   : > { %v1753_v2 = vadd.f32 %v1705_v28, %v561_v63 }
  0xc1   : > { %v503_v0 = vpop.f32.mrf.mxu0 }
  0xc2   : > { %v504_v1 = vadd.f32 %v1705_v28, %v503_v0  ;;  %v599_v6 = vmax.f32 %v1753_v2, 0.0 }
  0xc4   : > { %v576_v3 = vmax.f32 %v504_v1, 0.0 }
  0xc6   : > { %v605_v4 = vpack.c.bf16 %v576_v3, %v575_v62  ;;  %1350 = vmatmul.msk.f32.gmra.mxu2 %vm433_vm0, %v576_v3 }
  0xc7   : > { %v563_v5 = vpop.f32.mrf.mxu3 }
  0xc8   : > { %v1758_v7 = vadd.f32 %v1705_v28, %v563_v5  ;;  %1331 = vmatmul.msk.bf16.gmra.mxu1 %vm433_vm0, %v605_v4 }
  0xc9   : > { %v506_v9 = vpop.f32.mrf.mxu0 }
  0xca   : > { %v600_v10 = vmax.f32 %v1758_v7, 0.0  ;;  %v507_v11 = vadd.f32 %v1705_v28, %v506_v9 }
  0xcc   : > { %v617_v12 = vpack.c.bf16 %v600_v10, %v599_v6  ;;  %v577_v13 = vmax.f32 %v507_v11, 0.0  ;;  %1308 = vmatmul.msk.bf16.gmra.mxu0 %vm433_vm0, %v1390_v8 }
  0xce   : > { %1343 = vmatmul.msk.bf16.gmra.mxu3 %vm433_vm0, %v617_v12  ;;  %1351 = vmatmul.msk.f32.gmra.mxu2 %vm433_vm0, %v577_v13 }
  0xcf   : > { %v566_v14 = vpop.f32.mrf.mxu3 }
  0xd0   : > { %v1773_v17 = vadd.f32 %v1705_v28, %v566_v14 }
  0xd1   : > { %v508_v15 = vpop.f32.mrf.mxu0 }
  0xd2   : > { %v509_v16 = vadd.f32 %v1705_v28, %v508_v15  ;;  %v601_v21 = vmax.f32 %v1773_v17, 0.0 }
  0xd4   : > { %v578_v18 = vmax.f32 %v509_v16, 0.0 }
  0xd6   : > { %v606_v19 = vpack.c.bf16 %v578_v18, %v577_v13  ;;  %1352 = vmatmul.msk.f32.gmra.mxu2 %vm433_vm0, %v578_v18 }
  0xd7   : > { %v568_v20 = vpop.f32.mrf.mxu3 }
  0xd8   : > { %v1778_v22 = vadd.f32 %v1705_v28, %v568_v20  ;;  %1332 = vmatmul.msk.bf16.gmra.mxu1 %vm433_vm0, %v606_v19 }
  0xd9   : > { %v511_v23 = vpop.f32.mrf.mxu0 }
  0xda   : > { %v602_v24 = vmax.f32 %v1778_v22, 0.0  ;;  %v512_v25 = vadd.f32 %v1705_v28, %v511_v23 }
  0xdc   : > { %v618_v26 = vpack.c.bf16 %v602_v24, %v601_v21  ;;  %v579_v27 = vmax.f32 %v512_v25, 0.0 }
  0xde   : > { %1344 = vmatmul.msk.bf16.gmra.mxu3 %vm433_vm0, %v618_v26  ;;  %1353 = vmatmul.msk.f32.gmra.mxu2 %vm433_vm0, %v579_v27 }
  0xe1   : > { %v513_v29 = vpop.f32.mrf.mxu0 }
  0xe2   : > { %v514_v30 = vadd.f32 %v1705_v28, %v513_v29 }
  0xe4   : > { %v580_v31 = vmax.f32 %v514_v30, 0.0 }
  0xe6   : > { %v607_v32 = vpack.c.bf16 %v580_v31, %v579_v27  ;;  %1354 = vmatmul.msk.f32.gmra.mxu2 %vm433_vm0, %v580_v31 }
  0xe8   : > { %1333 = vmatmul.msk.bf16.gmra.mxu1 %vm433_vm0, %v607_v32 }
  0xe9   : > { %v516_v33 = vpop.f32.mrf.mxu0 }
  0xea   : > { %v517_v34 = vadd.f32 %v1705_v28, %v516_v33 }
  0xec   : > { %v581_v35 = vmax.f32 %v517_v34, 0.0 }
  0xee   : > { %1355 = vmatmul.msk.f32.gmra.mxu2 %vm433_vm0, %v581_v35  ;;  %1369 = vmatmul.msk.f32.vlgmr.msra.gmra.mxu3 %vm433_vm0, %v595_v40 }
  0xf1   : > { %v518_v37 = vpop.f32.mrf.mxu0 }
  0xf2   : > { %v519_v38 = vadd.f32 %v1705_v28, %v518_v37 }
  0xf4   : > { %v582_v39 = vmax.f32 %v519_v38, 0.0 }
  0xf6   : > { %v608_v42 = vpack.c.bf16 %v582_v39, %v581_v35  ;;  %1356 = vmatmul.msk.f32.gmra.mxu2 %vm433_vm0, %v582_v39  ;;  %1370 = vmatmul.msk.f32.gmra.mxu3 %vm433_vm0, %v596_v44 }
  0xf8   : > { %1334 = vmatmul.msk.bf16.gmra.mxu1 %vm433_vm0, %v608_v42 }
  0xf9   : > { %v521_v43 = vpop.f32.mrf.mxu0 }
  0xfa   : > { %v522_v45 = vadd.f32 %v1705_v28, %v521_v43 }
  0xfc   : > { %v583_v46 = vmax.f32 %v522_v45, 0.0 }
  0xfe   : > { %1357 = vmatmul.msk.f32.gmra.mxu2 %vm433_vm0, %v583_v46  ;;  %1371 = vmatmul.msk.f32.gmra.mxu3 %vm433_vm0, %v597_v55 }
 0x101   : > { %v523_v36 = vpop.f32.mrf.mxu0 }
 0x102   : > { %v524_v40 = vadd.f32 %v1705_v28, %v523_v36 }
 0x104   : > { %v584_v47 = vmax.f32 %v524_v40, 0.0 }
 0x106   : > { %v609_v48 = vpack.c.bf16 %v584_v47, %v583_v46  ;;  %1358 = vmatmul.msk.f32.gmra.mxu2 %vm433_vm0, %v584_v47  ;;  %1372 = vmatmul.msk.f32.gmra.mxu3 %vm433_vm0, %v598_v59 }
 0x108   : > { %1335 = vmatmul.msk.bf16.gmra.mxu1 %vm433_vm0, %v609_v48 }
 0x109   : > { %v526_v41 = vpop.f32.mrf.mxu0 }
 0x10a   : > { %v527_v44 = vadd.f32 %v1705_v28, %v526_v41 }
 0x10c   : > { %v585_v49 = vmax.f32 %v527_v44, 0.0 }
 0x10e   : > { %1359 = vmatmul.msk.f32.gmra.mxu2 %vm433_vm0, %v585_v49  ;;  %1373 = vmatmul.msk.f32.gmra.mxu3 %vm433_vm0, %v599_v6 }
 0x111   : > { %v528_v50 = vpop.f32.mrf.mxu0 }
 0x112   : > { %v529_v51 = vadd.f32 %v1705_v28, %v528_v50 }
 0x114   : > { %v586_v52 = vmax.f32 %v529_v51, 0.0 }
 0x116   : > { %v610_v53 = vpack.c.bf16 %v586_v52, %v585_v49  ;;  %1360 = vmatmul.msk.f32.gmra.mxu2 %vm433_vm0, %v586_v52  ;;  %1374 = vmatmul.msk.f32.gmra.mxu3 %vm433_vm0, %v600_v10 }
 0x118   : > { %1336 = vmatmul.msk.bf16.gmra.mxu1 %vm433_vm0, %v610_v53 }
 0x119   : > { %v531_v54 = vpop.f32.mrf.mxu0 }
 0x11a   : > { %v532_v55 = vadd.f32 %v1705_v28, %v531_v54 }
 0x11c   : > { %v587_v56 = vmax.f32 %v532_v55, 0.0 }
 0x11e   : > { %1361 = vmatmul.msk.f32.gmra.mxu2 %vm433_vm0, %v587_v56  ;;  %1375 = vmatmul.msk.f32.gmra.mxu3 %vm433_vm0, %v601_v21 }
 0x121   : > { %v533_v57 = vpop.f32.mrf.mxu0  ;;  %v973_v58 = vpop.f32.mrf.mxu2 }
 0x122   : > { %v534_v59 = vadd.f32 %v1705_v28, %v533_v57  ;;  %1070 = vst.msk [vmem:[%s1830_s24] sm:$0xff] %vm1069_vm1, %v973_v58 }
 0x124   : > { %v588_v60 = vmax.f32 %v534_v59, 0.0 }
 0x125   : > { %v708_v61 = vpop.f32.mrf.mxu1 }
 0x126   : > { %v611_v62 = vpack.c.bf16 %v588_v60, %v587_v56  ;;  %1362 = vmatmul.msk.f32.gmra.mxu2 %vm433_vm0, %v588_v60  ;;  %1376 = vmatmul.msk.f32.gmra.mxu3 %vm433_vm0, %v602_v24 }
 0x128   : > { %1337 = vmatmul.msk.bf16.gmra.mxu1 %vm433_vm0, %v611_v62 }
 0x129   : > { %v536_v63 = vpop.f32.mrf.mxu0  ;;  %v976_v0 = vpop.f32.mrf.mxu2 }
 0x12a   : > { %v537_v1 = vadd.f32 %v1705_v28, %v536_v63  ;;  %1071 = vst.msk [vmem:[%s1830_s24 + $0x8] sm:$0xff] %vm1069_vm1, %v976_v0 }
 0x12c   : > { %v589_v2 = vmax.f32 %v537_v1, 0.0 }
 0x12d   : > { %v710_v3 = vpop.f32.mrf.mxu1 }
 0x12e   : > { %v1406_v4 = vpack.c.bf16 %v710_v3, %v708_v61  ;;  %1363 = vmatmul.msk.f32.gmra.mxu2 %vm433_vm0, %v589_v2 }
 0x130   : > { %1407 = vst [vmem:[%s1848_s27] sm:$0xff] %v1406_v4  }
 0x131   : > { %v538_v5 = vpop.f32.mrf.mxu0  ;;  %v768_v6 = vpop.f32.mrf.mxu3 }
 0x132   : > { %v539_v7 = vadd.f32 %v1705_v28, %v538_v5  ;;  %v979_v8 = vpop.f32.mrf.mxu2 }
 0x133   : > { %1072 = vst.msk [vmem:[%s1830_s24 + $0x10] sm:$0xff] %vm1069_vm1, %v979_v8 }
 0x134   : > { %v590_v9 = vmax.f32 %v539_v7, 0.0 }
 0x135   : > { %v713_v10 = vpop.f32.mrf.mxu1 }
 0x136   : > { %v612_v11 = vpack.c.bf16 %v590_v9, %v589_v2  ;;  %1364 = vmatmul.msk.f32.gmra.mxu2 %vm433_vm0, %v590_v9 }
 0x138   : > { %1338 = vmatmul.msk.bf16.gmra.mxu1 %vm433_vm0, %v612_v11 }
 0x139   : > { %v541_v12 = vpop.f32.mrf.mxu0  ;;  %v770_v13 = vpop.f32.mrf.mxu3 }
 0x13a   : > { %v542_v14 = vadd.f32 %v1705_v28, %v541_v12  ;;  %v1466_v15 = vpack.c.bf16 %v770_v13, %v768_v6  ;;  %v982_v16 = vpop.f32.mrf.mxu2 }
 0x13b   : > { %1073 = vst.msk [vmem:[%s1830_s24 + $0x18] sm:$0xff] %vm1069_vm1, %v982_v16 }
 0x13c   : > { %v591_v17 = vmax.f32 %v542_v14, 0.0  ;;  %1494 = vst [vmem:[%s1848_s27 + $0x60] sm:$0xff] %v1466_v15  }
 0x13d   : > { %v715_v18 = vpop.f32.mrf.mxu1 }
 0x13e   : > { %v1411_v19 = vpack.c.bf16 %v715_v18, %v713_v10  ;;  %1365 = vmatmul.msk.f32.gmra.mxu2 %vm433_vm0, %v591_v17 }
 0x140   : > { %1483 = vst [vmem:[%s1848_s27 + $0x8] sm:$0xff] %v1411_v19  }
 0x141   : > { %v543_v20 = vpop.f32.mrf.mxu0  ;;  %v773_v21 = vpop.f32.mrf.mxu3 }
 0x142   : > { %v544_v22 = vadd.f32 %v1705_v28, %v543_v20  ;;  %v985_v23 = vpop.f32.mrf.mxu2 }
 0x143   : > { %1074 = vst.msk [vmem:[%s1830_s24 + $0x20] sm:$0xff] %vm1069_vm1, %v985_v23 }
 0x144   : > { %v592_v24 = vmax.f32 %v544_v22, 0.0 }
 0x145   : > { %v718_v25 = vpop.f32.mrf.mxu1 }
 0x146   : > { %v613_v26 = vpack.c.bf16 %v592_v24, %v591_v17  ;;  %1366 = vmatmul.msk.f32.gmra.mxu2 %vm433_vm0, %v592_v24 }
 0x148   : > { %1339 = vmatmul.msk.bf16.gmra.mxu1 %vm433_vm0, %v613_v26 }
 0x149   : > { %v546_v27 = vpop.f32.mrf.mxu0  ;;  %v775_v29 = vpop.f32.mrf.mxu3 }
 0x14a   : > { %v547_v30 = vadd.f32 %v1705_v28, %v546_v27  ;;  %v1471_v31 = vpack.c.bf16 %v775_v29, %v773_v21  ;;  %v988_v32 = vpop.f32.mrf.mxu2 }
 0x14b   : > { %1075 = vst.msk [vmem:[%s1830_s24 + $0x28] sm:$0xff] %vm1069_vm1, %v988_v32 }
 0x14c   : > { %v593_v33 = vmax.f32 %v547_v30, 0.0  ;;  %1495 = vst [vmem:[%s1848_s27 + $0x68] sm:$0xff] %v1471_v31  }
 0x14d   : > { %v720_v34 = vpop.f32.mrf.mxu1 }
 0x14e   : > { %v1416_v35 = vpack.c.bf16 %v720_v34, %v718_v25  ;;  %1367 = vmatmul.msk.f32.gmra.mxu2 %vm433_vm0, %v593_v33 }
 0x150   : > { %1484 = vst [vmem:[%s1848_s27 + $0x10] sm:$0xff] %v1416_v35  }
 0x151   : > { %v548_v37 = vpop.f32.mrf.mxu0  ;;  %v778_v38 = vpop.f32.mrf.mxu3 }
 0x152   : > { %v549_v39 = vadd.f32 %v1705_v28, %v548_v37  ;;  %v991_v42 = vpop.f32.mrf.mxu2 }
 0x153   : > { %1076 = vst.msk [vmem:[%s1830_s24 + $0x30] sm:$0xff] %vm1069_vm1, %v991_v42 }
 0x154   : > { %v594_v43 = vmax.f32 %v549_v39, 0.0 }
 0x155   : > { %v723_v45 = vpop.f32.mrf.mxu1 }
 0x156   : > { %v614_v46 = vpack.c.bf16 %v594_v43, %v593_v33  ;;  %1368 = vmatmul.msk.f32.gmra.mxu2 %vm433_vm0, %v594_v43 }
 0x158   : > { %1340 = vmatmul.msk.bf16.gmra.mxu1 %vm433_vm0, %v614_v46 }
 0x159   : > { %v780_v36 = vpop.f32.mrf.mxu3 }
 0x15a   : > { %v1476_v40 = vpack.c.bf16 %v780_v36, %v778_v38  ;;  %v994_v47 = vpop.f32.mrf.mxu2 }
 0x15b   : > { %1077 = vst.msk [vmem:[%s1830_s24 + $0x38] sm:$0xff] %vm1069_vm1, %v994_v47 }
 0x15c   : > { %1496 = vst [vmem:[%s1848_s27 + $0x70] sm:$0xff] %v1476_v40  }
 0x15d   : > { %v725_v28 = vpop.f32.mrf.mxu1 }
 0x15e   : > { %v1421_v48 = vpack.c.bf16 %v725_v28, %v723_v45 }
 0x160   : > { %1485 = vst [vmem:[%s1848_s27 + $0x18] sm:$0xff] %v1421_v48  }
 0x161   : > { %v783_v41 = vpop.f32.mrf.mxu3 }
 0x162   : > { %v997_v44 = vpop.f32.mrf.mxu2 }
 0x163   : > { %1078 = vst.msk [vmem:[%s1830_s24 + $0x40] sm:$0xff] %vm1069_vm1, %v997_v44 }
 0x165   : > { %v728_v49 = vpop.f32.mrf.mxu1 }
 0x169   : > { %v785_v50 = vpop.f32.mrf.mxu3 }
 0x16a   : > { %v1481_v51 = vpack.c.bf16 %v785_v50, %v783_v41  ;;  %v1000_v52 = vpop.f32.mrf.mxu2 }
 0x16b   : > { %1079 = vst.msk [vmem:[%s1830_s24 + $0x48] sm:$0xff] %vm1069_vm1, %v1000_v52 }
 0x16c   : > { %1497 = vst [vmem:[%s1848_s27 + $0x78] sm:$0xff] %v1481_v51  }
 0x16d   : > { %v730_v53 = vpop.f32.mrf.mxu1 }
 0x16e   : > { %v1426_v54 = vpack.c.bf16 %v730_v53, %v728_v49 }
 0x170   : > { %1486 = vst [vmem:[%s1848_s27 + $0x20] sm:$0xff] %v1426_v54  }
 0x171   : > { %v1045_v55 = vpop.f32.mrf.mxu3 }
 0x172   : > { %v1003_v56 = vpop.f32.mrf.mxu2  ;;  %1094 = vst.msk [vmem:[%s1830_s24 + $0xc0] sm:$0xff] %vm1069_vm1, %v1045_v55 }
 0x173   : > { %1080 = vst.msk [vmem:[%s1830_s24 + $0x50] sm:$0xff] %vm1069_vm1, %v1003_v56 }
 0x175   : > { %v733_v57 = vpop.f32.mrf.mxu1 }
 0x179   : > { %v1048_v58 = vpop.f32.mrf.mxu3 }
 0x17a   : > { %v1006_v59 = vpop.f32.mrf.mxu2  ;;  %1095 = vst.msk [vmem:[%s1830_s24 + $0xc8] sm:$0xff] %vm1069_vm1, %v1048_v58 }
 0x17b   : > { %1081 = vst.msk [vmem:[%s1830_s24 + $0x58] sm:$0xff] %vm1069_vm1, %v1006_v59 }
 0x17d   : > { %v735_v60 = vpop.f32.mrf.mxu1 }
 0x17e   : > { %v1431_v61 = vpack.c.bf16 %v735_v60, %v733_v57 }
 0x180   : > { %1487 = vst [vmem:[%s1848_s27 + $0x28] sm:$0xff] %v1431_v61  }
 0x181   : > { %v1051_v62 = vpop.f32.mrf.mxu3 }
 0x182   : > { %v1009_v63 = vpop.f32.mrf.mxu2  ;;  %1096 = vst.msk [vmem:[%s1830_s24 + $0xd0] sm:$0xff] %vm1069_vm1, %v1051_v62 }
 0x183   : > { %1082 = vst.msk [vmem:[%s1830_s24 + $0x60] sm:$0xff] %vm1069_vm1, %v1009_v63 }
 0x185   : > { %v738_v0 = vpop.f32.mrf.mxu1 }
 0x189   : > { %v1054_v1 = vpop.f32.mrf.mxu3 }
 0x18a   : > { %v1012_v2 = vpop.f32.mrf.mxu2  ;;  %1097 = vst.msk [vmem:[%s1830_s24 + $0xd8] sm:$0xff] %vm1069_vm1, %v1054_v1 }
 0x18b   : > { %1083 = vst.msk [vmem:[%s1830_s24 + $0x68] sm:$0xff] %vm1069_vm1, %v1012_v2 }
 0x18d   : > { %v740_v3 = vpop.f32.mrf.mxu1 }
 0x18e   : > { %v1436_v4 = vpack.c.bf16 %v740_v3, %v738_v0 }
 0x190   : > { %1488 = vst [vmem:[%s1848_s27 + $0x30] sm:$0xff] %v1436_v4  }
 0x191   : > { %v1057_v5 = vpop.f32.mrf.mxu3 }
 0x192   : > { %v1015_v6 = vpop.f32.mrf.mxu2  ;;  %1098 = vst.msk [vmem:[%s1830_s24 + $0xe0] sm:$0xff] %vm1069_vm1, %v1057_v5 }
 0x193   : > { %1084 = vst.msk [vmem:[%s1830_s24 + $0x70] sm:$0xff] %vm1069_vm1, %v1015_v6 }
 0x195   : > { %v743_v7 = vpop.f32.mrf.mxu1 }
 0x199   : > { %v1060_v8 = vpop.f32.mrf.mxu3 }
 0x19a   : > { %v1018_v9 = vpop.f32.mrf.mxu2  ;;  %1099 = vst.msk [vmem:[%s1830_s24 + $0xe8] sm:$0xff] %vm1069_vm1, %v1060_v8 }
 0x19b   : > { %1085 = vst.msk [vmem:[%s1830_s24 + $0x78] sm:$0xff] %vm1069_vm1, %v1018_v9 }
 0x19d   : > { %v745_v10 = vpop.f32.mrf.mxu1 }
 0x19e   : > { %v1441_v11 = vpack.c.bf16 %v745_v10, %v743_v7 }
 0x1a0   : > { %1489 = vst [vmem:[%s1848_s27 + $0x38] sm:$0xff] %v1441_v11  }
 0x1a1   : > { %v1063_v12 = vpop.f32.mrf.mxu3 }
 0x1a2   : > { %v1021_v13 = vpop.f32.mrf.mxu2  ;;  %1100 = vst.msk [vmem:[%s1830_s24 + $0xf0] sm:$0xff] %vm1069_vm1, %v1063_v12 }
 0x1a3   : > { %1086 = vst.msk [vmem:[%s1830_s24 + $0x80] sm:$0xff] %vm1069_vm1, %v1021_v13 }
 0x1a5   : > { %v748_v14 = vpop.f32.mrf.mxu1 }
 0x1a9   : > { %v1066_v15 = vpop.f32.mrf.mxu3 }
 0x1aa   : > { %v1024_v16 = vpop.f32.mrf.mxu2  ;;  %1101 = vst.msk [vmem:[%s1830_s24 + $0xf8] sm:$0xff] %vm1069_vm1, %v1066_v15 }
 0x1ab   : > { %1087 = vst.msk [vmem:[%s1830_s24 + $0x88] sm:$0xff] %vm1069_vm1, %v1024_v16 }
 0x1ad   : > { %v750_v17 = vpop.f32.mrf.mxu1 }
 0x1ae   : > { %v1446_v18 = vpack.c.bf16 %v750_v17, %v748_v14 }
 0x1b0   : > { %1490 = vst [vmem:[%s1848_s27 + $0x40] sm:$0xff] %v1446_v18  }
 0x1b2   : > { %v1027_v19 = vpop.f32.mrf.mxu2 }
 0x1b3   : > { %1088 = vst.msk [vmem:[%s1830_s24 + $0x90] sm:$0xff] %vm1069_vm1, %v1027_v19 }
 0x1b5   : > { %v753_v20 = vpop.f32.mrf.mxu1 }
 0x1ba   : > { %v1030_v21 = vpop.f32.mrf.mxu2 }
 0x1bb   : > { %1089 = vst.msk [vmem:[%s1830_s24 + $0x98] sm:$0xff] %vm1069_vm1, %v1030_v21 }
 0x1bd   : > { %v755_v22 = vpop.f32.mrf.mxu1 }
 0x1be   : > { %v1451_v23 = vpack.c.bf16 %v755_v22, %v753_v20 }
 0x1c0   : > { %1491 = vst [vmem:[%s1848_s27 + $0x48] sm:$0xff] %v1451_v23  }
 0x1c2   : > { %v1033_v24 = vpop.f32.mrf.mxu2 }
 0x1c3   : > { %1090 = vst.msk [vmem:[%s1830_s24 + $0xa0] sm:$0xff] %vm1069_vm1, %v1033_v24 }
 0x1c5   : > { %v758_v25 = vpop.f32.mrf.mxu1 }
 0x1ca   : > { %v1036_v26 = vpop.f32.mrf.mxu2 }
 0x1cb   : > { %1091 = vst.msk [vmem:[%s1830_s24 + $0xa8] sm:$0xff] %vm1069_vm1, %v1036_v26 }
 0x1cd   : > { %v760_v27 = vpop.f32.mrf.mxu1 }
 0x1ce   : > { %v1456_v29 = vpack.c.bf16 %v760_v27, %v758_v25 }
 0x1d0   : > { %1492 = vst [vmem:[%s1848_s27 + $0x50] sm:$0xff] %v1456_v29  }
 0x1d2   : > { %v1039_v30 = vpop.f32.mrf.mxu2 }
 0x1d3   : > { %1092 = vst.msk [vmem:[%s1830_s24 + $0xb0] sm:$0xff] %vm1069_vm1, %v1039_v30 }
 0x1d5   : > { %v763_v31 = vpop.f32.mrf.mxu1 }
 0x1da   : > { %v1042_v32 = vpop.f32.mrf.mxu2 }
 0x1db   : > { %1093 = vst.msk [vmem:[%s1830_s24 + $0xb8] sm:$0xff] %vm1069_vm1, %v1042_v32 }
 0x1dd   : > { %v765_v33 = vpop.f32.mrf.mxu1 }
 0x1de   : > { %v1461_v34 = vpack.c.bf16 %v765_v33, %v763_v31 }
 0x1e0   : > { %1493 = vst [vmem:[%s1848_s27 + $0x58] sm:$0xff] %v1461_v34  }
 0x1e1 PF: > { %s18_s21 = sadd.s32 1, %s1574_s21  }
 0x1e2   : > { %p15_p7 = scmp.ge.s32.totalorder %s18_s21, 6  }
 0x1e4   :  { %17 = sbr.rel (!%p15_p7) target bundleno = 1 (0x1), region = 87 }
 0x1e9   :  { %1141 = vsyncpa [#allocation3], 1 }
 0x1ea   :  { %1143 = vsyncpa [#allocation3 + $0x1], 1 }

// kernel: structure_ae_forward.4
= control target key start
LH: loop header
LB: loop body
LE: loop exit
PB: predicated region body
PF: predicated region fallthrough
CT: control target
= control target key end

     0   :  { %s5064_s10 = smov [#allocation6]   ;;  %s5065_s11 = smov [#allocation7]   ;;  %s8054_s0 = inlined_call_operand.vmem [shape: s32[4], index: 0, kind: input, shape index: {}]   ;;  %s8055_s2 = inlined_call_operand.vmem [shape: bf16[1024,128], index: 2, kind: input, shape index: {}, may-alias: {2,4}]   ;;  %s8056_s3 = inlined_call_operand.vmem [shape: f32[1024,2], index: 3, kind: input, shape index: {}, may-alias: {3,5}]   ;;  %s8057_s4 = inlined_call_operand.vmem [shape: bf16[1024,128], index: 4, kind: input, shape index: {}, may-alias: {2,4}]   ;;  %s8058_s5 = inlined_call_operand.vmem [shape: f32[1024,2], index: 5, kind: input, shape index: {}, may-alias: {3,5}]   ;;  %s8059_s6 = inlined_call_operand.vmem [shape: s8[1024,1024], index: 6, kind: input, shape index: {}]   ;;  %s8060_s7 = inlined_call_operand.vmem [shape: f32[1,128], index: 7, kind: input, shape index: {}]   ;;  %s8061_s8 = inlined_call_operand.vmem [shape: bf16[1024,128], index: 8, kind: output, shape index: {}]   ;;  %s8062_s1 = inlined_call_operand.vmem [shape: s32[4,4], index: 1, kind: input, shape index: {}]  }
   0x1   :  { %8232 = sst [smem:[#allocation149_spill]] %s8056_s3  ;;  %s14_s28 = sshll.u32 %s8054_s0, 4  ;;  %s15_s28 = int_to_ptr.vmem [resolvable:$true] %s14_s28 }
   0x2   :  { %8233 = sst [smem:[#allocation150_spill]] %s8057_s4  ;;  %s19_s9 = sshll.u32 %s8062_s1, 4  ;;  %s20_s9 = int_to_ptr.vmem [resolvable:$true] %s19_s9 }
   0x3   :  { %8234 = sst [smem:[#allocation151_spill]] %s8058_s5 }
   0x4   :  { %8235 = sst [smem:[#allocation152_spill]] %s8059_s6 }
   0x5   :  { %8236 = sst [smem:[#allocation153_spill]] %s8060_s7 }
   0x6   :  { %8237 = sst [smem:[#allocation154_spill]] %s8061_s8 }
   0x7   :  { %17 = dma.vmem_to_smem %s15_s28, 16, %s5064_s10, [#allocation5] }
   0x8   :  { %22 = dma.vmem_to_smem %s20_s9, 64, %s5065_s11, [#allocation5] }
   0x9   :  { %5034 = dma.done.wait [#allocation5], 80 }
   0xa   :  { %5035 = vsyncadd [#allocation5], 4294967216 }
   0xb   :  { %25 = sfence }
   0xc   :  { %s5122_s12 = smov 0   ;;  %s5124_s13 = smov 0  }
   0xd   :  { %s5126_s14 = smov 0   ;;  %s5128_s0 = smov 0  }
   0xe   :  { %s5130_s15 = smov 0   ;;  %s5132_s1 = smov 0  }
   0xf   :  { %s5134_s16 = smov 0  }
  0x10 LB: > { %s40_s17 = sadd.s32 1, %s5054_s15  ;;  %s43_s18 = sadd.s32 1, %s5058_s1  ;;  %s5062_s16 = sphi %s5134_s16, %s31_s16   ;;  %s5058_s1 = sphi %s5132_s1, %s8769_s1   ;;  %s5054_s15 = sphi %s5130_s15, %s8768_s15   ;;  %s5050_s0 = sphi %s5128_s0, %s8767_s0   ;;  %s5046_s14 = sphi %s5126_s14, %s8766_s14   ;;  %s5042_s13 = sphi %s5124_s13, %s8765_s13   ;;  %s5038_s12 = sphi %s5122_s12, %s8764_s12  }
  0x11   : > { %p5159_p0 = scmp.ge.s32.totalorder %s40_s17, 4  ;;  %s207_s20 = sld [smem:[#allocation6 + %s5058_s1]] }
  0x12   : > { %p247_p1 = scmp.ne.s32.totalorder %s5042_s13, %s5038_s12  ;;  %p248_p2 = scmp.eq.s32.totalorder %s5062_s16, 0 }
  0x13   : > { %s8771_s18 = smov (!%p5159_p0, %s43_s18), %s5058_s1  ;;  %s8777_s17 = smov (%p5159_p0, %s40_s17), 0 }
  0x14   : > { %p45_p3 = scmp.ge.s32.totalorder %s8771_s18, 4  ;;  %p5170_p4 = por %p248_p2, %p247_p1 }
  0x15   : > { %s240_s8 = sadd.s32 1, %s5042_s13  ;;  %p4370_p10 = scmp.ge.s32.totalorder %s5062_s16, 16 }
  0x16   : > { %s8773_s18 = smov (%p45_p3, %s8771_s18), 0 }
  0x17   : > { %s4365_s21 = sadd.s32 4294967295, %s207_s20  ;;  %s221_s23 = sld [smem:[#allocation6 + %s8773_s18]] }
  0x18   : > { %p209_p5 = scmp.gt.s32.totalorder %s4365_s21, 0  ;;  %s235_s7 = ssub.s32 %s5058_s1, %s8773_s18 }
  0x1a   : > { %s8775_s21 = smov (!%p209_p5, %s4365_s21), 0 }
  0x1b   : > { %p211_p6 = scmp.lt.s32.totalorder %s5054_s15, %s8775_s21 }
  0x1d   : > { %s212_s24 = scalar_select %p211_p6, %s5054_s15, %s8775_s21 }
  0x1e   : > { %s4367_s25 = sadd.s32 4294967295, %s221_s23 }
  0x1f   : > { %s213_s2 = sshra.s32 %s212_s24, 7  ;;  %p223_p7 = scmp.gt.s32.totalorder %s4367_s25, 0 }
  0x20   : > { %s215_s26 = sadd.s32 %s5058_s1, %s213_s2  ;;  %s218_s27 = sand.u32 127, %s212_s24 }
  0x21   : > { %s8779_s25 = smov (!%p223_p7, %s4367_s25), 0  ;;  %s4366_s28 = sshll.u32 %s215_s26, 7 }
  0x22   : > { %p225_p8 = scmp.lt.s32.totalorder %s8777_s17, %s8779_s25  ;;  %s219_s30 = sadd.s32 %s4366_s28, %s218_s27 }
  0x23   : > { %s220_s20 = sld [smem:[#allocation7 + %s219_s30]] }
  0x24   : > { %s226_s29 = scalar_select %p225_p8, %s8777_s17, %s8779_s25 }
  0x26   : > { %s227_s9 = sshra.s32 %s226_s29, 7  ;;  %s232_s10 = sand.u32 127, %s226_s29 }
  0x27   : > { %s229_s11 = sadd.s32 %s227_s9, %s8773_s18 }
  0x28   : > { %s4368_s19 = sshll.u32 %s229_s11, 7 }
  0x29   : > { %s233_s21 = sadd.s32 %s4368_s19, %s232_s10 }
  0x2a   : > { %s234_s23 = sld [smem:[#allocation7 + %s233_s21]] }
  0x30   : > { %s236_s5 = ssub.s32 %s220_s20, %s234_s23  ;;  %323 = sbr.rel (%p4370_p10) target bundleno = 114 (0x72), region = 20 }
  0x31   : > { %s237_s4 = sor.u32 %s236_s5, %s235_s7 }
  0x32   : > { %p238_p9 = scmp.eq.s32.totalorder %s237_s4, 0 }
  0x34   : > { %s5191_s2 = scalar_select %p238_p9, %s5042_s13, %s240_s8  }
  0x35   : > { %418 = sbr.rel (!%p5170_p4) target bundleno = 114 (0x72), region = 40  ;;  %s423_s24 = sld [smem:[#allocation6 + %s5058_s1]] (%p5170_p4) }
  0x36   : > { %s420_s22 = sand.u32 (%p5170_p4), 1, %s5042_s13   ;;  %s4525_s29 = sshll.u32 (%p5170_p4), %s5058_s1, 8 }
  0x37   : > { %s4371_s30 = sshll.u32 (%p5170_p4), %s420_s22, 7  ;;  %s8240_s6 = sld [smem:[#allocation152_spill]] (%p5170_p4) }
  0x38   : > { %s5210_s23 = scalar_lea.vmem (%p5170_p4), [#allocation8], %s4371_s30 }
  0x3b   : > { %s4372_s25 = sadd.s32 4294967295, %s423_s24 }
  0x3c   : > { %p425_p11 = scmp.gt.s32.totalorder %s4372_s25, 0 }
  0x3e   : > { %s8781_s25 = smov (!%p425_p11, %s4372_s25), 0 }
  0x3f   : > { %p427_p12 = scmp.lt.s32.totalorder %s5054_s15, %s8781_s25 }
  0x41   : > { %s428_s4 = scalar_select %p427_p12, %s5054_s15, %s8781_s25 }
  0x43   : > { %s429_s5 = sshra.s32 %s428_s4, 7  ;;  %s434_s7 = sand.u32 127, %s428_s4 }
  0x44   : > { %s431_s8 = sadd.s32 %s5058_s1, %s429_s5 }
  0x45   : > { %s4373_s26 = sshll.u32 %s431_s8, 7 }
  0x46   : > { %s435_s27 = sadd.s32 %s4373_s26, %s434_s7 }
  0x47   : > { %s436_s28 = sld [smem:[#allocation7 + %s435_s27]] }
  0x4d   : > { %s4375_s9 = sshll.u32 %s436_s28, 1 }
  0x4e   : > { %s440_s10 = sadd.s32 %s4525_s29, %s4375_s9 }
  0x4f   : > { %s4377_s11 = sshll.u32 %s440_s10, 1 }
  0x50   : > { %s5205_s21 = scalar_lea.vmem %s8240_s6, %s4377_s11 }
  0x51   : > { %v459_v0 = vld [vmem:[%s5205_s21] sm:$0xf]  ;;  %v461_v1 = vld [vmem:[%s5205_s21 + $0x10] sm:$0xf] }
  0x52   : > { %v463_v2 = vld [vmem:[%s5205_s21 + $0x20] sm:$0xf]  ;;  %460 = vst [vmem:[%s5210_s23] sm:$0xf] %v459_v0  ;;  %v465_v3 = vld [vmem:[%s5205_s21 + $0x30] sm:$0xf] }
  0x53   : > { %462 = vst [vmem:[%s5210_s23 + $0x4] sm:$0xf] %v461_v1  ;;  %v467_v4 = vld [vmem:[%s5205_s21 + $0x40] sm:$0xf]  ;;  %v469_v5 = vld [vmem:[%s5205_s21 + $0x50] sm:$0xf] }
  0x54   : > { %464 = vst [vmem:[%s5210_s23 + $0x8] sm:$0xf] %v463_v2  ;;  %v471_v6 = vld [vmem:[%s5205_s21 + $0x60] sm:$0xf]  ;;  %v473_v7 = vld [vmem:[%s5205_s21 + $0x70] sm:$0xf] }
  0x55   : > { %466 = vst [vmem:[%s5210_s23 + $0xc] sm:$0xf] %v465_v3  ;;  %v475_v8 = vld [vmem:[%s5205_s21 + $0x80] sm:$0xf]  ;;  %v477_v9 = vld [vmem:[%s5205_s21 + $0x90] sm:$0xf] }
  0x56   : > { %468 = vst [vmem:[%s5210_s23 + $0x10] sm:$0xf] %v467_v4  ;;  %v479_v10 = vld [vmem:[%s5205_s21 + $0xa0] sm:$0xf]  ;;  %v481_v11 = vld [vmem:[%s5205_s21 + $0xb0] sm:$0xf] }
  0x57   : > { %470 = vst [vmem:[%s5210_s23 + $0x14] sm:$0xf] %v469_v5  ;;  %v483_v12 = vld [vmem:[%s5205_s21 + $0xc0] sm:$0xf]  ;;  %v485_v13 = vld [vmem:[%s5205_s21 + $0xd0] sm:$0xf] }
  0x58   : > { %472 = vst [vmem:[%s5210_s23 + $0x18] sm:$0xf] %v471_v6  ;;  %v487_v14 = vld [vmem:[%s5205_s21 + $0xe0] sm:$0xf]  ;;  %v489_v15 = vld [vmem:[%s5205_s21 + $0xf0] sm:$0xf] }
  0x59   : > { %474 = vst [vmem:[%s5210_s23 + $0x1c] sm:$0xf] %v473_v7  ;;  %v491_v16 = vld [vmem:[%s5205_s21 + $0x100] sm:$0xf]  ;;  %v493_v17 = vld [vmem:[%s5205_s21 + $0x110] sm:$0xf] }
  0x5a   : > { %476 = vst [vmem:[%s5210_s23 + $0x20] sm:$0xf] %v475_v8  ;;  %v495_v18 = vld [vmem:[%s5205_s21 + $0x120] sm:$0xf]  ;;  %v497_v19 = vld [vmem:[%s5205_s21 + $0x130] sm:$0xf] }
  0x5b   : > { %478 = vst [vmem:[%s5210_s23 + $0x24] sm:$0xf] %v477_v9  ;;  %v499_v20 = vld [vmem:[%s5205_s21 + $0x140] sm:$0xf]  ;;  %v501_v21 = vld [vmem:[%s5205_s21 + $0x150] sm:$0xf] }
  0x5c   : > { %480 = vst [vmem:[%s5210_s23 + $0x28] sm:$0xf] %v479_v10  ;;  %v503_v22 = vld [vmem:[%s5205_s21 + $0x160] sm:$0xf]  ;;  %v505_v23 = vld [vmem:[%s5205_s21 + $0x170] sm:$0xf] }
  0x5d   : > { %482 = vst [vmem:[%s5210_s23 + $0x2c] sm:$0xf] %v481_v11  ;;  %v507_v24 = vld [vmem:[%s5205_s21 + $0x180] sm:$0xf]  ;;  %v509_v25 = vld [vmem:[%s5205_s21 + $0x190] sm:$0xf] }
  0x5e   : > { %484 = vst [vmem:[%s5210_s23 + $0x30] sm:$0xf] %v483_v12  ;;  %v511_v26 = vld [vmem:[%s5205_s21 + $0x1a0] sm:$0xf]  ;;  %v513_v27 = vld [vmem:[%s5205_s21 + $0x1b0] sm:$0xf] }
  0x5f   : > { %486 = vst [vmem:[%s5210_s23 + $0x34] sm:$0xf] %v485_v13  ;;  %v515_v28 = vld [vmem:[%s5205_s21 + $0x1c0] sm:$0xf]  ;;  %v517_v29 = vld [vmem:[%s5205_s21 + $0x1d0] sm:$0xf] }
  0x60   : > { %488 = vst [vmem:[%s5210_s23 + $0x38] sm:$0xf] %v487_v14  ;;  %v519_v30 = vld [vmem:[%s5205_s21 + $0x1e0] sm:$0xf]  ;;  %v521_v31 = vld [vmem:[%s5205_s21 + $0x1f0] sm:$0xf] }
  0x61   : > { %490 = vst [vmem:[%s5210_s23 + $0x3c] sm:$0xf] %v489_v15 }
  0x62   : > { %492 = vst [vmem:[%s5210_s23 + $0x40] sm:$0xf] %v491_v16 }
  0x63   : > { %494 = vst [vmem:[%s5210_s23 + $0x44] sm:$0xf] %v493_v17 }
  0x64   : > { %496 = vst [vmem:[%s5210_s23 + $0x48] sm:$0xf] %v495_v18 }
  0x65   : > { %498 = vst [vmem:[%s5210_s23 + $0x4c] sm:$0xf] %v497_v19 }
  0x66   : > { %500 = vst [vmem:[%s5210_s23 + $0x50] sm:$0xf] %v499_v20 }
  0x67   : > { %502 = vst [vmem:[%s5210_s23 + $0x54] sm:$0xf] %v501_v21 }
  0x68   : > { %504 = vst [vmem:[%s5210_s23 + $0x58] sm:$0xf] %v503_v22 }
  0x69   : > { %506 = vst [vmem:[%s5210_s23 + $0x5c] sm:$0xf] %v505_v23 }
  0x6a   : > { %508 = vst [vmem:[%s5210_s23 + $0x60] sm:$0xf] %v507_v24 }
  0x6b   : > { %510 = vst [vmem:[%s5210_s23 + $0x64] sm:$0xf] %v509_v25 }
  0x6c   : > { %512 = vst [vmem:[%s5210_s23 + $0x68] sm:$0xf] %v511_v26 }
  0x6d   : > { %514 = vst [vmem:[%s5210_s23 + $0x6c] sm:$0xf] %v513_v27 }
  0x6e   : > { %516 = vst [vmem:[%s5210_s23 + $0x70] sm:$0xf] %v515_v28 }
  0x6f   : > { %518 = vst [vmem:[%s5210_s23 + $0x74] sm:$0xf] %v517_v29 }
  0x70   : > { %520 = vst [vmem:[%s5210_s23 + $0x78] sm:$0xf] %v519_v30 }
  0x71   : > { %522 = vst [vmem:[%s5210_s23 + $0x7c] sm:$0xf] %v521_v31 }
  0x72 PF: > { %p4378_p13 = scmp.ge.s32.totalorder %s5062_s16, 1  ;;  %p609_p0 = scmp.lt.s32.totalorder %s5062_s16, 17 }
  0x74   : > { %p610_p1 = pnand %p4378_p13, %p609_p0 }
  0x75   : > { %s616_s24 = sand.u32 (!%p610_p1), 1, %s5038_s12   ;;  %s4380_s25 = sshll.u32 (!%p610_p1), %s5050_s0, 5 }
  0x76   : > { %613 = sbr.rel (%p610_p1) target bundleno = 1378 (0x562), region = 81  ;;  %s5277_s4 = sshll.u32 (!%p610_p1), %s616_s24, 7 }
  0x77   : > { %p700_p2 = scmp.lt.s32.totalorder (!%p610_p1), %s4380_s25, 127  ;;  %s705_s5 = sld [smem:[#allocation6 + %s5050_s0]] (!%p610_p1) }
  0x78   : > { %s739_s7 = sld [smem:[#allocation6 + %s5050_s0]] (!%p610_p1)  ;;  %p4392_p9 = scmp.ne.s32.totalorder (!%p610_p1), %s5046_s14, 0 }
  0x79   : > { %s8241_s3 = sld [smem:[#allocation149_spill]] (!%p610_p1) }
  0x7a   : > { %s8242_s30 = sld [smem:[#allocation154_spill]] (!%p610_p1) }
  0x7b   : > { %s8783_s25 = smov (!%p700_p2, %s4380_s25), 127 }
  0x7c   : > { %s4381_s8 = sshll.u32 %s8783_s25, 3  ;;  %s4391_s26 = sshll.u32 %s8783_s25, 2 }
  0x7d   : > { %s4382_s10 = sadd.s32 4294967295, %s705_s5 }
  0x7e   : > { %p707_p3 = scmp.gt.s32.totalorder %s4382_s10, 0  ;;  %s4386_s11 = sadd.s32 4294967295, %s739_s7 }
  0x7f   : > { %s5284_s22 = scalar_lea.vmem %s8241_s3, %s4381_s8  ;;  %p741_p4 = scmp.gt.s32.totalorder %s4386_s11, 0 }
  0x80   : > { %s5289_s9 = scalar_lea.vmem %s8242_s30, %s4391_s26  ;;  %s8785_s10 = smov (!%p707_p3, %s4382_s10), 0 }
  0x81   : > { %p709_p5 = scmp.lt.s32.totalorder %s5046_s14, %s8785_s10  ;;  %s8787_s11 = smov (!%p741_p4, %s4386_s11), 0 }
  0x82   : > { %p743_p6 = scmp.lt.s32.totalorder %s5046_s14, %s8787_s11 }
  0x83   : > { %s710_s20 = scalar_select %p709_p5, %s5046_s14, %s8785_s10 }
  0x84   : > { %s744_s27 = scalar_select %p743_p6, %s5046_s14, %s8787_s11 }
  0x85   : > { %s711_s19 = sshra.s32 %s710_s20, 7  ;;  %s716_s21 = sand.u32 127, %s710_s20 }
  0x86   : > { %s713_s23 = sadd.s32 %s5050_s0, %s711_s19  ;;  %s745_s26 = sshra.s32 %s744_s27, 7 }
  0x87   : > { %s4383_s24 = sshll.u32 %s713_s23, 7  ;;  %s750_s28 = sand.u32 127, %s744_s27 }
  0x88   : > { %s717_s25 = sadd.s32 %s4383_s24, %s716_s21  ;;  %s747_s5 = sadd.s32 %s5050_s0, %s745_s26 }
  0x89   : > { %s718_s8 = sld [smem:[#allocation7 + %s717_s25]]  ;;  %s4387_s29 = sshll.u32 %s747_s5, 7 }
  0x8a   : > { %s751_s12 = sadd.s32 %s4387_s29, %s750_s28  ;;  %s8243_s20 = sld [smem:[#allocation150_spill]] }
  0x8b   : > { %s752_s30 = sld [smem:[#allocation7 + %s751_s12]] }
  0x8c   : > { %s8244_s25 = sld [smem:[#allocation151_spill]] }
  0x8f   : > { %s4384_s7 = sshll.u32 %s718_s8, 5  ;;  %s5308_s8 = scalar_lea.vmem [#allocation8], %s5277_s4 }
  0x90   : > { %p720_p7 = scmp.lt.s32.totalorder %s4384_s7, 127 }
  0x91   : > { %s4388_s23 = sshll.u32 %s752_s30, 5 }
  0x92   : > { %s8789_s7 = smov (!%p720_p7, %s4384_s7), 127  ;;  %p754_p8 = scmp.lt.s32.totalorder %s4388_s23, 127 }
  0x93   : > { %s4385_s3 = sshll.u32 %s8789_s7, 2  ;;  %802 = sbr.rel (%p4392_p9) target bundleno = 249 (0xf9), region = 89 }
  0x94   : > { %s5300_s19 = scalar_lea.vmem %s8243_s20, %s4385_s3  ;;  %s8791_s23 = smov (!%p754_p8, %s4388_s23), 127 }
  0x95   : > { %s4389_s11 = sshll.u32 %s8791_s23, 3 }
  0x96   : > { %s5305_s27 = scalar_lea.vmem %s8244_s25, %s4389_s11 }
  0x98   : > { %vm803_vm0 = vcmask 7168   ;;  %v5066_v32 = vmov -1e+30   ;;  %v5067_v33 = vmov 0.0  }
  0x99   : > { %804 = vst.msk [vmem:[#allocation2] sm:$0xff] %vm803_vm0, %v5066_v32 }
  0x9a   : > { %805 = vst.msk [vmem:[#allocation2 + $0x8] sm:$0xff] %vm803_vm0, %v5066_v32 }
  0x9b   : > { %806 = vst.msk [vmem:[#allocation2 + $0x10] sm:$0xff] %vm803_vm0, %v5066_v32 }
  0x9c   : > { %807 = vst.msk [vmem:[#allocation2 + $0x18] sm:$0xff] %vm803_vm0, %v5066_v32 }
  0x9d   : > { %808 = vst.msk [vmem:[#allocation2 + $0x20] sm:$0xff] %vm803_vm0, %v5066_v32 }
  0x9e   : > { %809 = vst.msk [vmem:[#allocation2 + $0x28] sm:$0xff] %vm803_vm0, %v5066_v32 }
  0x9f   : > { %810 = vst.msk [vmem:[#allocation2 + $0x30] sm:$0xff] %vm803_vm0, %v5066_v32 }
  0xa0   : > { %811 = vst.msk [vmem:[#allocation2 + $0x38] sm:$0xff] %vm803_vm0, %v5066_v32 }
  0xa1   : > { %812 = vst.msk [vmem:[#allocation2 + $0x40] sm:$0xff] %vm803_vm0, %v5066_v32 }
  0xa2   : > { %813 = vst.msk [vmem:[#allocation2 + $0x48] sm:$0xff] %vm803_vm0, %v5066_v32 }
  0xa3   : > { %814 = vst.msk [vmem:[#allocation2 + $0x50] sm:$0xff] %vm803_vm0, %v5066_v32 }
  0xa4   : > { %815 = vst.msk [vmem:[#allocation2 + $0x58] sm:$0xff] %vm803_vm0, %v5066_v32 }
  0xa5   : > { %816 = vst.msk [vmem:[#allocation2 + $0x60] sm:$0xff] %vm803_vm0, %v5066_v32 }
  0xa6   : > { %817 = vst.msk [vmem:[#allocation2 + $0x68] sm:$0xff] %vm803_vm0, %v5066_v32 }
  0xa7   : > { %818 = vst.msk [vmem:[#allocation2 + $0x70] sm:$0xff] %vm803_vm0, %v5066_v32 }
  0xa8   : > { %819 = vst.msk [vmem:[#allocation2 + $0x78] sm:$0xff] %vm803_vm0, %v5066_v32 }
  0xa9   : > { %820 = vst.msk [vmem:[#allocation2 + $0x80] sm:$0xff] %vm803_vm0, %v5066_v32 }
  0xaa   : > { %821 = vst.msk [vmem:[#allocation2 + $0x88] sm:$0xff] %vm803_vm0, %v5066_v32 }
  0xab   : > { %822 = vst.msk [vmem:[#allocation2 + $0x90] sm:$0xff] %vm803_vm0, %v5066_v32 }
  0xac   : > { %823 = vst.msk [vmem:[#allocation2 + $0x98] sm:$0xff] %vm803_vm0, %v5066_v32 }
  0xad   : > { %824 = vst.msk [vmem:[#allocation2 + $0xa0] sm:$0xff] %vm803_vm0, %v5066_v32 }
  0xae   : > { %825 = vst.msk [vmem:[#allocation2 + $0xa8] sm:$0xff] %vm803_vm0, %v5066_v32 }
  0xaf   : > { %826 = vst.msk [vmem:[#allocation2 + $0xb0] sm:$0xff] %vm803_vm0, %v5066_v32 }
  0xb0   : > { %827 = vst.msk [vmem:[#allocation2 + $0xb8] sm:$0xff] %vm803_vm0, %v5066_v32 }
  0xb1   : > { %828 = vst.msk [vmem:[#allocation2 + $0xc0] sm:$0xff] %vm803_vm0, %v5066_v32 }
  0xb2   : > { %829 = vst.msk [vmem:[#allocation2 + $0xc8] sm:$0xff] %vm803_vm0, %v5066_v32 }
  0xb3   : > { %830 = vst.msk [vmem:[#allocation2 + $0xd0] sm:$0xff] %vm803_vm0, %v5066_v32 }
  0xb4   : > { %831 = vst.msk [vmem:[#allocation2 + $0xd8] sm:$0xff] %vm803_vm0, %v5066_v32 }
  0xb5   : > { %832 = vst.msk [vmem:[#allocation2 + $0xe0] sm:$0xff] %vm803_vm0, %v5066_v32 }
  0xb6   : > { %833 = vst.msk [vmem:[#allocation2 + $0xe8] sm:$0xff] %vm803_vm0, %v5066_v32 }
  0xb7   : > { %834 = vst.msk [vmem:[#allocation2 + $0xf0] sm:$0xff] %vm803_vm0, %v5066_v32 }
  0xb8   : > { %835 = vst.msk [vmem:[#allocation2 + $0xf8] sm:$0xff] %vm803_vm0, %v5066_v32 }
  0xb9   : > { %836 = vst.msk [vmem:[#allocation3] sm:$0xff] %vm803_vm0, %v5067_v33 }
  0xba   : > { %837 = vst.msk [vmem:[#allocation3 + $0x8] sm:$0xff] %vm803_vm0, %v5067_v33 }
  0xbb   : > { %838 = vst.msk [vmem:[#allocation3 + $0x10] sm:$0xff] %vm803_vm0, %v5067_v33 }
  0xbc   : > { %839 = vst.msk [vmem:[#allocation3 + $0x18] sm:$0xff] %vm803_vm0, %v5067_v33 }
  0xbd   : > { %840 = vst.msk [vmem:[#allocation3 + $0x20] sm:$0xff] %vm803_vm0, %v5067_v33 }
  0xbe   : > { %841 = vst.msk [vmem:[#allocation3 + $0x28] sm:$0xff] %vm803_vm0, %v5067_v33 }
  0xbf   : > { %842 = vst.msk [vmem:[#allocation3 + $0x30] sm:$0xff] %vm803_vm0, %v5067_v33 }
  0xc0   : > { %843 = vst.msk [vmem:[#allocation3 + $0x38] sm:$0xff] %vm803_vm0, %v5067_v33 }
  0xc1   : > { %844 = vst.msk [vmem:[#allocation3 + $0x40] sm:$0xff] %vm803_vm0, %v5067_v33 }
  0xc2   : > { %845 = vst.msk [vmem:[#allocation3 + $0x48] sm:$0xff] %vm803_vm0, %v5067_v33 }
  0xc3   : > { %846 = vst.msk [vmem:[#allocation3 + $0x50] sm:$0xff] %vm803_vm0, %v5067_v33 }
  0xc4   : > { %847 = vst.msk [vmem:[#allocation3 + $0x58] sm:$0xff] %vm803_vm0, %v5067_v33 }
  0xc5   : > { %848 = vst.msk [vmem:[#allocation3 + $0x60] sm:$0xff] %vm803_vm0, %v5067_v33 }
  0xc6   : > { %849 = vst.msk [vmem:[#allocation3 + $0x68] sm:$0xff] %vm803_vm0, %v5067_v33 }
  0xc7   : > { %850 = vst.msk [vmem:[#allocation3 + $0x70] sm:$0xff] %vm803_vm0, %v5067_v33 }
  0xc8   : > { %851 = vst.msk [vmem:[#allocation3 + $0x78] sm:$0xff] %vm803_vm0, %v5067_v33 }
  0xc9   : > { %852 = vst.msk [vmem:[#allocation3 + $0x80] sm:$0xff] %vm803_vm0, %v5067_v33 }
  0xca   : > { %853 = vst.msk [vmem:[#allocation3 + $0x88] sm:$0xff] %vm803_vm0, %v5067_v33 }
  0xcb   : > { %854 = vst.msk [vmem:[#allocation3 + $0x90] sm:$0xff] %vm803_vm0, %v5067_v33 }
  0xcc   : > { %855 = vst.msk [vmem:[#allocation3 + $0x98] sm:$0xff] %vm803_vm0, %v5067_v33 }
  0xcd   : > { %856 = vst.msk [vmem:[#allocation3 + $0xa0] sm:$0xff] %vm803_vm0, %v5067_v33 }
  0xce   : > { %857 = vst.msk [vmem:[#allocation3 + $0xa8] sm:$0xff] %vm803_vm0, %v5067_v33 }
  0xcf   : > { %858 = vst.msk [vmem:[#allocation3 + $0xb0] sm:$0xff] %vm803_vm0, %v5067_v33 }
  0xd0   : > { %859 = vst.msk [vmem:[#allocation3 + $0xb8] sm:$0xff] %vm803_vm0, %v5067_v33 }
  0xd1   : > { %860 = vst.msk [vmem:[#allocation3 + $0xc0] sm:$0xff] %vm803_vm0, %v5067_v33 }
  0xd2   : > { %861 = vst.msk [vmem:[#allocation3 + $0xc8] sm:$0xff] %vm803_vm0, %v5067_v33 }
  0xd3   : > { %862 = vst.msk [vmem:[#allocation3 + $0xd0] sm:$0xff] %vm803_vm0, %v5067_v33 }
  0xd4   : > { %863 = vst.msk [vmem:[#allocation3 + $0xd8] sm:$0xff] %vm803_vm0, %v5067_v33 }
  0xd5   : > { %864 = vst.msk [vmem:[#allocation3 + $0xe0] sm:$0xff] %vm803_vm0, %v5067_v33 }
  0xd6   : > { %865 = vst.msk [vmem:[#allocation3 + $0xe8] sm:$0xff] %vm803_vm0, %v5067_v33 }
  0xd7   : > { %866 = vst.msk [vmem:[#allocation3 + $0xf0] sm:$0xff] %vm803_vm0, %v5067_v33 }
  0xd8   : > { %867 = vst.msk [vmem:[#allocation3 + $0xf8] sm:$0xff] %vm803_vm0, %v5067_v33 }
  0xd9   : > { %868 = vst [vmem:[#allocation4 + $0xb0] sm:$0xff] %v5067_v33 }
  0xda   : > { %869 = vst [vmem:[#allocation4] sm:$0xff] %v5067_v33 }
  0xdb   : > { %870 = vst [vmem:[#allocation4 + $0xd8] sm:$0xff] %v5067_v33 }
  0xdc   : > { %871 = vst [vmem:[#allocation4 + $0x18] sm:$0xff] %v5067_v33 }
  0xdd   : > { %872 = vst [vmem:[#allocation4 + $0x50] sm:$0xff] %v5067_v33 }
  0xde   : > { %873 = vst [vmem:[#allocation4 + $0x68] sm:$0xff] %v5067_v33 }
  0xdf   : > { %874 = vst [vmem:[#allocation4 + $0x30] sm:$0xff] %v5067_v33 }
  0xe0   : > { %875 = vst [vmem:[#allocation4 + $0x48] sm:$0xff] %v5067_v33 }
  0xe1   : > { %876 = vst [vmem:[#allocation4 + $0x80] sm:$0xff] %v5067_v33 }
  0xe2   : > { %877 = vst [vmem:[#allocation4 + $0x88] sm:$0xff] %v5067_v33 }
  0xe3   : > { %878 = vst [vmem:[#allocation4 + $0xe8] sm:$0xff] %v5067_v33 }
  0xe4   : > { %879 = vst [vmem:[#allocation4 + $0xb8] sm:$0xff] %v5067_v33 }
  0xe5   : > { %880 = vst [vmem:[#allocation4 + $0x60] sm:$0xff] %v5067_v33 }
  0xe6   : > { %881 = vst [vmem:[#allocation4 + $0xf0] sm:$0xff] %v5067_v33 }
  0xe7   : > { %882 = vst [vmem:[#allocation4 + $0x8] sm:$0xff] %v5067_v33 }
  0xe8   : > { %883 = vst [vmem:[#allocation4 + $0x78] sm:$0xff] %v5067_v33 }
  0xe9   : > { %884 = vst [vmem:[#allocation4 + $0x38] sm:$0xff] %v5067_v33 }
  0xea   : > { %885 = vst [vmem:[#allocation4 + $0x58] sm:$0xff] %v5067_v33 }
  0xeb   : > { %886 = vst [vmem:[#allocation4 + $0x40] sm:$0xff] %v5067_v33 }
  0xec   : > { %887 = vst [vmem:[#allocation4 + $0xc8] sm:$0xff] %v5067_v33 }
  0xed   : > { %888 = vst [vmem:[#allocation4 + $0xe0] sm:$0xff] %v5067_v33 }
  0xee   : > { %889 = vst [vmem:[#allocation4 + $0x90] sm:$0xff] %v5067_v33 }
  0xef   : > { %890 = vst [vmem:[#allocation4 + $0x70] sm:$0xff] %v5067_v33 }
  0xf0   : > { %891 = vst [vmem:[#allocation4 + $0xc0] sm:$0xff] %v5067_v33 }
  0xf1   : > { %892 = vst [vmem:[#allocation4 + $0xa8] sm:$0xff] %v5067_v33 }
  0xf2   : > { %893 = vst [vmem:[#allocation4 + $0xd0] sm:$0xff] %v5067_v33 }
  0xf3   : > { %894 = vst [vmem:[#allocation4 + $0x10] sm:$0xff] %v5067_v33 }
  0xf4   : > { %895 = vst [vmem:[#allocation4 + $0x28] sm:$0xff] %v5067_v33 }
  0xf5   : > { %896 = vst [vmem:[#allocation4 + $0xa0] sm:$0xff] %v5067_v33 }
  0xf6   : > { %897 = vst [vmem:[#allocation4 + $0xf8] sm:$0xff] %v5067_v33 }
  0xf7   : > { %898 = vst [vmem:[#allocation4 + $0x20] sm:$0xff] %v5067_v33 }
  0xf8   : > { %899 = vst [vmem:[#allocation4 + $0x98] sm:$0xff] %v5067_v33 }
  0xf9 PF: > { %s900_s3 = sld [smem:[#allocation6 + %s5050_s0]] }
  0xff   : > { %p4393_p10 = scmp.ge.s32.totalorder %s5046_s14, %s900_s3 }
 0x101   : > { %904 = sbr.rel (%p4393_p10) target bundleno = 1159 (0x487), region = 93 }
 0x106   : > { %v985_v34 = vld [vmem:[%s5305_s27 + $0x80] sm:$0xff]  ;;  %v5068_v37 = vmov 1   ;;  %v986_v38 = vld [vmem:[%s5305_s27 + $0x88] sm:$0xff]  ;;  %v987_v41 = vld [vmem:[%s5305_s27 + $0x90] sm:$0xff] }
 0x107   : > { %v969_v35 = vld [vmem:[%s5305_s27] sm:$0xff]  ;;  %4716 = vset.pattern.permute.xlu2 %v5068_v37  ;;  %1033 = vxpose.xlu1.b32.start [1/16] (narrow) %v985_v34, 8  ;;  %v970_v39 = vld [vmem:[%s5305_s27 + $0x8] sm:$0xff]  ;;  %v971_v42 = vld [vmem:[%s5305_s27 + $0x10] sm:$0xff] }
 0x108   : > { %v937_v36 = vld [vmem:[%s5284_s22] sm:$0xff]  ;;  %1001 = vxpose.xlu0.b32.start [1/16] (narrow) %v969_v35, 8  ;;  %v938_v40 = vld [vmem:[%s5284_s22 + $0x8] sm:$0xff]  ;;  %v939_v43 = vld [vmem:[%s5284_s22 + $0x10] sm:$0xff] }
 0x109   : > { %1067 = vperm.xlu2 %4716, %v937_v36   ;;  %v988_v44 = vld [vmem:[%s5305_s27 + $0x98] sm:$0xff]  ;;  %v989_v47 = vld [vmem:[%s5305_s27 + $0xa0] sm:$0xff]  ;;  %v990_v50 = vld [vmem:[%s5305_s27 + $0xa8] sm:$0xff] }
 0x10a   : > { %v972_v45 = vld [vmem:[%s5305_s27 + $0x18] sm:$0xff]  ;;  %v973_v48 = vld [vmem:[%s5305_s27 + $0x20] sm:$0xff]  ;;  %v974_v51 = vld [vmem:[%s5305_s27 + $0x28] sm:$0xff] }
 0x10b   : > { %v940_v46 = vld [vmem:[%s5284_s22 + $0x18] sm:$0xff]  ;;  %v941_v49 = vld [vmem:[%s5284_s22 + $0x20] sm:$0xff]  ;;  %v942_v52 = vld [vmem:[%s5284_s22 + $0x28] sm:$0xff] }
 0x10c   : > { %v991_v53 = vld [vmem:[%s5305_s27 + $0xb0] sm:$0xff]  ;;  %v992_v56 = vld [vmem:[%s5305_s27 + $0xb8] sm:$0xff]  ;;  %v993_v59 = vld [vmem:[%s5305_s27 + $0xc0] sm:$0xff] }
 0x10d   : > { %v975_v54 = vld [vmem:[%s5305_s27 + $0x30] sm:$0xff]  ;;  %v976_v57 = vld [vmem:[%s5305_s27 + $0x38] sm:$0xff]  ;;  %v977_v60 = vld [vmem:[%s5305_s27 + $0x40] sm:$0xff] }
 0x10e   : > { %v943_v55 = vld [vmem:[%s5284_s22 + $0x30] sm:$0xff]  ;;  %v944_v58 = vld [vmem:[%s5284_s22 + $0x38] sm:$0xff]  ;;  %v945_v61 = vld [vmem:[%s5284_s22 + $0x40] sm:$0xff] }
 0x10f   : > { %1034 = vxpose.xlu1.b32.cont [2/16] (narrow) %v986_v38, 8  ;;  %v994_v62 = vld [vmem:[%s5305_s27 + $0xc8] sm:$0xff]  ;;  %v995_v1 = vld [vmem:[%s5305_s27 + $0xd0] sm:$0xff]  ;;  %v996_v4 = vld [vmem:[%s5305_s27 + $0xd8] sm:$0xff] }
 0x110   : > { %1002 = vxpose.xlu0.b32.cont [2/16] (narrow) %v970_v39, 8  ;;  %v978_v63 = vld [vmem:[%s5305_s27 + $0x48] sm:$0xff]  ;;  %v979_v2 = vld [vmem:[%s5305_s27 + $0x50] sm:$0xff]  ;;  %v980_v5 = vld [vmem:[%s5305_s27 + $0x58] sm:$0xff] }
 0x111   : > { %1072 = vperm.xlu2 %4716, %v938_v40   ;;  %v946_v0 = vld [vmem:[%s5284_s22 + $0x48] sm:$0xff]  ;;  %v947_v3 = vld [vmem:[%s5284_s22 + $0x50] sm:$0xff]  ;;  %v948_v6 = vld [vmem:[%s5284_s22 + $0x58] sm:$0xff] }
 0x112   : > { %v997_v8 = vld [vmem:[%s5305_s27 + $0xe0] sm:$0xff]  ;;  %v998_v12 = vld [vmem:[%s5305_s27 + $0xe8] sm:$0xff]  ;;  %v999_v16 = vld [vmem:[%s5305_s27 + $0xf0] sm:$0xff] }
 0x113   : > { %v981_v9 = vld [vmem:[%s5305_s27 + $0x60] sm:$0xff]  ;;  %v982_v13 = vld [vmem:[%s5305_s27 + $0x68] sm:$0xff]  ;;  %v983_v17 = vld [vmem:[%s5305_s27 + $0x70] sm:$0xff] }
 0x114   : > { %v949_v10 = vld [vmem:[%s5284_s22 + $0x60] sm:$0xff]  ;;  %v950_v14 = vld [vmem:[%s5284_s22 + $0x68] sm:$0xff]  ;;  %v951_v18 = vld [vmem:[%s5284_s22 + $0x70] sm:$0xff] }
 0x115   : > { %v1000_v20 = vld [vmem:[%s5305_s27 + $0xf8] sm:$0xff]  ;;  %v955_v24 = vld [vmem:[%s5284_s22 + $0x90] sm:$0xff]  ;;  %v957_v28 = vld [vmem:[%s5284_s22 + $0xa0] sm:$0xff] }
 0x116   : > { %v984_v21 = vld [vmem:[%s5305_s27 + $0x78] sm:$0xff]  ;;  %v958_v30 = vld [vmem:[%s5284_s22 + $0xa8] sm:$0xff]  ;;  %v959_v32 = vld [vmem:[%s5284_s22 + $0xb0] sm:$0xff] }
 0x117   : > { %1035 = vxpose.xlu1.b32.cont [3/16] (narrow) %v987_v41, 8  ;;  %v952_v22 = vld [vmem:[%s5284_s22 + $0x78] sm:$0xff]  ;;  %v961_v36 = vld [vmem:[%s5284_s22 + $0xc0] sm:$0xff]  ;;  %v962_v39 = vld [vmem:[%s5284_s22 + $0xc8] sm:$0xff] }
 0x118   : > { %1003 = vxpose.xlu0.b32.cont [3/16] (narrow) %v971_v42, 8  ;;  %v956_v26 = vld [vmem:[%s5284_s22 + $0x98] sm:$0xff]  ;;  %v963_v41 = vld [vmem:[%s5284_s22 + $0xd0] sm:$0xff] }
 0x119   : > { %1077 = vperm.xlu2 %4716, %v939_v43   ;;  %v960_v34 = vld [vmem:[%s5284_s22 + $0xb8] sm:$0xff] }
 0x11a   : > { %v964_v43 = vld [vmem:[%s5284_s22 + $0xd8] sm:$0xff] }
 0x11f   : > { %1036 = vxpose.xlu1.b32.cont [4/16] (narrow) %v988_v44, 8 }
 0x120   : > { %1004 = vxpose.xlu0.b32.cont [4/16] (narrow) %v972_v45, 8  ;;  %v965_v45 = vld [vmem:[%s5284_s22 + $0xe0] sm:$0xff] }
 0x121   : > { %1082 = vperm.xlu2 %4716, %v940_v46   ;;  %v954_v46 = vld [vmem:[%s5284_s22 + $0x88] sm:$0xff] }
 0x127   : > { %1037 = vxpose.xlu1.b32.cont [5/16] (narrow) %v989_v47, 8  ;;  %v966_v47 = vld [vmem:[%s5284_s22 + $0xe8] sm:$0xff] }
 0x128   : > { %1005 = vxpose.xlu0.b32.cont [5/16] (narrow) %v973_v48, 8  ;;  %v967_v48 = vld [vmem:[%s5284_s22 + $0xf0] sm:$0xff] }
 0x129   : > { %1087 = vperm.xlu2 %4716, %v941_v49  }
 0x12f   : > { %1038 = vxpose.xlu1.b32.cont [6/16] (narrow) %v990_v50, 8  ;;  %v968_v50 = vld [vmem:[%s5284_s22 + $0xf8] sm:$0xff] }
 0x130   : > { %1006 = vxpose.xlu0.b32.cont [6/16] (narrow) %v974_v51, 8  ;;  %v1483_v51 = vld [vmem:[%s5308_s8] sm:$0xf] }
 0x131   : > { %1092 = vperm.xlu2 %4716, %v942_v52   ;;  %v1484_v52 = vld [vmem:[%s5308_s8 + $0x4] sm:$0xf]  ;;  %vm1515_vm1 = vnez %v1483_v51 }
 0x132   : > { %vm1516_vm2 = vnez %v1484_v52 }
 0x137   : > { %1039 = vxpose.xlu1.b32.cont [7/16] (narrow) %v991_v53, 8 }
 0x138   : > { %1007 = vxpose.xlu0.b32.cont [7/16] (narrow) %v975_v54, 8  ;;  %v8067_v54 = vmov 0  }
 0x139   : > { %1097 = vperm.xlu2 %4716, %v943_v55   ;;  %v1486_v55 = vld [vmem:[%s5308_s8 + $0xc] sm:$0xf] }
 0x13a   : > { %vm1518_vm3 = vnez %v1486_v55 }
 0x13f   : > { %1040 = vxpose.xlu1.b32.cont [8/16] (narrow) %v992_v56, 8  ;;  %v1485_v56 = vld [vmem:[%s5308_s8 + $0x8] sm:$0xf] }
 0x140   : > { %1008 = vxpose.xlu0.b32.cont [8/16] (narrow) %v976_v57, 8  ;;  %v953_v57 = vld [vmem:[%s5284_s22 + $0x80] sm:$0xff]  ;;  %vm1517_vm4 = vnez %v1485_v56 }
 0x141   : > { %1102 = vperm.xlu2 %4716, %v944_v58   ;;  %v1487_v58 = vld [vmem:[%s5308_s8 + $0x10] sm:$0xf] }
 0x142   : > { %vm1519_vm5 = vnez %v1487_v58 }
 0x147   : > { %1041 = vxpose.xlu1.b32.cont [9/16] (narrow) %v993_v59, 8  ;;  %v1488_v59 = vld [vmem:[%s5308_s8 + $0x14] sm:$0xf] }
 0x148   : > { %1009 = vxpose.xlu0.b32.cont [9/16] (narrow) %v977_v60, 8  ;;  %v5550_v60 = vsel %vm1515_vm1, 16843009, %v8067_v54  ;;  %vm1520_vm6 = vnez %v1488_v59 }
 0x149   : > { %1107 = vperm.xlu2 %4716, %v945_v61   ;;  %v1489_v61 = vld [vmem:[%s5308_s8 + $0x18] sm:$0xf] }
 0x14a   : > { %vm1521_vm7 = vnez %v1489_v61 }
 0x14f   : > { %1042 = vxpose.xlu1.b32.cont [10/16] (narrow) %v994_v62, 8 }
 0x150   : > { %1010 = vxpose.xlu0.b32.cont [10/16] (narrow) %v978_v63, 8 }
 0x151   : > { %1112 = vperm.xlu2 %4716, %v946_v0   ;;  %v8066_v0 = vunpack.c.0.s8 %v5550_v60 }
 0x153   : > { %vm5608_vm12 = vcmp.ne.s32.totalorder %v8066_v0, 0 }
 0x157   : > { %1043 = vxpose.xlu1.b32.cont [11/16] (narrow) %v995_v1, 8  ;;  %v1490_v1 = vld [vmem:[%s5308_s8 + $0x1c] sm:$0xf] }
 0x158   : > { %1011 = vxpose.xlu0.b32.cont [11/16] (narrow) %v979_v2, 8  ;;  %v1491_v2 = vld [vmem:[%s5308_s8 + $0x20] sm:$0xf]  ;;  %vm1522_vm8 = vnez %v1490_v1 }
 0x159   : > { %1117 = vperm.xlu2 %4716, %v947_v3   ;;  %v8065_v3 = vunpack.c.1.s8 %v5550_v60  ;;  %vm1523_vm9 = vnez %v1491_v2 }
 0x15b   : > { %vm5614_vm13 = vcmp.ne.s32.totalorder %v8065_v3, 0 }
 0x15f   : > { %1044 = vxpose.xlu1.b32.cont [12/16] (narrow) %v996_v4, 8 }
 0x160   : > { %1012 = vxpose.xlu0.b32.cont [12/16] (narrow) %v980_v5, 8 }
 0x161   : > { %1122 = vperm.xlu2 %4716, %v948_v6   ;;  %v5563_v6 = vsel %vm1518_vm3, 16843009, %v8067_v54 }
 0x162   : > { %8245 = vst [vmem:[#allocation10_spill] sm:$0xff] %v5563_v6 }
 0x163   : > { %v5478_v7 = vpop.permute.xlu2 %1067 }
 0x167   : > { %1045 = vxpose.xlu1.b32.cont [13/16] (narrow) %v997_v8, 8  ;;  %v1492_v8 = vld [vmem:[%s5308_s8 + $0x24] sm:$0xf] }
 0x168   : > { %1013 = vxpose.xlu0.b32.cont [13/16] (narrow) %v981_v9, 8  ;;  %v1493_v9 = vld [vmem:[%s5308_s8 + $0x28] sm:$0xf]  ;;  %vm1524_vm10 = vnez %v1492_v8 }
 0x169   : > { %1127 = vperm.xlu2 %4716, %v949_v10   ;;  %v5570_v10 = vsel %vm1517_vm4, 16843009, %v8067_v54  ;;  %vm1525_vm11 = vnez %v1493_v9 }
 0x16a   : > { %8246 = vst [vmem:[#allocation11_spill] sm:$0xff] %v5570_v10 }
 0x16b   : > { %v5483_v11 = vpop.permute.xlu2 %1072 }
 0x16f   : > { %1046 = vxpose.xlu1.b32.cont [14/16] (narrow) %v998_v12, 8  ;;  %v5574_v12 = vsel %vm1519_vm5, 16843009, %v8067_v54 }
 0x170   : > { %1014 = vxpose.xlu0.b32.cont [14/16] (narrow) %v982_v13, 8  ;;  %8247 = vst [vmem:[#allocation12_spill] sm:$0xff] %v5574_v12  ;;  %v5578_v13 = vsel %vm1520_vm6, 16843009, %v8067_v54 }
 0x171   : > { %1132 = vperm.xlu2 %4716, %v950_v14   ;;  %8248 = vst [vmem:[#allocation13_spill] sm:$0xff] %v5578_v13 }
 0x173   : > { %v5488_v15 = vpop.permute.xlu2 %1077 }
 0x177   : > { %1047 = vxpose.xlu1.b32.cont [15/16] (narrow) %v999_v16, 8 }
 0x178   : > { %1015 = vxpose.xlu0.b32.cont [15/16] (narrow) %v983_v17, 8 }
 0x179   : > { %1137 = vperm.xlu2 %4716, %v951_v18   ;;  %v8074_v18 = vunpack.c.0.s8 %v5563_v6 }
 0x17b   : > { %v5493_v19 = vpop.permute.xlu2 %1082  ;;  %vm5690_vm4 = vcmp.ne.s32.totalorder %v8074_v18, 0 }
 0x17f   : > { %1048 = vxpose.xlu1.b32.end [16/16] (narrow) %v1000_v20, 8  ;;  %v8073_v20 = vunpack.c.1.s8 %v5563_v6 }
 0x180   : > { %1016 = vxpose.xlu0.b32.end [16/16] (narrow) %v984_v21, 8  ;;  %v8072_v21 = vunpack.c.0.s8 %v5570_v10 }
 0x181   : > { %1142 = vperm.xlu2 %4716, %v952_v22   ;;  %v8071_v22 = vunpack.c.1.s8 %v5570_v10  ;;  %vm5696_vm5 = vcmp.ne.s32.totalorder %v8073_v20, 0 }
 0x183   : > { %v5498_v23 = vpop.permute.xlu2 %1087 }
 0x189   : > { %1157 = vperm.xlu2 %4716, %v955_v24   ;;  %v8070_v24 = vunpack.c.0.s8 %v5574_v12 }
 0x18b   : > { %v5501_v25 = vpop.permute.xlu2 %1092 }
 0x191   : > { %1162 = vperm.xlu2 %4716, %v956_v26   ;;  %v5592_v26 = vsel %vm1521_vm7, 16843009, %v8067_v54  ;;  %vm5710_vm7 = vcmp.ne.s32.totalorder %v8072_v21, 0 }
 0x193   : > { %v5504_v27 = vpop.permute.xlu2 %1097 }
 0x199   : > { %1167 = vperm.xlu2 %4716, %v957_v28   ;;  %v8069_v28 = vunpack.c.1.s8 %v5574_v12  ;;  %v8278_v12 = vmov 0  }
 0x19a   : > { %v5794_v10 = vunpack.c.l.b16 %v8278_v12 }
 0x19b   : > { %v5507_v29 = vpop.permute.xlu2 %1102 }
 0x1a1   : > { %1172 = vperm.xlu2 %4716, %v958_v30   ;;  %v8076_v30 = vunpack.c.0.s8 %v5578_v13 }
 0x1a3   : > { %v5510_v31 = vpop.permute.xlu2 %1107 }
 0x1a9   : > { %1177 = vperm.xlu2 %4716, %v959_v32   ;;  %v5597_v32 = vsel %vm1522_vm8, 16843009, %v8067_v54  ;;  %vm5716_vm8 = vcmp.ne.s32.totalorder %v8071_v22, 0 }
 0x1ab   : > { %v5513_v33 = vpop.permute.xlu2 %1112  ;;  %v1049_v62 = vpop.trf.xlu1 }
 0x1ac   : > { %v1017_v63 = vpop.trf.xlu0  ;;  %v5580_v14 = vperm.slane %v1049_v62, 0 }
 0x1ad   : > { %v5582_v16 = vperm.slane %v1017_v63, 0 }
 0x1ae   : > { %v5653_v63 = vadd.f32 %v5580_v14, %v5488_v15  ;;  %v1236_v0 = vadd.f32 %v5580_v14, %v5498_v23  ;;  %v5664_v61 = vadd.f32 %v5580_v14, %v5501_v25  ;;  %v5668_v59 = vadd.f32 %v5580_v14, %v5504_v27 }
 0x1af   : > { %v1233_v3 = vadd.f32 %v5582_v16, %v5493_v19  ;;  %v5672_v58 = vadd.f32 %v5580_v14, %v5507_v29  ;;  %v1231_v56 = vadd.f32 %v5582_v16, %v5488_v15  ;;  %v5684_v52 = vadd.f32 %v5580_v14, %v5513_v33 }
 0x1b0   : > { %v1235_v8 = vadd.f32 %v5582_v16, %v5498_v23  ;;  %v5706_v23 = vadd.f32 %v5582_v16, %v5504_v27  ;;  %v1364_v20 = vmul.f32 0.2, %v1236_v0 }
 0x1b1   : > { %1182 = vperm.xlu2 %4716, %v960_v34   ;;  %v5600_v34 = vsel %vm1523_vm9, 16843009, %v8067_v54  ;;  %vm1297_vm6 = vcmp.gt.f32.partialorder %v1233_v3, 0.0  ;;  %vm5734_vm9 = vcmp.ne.s32.totalorder %v8070_v24, 0  ;;  %v1496_v24 = vld [vmem:[%s5308_s8 + $0x34] sm:$0xf] }
 0x1b2   : > { %v1363_v21 = vmul.f32 0.2, %v1235_v8 }
 0x1b3   : > { %v5516_v35 = vpop.permute.xlu2 %1117 }
 0x1b9   : > { %1187 = vperm.xlu2 %4716, %v961_v36   ;;  %v1228_v36 = vadd.f32 %v5580_v14, %v5478_v7 }
 0x1bb   : > { %v5519_v38 = vpop.permute.xlu2 %1122  ;;  %v1356_v2 = vmul.f32 0.2, %v1228_v36  ;;  %vm1292_vm1 = vcmp.gt.f32.partialorder %v1228_v36, 0.0 }
 0x1bd   : > { %v1420_v55 = vsel %vm1292_vm1, %v1228_v36, %v1356_v2  ;;  %v5702_v36 = vadd.f32 %v5582_v16, %v5501_v25  ;;  %v5722_v25 = vadd.f32 %v5582_v16, %v5507_v29  ;;  %vm1300_vm1 = vcmp.gt.f32.partialorder %v1236_v0, 0.0 }
 0x1be   : > { %v5869_v2 = vadd.f32 %v5580_v14, %v5519_v38 }
 0x1c1   : > { %1192 = vperm.xlu2 %4716, %v962_v39   ;;  %v1227_v39 = vadd.f32 %v5582_v16, %v5478_v7  ;;  %v1230_v7 = vadd.f32 %v5580_v14, %v5483_v11 }
 0x1c3   : > { %v5522_v40 = vpop.permute.xlu2 %1127  ;;  %v1355_v1 = vmul.f32 0.2, %v1227_v39  ;;  %vm1291_vm0 = vcmp.gt.f32.partialorder %v1227_v39, 0.0  ;;  %vm1294_vm3 = vcmp.gt.f32.partialorder %v1230_v7, 0.0 }
 0x1c9   : > { %1197 = vperm.xlu2 %4716, %v963_v41   ;;  %v5746_v41 = vadd.f32 %v5582_v16, %v5510_v31 }
 0x1cb   : > { %v5525_v42 = vpop.permute.xlu2 %1132 }
 0x1d1   : > { %1202 = vperm.xlu2 %4716, %v964_v43  }
 0x1d2   : > { %4718 = vset.pattern.permute.xlu1 %v5068_v37 }
 0x1d3   : > { %v5529_v44 = vpop.permute.xlu2 %1137 }
 0x1d9   : > { %1207 = vperm.xlu2 %4716, %v965_v45   ;;  %1152 = vperm.xlu1 %4718, %v954_v46   ;;  %v5619_v45 = vsel %vm1524_vm10, 16843009, %v8067_v54  ;;  %v5622_v46 = vsel %vm1525_vm11, 16843009, %v8067_v54  ;;  %vm5740_vm10 = vcmp.ne.s32.totalorder %v8069_v28, 0 }
 0x1da   : > { %v1360_v28 = vmul.f32 0.2, %v5653_v63 }
 0x1db   : > { %v5535_v49 = vpop.permute.xlu2 %1142 }
 0x1e1   : > { %1212 = vperm.xlu2 %4716, %v966_v47   ;;  %1217 = vperm.xlu1 %4718, %v967_v48   ;;  %v1229_v47 = vadd.f32 %v5582_v16, %v5483_v11  ;;  %v1419_v11 = vsel %vm1291_vm0, %v1227_v39, %v1355_v1  ;;  %v5767_v48 = vadd.f32 %v5580_v14, %v5516_v35  ;;  %vm1299_vm0 = vcmp.gt.f32.partialorder %v1235_v8, 0.0 }
 0x1e2   : > { %v5726_v27 = vsel %vm5608_vm12, %v1419_v11, -1e+30  ;;  %v1359_v11 = vmul.f32 0.2, %v1231_v56  ;;  %vm1295_vm12 = vcmp.gt.f32.partialorder %v1231_v56, 0.0 }
 0x1e3   : > { %v5541_v53 = vpop.permute.xlu2 %1157  ;;  %v1357_v9 = vmul.f32 0.2, %v1229_v47  ;;  %8265 = vst [vmem:[#allocation14_spill] sm:$0xff] %v5726_v27 }
 0x1e7   : > { %4717 = vset.pattern.permute.xlu0 %v5068_v37  ;;  %v5553_v37 = vsel %vm1516_vm2, 16843009, %v8067_v54  ;;  %vm1293_vm2 = vcmp.gt.f32.partialorder %v1229_v47, 0.0 }
 0x1e8   : > { %v8064_v4 = vunpack.c.0.s8 %v5553_v37  ;;  %v8063_v5 = vunpack.c.1.s8 %v5553_v37  ;;  %v1421_v62 = vsel %vm1293_vm2, %v1229_v47, %v1357_v9  ;;  %v5730_v47 = vsel %vm5614_vm13, %v1420_v55, -1e+30 }
 0x1e9   : > { %1222 = vperm.xlu2 %4716, %v968_v50   ;;  %4719 = vset.pattern.permute.xlu1 %v8067_v54  ;;  %8266 = vst [vmem:[#allocation15_spill] sm:$0xff] %v5730_v47  ;;  %v5758_v9 = vadd.f32 %v5582_v16, %v5513_v33  ;;  %vm1296_vm13 = vcmp.gt.f32.partialorder %v5653_v63, 0.0  ;;  %v8275_v50 = vunpack.c.1.s8 %v5578_v13  ;;  %v1366_v13 = vmul.f32 0.2, %v5664_v61 }
 0x1ea   : > { %vm5631_vm14 = vcmp.ne.s32.totalorder %v8064_v4, 0  ;;  %vm5637_vm15 = vcmp.ne.s32.totalorder %v8063_v5, 0  ;;  %v1358_v5 = vmul.f32 0.2, %v1230_v7  ;;  %v1234_v4 = vadd.f32 %v5580_v14, %v5493_v19 }
 0x1eb   : > { %v5584_v17 = vpop.permute.xlu2 %1162  ;;  %v5678_v19 = vadd.f32 %v5580_v14, %v5510_v31  ;;  %v5750_v43 = vsel %vm5631_vm14, %v1421_v62, -1e+30  ;;  %v5763_v31 = vadd.f32 %v5582_v16, %v5516_v35  ;;  %vm5774_vm14 = vcmp.ne.s32.totalorder %v8076_v30, 0 }
 0x1ec   : > { %v1362_v1 = vmul.f32 0.2, %v1234_v4  ;;  %8271 = vst [vmem:[#allocation16_spill] sm:$0xff] %v5750_v43  ;;  %vm1298_vm11 = vcmp.gt.f32.partialorder %v1234_v4, 0.0  ;;  %vm1528_vm2 = vnez %v1496_v24  ;;  %v8292_v24 = vunpack.c.0.s8 %v5597_v32 }
 0x1ed   : > { %v5845_v51 = vsel %vm1528_vm2, 16843009, %v8278_v12 }
 0x1ee   : > { %1147 = vperm.xlu0 %4717, %v953_v57   ;;  %v1426_v18 = vsel %vm1298_vm11, %v1234_v4, %v1362_v1  ;;  %v8279_v4 = vunpack.c.0.s8 %v5622_v46 }
 0x1f1   : > { %4721 = vset.pattern.permute.xlu2 %v8067_v54 }
 0x1f3   : > { %v5674_v57 = vpop.permute.xlu2 %1167 }
 0x1f6   : > { %4720 = vset.pattern.permute.xlu0 %v8067_v54  ;;  %v1422_v54 = vsel %vm1294_vm3, %v1230_v7, %v1358_v5  ;;  %v1361_v5 = vmul.f32 0.2, %v1233_v3  ;;  %vm1301_vm3 = vcmp.gt.f32.partialorder %v5702_v36, 0.0 }
 0x1f7   : > { %v5754_v55 = vsel %vm5637_vm15, %v1422_v54, -1e+30  ;;  %v1803_v54 = vmax.f32 %v5726_v27, %v5730_v47  ;;  %vm5780_vm15 = vcmp.ne.s32.totalorder %v8275_v50, 0  ;;  %v1423_v47 = vsel %vm1295_vm12, %v1231_v56, %v1359_v11 }
 0x1f8   : > { %8272 = vst [vmem:[#allocation17_spill] sm:$0xff] %v5754_v55  ;;  %v1806_v35 = vmax.f32 %v5750_v43, %v5754_v55  ;;  %v1425_v22 = vsel %vm1297_vm6, %v1233_v3, %v1361_v5  ;;  %v1424_v27 = vsel %vm1296_vm13, %v5653_v63, %v1360_v28  ;;  %v1365_v50 = vmul.f32 0.2, %v5702_v36 }
 0x1f9   : > { %v5797_v3 = vunpack.c.h.b16 %v8278_v12  ;;  %v4414_v56 = vunpack.i.l.s16 %v8279_v4  ;;  %v8280_v5 = vunpack.c.1.s8 %v5622_v46  ;;  %v1427_v11 = vsel %vm1299_vm0, %v1235_v8, %v1363_v21 }
 0x1fa   : > { %v1428_v55 = vsel %vm1300_vm1, %v1236_v0, %v1364_v20  ;;  %vm1302_vm6 = vcmp.gt.f32.partialorder %v5664_v61, 0.0  ;;  %v8281_v28 = vunpack.c.0.s8 %v5592_v26  ;;  %v8284_v43 = vunpack.c.1.s8 %v5592_v26 }
 0x1fb   : > { %v5788_v30 = vpop.permute.xlu2 %1172  ;;  %v4415_v1 = vunpack.i.l.s16 %v8280_v5  ;;  %v5819_v21 = vsel %vm5690_vm4, %v1425_v22, -1e+30  ;;  %v5823_v0 = vsel %vm5696_vm5, %v1426_v18, -1e+30  ;;  %vm2613_vm13 = vcmp.ne.s32.totalorder %v4414_v56, %v5794_v10 }
 0x1fc   : > { %vm5807_vm11 = vcmp.ne.s32.totalorder %v8281_v28, 0  ;;  %vm5813_vm12 = vcmp.ne.s32.totalorder %v8284_v43, 0  ;;  %v5829_v20 = vadd.f32 %v5582_v16, %v5519_v38  ;;  %v5833_v8 = vsel %vm5710_vm7, %v1423_v47, -1e+30 }
 0x1fd   : > { %vm2614_vm0 = vcmp.ne.s32.totalorder %v4415_v1, %v5797_v3  ;;  %v5837_v22 = vsel %vm5716_vm8, %v1424_v27, -1e+30  ;;  %v8287_v18 = vmov 0  ;;  %v5849_v15 = vsel %vm5734_vm9, %v1427_v11, -1e+30 }
 0x1fe   : > { %vm5839_vm4 = vmpackc.low %vm2614_vm0, %vm2613_vm13  ;;  %8290 = vst [vmem:[#allocation19_spill] sm:$0xff] %v5849_v15  ;;  %v5853_v39 = vsel %vm5740_vm10, %v1428_v55, -1e+30  ;;  %v1429_v7 = vsel %vm1301_vm3, %v5702_v36, %v1365_v50  ;;  %v1430_v27 = vsel %vm1302_vm6, %v5664_v61, %v1366_v13  ;;  %vm5863_vm5 = vcmp.ne.s32.totalorder %v8292_v24, 0 }
 0x1ff   : > { %v8288_v18 = vsel %vm5839_vm4, 4294967295, %v8287_v18  ;;  %8291 = vst [vmem:[#allocation20_spill] sm:$0xff] %v5853_v39  ;;  %v1812_v29 = vmax.f32 %v5819_v21, %v5823_v0  ;;  %v1367_v43 = vmul.f32 0.2, %v5706_v23  ;;  %v1368_v36 = vmul.f32 0.2, %v5668_v59 }
 0x200   : > { %8289 = vst [vmem:[#allocation18_spill] sm:$0xff] %v8288_v18  ;;  %v8295_v55 = vunpack.c.1.s8 %v5597_v32  ;;  %vm1303_vm8 = vcmp.gt.f32.partialorder %v5706_v23, 0.0  ;;  %vm1304_vm9 = vcmp.gt.f32.partialorder %v5668_v59, 0.0  ;;  %v8298_v38 = vunpack.c.0.s8 %v5600_v34 }
 0x201   : > { %v8090_v4 = vunpack.c.0.s8 %v5845_v51  ;;  %v8089_v56 = vunpack.c.1.s8 %v5845_v51  ;;  %v1809_v5 = vmax.f32 %v5833_v8, %v5837_v22  ;;  %v1815_v1 = vmax.f32 %v5849_v15, %v5853_v39 }
 0x202   : > { %vm5877_vm7 = vcmp.ne.s32.totalorder %v8295_v55, 0  ;;  %vm5885_vm10 = vcmp.ne.s32.totalorder %v8298_v38, 0  ;;  %v5903_v11 = vsel %vm5774_vm14, %v1429_v7, -1e+30  ;;  %v5907_v28 = vsel %vm5780_vm15, %v1430_v27, -1e+30 }
 0x203   : > { %8304 = vst [vmem:[#allocation21_spill] sm:$0xff] %v5907_v28  ;;  %v1369_v24 = vmul.f32 0.2, %v5722_v25  ;;  %v1370_v55 = vmul.f32 0.2, %v5672_v58  ;;  %v4420_v38 = vunpack.i.l.s16 %v8090_v4  ;;  %v5915_v18 = vpop.permute.xlu2 %1177  ;;  %v1431_v33 = vsel %vm1303_vm8, %v5706_v23, %v1367_v43 }
 0x204   : > { %v1432_v62 = vsel %vm1304_vm9, %v5668_v59, %v1368_v36  ;;  %vm1305_vm14 = vcmp.gt.f32.partialorder %v5722_v25, 0.0  ;;  %vm1306_vm15 = vcmp.gt.f32.partialorder %v5672_v58, 0.0  ;;  %v1371_v7 = vmul.f32 0.2, %v5746_v41  ;;  %v1494_v59 = vld [vmem:[%s5308_s8 + $0x2c] sm:$0xf] }
 0x205   : > { %v1372_v27 = vmul.f32 0.2, %v5678_v19  ;;  %v8308_v23 = vunpack.c.1.s8 %v5619_v45  ;;  %vm2634_vm6 = vcmp.ne.s32.totalorder %v4420_v38, %v5794_v10  ;;  %v5944_v36 = vadd.f32 %v5582_v16, %v5522_v40 }
 0x206   : > { %vm1307_vm0 = vcmp.gt.f32.partialorder %v5746_v41, 0.0  ;;  %vm1308_vm8 = vcmp.gt.f32.partialorder %v5678_v19, 0.0  ;;  %v5958_v38 = vsel %vm5807_vm11, %v1431_v33, -1e+30  ;;  %v1373_v4 = vmul.f32 0.2, %v5758_v9 }
 0x207   : > { %vm5935_vm3 = vcmp.ne.s32.totalorder %v8308_v23, 0  ;;  %v8311_v23 = vmov 0  ;;  %8314 = vst [vmem:[#allocation23_spill] sm:$0xff] %v5958_v38  ;;  %v1374_v63 = vmul.f32 0.2, %v5684_v52  ;;  %vm1526_vm11 = vnez %v1494_v59 }
 0x208   : > { %v1435_v33 = vsel %vm1307_vm0, %v5746_v41, %v1371_v7  ;;  %v1436_v6 = vsel %vm1308_vm8, %v5678_v19, %v1372_v27  ;;  %v5994_v7 = vsel %vm1526_vm11, 16843009, %v8278_v12  ;;  %v8321_v50 = vunpack.c.1.s8 %v5622_v46 }
 0x209   : > { %v5998_v47 = vsel %vm5885_vm10, %v1435_v33, -1e+30  ;;  %v1253_v33 = vadd.f32 %v5582_v16, %v5525_v42 }
 0x20b   : > { %1804 = vmax.xlane.f32.xlu1 %v1803_v54  ;;  %v8301_v54 = vunpack.c.1.s8 %v5600_v34  ;;  %vm1317_vm11 = vcmp.gt.f32.partialorder %v1253_v33, 0.0 }
 0x20d   : > { %vm5891_vm1 = vcmp.ne.s32.totalorder %v8301_v54, 0  ;;  %v4421_v54 = vunpack.i.l.s16 %v8089_v56  ;;  %v8305_v56 = vunpack.c.0.s8 %v5619_v45 }
 0x20f   : > { %vm5929_vm2 = vcmp.ne.s32.totalorder %v8305_v56, 0  ;;  %vm2635_vm13 = vcmp.ne.s32.totalorder %v4421_v54, %v5797_v3  ;;  %v5948_v56 = vadd.f32 %v5580_v14, %v5522_v40  ;;  %v5962_v54 = vsel %vm5813_vm12, %v1432_v62, -1e+30 }
 0x210   : > { %vm5952_vm9 = vmpackc.low %vm2635_vm13, %vm2634_vm6  ;;  %8315 = vst [vmem:[#allocation24_spill] sm:$0xff] %v5962_v54  ;;  %v1433_v40 = vsel %vm1305_vm14, %v5722_v25, %v1369_v24  ;;  %vm1309_vm6 = vcmp.gt.f32.partialorder %v5758_v9, 0.0  ;;  %vm1310_vm12 = vcmp.gt.f32.partialorder %v5684_v52, 0.0  ;;  %v1375_v62 = vmul.f32 0.2, %v5763_v31 }
 0x211   : > { %v8312_v23 = vsel %vm5952_vm9, 4294967295, %v8311_v23  ;;  %v1495_v25 = vld [vmem:[%s5308_s8 + $0x30] sm:$0xf]  ;;  %v1818_v24 = vmax.f32 %v5903_v11, %v5907_v28  ;;  %vm1311_vm14 = vcmp.gt.f32.partialorder %v5763_v31, 0.0  ;;  %v1821_v19 = vmax.f32 %v5958_v38, %v5962_v54 }
 0x212   : > { %1807 = vmax.xlane.f32.xlu2 %v1806_v35  ;;  %8313 = vst [vmem:[#allocation22_spill] sm:$0xff] %v8312_v23  ;;  %v1437_v13 = vsel %vm1309_vm6, %v5758_v9, %v1373_v4  ;;  %v1438_v27 = vsel %vm1310_vm12, %v5684_v52, %v1374_v63  ;;  %v1439_v59 = vsel %vm1311_vm14, %v5763_v31, %v1375_v62  ;;  %v1377_v9 = vmul.f32 0.2, %v5829_v20  ;;  %v6024_v4 = vpop.permute.xlu2 %1182 }
 0x213   : > { %1813 = vmax.xlane.f32.xlu1 %v1812_v29  ;;  %v1434_v29 = vsel %vm1306_vm15, %v5672_v58, %v1370_v55  ;;  %v5982_v58 = vsel %vm5863_vm5, %v1433_v40, -1e+30  ;;  %v1376_v55 = vmul.f32 0.2, %v5767_v48  ;;  %vm1312_vm15 = vcmp.gt.f32.partialorder %v5767_v48, 0.0 }
 0x214   : > { %8316 = vst [vmem:[#allocation25_spill] sm:$0xff] %v5982_v58  ;;  %v5990_v41 = vsel %vm5877_vm7, %v1434_v29, -1e+30  ;;  %vm6019_vm7 = vcmp.ne.s32.totalorder %v8321_v50, 0  ;;  %v1378_v31 = vmul.f32 0.2, %v5869_v2  ;;  %v8093_v29 = vunpack.c.0.s8 %v5994_v7 }
 0x215   : > { %8317 = vst [vmem:[#allocation26_spill] sm:$0xff] %v5990_v41  ;;  %v1440_v52 = vsel %vm1312_vm15, %v5767_v48, %v1376_v55  ;;  %vm1527_vm10 = vnez %v1495_v25  ;;  %vm1314_vm13 = vcmp.gt.f32.partialorder %v5869_v2, 0.0  ;;  %v8091_v63 = vunpack.c.1.s8 %v5994_v7  ;;  %v1497_v25 = vld [vmem:[%s5308_s8 + $0x38] sm:$0xf] }
 0x216   : > { %v6044_v62 = vsel %vm5935_vm3, %v1438_v27, -1e+30  ;;  %v6058_v35 = vsel %vm1527_vm10, 16843009, %v8278_v12  ;;  %v1442_v43 = vsel %vm1314_vm13, %v5869_v2, %v1378_v31  ;;  %vm1315_vm3 = vcmp.gt.f32.partialorder %v5944_v36, 0.0 }
 0x217   : > { %8325 = vst [vmem:[#allocation28_spill] sm:$0xff] %v6044_v62  ;;  %vm6067_vm0 = vcmp.ne.s32.totalorder %v8091_v63, 0  ;;  %v1379_v27 = vmul.f32 0.2, %v5944_v36  ;;  %vm1529_vm8 = vnez %v1497_v25  ;;  %v1256_v2 = vadd.f32 %v5580_v14, %v5529_v44 }
 0x218   : > { %1810 = vmax.xlane.f32.xlu0 %v1809_v5  ;;  %v6002_v5 = vsel %vm5891_vm1, %v1436_v6, -1e+30  ;;  %vm1313_vm1 = vcmp.gt.f32.partialorder %v5829_v20, 0.0  ;;  %v6040_v6 = vsel %vm5929_vm2, %v1437_v13, -1e+30  ;;  %vm1665_vm2 = vcmp.ne.s32.totalorder %v8093_v29, 0 }
 0x219   : > { %v1827_v48 = vmax.f32 %v5998_v47, %v6002_v5  ;;  %8324 = vst [vmem:[#allocation27_spill] sm:$0xff] %v6040_v6  ;;  %v1441_v13 = vsel %vm1313_vm1, %v5829_v20, %v1377_v9  ;;  %v1255_v20 = vadd.f32 %v5582_v16, %v5529_v44  ;;  %vm1316_vm6 = vcmp.gt.f32.partialorder %v5948_v56, 0.0  ;;  %v1498_v9 = vld [vmem:[%s5308_s8 + $0x3c] sm:$0xf] }
 0x21a   : > { %1816 = vmax.xlane.f32.xlu2 %v1815_v1  ;;  %v8318_v1 = vunpack.c.0.s8 %v5622_v46  ;;  %v1824_v46 = vmax.f32 %v5982_v58, %v5990_v41  ;;  %v1830_v61 = vmax.f32 %v6040_v6, %v6044_v62  ;;  %v6081_v50 = vsel %vm1665_vm2, %v1441_v13, -1e+30  ;;  %v1509_v41 = vld [vmem:[%s5308_s8 + $0x68] sm:$0xf] }
 0x21b   : > { %1819 = vmax.xlane.f32.xlu1 %v1818_v24  ;;  %v1254_v24 = vadd.f32 %v5580_v14, %v5525_v42  ;;  %8330 = vst [vmem:[#allocation31_spill] sm:$0xff] %v6081_v50  ;;  %v8094_v40 = vunpack.c.1.s8 %v6058_v35  ;;  %v6089_v44 = vsel %vm6067_vm0, %v1442_v43, -1e+30  ;;  %v1381_v31 = vmul.f32 0.2, %v1253_v33 }
 0x21c   : > { %vm6013_vm5 = vcmp.ne.s32.totalorder %v8318_v1, 0  ;;  %v6055_v1 = vsel %vm6019_vm7, %v1440_v52, -1e+30  ;;  %8331 = vst [vmem:[#allocation32_spill] sm:$0xff] %v6089_v44  ;;  %v1443_v25 = vsel %vm1315_vm3, %v5944_v36, %v1379_v27  ;;  %vm1319_vm15 = vcmp.gt.f32.partialorder %v1255_v20, 0.0 }
 0x21d   : > { %v6051_v55 = vsel %vm6013_vm5, %v1439_v59, -1e+30  ;;  %8327 = vst [vmem:[#allocation30_spill] sm:$0xff] %v6055_v1  ;;  %v1380_v59 = vmul.f32 0.2, %v5948_v56  ;;  %vm1318_vm12 = vcmp.gt.f32.partialorder %v1254_v24, 0.0  ;;  %vm1530_vm7 = vnez %v1498_v9 }
 0x21e   : > { %8326 = vst [vmem:[#allocation29_spill] sm:$0xff] %v6051_v55  ;;  %v1833_v52 = vmax.f32 %v6051_v55, %v6055_v1  ;;  %v1382_v63 = vmul.f32 0.2, %v1254_v24  ;;  %vm1320_vm5 = vcmp.gt.f32.partialorder %v1256_v2, 0.0  ;;  %vm1668_vm10 = vcmp.ne.s32.totalorder %v8094_v40, 0 }
 0x21f   : > { %v1444_v13 = vsel %vm1316_vm6, %v5948_v56, %v1380_v59  ;;  %v1383_v36 = vmul.f32 0.2, %v1255_v20  ;;  %v1384_v43 = vmul.f32 0.2, %v1256_v2  ;;  %v1257_v27 = vadd.f32 %v5582_v16, %v5535_v49  ;;  %v1501_v56 = vld [vmem:[%s5308_s8 + $0x48] sm:$0xf] }
 0x220   : > { %1822 = vmax.xlane.f32.xlu0 %v1821_v19  ;;  %v8092_v19 = vunpack.c.0.s8 %v6058_v35  ;;  %v1445_v59 = vsel %vm1317_vm11, %v1253_v33, %v1381_v31  ;;  %v1258_v9 = vadd.f32 %v5580_v14, %v5535_v49  ;;  %v1836_v40 = vmax.f32 %v6081_v50, %v6089_v44 }
 0x221   : > { %v6120_v23 = vsel %vm1530_vm7, 16843009, %v8278_v12  ;;  %v6127_v31 = vsel %vm1668_vm10, %v1444_v13, -1e+30  ;;  %v8337_v29 = vunpack.c.1.s8 %v5845_v51  ;;  %v1448_v62 = vsel %vm1320_vm5, %v1256_v2, %v1384_v43 }
 0x222   : > { %1825 = vmax.xlane.f32.xlu2 %v1824_v46  ;;  %v6092_v46 = vsel %vm1529_vm8, 16843009, %v8278_v12  ;;  %vm6102_vm14 = vcmp.ne.s32.totalorder %v8092_v19, 0  ;;  %v8334_v19 = vunpack.c.0.s8 %v5845_v51  ;;  %8336 = vst [vmem:[#allocation34_spill] sm:$0xff] %v6127_v31  ;;  %v8100_v13 = vunpack.c.0.s8 %v6120_v23 }
 0x223   : > { %1828 = vmax.xlane.f32.xlu1 %v1827_v48  ;;  %v6098_v48 = vpop.permute.xlu2 %1187  ;;  %v6125_v33 = vsel %vm6102_vm14, %v1443_v25, -1e+30  ;;  %vm1670_vm13 = vcmp.ne.s32.totalorder %v8337_v29, 0  ;;  %v8339_v6 = vunpack.c.0.s8 %v6092_v46  ;;  %v1385_v25 = vmul.f32 0.2, %v1257_v27 }
 0x224   : > { %vm1669_vm1 = vcmp.ne.s32.totalorder %v8334_v19, 0  ;;  %8335 = vst [vmem:[#allocation33_spill] sm:$0xff] %v6125_v33  ;;  %v1446_v19 = vsel %vm1318_vm12, %v1254_v24, %v1382_v63  ;;  %vm1533_vm0 = vnez %v1501_v56  ;;  %vm1321_vm8 = vcmp.gt.f32.partialorder %v1257_v27, 0.0 }
 0x225   : > { %v6132_v49 = vsel %vm1669_vm1, %v1445_v59, -1e+30  ;;  %vm1671_vm2 = vcmp.ne.s32.totalorder %v8339_v6, 0  ;;  %v6141_v63 = vsel %vm1670_vm13, %v1446_v19, -1e+30  ;;  %v8098_v29 = vunpack.c.1.s8 %v6120_v23 }
 0x226   : > { %8338 = vst [vmem:[#allocation35_spill] sm:$0xff] %v6132_v49  ;;  %v1386_v51 = vmul.f32 0.2, %v1258_v9  ;;  %v1839_v24 = vmax.f32 %v6125_v33, %v6127_v31  ;;  %vm1322_vm6 = vcmp.gt.f32.partialorder %v1258_v9, 0.0  ;;  %v1263_v6 = vadd.f32 %v5582_v16, %v5541_v53  ;;  %v1504_v19 = vld [vmem:[%s5308_s8 + $0x54] sm:$0xf] }
 0x227   : > { %8341 = vst [vmem:[#allocation36_spill] sm:$0xff] %v6141_v63  ;;  %v1264_v42 = vadd.f32 %v5580_v14, %v5541_v53  ;;  %v1842_v43 = vmax.f32 %v6132_v49, %v6141_v63  ;;  %v1449_v56 = vsel %vm1321_vm8, %v1257_v27, %v1385_v25  ;;  %vm1673_vm11 = vcmp.ne.s32.totalorder %v8100_v13, 0  ;;  %v1502_v25 = vld [vmem:[%s5308_s8 + $0x4c] sm:$0xf] }
 0x228   : > { %1831 = vmax.xlane.f32.xlu0 %v1830_v61  ;;  %v1447_v61 = vsel %vm1319_vm15, %v1255_v20, %v1383_v36  ;;  %v1450_v59 = vsel %vm1322_vm6, %v1258_v9, %v1386_v51  ;;  %vm1674_vm12 = vcmp.ne.s32.totalorder %v8098_v29, 0  ;;  %vm1327_vm14 = vcmp.gt.f32.partialorder %v1263_v6, 0.0 }
 0x229   : > { %v6148_v20 = vsel %vm1671_vm2, %v1447_v61, -1e+30  ;;  %v6169_v61 = vsel %vm1673_vm11, %v1449_v56, -1e+30  ;;  %v6173_v9 = vsel %vm1674_vm12, %v1450_v59, -1e+30  ;;  %vm1536_vm5 = vnez %v1504_v19 }
 0x22a   : > { %1834 = vmax.xlane.f32.xlu2 %v1833_v52  ;;  %v8340_v52 = vunpack.c.1.s8 %v6092_v46  ;;  %8342 = vst [vmem:[#allocation37_spill] sm:$0xff] %v6148_v20  ;;  %v1392_v51 = vmul.f32 0.2, %v1264_v42  ;;  %vm1328_vm15 = vcmp.gt.f32.partialorder %v1264_v42, 0.0  ;;  %v1507_v56 = vld [vmem:[%s5308_s8 + $0x60] sm:$0xf]  ;;  %vm1534_vm1 = vnez %v1502_v25 }
 0x22b   : > { %1837 = vmax.xlane.f32.xlu1 %v1836_v40  ;;  %v6153_v40 = vsel %vm1533_vm0, 16843009, %v8278_v12  ;;  %v6157_v36 = vpop.permute.xlu2 %1192  ;;  %8344 = vst [vmem:[#allocation39_spill] sm:$0xff] %v6169_v61  ;;  %v1269_v59 = vadd.f32 %v5582_v16, %v5788_v30  ;;  %v6187_v19 = vsel %vm1536_vm5, 16843009, %v8278_v12  ;;  %vm1539_vm13 = vnez %v1507_v56 }
 0x22c   : > { %vm1672_vm3 = vcmp.ne.s32.totalorder %v8340_v52, 0  ;;  %v8099_v53 = vunpack.c.0.s8 %v6153_v40  ;;  %v1391_v52 = vmul.f32 0.2, %v1263_v6  ;;  %v8101_v27 = vunpack.c.1.s8 %v6153_v40  ;;  %8345 = vst [vmem:[#allocation40_spill] sm:$0xff] %v6173_v9 }
 0x22d   : > { %v6150_v2 = vsel %vm1672_vm3, %v1448_v62, -1e+30  ;;  %v1456_v29 = vsel %vm1328_vm15, %v1264_v42, %v1392_v51  ;;  %vm1333_vm3 = vcmp.gt.f32.partialorder %v1269_v59, 0.0  ;;  %v1276_v56 = vadd.f32 %v5580_v14, %v6098_v48 }
 0x22e   : > { %8343 = vst [vmem:[#allocation38_spill] sm:$0xff] %v6150_v2  ;;  %v1845_v62 = vmax.f32 %v6148_v20, %v6150_v2  ;;  %vm1679_vm7 = vcmp.ne.s32.totalorder %v8099_v53, 0  ;;  %vm1680_vm10 = vcmp.ne.s32.totalorder %v8101_v27, 0  ;;  %v1503_v53 = vld [vmem:[%s5308_s8 + $0x50] sm:$0xf]  ;;  %v8348_v51 = vunpack.c.0.s8 %v6187_v19 }
 0x22f   : > { %v6197_v25 = vsel %vm1680_vm10, %v1456_v29, -1e+30  ;;  %vm1535_vm2 = vnez %v1503_v53  ;;  %v1510_v29 = vld [vmem:[%s5308_s8 + $0x6c] sm:$0xf]  ;;  %v1267_v53 = vadd.f32 %v5582_v16, %v5674_v57  ;;  %v8351_v63 = vunpack.c.1.s8 %v6187_v19 }
 0x230   : > { %1840 = vmax.xlane.f32.xlu0 %v1839_v24  ;;  %v1848_v24 = vmax.f32 %v6169_v61, %v6173_v9  ;;  %8347 = vst [vmem:[#allocation42_spill] sm:$0xff] %v6197_v25  ;;  %vm6216_vm8 = vcmp.ne.s32.totalorder %v8348_v51, 0  ;;  %v1404_v51 = vmul.f32 0.2, %v1276_v56  ;;  %vm1542_vm11 = vnez %v1510_v29 }
 0x231   : > { %vm6225_vm6 = vcmp.ne.s32.totalorder %v8351_v63, 0  ;;  %v1268_v55 = vadd.f32 %v5580_v14, %v5674_v57  ;;  %v6237_v63 = vadd.f32 %v5582_v16, %v5584_v17  ;;  %v6249_v29 = vsel %vm1542_vm11, 16843009, %v8278_v12 }
 0x232   : > { %1843 = vmax.xlane.f32.xlu2 %v1842_v43  ;;  %v1455_v43 = vsel %vm1327_vm14, %v1263_v6, %v1391_v52  ;;  %v6193_v6 = vsel %vm1534_vm1, 16843009, %v8278_v12  ;;  %vm1340_vm14 = vcmp.gt.f32.partialorder %v1276_v56, 0.0  ;;  %vm1331_vm10 = vcmp.gt.f32.partialorder %v1267_v53, 0.0 }
 0x233   : > { %1846 = vmax.xlane.f32.xlu1 %v1845_v62  ;;  %v1270_v62 = vadd.f32 %v5580_v14, %v5788_v30  ;;  %v6190_v13 = vpop.permute.xlu2 %1197  ;;  %v6195_v52 = vsel %vm1679_vm7, %v1455_v43, -1e+30  ;;  %v1397_v30 = vmul.f32 0.2, %v1269_v59  ;;  %v6206_v43 = vsel %vm1539_vm13, 16843009, %v8278_v12 }
 0x234   : > { %8346 = vst [vmem:[#allocation41_spill] sm:$0xff] %v6195_v52  ;;  %v1857_v9 = vmax.f32 %v6195_v52, %v6197_v25  ;;  %v8112_v49 = vunpack.c.0.s8 %v6206_v43  ;;  %v1500_v25 = vld [vmem:[%s5308_s8 + $0x44] sm:$0xf]  ;;  %v1468_v1 = vsel %vm1340_vm14, %v1276_v56, %v1404_v51  ;;  %v8356_v61 = vunpack.c.1.s8 %v6206_v43  ;;  %v1506_v56 = vld [vmem:[%s5308_s8 + $0x5c] sm:$0xf] }
 0x235   : > { %v1398_v42 = vmul.f32 0.2, %v1270_v62  ;;  %vm1334_vm0 = vcmp.gt.f32.partialorder %v1270_v62, 0.0  ;;  %v1461_v31 = vsel %vm1333_vm3, %v1269_v59, %v1397_v30  ;;  %vm1532_vm15 = vnez %v1500_v25  ;;  %v1499_v51 = vld [vmem:[%s5308_s8 + $0x40] sm:$0xf] }
 0x236   : > { %vm1691_vm5 = vcmp.ne.s32.totalorder %v8112_v49, 0  ;;  %vm1692_vm7 = vcmp.ne.s32.totalorder %v8356_v61, 0  ;;  %vm1332_vm1 = vcmp.gt.f32.partialorder %v1268_v55, 0.0  ;;  %vm1531_vm13 = vnez %v1499_v51 }
 0x237   : > { %v1462_v33 = vsel %vm1334_vm0, %v1270_v62, %v1398_v42  ;;  %v1395_v62 = vmul.f32 0.2, %v1267_v53  ;;  %v6242_v42 = vsel %vm6216_vm8, %v1461_v31, -1e+30  ;;  %v6257_v31 = vsel %vm1532_vm15, 16843009, %v8278_v12 }
 0x238   : > { %1849 = vmax.xlane.f32.xlu0 %v1848_v24  ;;  %v1275_v24 = vadd.f32 %v5582_v16, %v6098_v48  ;;  %v6221_v48 = vsel %vm1535_vm2, 16843009, %v8278_v12  ;;  %8354 = vst [vmem:[#allocation43_spill] sm:$0xff] %v6242_v42  ;;  %v6246_v57 = vsel %vm6225_vm6, %v1462_v33, -1e+30  ;;  %vm1538_vm0 = vnez %v1506_v56 }
 0x239   : > { %8355 = vst [vmem:[#allocation44_spill] sm:$0xff] %v6246_v57  ;;  %v1396_v33 = vmul.f32 0.2, %v1268_v55  ;;  %v6269_v59 = vsel %vm1692_vm7, %v1468_v1, -1e+30  ;;  %v1459_v38 = vsel %vm1331_vm10, %v1267_v53, %v1395_v62  ;;  %v8371_v2 = vunpack.c.0.s8 %v6257_v31 }
 0x23a   : > { %v1403_v52 = vmul.f32 0.2, %v1275_v24  ;;  %vm1339_vm12 = vcmp.gt.f32.partialorder %v1275_v24, 0.0  ;;  %8358 = vst [vmem:[#allocation46_spill] sm:$0xff] %v6269_v59  ;;  %v8378_v28 = vmov 0 }
 0x23b   : > { %v1203_v30 = vpop.permute.xlu2 %1202 }
 0x23c   : > { %v1467_v25 = vsel %vm1339_vm12, %v1275_v24, %v1403_v52  ;;  %v1281_v27 = vadd.f32 %v5582_v16, %v1203_v30  ;;  %v1282_v49 = vadd.f32 %v5580_v14, %v1203_v30  ;;  %v8362_v24 = vunpack.c.1.s8 %v6221_v48 }
 0x23d   : > { %v6267_v61 = vsel %vm1691_vm5, %v1467_v25, -1e+30  ;;  %v1460_v25 = vsel %vm1332_vm1, %v1268_v55, %v1396_v33  ;;  %v1513_v55 = vld [vmem:[%s5308_s8 + $0x78] sm:$0xf]  ;;  %vm6310_vm12 = vcmp.ne.s32.totalorder %v8371_v2, 0 }
 0x23e   : > { %8357 = vst [vmem:[#allocation45_spill] sm:$0xff] %v6267_v61  ;;  %vm6280_vm3 = vcmp.ne.s32.totalorder %v8362_v24, 0  ;;  %v1409_v53 = vmul.f32 0.2, %v1281_v27  ;;  %v1875_v62 = vmax.f32 %v6267_v61, %v6269_v59  ;;  %v8368_v24 = vunpack.c.1.s8 %v6249_v29 }
 0x23f   : > { %v1410_v33 = vmul.f32 0.2, %v1282_v49  ;;  %vm1345_vm11 = vcmp.gt.f32.partialorder %v1281_v27, 0.0  ;;  %vm1346_vm14 = vcmp.gt.f32.partialorder %v1282_v49, 0.0 }
 0x240   : > { %1858 = vmax.xlane.f32.xlu0 %v1857_v9  ;;  %v1866_v9 = vmax.f32 %v6242_v42, %v6246_v57  ;;  %v8359_v57 = vunpack.c.0.s8 %v6221_v48  ;;  %vm6299_vm6 = vcmp.ne.s32.totalorder %v8368_v24, 0  ;;  %v8374_v24 = vunpack.c.1.s8 %v6257_v31 }
 0x241   : > { %v1473_v2 = vsel %vm1345_vm11, %v1281_v27, %v1409_v53  ;;  %v1474_v44 = vsel %vm1346_vm14, %v1282_v49, %v1410_v33  ;;  %vm1329_vm11 = vcmp.gt.f32.partialorder %v6237_v63, 0.0  ;;  %v1274_v49 = vadd.f32 %v5580_v14, %v6024_v4 }
 0x242   : > { %vm6274_vm2 = vcmp.ne.s32.totalorder %v8359_v57, 0  ;;  %v8365_v57 = vunpack.c.0.s8 %v6249_v29  ;;  %vm6316_vm15 = vcmp.ne.s32.totalorder %v8374_v24, 0  ;;  %v1273_v24 = vadd.f32 %v5582_v16, %v6024_v4 }
 0x243   : > { %v1266_v27 = vadd.f32 %v5580_v14, %v5584_v17  ;;  %v6370_v17 = vsel %vm6280_vm3, %v1460_v25, -1e+30  ;;  %v1402_v30 = vmul.f32 0.2, %v1274_v49  ;;  %v6380_v33 = vpop.permute.xlu2 %1207 }
 0x244   : > { %vm6293_vm8 = vcmp.ne.s32.totalorder %v8365_v57, 0  ;;  %8387 = vst [vmem:[#allocation53_spill] sm:$0xff] %v6370_v17  ;;  %v1401_v52 = vmul.f32 0.2, %v1273_v24 }
 0x245   : > { %v6357_v4 = vsel %vm6293_vm8, %v1473_v2, -1e+30 }
 0x246   : > { %8384 = vst [vmem:[#allocation50_spill] sm:$0xff] %v6357_v4 }
 0x248   : > { %1867 = vmax.xlane.f32.xlu0 %v1866_v9  ;;  %v6287_v9 = vsel %vm1531_vm13, 16843009, %v8278_v12 }
 0x249   : > { %v8127_v42 = vunpack.c.0.s8 %v6287_v9  ;;  %v8377_v58 = vunpack.c.1.s8 %v6287_v9 }
 0x24b   : > { %v1153_v54 = vpop.permute.xlu1 %1152  ;;  %v4426_v59 = vunpack.i.l.s16 %v8127_v42 }
 0x24c   : > { %v1261_v61 = vadd.f32 %v5582_v16, %v1153_v54  ;;  %v1262_v57 = vadd.f32 %v5580_v14, %v1153_v54  ;;  %v4427_v54 = vunpack.i.l.s16 %v8377_v58  ;;  %v6330_v58 = vsel %vm1538_vm0, 16843009, %v8278_v12 }
 0x24d   : > { %vm2655_vm1 = vcmp.ne.s32.totalorder %v4426_v59, %v5794_v10  ;;  %vm8383_vm0 = vnez %v1513_v55 }
 0x24e   : > { %v1389_v39 = vmul.f32 0.2, %v1261_v61  ;;  %v1390_v15 = vmul.f32 0.2, %v1262_v57  ;;  %vm1325_vm7 = vcmp.gt.f32.partialorder %v1261_v61, 0.0  ;;  %vm1326_vm10 = vcmp.gt.f32.partialorder %v1262_v57, 0.0 }
 0x24f   : > { %vm2656_vm13 = vcmp.ne.s32.totalorder %v4427_v54, %v5797_v3  ;;  %v1394_v54 = vmul.f32 0.2, %v1266_v27 }
 0x250   : > { %1876 = vmax.xlane.f32.xlu0 %v1875_v62  ;;  %v1453_v50 = vsel %vm1325_vm7, %v1261_v61, %v1389_v39  ;;  %v1454_v42 = vsel %vm1326_vm10, %v1262_v57, %v1390_v15  ;;  %vm6332_vm5 = vmpackc.low %vm2656_vm13, %vm2655_vm1  ;;  %v6349_v39 = vsel %vm8383_vm0, 16843009, %v8278_v12  ;;  %v8131_v61 = vunpack.c.0.s8 %v6330_v58 }
 0x251   : > { %v8379_v28 = vsel %vm6332_vm5, 4294967295, %v8378_v28  ;;  %v6341_v59 = vsel %vm6310_vm12, %v1453_v50, -1e+30  ;;  %v6345_v15 = vsel %vm6316_vm15, %v1454_v42, -1e+30  ;;  %v8129_v51 = vunpack.c.1.s8 %v6349_v39 }
 0x252   : > { %8380 = vst [vmem:[#allocation47_spill] sm:$0xff] %v8379_v28  ;;  %v1854_v56 = vmax.f32 %v6341_v59, %v6345_v15  ;;  %v6361_v50 = vsel %vm6299_vm6, %v1474_v44, -1e+30  ;;  %v6366_v42 = vsel %vm6274_vm2, %v1459_v38, -1e+30  ;;  %v8130_v44 = vunpack.c.0.s8 %v6349_v39 }
 0x253   : > { %8381 = vst [vmem:[#allocation48_spill] sm:$0xff] %v6341_v59  ;;  %v1218_v20 = vpop.permute.xlu1 %1217  ;;  %v1884_v38 = vmax.f32 %v6357_v4, %v6361_v50  ;;  %vm1541_vm2 = vnez %v1509_v41  ;;  %vm1337_vm6 = vcmp.gt.f32.partialorder %v1273_v24, 0.0  ;;  %vm1338_vm12 = vcmp.gt.f32.partialorder %v1274_v49, 0.0 }
 0x254   : > { %8382 = vst [vmem:[#allocation49_spill] sm:$0xff] %v6345_v15  ;;  %v1287_v62 = vadd.f32 %v5582_v16, %v1218_v20  ;;  %v1288_v1 = vadd.f32 %v5580_v14, %v1218_v20  ;;  %1855 = vmax.xlane.f32.xlu1 %v1854_v56  ;;  %v1393_v57 = vmul.f32 0.2, %v6237_v63  ;;  %vm1703_vm14 = vcmp.ne.s32.totalorder %v8130_v44, 0 }
 0x255   : > { %8385 = vst [vmem:[#allocation51_spill] sm:$0xff] %v6361_v50  ;;  %vm1704_vm15 = vcmp.ne.s32.totalorder %v8129_v51, 0  ;;  %v1863_v20 = vmax.f32 %v6366_v42, %v6370_v17  ;;  %vm6391_vm7 = vcmp.ne.s32.totalorder %v8131_v61, 0  ;;  %vm1330_vm10 = vcmp.gt.f32.partialorder %v1266_v27, 0.0 }
 0x256   : > { %8386 = vst [vmem:[#allocation52_spill] sm:$0xff] %v6366_v42  ;;  %v1415_v25 = vmul.f32 0.2, %v1287_v62  ;;  %v1416_v55 = vmul.f32 0.2, %v1288_v1  ;;  %vm1351_vm3 = vcmp.gt.f32.partialorder %v1287_v62, 0.0  ;;  %v1457_v41 = vsel %vm1329_vm11, %v6237_v63, %v1393_v57 }
 0x257   : > { %vm1352_vm8 = vcmp.gt.f32.partialorder %v1288_v1, 0.0  ;;  %v8393_v61 = vunpack.c.0.s8 %v6193_v6  ;;  %v1280_v28 = vadd.f32 %v5580_v14, %v6190_v13  ;;  %v1505_v57 = vld [vmem:[%s5308_s8 + $0x58] sm:$0xf] }
 0x258   : > { %1885 = vmax.xlane.f32.xlu0 %v1884_v38  ;;  %v1479_v2 = vsel %vm1351_vm3, %v1287_v62, %v1415_v25  ;;  %v1480_v56 = vsel %vm1352_vm8, %v1288_v1, %v1416_v55  ;;  %v6397_v38 = vsel %vm1541_vm2, 16843009, %v8278_v12  ;;  %v1279_v62 = vadd.f32 %v5582_v16, %v6190_v13 }
 0x259   : > { %v1465_v1 = vsel %vm1337_vm6, %v1273_v24, %v1401_v52  ;;  %v1466_v25 = vsel %vm1338_vm12, %v1274_v49, %v1402_v30  ;;  %v8390_v55 = vunpack.c.1.s8 %v6330_v58  ;;  %v6403_v51 = vsel %vm1703_vm14, %v1479_v2, -1e+30 }
 0x25a   : > { %8391 = vst [vmem:[#allocation54_spill] sm:$0xff] %v6403_v51  ;;  %v6405_v44 = vsel %vm1704_vm15, %v1480_v56, -1e+30  ;;  %vm1681_vm13 = vcmp.ne.s32.totalorder %v8393_v61, 0  ;;  %v8134_v24 = vunpack.c.0.s8 %v6397_v38  ;;  %v1458_v49 = vsel %vm1330_vm10, %v1266_v27, %v1394_v54  ;;  %v1512_v54 = vld [vmem:[%s5308_s8 + $0x74] sm:$0xf] }
 0x25b   : > { %vm1690_vm1 = vcmp.ne.s32.totalorder %v8390_v55, 0  ;;  %8392 = vst [vmem:[#allocation55_spill] sm:$0xff] %v6405_v44  ;;  %v8394_v52 = vunpack.c.1.s8 %v6193_v6  ;;  %v6419_v30 = vsel %vm6391_vm7, %v1465_v1, -1e+30  ;;  %v8137_v63 = vunpack.c.1.s8 %v6397_v38  ;;  %v1213_v55 = vpop.permute.xlu2 %1212 }
 0x25c   : > { %1864 = vmax.xlane.f32.xlu1 %v1863_v20  ;;  %8395 = vst [vmem:[#allocation56_spill] sm:$0xff] %v6419_v30  ;;  %v6421_v2 = vsel %vm1690_vm1, %v1466_v25, -1e+30  ;;  %v1407_v61 = vmul.f32 0.2, %v1279_v62  ;;  %v1893_v13 = vmax.f32 %v6403_v51, %v6405_v44  ;;  %vm1343_vm11 = vcmp.gt.f32.partialorder %v1279_v62, 0.0 }
 0x25d   : > { %vm1682_vm0 = vcmp.ne.s32.totalorder %v8394_v52, 0  ;;  %8396 = vst [vmem:[#allocation57_spill] sm:$0xff] %v6421_v2  ;;  %v6427_v56 = vsel %vm1681_vm13, %v1457_v41, -1e+30  ;;  %v1408_v20 = vmul.f32 0.2, %v1280_v28  ;;  %v1872_v1 = vmax.f32 %v6419_v30, %v6421_v2 }
 0x25e   : > { %8397 = vst [vmem:[#allocation58_spill] sm:$0xff] %v6427_v56  ;;  %v6429_v27 = vsel %vm1682_vm0, %v1458_v49, -1e+30  ;;  %vm6436_vm2 = vcmp.ne.s32.totalorder %v8134_v24, 0  ;;  %vm1537_vm3 = vnez %v1505_v57  ;;  %vm1344_vm8 = vcmp.gt.f32.partialorder %v1280_v28, 0.0 }
 0x25f   : > { %8398 = vst [vmem:[#allocation59_spill] sm:$0xff] %v6429_v27  ;;  %vm6444_vm6 = vcmp.ne.s32.totalorder %v8137_v63, 0  ;;  %v8403_v44 = vunpack.c.0.s8 %v6287_v9  ;;  %v8406_v51 = vunpack.c.1.s8 %v6287_v9  ;;  %vm1544_vm15 = vnez %v1512_v54  ;;  %v1508_v52 = vld [vmem:[%s5308_s8 + $0x64] sm:$0xf] }
 0x260   : > { %v1148_v53 = vpop.permute.xlu0 %1147  ;;  %1894 = vmax.xlane.f32.xlu0 %v1893_v13  ;;  %v1511_v13 = vld [vmem:[%s5308_s8 + $0x70] sm:$0xf]  ;;  %v1285_v2 = vadd.f32 %v5582_v16, %v1213_v55  ;;  %v1472_v30 = vsel %vm1344_vm8, %v1280_v28, %v1408_v20  ;;  %v1271_v9 = vadd.f32 %v5582_v16, %v5915_v18  ;;  %v6467_v42 = vsel %vm1544_vm15, 16843009, %v8278_v12 }
 0x261   : > { %v1259_v41 = vadd.f32 %v5582_v16, %v1148_v53  ;;  %v1260_v49 = vadd.f32 %v5580_v14, %v1148_v53  ;;  %vm6451_vm12 = vcmp.ne.s32.totalorder %v8403_v44, 0  ;;  %vm6457_vm14 = vcmp.ne.s32.totalorder %v8406_v51, 0 }
 0x262   : > { %v1471_v53 = vsel %vm1343_vm11, %v1279_v62, %v1407_v61  ;;  %v1286_v44 = vadd.f32 %v5580_v14, %v1213_v55  ;;  %vm1543_vm1 = vnez %v1511_v13  ;;  %v1272_v62 = vadd.f32 %v5580_v14, %v5915_v18  ;;  %v1514_v13 = vld [vmem:[%s5308_s8 + $0x7c] sm:$0xf] }
 0x263   : > { %v1387_v63 = vmul.f32 0.2, %v1259_v41  ;;  %v1388_v4 = vmul.f32 0.2, %v1260_v49  ;;  %vm1323_vm7 = vcmp.gt.f32.partialorder %v1259_v41, 0.0  ;;  %vm1324_vm10 = vcmp.gt.f32.partialorder %v1260_v49, 0.0 }
 0x264   : > { %1873 = vmax.xlane.f32.xlu1 %v1872_v1  ;;  %v6481_v28 = vsel %vm1537_vm3, 16843009, %v8278_v12  ;;  %v6491_v18 = vsel %vm6444_vm6, %v1472_v30, -1e+30  ;;  %v6494_v50 = vsel %vm1543_vm1, 16843009, %v8278_v12  ;;  %v8146_v57 = vunpack.c.0.s8 %v6467_v42 }
 0x265   : > { %v1451_v51 = vsel %vm1323_vm7, %v1259_v41, %v1387_v63  ;;  %v1452_v17 = vsel %vm1324_vm10, %v1260_v49, %v1388_v4  ;;  %v6487_v63 = vsel %vm6436_vm2, %v1471_v53, -1e+30  ;;  %8412 = vst [vmem:[#allocation63_spill] sm:$0xff] %v6491_v18  ;;  %v1414_v24 = vmul.f32 0.2, %v1286_v44 }
 0x266   : > { %v6473_v61 = vsel %vm6451_vm12, %v1451_v51, -1e+30  ;;  %v6477_v54 = vsel %vm6457_vm14, %v1452_v17, -1e+30  ;;  %8411 = vst [vmem:[#allocation62_spill] sm:$0xff] %v6487_v63  ;;  %v1860_v1 = vmax.f32 %v6427_v56, %v6429_v27  ;;  %vm1349_vm13 = vcmp.gt.f32.partialorder %v1285_v2, 0.0 }
 0x267   : > { %8409 = vst [vmem:[#allocation60_spill] sm:$0xff] %v6473_v61  ;;  %v1851_v4 = vmax.f32 %v6473_v61, %v6477_v54  ;;  %v1413_v17 = vmul.f32 0.2, %v1285_v2  ;;  %vm1350_vm0 = vcmp.gt.f32.partialorder %v1286_v44, 0.0  ;;  %v1399_v25 = vmul.f32 0.2, %v1271_v9 }
 0x268   : > { %8410 = vst [vmem:[#allocation61_spill] sm:$0xff] %v6477_v54  ;;  %v1881_v30 = vmax.f32 %v6487_v63, %v6491_v18  ;;  %v1400_v55 = vmul.f32 0.2, %v1272_v62  ;;  %vm1335_vm11 = vcmp.gt.f32.partialorder %v1271_v9, 0.0  ;;  %vm1336_vm2 = vcmp.gt.f32.partialorder %v1272_v62, 0.0  ;;  %v6972_v61 = vld [vmem:[#allocation2 + $0xe0] sm:$0xff] }
 0x269   : > { %1852 = vmax.xlane.f32.xlu2 %v1851_v4  ;;  %v8151_v53 = vunpack.c.0.s8 %v6494_v50  ;;  %v8150_v51 = vunpack.c.1.s8 %v6494_v50  ;;  %v1477_v4 = vsel %vm1349_vm13, %v1285_v2, %v1413_v17  ;;  %v1478_v20 = vsel %vm1350_vm0, %v1286_v44, %v1414_v24 }
 0x26a   : > { %vm1701_vm3 = vcmp.ne.s32.totalorder %v8146_v57, 0  ;;  %v8413_v27 = vunpack.c.1.s8 %v6467_v42  ;;  %vm1540_vm6 = vnez %v1508_v52  ;;  %vm1546_vm12 = vnez %v1514_v13 }
 0x26b   : > { %v4450_v49 = vunpack.i.l.s16 %v8151_v53  ;;  %v4451_v41 = vunpack.i.l.s16 %v8150_v51  ;;  %v1463_v56 = vsel %vm1335_vm11, %v1271_v9, %v1399_v25  ;;  %v1464_v18 = vsel %vm1336_vm2, %v1272_v62, %v1400_v55  ;;  %v6572_v53 = vld [vmem:[#allocation2] sm:$0xff] }
 0x26c   : > { %1882 = vmax.xlane.f32.xlu1 %v1881_v30  ;;  %vm1702_vm8 = vcmp.ne.s32.totalorder %v8413_v27, 0  ;;  %v8414_v30 = vunpack.c.0.s8 %v6481_v28  ;;  %v8415_v2 = vunpack.c.1.s8 %v6481_v28  ;;  %v6520_v44 = vsel %vm1701_vm3, %v1477_v4, -1e+30 }
 0x26d   : > { %8416 = vst [vmem:[#allocation64_spill] sm:$0xff] %v6520_v44  ;;  %v6522_v17 = vsel %vm1702_vm8, %v1478_v20, -1e+30  ;;  %vm2739_vm7 = vcmp.ne.s32.totalorder %v4450_v49, %v5794_v10  ;;  %vm2740_vm10 = vcmp.ne.s32.totalorder %v4451_v41, %v5797_v3  ;;  %v1277_v27 = vadd.f32 %v5582_v16, %v6157_v36 }
 0x26e   : > { %vm1687_vm14 = vcmp.ne.s32.totalorder %v8414_v30, 0  ;;  %vm1688_vm15 = vcmp.ne.s32.totalorder %v8415_v2, 0  ;;  %8417 = vst [vmem:[#allocation65_spill] sm:$0xff] %v6522_v17  ;;  %v1278_v9 = vadd.f32 %v5580_v14, %v6157_v36  ;;  %v6531_v62 = vsel %vm1540_vm6, 16843009, %v8278_v12  ;;  %vm6533_vm1 = vmpackc.low %vm2740_vm10, %vm2739_vm7 }
 0x26f   : > { %v8418_v24 = vmov 0  ;;  %v6538_v20 = vsel %vm1546_vm12, 16843009, %v8278_v12  ;;  %v1890_v25 = vmax.f32 %v6520_v44, %v6522_v17  ;;  %v6542_v55 = vsel %vm1687_vm14, %v1463_v56, -1e+30  ;;  %v8511_v44 = vld [vmem:[#allocation16_spill] sm:$0xff] }
 0x270   : > { %v8419_v24 = vsel %vm6533_vm1, 4294967295, %v8418_v24  ;;  %8421 = vst [vmem:[#allocation67_spill] sm:$0xff] %v6542_v55  ;;  %v6544_v41 = vsel %vm1688_vm15, %v1464_v18, -1e+30  ;;  %v8148_v36 = vunpack.c.0.s8 %v6531_v62  ;;  %v8149_v49 = vunpack.c.1.s8 %v6531_v62 }
 0x271   : > { %8420 = vst [vmem:[#allocation66_spill] sm:$0xff] %v8419_v24  ;;  %1861 = vmax.xlane.f32.xlu2 %v1860_v1  ;;  %v1641_v52 = vunpack.c.0.s8 %v6538_v20  ;;  %v8147_v13 = vunpack.c.1.s8 %v6538_v20  ;;  %v1405_v4 = vmul.f32 0.2, %v1277_v27  ;;  %v1406_v30 = vmul.f32 0.2, %v1278_v9  ;;  %v6589_v24 = vld [vmem:[#allocation2 + $0x8] sm:$0xff] }
 0x272   : > { %8422 = vst [vmem:[#allocation68_spill] sm:$0xff] %v6544_v41  ;;  %vm1341_vm13 = vcmp.gt.f32.partialorder %v1277_v27, 0.0  ;;  %vm1342_vm0 = vcmp.gt.f32.partialorder %v1278_v9, 0.0  ;;  %v1869_v18 = vmax.f32 %v6542_v55, %v6544_v41  ;;  %vm1693_vm11 = vcmp.ne.s32.totalorder %v8148_v36, 0 }
 0x273   : > { %v4456_v12 = vunpack.i.l.s16 %v1641_v52  ;;  %v4457_v56 = vunpack.i.l.s16 %v8147_v13  ;;  %vm1694_vm2 = vcmp.ne.s32.totalorder %v8149_v49, 0  ;;  %v1283_v1 = vadd.f32 %v5582_v16, %v6380_v33 }
 0x274   : > { %1891 = vmax.xlane.f32.xlu1 %v1890_v25  ;;  %v1284_v2 = vadd.f32 %v5580_v14, %v6380_v33  ;;  %v1469_v25 = vsel %vm1341_vm13, %v1277_v27, %v1405_v4  ;;  %v1470_v57 = vsel %vm1342_vm0, %v1278_v9, %v1406_v30  ;;  %v8423_v13 = vmov 0 }
 0x275   : > { %vm2760_vm3 = vcmp.ne.s32.totalorder %v4456_v12, %v5794_v10  ;;  %vm2761_vm8 = vcmp.ne.s32.totalorder %v4457_v56, %v5797_v3  ;;  %v6568_v36 = vsel %vm1693_vm11, %v1469_v25, -1e+30  ;;  %v6570_v49 = vsel %vm1694_vm2, %v1470_v57, -1e+30  ;;  %v1223_v56 = vpop.permute.xlu2 %1222 }
 0x276   : > { %vm6564_vm6 = vmpackc.low %vm2761_vm8, %vm2760_vm3  ;;  %8426 = vst [vmem:[#allocation70_spill] sm:$0xff] %v6568_v36  ;;  %v1411_v12 = vmul.f32 0.2, %v1283_v1  ;;  %v1412_v51 = vmul.f32 0.2, %v1284_v2  ;;  %vm1347_vm12 = vcmp.gt.f32.partialorder %v1283_v1, 0.0  ;;  %v1878_v9 = vmax.f32 %v6568_v36, %v6570_v49 }
 0x277   : > { %v8424_v13 = vsel %vm6564_vm6, 4294967295, %v8423_v13  ;;  %8427 = vst [vmem:[#allocation71_spill] sm:$0xff] %v6570_v49  ;;  %vm1348_vm14 = vcmp.gt.f32.partialorder %v1284_v2, 0.0  ;;  %vm3051_vm15 = vcmask 7168   ;;  %v8428_v57 = vunpack.c.0.s8 %v6494_v50 }
 0x278   : > { %8425 = vst [vmem:[#allocation69_spill] sm:$0xff] %v8424_v13  ;;  %v1475_v4 = vsel %vm1347_vm12, %v1283_v1, %v1411_v12  ;;  %v1476_v30 = vsel %vm1348_vm14, %v1284_v2, %v1412_v51  ;;  %v1290_v25 = vadd.f32 %v5580_v14, %v1223_v56  ;;  %v6591_v1 = vld [vmem:[#allocation2 + $0x18] sm:$0xff]  ;;  %vm1705_vm11 = vcmp.ne.s32.totalorder %v1641_v52, 0  ;;  %v6618_v13 = vld [vmem:[#allocation2 + $0x20] sm:$0xff] }
 0x279   : > { %1870 = vmax.xlane.f32.xlu2 %v1869_v18  ;;  %vm1699_vm7 = vcmp.ne.s32.totalorder %v8428_v57, 0  ;;  %v1289_v18 = vadd.f32 %v5582_v16, %v1223_v56  ;;  %8430 = vst [vmem:[#allocation72_spill] sm:$0xff] %v6591_v1 }
 0x27a   : > { %v6593_v2 = vsel %vm1699_vm7, %v1475_v4, -1e+30  ;;  %v1418_v12 = vmul.f32 0.2, %v1290_v25  ;;  %vm1354_vm0 = vcmp.gt.f32.partialorder %v1290_v25, 0.0  ;;  %8436 = vst [vmem:[#allocation77_spill] sm:$0xff] %v6618_v13 }
 0x27b   : > { %8431 = vst [vmem:[#allocation73_spill] sm:$0xff] %v6593_v2  ;;  %v1417_v14 = vmul.f32 0.2, %v1289_v18  ;;  %vm1353_vm13 = vcmp.gt.f32.partialorder %v1289_v18, 0.0 }
 0x27e   : > { %v1805_v33 = vpop.xlane.xlu1 %1804 }
 0x27f   : > { %v6575_v27 = vmax.f32 %v6572_v53, %v1805_v33  ;;  %v8429_v33 = vunpack.c.1.s8 %v6494_v50  ;;  %v1482_v50 = vsel %vm1354_vm0, %v1290_v25, %v1418_v12  ;;  %v6679_v12 = vld [vmem:[#allocation2 + $0x48] sm:$0xff] }
 0x280   : > { %8449 = vst [vmem:[#allocation90_spill] sm:$0xff] %v6679_v12 }
 0x281   : > { %3806 = vst.msk [vmem:[#allocation2] sm:$0xff] %vm3051_vm15, %v6575_v27  ;;  %1879 = vmax.xlane.f32.xlu2 %v1878_v9  ;;  %vm1700_vm10 = vcmp.ne.s32.totalorder %v8429_v33, 0  ;;  %v6614_v33 = vld [vmem:[#allocation2 + $0x10] sm:$0xff] }
 0x282   : > { %v6595_v16 = vsel %vm1700_vm10, %v1476_v30, -1e+30  ;;  %8434 = vst [vmem:[#allocation76_spill] sm:$0xff] %v6614_v33 }
 0x283   : > { %8432 = vst [vmem:[#allocation74_spill] sm:$0xff] %v6595_v16  ;;  %v1887_v4 = vmax.f32 %v6593_v2, %v6595_v16  ;;  %v6623_v2 = vld [vmem:[#allocation2 + $0x28] sm:$0xff] }
 0x284   : > { %8438 = vst [vmem:[#allocation79_spill] sm:$0xff] %v6623_v2 }
 0x285   : > { %v1808_v51 = vpop.xlane.xlu2 %1807 }
 0x286   : > { %v6598_v56 = vmax.f32 %v6589_v24, %v1808_v51  ;;  %v1814_v57 = vpop.xlane.xlu1 %1813  ;;  %v1481_v51 = vsel %vm1353_vm13, %v1289_v18, %v1417_v14  ;;  %v6657_v18 = vld [vmem:[#allocation2 + $0x40] sm:$0xff] }
 0x287   : > { %v6605_v9 = vmax.f32 %v6591_v1, %v1814_v57  ;;  %v8435_v57 = vunpack.c.1.s8 %v6538_v20  ;;  %v6625_v30 = vsel %vm1705_vm11, %v1481_v51, -1e+30  ;;  %v6652_v51 = vld [vmem:[#allocation2 + $0x38] sm:$0xff]  ;;  %8446 = vst [vmem:[#allocation87_spill] sm:$0xff] %v6657_v18 }
 0x288   : > { %3807 = vst.msk [vmem:[#allocation2 + $0x8] sm:$0xff] %vm3051_vm15, %v6598_v56  ;;  %2034 = vperm.xlu0 %4720, %v6598_v56  }
 0x289   : > { %8433 = vst [vmem:[#allocation75_spill] sm:$0xff] %v6605_v9  ;;  %1888 = vmax.xlane.f32.xlu2 %v1887_v4  ;;  %vm1706_vm2 = vcmp.ne.s32.totalorder %v8435_v57, 0 }
 0x28a   : > { %3809 = vst.msk [vmem:[#allocation2 + $0x18] sm:$0xff] %vm3051_vm15, %v6605_v9  ;;  %v6627_v1 = vsel %vm1706_vm2, %v1482_v50, -1e+30  ;;  %v6650_v50 = vld [vmem:[#allocation2 + $0x30] sm:$0xff] }
 0x28b   : > { %v1811_v49 = vpop.xlane.xlu0 %1810  ;;  %8439 = vst [vmem:[#allocation80_spill] sm:$0xff] %v6625_v30  ;;  %v1896_v14 = vmax.f32 %v6625_v30, %v6627_v1 }
 0x28c   : > { %v6621_v16 = vmax.f32 %v6614_v33, %v1811_v49  ;;  %8440 = vst [vmem:[#allocation81_spill] sm:$0xff] %v6627_v1  ;;  %v6686_v33 = vld [vmem:[#allocation2 + $0x58] sm:$0xff] }
 0x28d   : > { %v1817_v52 = vpop.xlane.xlu2 %1816  ;;  %2029 = vperm.xlu1 %4719, %v6575_v27   ;;  %8443 = vst [vmem:[#allocation84_spill] sm:$0xff] %v6650_v50 }
 0x28e   : > { %8437 = vst [vmem:[#allocation78_spill] sm:$0xff] %v6621_v16  ;;  %v6630_v4 = vmax.f32 %v6618_v13, %v1817_v52  ;;  %v1820_v49 = vpop.xlane.xlu1 %1819 }
 0x28f   : > { %3808 = vst.msk [vmem:[#allocation2 + $0x10] sm:$0xff] %vm3051_vm15, %v6621_v16  ;;  %v6642_v25 = vmax.f32 %v6623_v2, %v1820_v49 }
 0x290   : > { %8441 = vst [vmem:[#allocation82_spill] sm:$0xff] %v6630_v4 }
 0x291   : > { %3810 = vst.msk [vmem:[#allocation2 + $0x20] sm:$0xff] %vm3051_vm15, %v6630_v4  ;;  %1897 = vmax.xlane.f32.xlu2 %v1896_v14 }
 0x292   : > { %8442 = vst [vmem:[#allocation83_spill] sm:$0xff] %v6642_v25 }
 0x293   : > { %3811 = vst.msk [vmem:[#allocation2 + $0x28] sm:$0xff] %vm3051_vm15, %v6642_v25  ;;  %v1823_v57 = vpop.xlane.xlu0 %1822 }
 0x294   : > { %8444 = vst [vmem:[#allocation85_spill] sm:$0xff] %v6652_v51  ;;  %v6655_v52 = vmax.f32 %v6650_v50, %v1823_v57  ;;  %v6681_v50 = vld [vmem:[#allocation2 + $0x50] sm:$0xff] }
 0x295   : > { %v1826_v49 = vpop.xlane.xlu2 %1825  ;;  %2044 = vperm.xlu1 %4719, %v6605_v9   ;;  %8450 = vst [vmem:[#allocation91_spill] sm:$0xff] %v6681_v50  ;;  %v6715_v9 = vld [vmem:[#allocation2 + $0x70] sm:$0xff] }
 0x296   : > { %8445 = vst [vmem:[#allocation86_spill] sm:$0xff] %v6655_v52  ;;  %v6660_v20 = vmax.f32 %v6652_v51, %v1826_v49  ;;  %v1829_v14 = vpop.xlane.xlu1 %1828  ;;  %v6708_v49 = vld [vmem:[#allocation2 + $0x60] sm:$0xff] }
 0x297   : > { %3812 = vst.msk [vmem:[#allocation2 + $0x30] sm:$0xff] %vm3051_vm15, %v6655_v52  ;;  %v6672_v57 = vmax.f32 %v6657_v18, %v1829_v14 }
 0x298   : > { %8447 = vst [vmem:[#allocation88_spill] sm:$0xff] %v6660_v20 }
 0x299   : > { %3813 = vst.msk [vmem:[#allocation2 + $0x38] sm:$0xff] %vm3051_vm15, %v6660_v20  ;;  %2069 = vperm.xlu0 %4720, %v6672_v57  }
 0x29a   : > { %8448 = vst [vmem:[#allocation89_spill] sm:$0xff] %v6672_v57 }
 0x29b   : > { %3814 = vst.msk [vmem:[#allocation2 + $0x40] sm:$0xff] %vm3051_vm15, %v6672_v57  ;;  %v1832_v13 = vpop.xlane.xlu0 %1831 }
 0x29c   : > { %v6684_v2 = vmax.f32 %v6679_v12, %v1832_v13  ;;  %8452 = vst [vmem:[#allocation93_spill] sm:$0xff] %v6686_v33  ;;  %v6710_v12 = vld [vmem:[#allocation2 + $0x68] sm:$0xff] }
 0x29d   : > { %v1835_v51 = vpop.xlane.xlu2 %1834  ;;  %2054 = vperm.xlu1 %4719, %v6642_v25   ;;  %8455 = vst [vmem:[#allocation96_spill] sm:$0xff] %v6708_v49 }
 0x29e   : > { %8451 = vst [vmem:[#allocation92_spill] sm:$0xff] %v6684_v2  ;;  %v6689_v14 = vmax.f32 %v6681_v50, %v1835_v51  ;;  %v1838_v57 = vpop.xlane.xlu1 %1837  ;;  %v6738_v51 = vld [vmem:[#allocation2 + $0x78] sm:$0xff] }
 0x29f   : > { %3815 = vst.msk [vmem:[#allocation2 + $0x48] sm:$0xff] %vm3051_vm15, %v6684_v2  ;;  %v6701_v13 = vmax.f32 %v6686_v33, %v1838_v57 }
 0x2a0   : > { %8453 = vst [vmem:[#allocation94_spill] sm:$0xff] %v6689_v14 }
 0x2a1   : > { %3816 = vst.msk [vmem:[#allocation2 + $0x50] sm:$0xff] %vm3051_vm15, %v6689_v14  ;;  %2084 = vperm.xlu0 %4720, %v6701_v13  }
 0x2a2   : > { %8454 = vst [vmem:[#allocation95_spill] sm:$0xff] %v6701_v13 }
 0x2a3   : > { %3817 = vst.msk [vmem:[#allocation2 + $0x58] sm:$0xff] %vm3051_vm15, %v6701_v13  ;;  %v1841_v25 = vpop.xlane.xlu0 %1840 }
 0x2a4   : > { %8456 = vst [vmem:[#allocation97_spill] sm:$0xff] %v6710_v12  ;;  %v6713_v18 = vmax.f32 %v6708_v49, %v1841_v25 }
 0x2a5   : > { %v1844_v50 = vpop.xlane.xlu2 %1843  ;;  %8458 = vst [vmem:[#allocation99_spill] sm:$0xff] %v6715_v9  ;;  %2064 = vperm.xlu1 %4719, %v6660_v20   ;;  %v6795_v20 = vld [vmem:[#allocation2 + $0xa0] sm:$0xff] }
 0x2a6   : > { %8457 = vst [vmem:[#allocation98_spill] sm:$0xff] %v6713_v18  ;;  %v6718_v57 = vmax.f32 %v6710_v12, %v1844_v50  ;;  %v1847_v13 = vpop.xlane.xlu1 %1846  ;;  %v6749_v50 = vld [vmem:[#allocation2 + $0x90] sm:$0xff] }
 0x2a7   : > { %3818 = vst.msk [vmem:[#allocation2 + $0x60] sm:$0xff] %vm3051_vm15, %v6713_v18  ;;  %v6730_v25 = vmax.f32 %v6715_v9, %v1847_v13  ;;  %v6760_v13 = vld [vmem:[#allocation2 + $0xa8] sm:$0xff] }
 0x2a8   : > { %8459 = vst [vmem:[#allocation100_spill] sm:$0xff] %v6718_v57 }
 0x2a9   : > { %3819 = vst.msk [vmem:[#allocation2 + $0x68] sm:$0xff] %vm3051_vm15, %v6718_v57  ;;  %2039 = vperm.xlu2 %4721, %v6621_v16   ;;  %2099 = vperm.xlu0 %4720, %v6730_v25  }
 0x2aa   : > { %8460 = vst [vmem:[#allocation101_spill] sm:$0xff] %v6730_v25 }
 0x2ab   : > { %3820 = vst.msk [vmem:[#allocation2 + $0x70] sm:$0xff] %vm3051_vm15, %v6730_v25  ;;  %v1850_v49 = vpop.xlane.xlu0 %1849 }
 0x2ac   : > { %8461 = vst [vmem:[#allocation102_spill] sm:$0xff] %v6738_v51  ;;  %v6741_v33 = vmax.f32 %v6738_v51, %v1850_v49  ;;  %v6770_v49 = vld [vmem:[#allocation2 + $0xc0] sm:$0xff] }
 0x2ad   : > { %2079 = vperm.xlu1 %4719, %v6689_v14   ;;  %8463 = vst [vmem:[#allocation104_spill] sm:$0xff] %v6749_v50  ;;  %v6775_v14 = vld [vmem:[#allocation2 + $0x88] sm:$0xff] }
 0x2ae   : > { %8462 = vst [vmem:[#allocation103_spill] sm:$0xff] %v6741_v33 }
 0x2af   : > { %3821 = vst.msk [vmem:[#allocation2 + $0x78] sm:$0xff] %vm3051_vm15, %v6741_v33 }
 0x2b0   : > { %8465 = vst [vmem:[#allocation106_spill] sm:$0xff] %v6760_v13 }
 0x2b1   : > { %2049 = vperm.xlu2 %4721, %v6630_v4   ;;  %8467 = vst [vmem:[#allocation108_spill] sm:$0xff] %v6770_v49 }
 0x2b2   : > { %8469 = vst [vmem:[#allocation110_spill] sm:$0xff] %v6775_v14 }
 0x2b3   : > { %v1859_v9 = vpop.xlane.xlu0 %1858  ;;  %8473 = vst [vmem:[#allocation114_spill] sm:$0xff] %v6795_v20 }
 0x2b4   : > { %v6752_v25 = vmax.f32 %v6749_v50, %v1859_v9 }
 0x2b5   : > { %2094 = vperm.xlu1 %4719, %v6718_v57  }
 0x2b6   : > { %8464 = vst [vmem:[#allocation105_spill] sm:$0xff] %v6752_v25 }
 0x2b7   : > { %3824 = vst.msk [vmem:[#allocation2 + $0x90] sm:$0xff] %vm3051_vm15, %v6752_v25 }
 0x2b9   : > { %2059 = vperm.xlu2 %4721, %v6655_v52  }
 0x2bb   : > { %v1868_v51 = vpop.xlane.xlu0 %1867 }
 0x2bc   : > { %v6763_v12 = vmax.f32 %v6760_v13, %v1868_v51 }
 0x2be   : > { %8466 = vst [vmem:[#allocation107_spill] sm:$0xff] %v6763_v12 }
 0x2bf   : > { %3827 = vst.msk [vmem:[#allocation2 + $0xa8] sm:$0xff] %vm3051_vm15, %v6763_v12 }
 0x2c1   : > { %2074 = vperm.xlu2 %4721, %v6684_v2   ;;  %v6785_v2 = vld [vmem:[#allocation2 + $0xd8] sm:$0xff] }
 0x2c2   : > { %8471 = vst [vmem:[#allocation112_spill] sm:$0xff] %v6785_v2 }
 0x2c3   : > { %v1877_v50 = vpop.xlane.xlu0 %1876 }
 0x2c4   : > { %v6773_v57 = vmax.f32 %v6770_v49, %v1877_v50 }
 0x2c6   : > { %8468 = vst [vmem:[#allocation109_spill] sm:$0xff] %v6773_v57 }
 0x2c7   : > { %3830 = vst.msk [vmem:[#allocation2 + $0xc0] sm:$0xff] %vm3051_vm15, %v6773_v57  ;;  %v1856_v9 = vpop.xlane.xlu1 %1855 }
 0x2c8   : > { %v6782_v13 = vmax.f32 %v6775_v14, %v1856_v9  ;;  %v6805_v14 = vld [vmem:[#allocation2 + $0xf0] sm:$0xff] }
 0x2c9   : > { %2089 = vperm.xlu2 %4721, %v6713_v18   ;;  %8475 = vst [vmem:[#allocation116_spill] sm:$0xff] %v6805_v14 }
 0x2ca   : > { %8470 = vst [vmem:[#allocation111_spill] sm:$0xff] %v6782_v13  ;;  %2114 = vperm.xlu0 %4720, %v6782_v13  }
 0x2cb   : > { %3823 = vst.msk [vmem:[#allocation2 + $0x88] sm:$0xff] %vm3051_vm15, %v6782_v13  ;;  %v1886_v51 = vpop.xlane.xlu0 %1885  ;;  %v4533_v13 = vld [vmem:[%s5300_s19 + $0x38] sm:$0xff] }
 0x2cc   : > { %v6793_v49 = vmax.f32 %v6785_v2, %v1886_v51  ;;  %3564 = vmatpush.bf16.msra.mxu0 %v4533_v13  ;;  %4637 = vmatpush.bf16.msra.mxu2 %v4533_v13 }
 0x2ce   : > { %8472 = vst [vmem:[#allocation113_spill] sm:$0xff] %v6793_v49 }
 0x2cf   : > { %3833 = vst.msk [vmem:[#allocation2 + $0xd8] sm:$0xff] %vm3051_vm15, %v6793_v49  ;;  %v1865_v18 = vpop.xlane.xlu1 %1864 }
 0x2d0   : > { %v6802_v50 = vmax.f32 %v6795_v20, %v1865_v18  ;;  %v6815_v18 = vld [vmem:[#allocation2 + $0xb8] sm:$0xff] }
 0x2d1   : > { %2104 = vperm.xlu2 %4721, %v6741_v33   ;;  %8477 = vst [vmem:[#allocation118_spill] sm:$0xff] %v6815_v18 }
 0x2d2   : > { %8474 = vst [vmem:[#allocation115_spill] sm:$0xff] %v6802_v50  ;;  %2129 = vperm.xlu0 %4720, %v6802_v50  }
 0x2d3   : > { %3826 = vst.msk [vmem:[#allocation2 + $0xa0] sm:$0xff] %vm3051_vm15, %v6802_v50  ;;  %v1895_v9 = vpop.xlane.xlu0 %1894  ;;  %v4532_v50 = vld [vmem:[%s5300_s19 + $0x30] sm:$0xff] }
 0x2d4   : > { %v6813_v2 = vmax.f32 %v6805_v14, %v1895_v9  ;;  %v6830_v9 = vld [vmem:[#allocation2 + $0x80] sm:$0xff]  ;;  %v4541_v14 = vld [vmem:[%s5300_s19 + $0x78] sm:$0xff]  ;;  %3565 = vmatpush.bf16.msra.mxu0 %v4532_v50  ;;  %4638 = vmatpush.bf16.msra.mxu2 %v4532_v50 }
 0x2d5   : > { %8479 = vst [vmem:[#allocation120_spill] sm:$0xff] %v6830_v9  ;;  %3653 = vmatpush.bf16.msra.mxu1 %v4541_v14  ;;  %4645 = vmatpush.bf16.msra.mxu3 %v4541_v14  ;;  %v6853_v14 = vld [vmem:[#allocation2 + $0x98] sm:$0xff]  ;;  %v4530_v50 = vld [vmem:[%s5300_s19 + $0x20] sm:$0xff] }
 0x2d6   : > { %8476 = vst [vmem:[#allocation117_spill] sm:$0xff] %v6813_v2 }
 0x2d7   : > { %3836 = vst.msk [vmem:[#allocation2 + $0xf0] sm:$0xff] %vm3051_vm15, %v6813_v2  ;;  %v1874_v33 = vpop.xlane.xlu1 %1873 }
 0x2d8   : > { %v6822_v51 = vmax.f32 %v6815_v18, %v1874_v33  ;;  %v6837_v33 = vld [vmem:[#allocation2 + $0xd0] sm:$0xff]  ;;  %8483 = vst [vmem:[#allocation124_spill] sm:$0xff] %v6853_v14  ;;  %v8491_v18 = vunpack.c.0.s8 %v5550_v60 }
 0x2d9   : > { %2119 = vperm.xlu2 %4721, %v6752_v25   ;;  %8481 = vst [vmem:[#allocation122_spill] sm:$0xff] %v6837_v33 }
 0x2da   : > { %8478 = vst [vmem:[#allocation119_spill] sm:$0xff] %v6822_v51  ;;  %2144 = vperm.xlu0 %4720, %v6822_v51  }
 0x2db   : > { %3829 = vst.msk [vmem:[#allocation2 + $0xb8] sm:$0xff] %vm3051_vm15, %v6822_v51 }
 0x2dc   : > { %v1853_v20 = vpop.xlane.xlu2 %1852 }
 0x2dd   : > { %v6835_v52 = vmax.f32 %v6830_v9, %v1853_v20  ;;  %v6860_v9 = vld [vmem:[#allocation2 + $0xe8] sm:$0xff] }
 0x2de   : > { %8485 = vst [vmem:[#allocation126_spill] sm:$0xff] %v6860_v9 }
 0x2df   : > { %8480 = vst [vmem:[#allocation121_spill] sm:$0xff] %v6835_v52  ;;  %2109 = vperm.xlu1 %4719, %v6835_v52   ;;  %v1883_v51 = vpop.xlane.xlu1 %1882 }
 0x2e0   : > { %3822 = vst.msk [vmem:[#allocation2 + $0x80] sm:$0xff] %vm3051_vm15, %v6835_v52  ;;  %v6845_v20 = vmax.f32 %v6837_v33, %v1883_v51  ;;  %v4540_v52 = vld [vmem:[%s5300_s19 + $0x70] sm:$0xff] }
 0x2e1   : > { %2134 = vperm.xlu2 %4721, %v6763_v12   ;;  %3654 = vmatpush.bf16.msra.mxu1 %v4540_v52  ;;  %v4539_v12 = vld [vmem:[%s5300_s19 + $0x68] sm:$0xff] }
 0x2e2   : > { %8482 = vst [vmem:[#allocation123_spill] sm:$0xff] %v6845_v20  ;;  %2159 = vperm.xlu0 %4720, %v6845_v20   ;;  %4646 = vmatpush.bf16.msra.mxu3 %v4540_v52 }
 0x2e3   : > { %3832 = vst.msk [vmem:[#allocation2 + $0xd0] sm:$0xff] %vm3051_vm15, %v6845_v20 }
 0x2e4   : > { %v1862_v13 = vpop.xlane.xlu2 %1861 }
 0x2e5   : > { %v6858_v51 = vmax.f32 %v6853_v14, %v1862_v13  ;;  %v4531_v13 = vld [vmem:[%s5300_s19 + $0x28] sm:$0xff]  ;;  %3655 = vmatpush.bf16.msra.mxu1 %v4539_v12  ;;  %v8494_v14 = vunpack.c.1.s8 %v5553_v37 }
 0x2e6   : > { %3566 = vmatpush.bf16.msra.mxu0 %v4531_v13  ;;  %4639 = vmatpush.bf16.msra.mxu2 %v4531_v13 }
 0x2e7   : > { %8484 = vst [vmem:[#allocation125_spill] sm:$0xff] %v6858_v51  ;;  %2124 = vperm.xlu1 %4719, %v6858_v51   ;;  %v1892_v20 = vpop.xlane.xlu1 %1891  ;;  %4647 = vmatpush.bf16.msra.mxu3 %v4539_v12  ;;  %v6893_v12 = vld [vmem:[#allocation2 + $0xc8] sm:$0xff]  ;;  %v6912_v25 = vunpack.i.l.s16 %v8494_v14 }
 0x2e8   : > { %3825 = vst.msk [vmem:[#allocation2 + $0x98] sm:$0xff] %vm3051_vm15, %v6858_v51  ;;  %v6868_v33 = vmax.f32 %v6860_v9, %v1892_v20  ;;  %v6878_v51 = vld [vmem:[#allocation2 + $0xb0] sm:$0xff]  ;;  %v4538_v20 = vld [vmem:[%s5300_s19 + $0x60] sm:$0xff]  ;;  %v4537_v9 = vld [vmem:[%s5300_s19 + $0x58] sm:$0xff] }
 0x2e9   : > { %2149 = vperm.xlu2 %4721, %v6773_v57   ;;  %8487 = vst [vmem:[#allocation128_spill] sm:$0xff] %v6878_v51  ;;  %3656 = vmatpush.bf16.msra.mxu1 %v4538_v20  ;;  %v8498_v14 = vld [vmem:[#allocation11_spill] sm:$0xff]  ;;  %vm2551_vm8 = vcmp.ne.s32.totalorder %v6912_v25, %v5797_v3 }
 0x2ea   : > { %8486 = vst [vmem:[#allocation127_spill] sm:$0xff] %v6868_v33  ;;  %2174 = vperm.xlu0 %4720, %v6868_v33   ;;  %3567 = vmatpush.bf16.msra.mxu0 %v4530_v50 }
 0x2eb   : > { %3835 = vst.msk [vmem:[#allocation2 + $0xe8] sm:$0xff] %vm3051_vm15, %v6868_v33  ;;  %4640 = vmatpush.bf16.msra.mxu2 %v4530_v50  ;;  %v4529_v33 = vld [vmem:[%s5300_s19 + $0x18] sm:$0xff]  ;;  %4648 = vmatpush.bf16.msra.mxu3 %v4538_v20  ;;  %v6900_v50 = vunpack.i.l.s16 %v8491_v18  ;;  %v8493_v20 = vunpack.c.0.s8 %v5553_v37  ;;  %v4536_v37 = vld [vmem:[%s5300_s19 + $0x50] sm:$0xff] }
 0x2ec   : > { %v1871_v52 = vpop.xlane.xlu2 %1870  ;;  %8489 = vst [vmem:[#allocation130_spill] sm:$0xff] %v6893_v12 }
 0x2ed   : > { %v6883_v57 = vmax.f32 %v6878_v51, %v1871_v52  ;;  %3657 = vmatpush.bf16.msra.mxu1 %v4537_v9  ;;  %v6908_v51 = vunpack.i.l.s16 %v8493_v20  ;;  %v8499_v20 = vunpack.c.0.s8 %v8498_v14  ;;  %vm2543_vm14 = vcmp.ne.s32.totalorder %v6900_v50, %v5794_v10 }
 0x2ee   : > { %3568 = vmatpush.bf16.msra.mxu0 %v4529_v33 }
 0x2ef   : > { %8488 = vst [vmem:[#allocation129_spill] sm:$0xff] %v6883_v57  ;;  %2139 = vperm.xlu1 %4719, %v6883_v57   ;;  %4641 = vmatpush.bf16.msra.mxu2 %v4529_v33  ;;  %v8495_v33 = vld [vmem:[#allocation10_spill] sm:$0xff]  ;;  %v6931_v16 = vunpack.i.l.s16 %v8499_v20  ;;  %vm2550_vm3 = vcmp.ne.s32.totalorder %v6908_v51, %v5794_v10 }
 0x2f0   : > { %3828 = vst.msk [vmem:[#allocation2 + $0xb0] sm:$0xff] %vm3051_vm15, %v6883_v57  ;;  %4649 = vmatpush.bf16.msra.mxu3 %v4537_v9  ;;  %v8497_v9 = vunpack.c.1.s8 %v8495_v33  ;;  %vm2552_vm12 = vmpackc.low %vm2551_vm8, %vm2550_vm3 }
 0x2f1   : > { %2164 = vperm.xlu2 %4721, %v6793_v49   ;;  %v8492_v49 = vunpack.c.1.s8 %v5550_v60  ;;  %8513 = vst [vmem:[#allocation10_spill] sm:$0xff] %v6972_v61  ;;  %3658 = vmatpush.bf16.msra.mxu1 %v4536_v37  ;;  %vm2557_vm11 = vcmp.ne.s32.totalorder %v6931_v16, %v5794_v10 }
 0x2f2   : > { %v6920_v18 = vunpack.i.l.s16 %v8497_v9 }
 0x2f3   : > { %v6904_v57 = vunpack.i.l.s16 %v8492_v49  ;;  %v4528_v49 = vld [vmem:[%s5300_s19 + $0x10] sm:$0xff] }
 0x2f4   : > { %v1880_v13 = vpop.xlane.xlu2 %1879  ;;  %3569 = vmatpush.bf16.msra.mxu0 %v4528_v49  ;;  %4642 = vmatpush.bf16.msra.mxu2 %v4528_v49  ;;  %vm2565_vm0 = vcmp.ne.s32.totalorder %v6920_v18, %v5797_v3 }
 0x2f5   : > { %v6896_v52 = vmax.f32 %v6893_v12, %v1880_v13  ;;  %v8496_v13 = vunpack.c.0.s8 %v8495_v33  ;;  %v8501_v33 = vld [vmem:[#allocation12_spill] sm:$0xff]  ;;  %4650 = vmatpush.bf16.msra.mxu3 %v4536_v37  ;;  %v8526_v37 = vunpack.c.0.s8 %v6092_v46  ;;  %vm2544_vm7 = vcmp.ne.s32.totalorder %v6904_v57, %v5797_v3  ;;  %v8583_v57 = vld [vmem:[#allocation31_spill] sm:$0xff] }
 0x2f6   : > { %v8502_v9 = vunpack.c.0.s8 %v8501_v33  ;;  %v8503_v60 = vunpack.c.1.s8 %v8501_v33  ;;  %v8509_v33 = vunpack.c.0.s8 %v5597_v32  ;;  %vm7194_vm10 = vmpackc.low %vm2544_vm7, %vm2543_vm14 }
 0x2f7   : > { %8490 = vst [vmem:[#allocation131_spill] sm:$0xff] %v6896_v52  ;;  %v6916_v4 = vunpack.i.l.s16 %v8496_v13  ;;  %2154 = vperm.xlu1 %4719, %v6896_v52   ;;  %v8500_v13 = vunpack.c.1.s8 %v8498_v14  ;;  %v8507_v14 = vunpack.c.0.s8 %v5592_v26 }
 0x2f8   : > { %3831 = vst.msk [vmem:[#allocation2 + $0xc8] sm:$0xff] %vm3051_vm15, %v6896_v52  ;;  %v6939_v30 = vunpack.i.l.s16 %v8502_v9  ;;  %v6943_v12 = vunpack.i.l.s16 %v8503_v60  ;;  %v8504_v52 = vld [vmem:[#allocation13_spill] sm:$0xff]  ;;  %v8508_v9 = vunpack.c.1.s8 %v5592_v26  ;;  %v4527_v26 = vld [vmem:[%s5300_s19 + $0x8] sm:$0xff] }
 0x2f9   : > { %v6935_v1 = vunpack.i.l.s16 %v8500_v13  ;;  %v8505_v36 = vunpack.c.0.s8 %v8504_v52  ;;  %v8506_v20 = vunpack.c.1.s8 %v8504_v52  ;;  %v6955_v13 = vunpack.i.l.s16 %v8507_v14  ;;  %2179 = vperm.xlu2 %4721, %v6813_v2   ;;  %v8512_v14 = vld [vmem:[#allocation17_spill] sm:$0xff]  ;;  %3570 = vmatpush.bf16.msra.mxu0 %v4527_v26 }
 0x2fa   : > { %v6959_v17 = vunpack.i.l.s16 %v8508_v9  ;;  %v2035_v60 = vpop.permute.xlu0 %2034  ;;  %v8510_v52 = vunpack.c.1.s8 %v5597_v32  ;;  %v4535_v9 = vld [vmem:[%s5300_s19 + $0x48] sm:$0xff]  ;;  %v8514_v2 = vunpack.c.0.s8 %v5600_v34  ;;  %v8518_v32 = vunpack.c.0.s8 %v5619_v45  ;;  %4643 = vmatpush.bf16.msra.mxu2 %v4527_v26  ;;  %v4526_v26 = vld [vmem:[%s5300_s19] sm:$0xff] }
 0x2fb   : > { %v6947_v41 = vunpack.i.l.s16 %v8505_v36  ;;  %v6951_v55 = vunpack.i.l.s16 %v8506_v20  ;;  %v6964_v36 = vunpack.i.l.s16 %v8509_v33  ;;  %v2189_v63 = vsub.f32 %v8511_v44, %v2035_v60  ;;  %3659 = vmatpush.bf16.msra.mxu1 %v4535_v9  ;;  %4651 = vmatpush.bf16.msra.mxu3 %v4535_v9 }
 0x2fc   : > { %v6968_v20 = vunpack.i.l.s16 %v8510_v52  ;;  %v2190_v54 = vsub.f32 %v8512_v14, %v2035_v60  ;;  %v6978_v15 = vunpack.i.l.s16 %v8514_v2  ;;  %v8516_v33 = vunpack.c.1.s8 %v5600_v34 }
 0x2fd   : > { %v6986_v52 = vunpack.i.l.s16 %v8518_v32  ;;  %v8520_v44 = vunpack.c.1.s8 %v5619_v45  ;;  %v8521_v14 = vunpack.c.0.s8 %v5994_v7  ;;  %v8523_v2 = vunpack.c.1.s8 %v5994_v7  ;;  %v1889_v32 = vpop.xlane.xlu2 %1888  ;;  %3571 = vmatpush.bf16.msra.mxu0 %v4526_v26 }
 0x2fe   : > { %8515 = vst [vmem:[#allocation11_spill] sm:$0xff] %v6978_v15  ;;  %v6982_v59 = vunpack.i.l.s16 %v8516_v33  ;;  %v8524_v34 = vunpack.c.0.s8 %v6058_v35  ;;  %v7017_v7 = vmax.f32 %v6972_v61, %v1889_v32  ;;  %v8536_v32 = vunpack.c.1.s8 %v6153_v40  ;;  %4644 = vmatpush.bf16.msra.mxu2 %v4526_v26 }
 0x2ff   : > { %8519 = vst [vmem:[#allocation13_spill] sm:$0xff] %v6986_v52  ;;  %v6990_v60 = vunpack.i.l.s16 %v8520_v44  ;;  %v6994_v49 = vunpack.i.l.s16 %v8521_v14  ;;  %v6998_v15 = vunpack.i.l.s16 %v8523_v2  ;;  %v8525_v52 = vunpack.c.1.s8 %v6058_v35 }
 0x300   : > { %8517 = vst [vmem:[#allocation12_spill] sm:$0xff] %v6982_v59  ;;  %v7002_v33 = vunpack.i.l.s16 %v8524_v34  ;;  %v2252_v59 = vpack.c.bf16 %v2190_v54, %v2189_v63  ;;  %v7010_v44 = vunpack.i.l.s16 %v8526_v37  ;;  %v8528_v14 = vunpack.c.1.s8 %v6092_v46  ;;  %2169 = vperm.xlu1 %4719, %v7017_v7  }
 0x301   : > { %8522 = vst [vmem:[#allocation16_spill] sm:$0xff] %v6994_v49  ;;  %v7006_v45 = vunpack.i.l.s16 %v8525_v52  ;;  %v8531_v54 = vunpack.c.0.s8 %v6120_v23  ;;  %v8532_v35 = vunpack.c.1.s8 %v6120_v23  ;;  %v8534_v46 = vunpack.c.0.s8 %v6153_v40 }
 0x302   : > { %8527 = vst [vmem:[#allocation17_spill] sm:$0xff] %v7010_v44  ;;  %v7014_v49 = vunpack.i.l.s16 %v8528_v14  ;;  %v2285_v2 = vunpack.c.l.bf16 %v2252_v59  ;;  %v2286_v34 = vunpack.c.h.bf16 %v2252_v59  ;;  %v7033_v14 = vunpack.i.l.s16 %v8536_v32  ;;  %v2030_v59 = vpop.permute.xlu1 %2029  ;;  %v8540_v32 = vld [vmem:[#allocation14_spill] sm:$0xff] }
 0x303   : > { %8530 = vst [vmem:[#allocation133_spill] sm:$0xff] %v7017_v7  ;;  %v7021_v63 = vunpack.i.l.s16 %v8531_v54  ;;  %v7025_v52 = vunpack.i.l.s16 %v8532_v35  ;;  %v7029_v37 = vunpack.i.l.s16 %v8534_v46  ;;  %v4534_v35 = vld [vmem:[%s5300_s19 + $0x40] sm:$0xff]  ;;  %v8543_v23 = vunpack.c.0.s8 %v6206_v43 }
 0x304   : > { %8529 = vst [vmem:[#allocation132_spill] sm:$0xff] %v7014_v49  ;;  %v8538_v49 = vunpack.c.0.s8 %v6187_v19  ;;  %v2351_v46 = vmul.f32 1.442695, %v2285_v2  ;;  %v2353_v40 = vmul.f32 1.442695, %v2286_v34  ;;  %v8545_v9 = vunpack.c.0.s8 %v6249_v29  ;;  %3660 = vmatpush.bf16.msra.mxu1 %v4534_v35  ;;  %4652 = vmatpush.bf16.msra.mxu3 %v4534_v35 }
 0x305   : > { %8533 = vst [vmem:[#allocation134_spill] sm:$0xff] %v7025_v52  ;;  %v7054_v61 = vunpack.i.l.s16 %v8543_v23  ;;  %v8547_v34 = vunpack.c.1.s8 %v6249_v29  ;;  %v8553_v29 = vunpack.c.1.s8 %v6221_v48  ;;  %v8555_v26 = vunpack.c.1.s8 %v6330_v58 }
 0x306   : > { %8535 = vst [vmem:[#allocation135_spill] sm:$0xff] %v7029_v37  ;;  %v7037_v54 = vunpack.i.l.s16 %v8538_v49  ;;  %v8541_v37 = vld [vmem:[#allocation15_spill] sm:$0xff]  ;;  %v8542_v49 = vunpack.c.1.s8 %v6187_v19  ;;  %v7062_v2 = vunpack.i.l.s16 %v8545_v9  ;;  %v8549_v19 = vunpack.c.0.s8 %v6221_v48 }
 0x307   : > { %8537 = vst [vmem:[#allocation136_spill] sm:$0xff] %v7033_v14  ;;  %v2187_v14 = vsub.f32 %v8540_v32, %v2030_v59  ;;  %v2188_v44 = vsub.f32 %v8541_v37, %v2030_v59  ;;  %v7066_v37 = vunpack.i.l.s16 %v8547_v34  ;;  %4722 = vpow2.f32 %v2351_v46  ;;  %v7072_v32 = vld [vmem:[#allocation2 + $0xf8] sm:$0xff] }
 0x308   : > { %8539 = vst [vmem:[#allocation137_spill] sm:$0xff] %v7037_v54  ;;  %v7050_v54 = vunpack.i.l.s16 %v8542_v49  ;;  %v7070_v59 = vunpack.i.l.s16 %v8549_v19  ;;  %v8552_v49 = vunpack.c.1.s8 %v6257_v31  ;;  %v7084_v34 = vunpack.i.l.s16 %v8553_v29 }
 0x309   : > { %3834 = vst.msk [vmem:[#allocation2 + $0xe0] sm:$0xff] %vm3051_vm15, %v7017_v7  ;;  %v8544_v7 = vunpack.c.1.s8 %v6206_v43  ;;  %v2251_v23 = vpack.c.bf16 %v2188_v44, %v2187_v14  ;;  %v8551_v43 = vunpack.c.0.s8 %v6257_v31  ;;  %4724 = vpow2.f32 %v2353_v40 }
 0x30a   : > { %8546 = vst [vmem:[#allocation14_spill] sm:$0xff] %v7062_v2  ;;  %v7080_v9 = vunpack.i.l.s16 %v8552_v49  ;;  %v8554_v44 = vunpack.c.0.s8 %v6330_v58  ;;  %v7092_v46 = vunpack.i.l.s16 %v8555_v26  ;;  %v8556_v31 = vunpack.c.0.s8 %v6349_v39 }
 0x30b   : > { %v7058_v52 = vunpack.i.l.s16 %v8544_v7  ;;  %8548 = vst [vmem:[#allocation15_spill] sm:$0xff] %v7066_v37  ;;  %v7076_v7 = vunpack.i.l.s16 %v8551_v43  ;;  %v2283_v19 = vunpack.c.l.bf16 %v2251_v23  ;;  %v2284_v43 = vunpack.c.h.bf16 %v2251_v23  ;;  %v1898_v37 = vpop.xlane.xlu2 %1897 }
 0x30c   : > { %8550 = vst [vmem:[#allocation138_spill] sm:$0xff] %v7072_v32  ;;  %v7088_v14 = vunpack.i.l.s16 %v8554_v44  ;;  %v7096_v49 = vunpack.i.l.s16 %v8556_v31  ;;  %v8558_v48 = vunpack.c.1.s8 %v6349_v39  ;;  %v8560_v35 = vunpack.c.0.s8 %v6397_v38 }
 0x30d   : > { %v7107_v44 = vmax.f32 %v7072_v32, %v1898_v37  ;;  %v8563_v58 = vunpack.c.1.s8 %v6397_v38  ;;  %v8565_v23 = vsub.f32 %v6572_v53, %v6575_v27  ;;  %v2349_v2 = vmul.f32 1.442695, %v2284_v43  ;;  %v2045_v38 = vpop.permute.xlu1 %2044  ;;  %v4723_v53 = vpop.eup %4722 }
 0x30e   : > { %8557 = vst [vmem:[#allocation139_spill] sm:$0xff] %v7096_v49  ;;  %v7100_v29 = vunpack.i.l.s16 %v8558_v48  ;;  %v7104_v40 = vunpack.i.l.s16 %v8560_v35  ;;  %v2347_v49 = vmul.f32 1.442695, %v2283_v19  ;;  %v8566_v39 = vsub.f32 %v6589_v24, %v6598_v56 }
 0x30f   : > { %8562 = vst [vmem:[#allocation142_spill] sm:$0xff] %v7107_v44  ;;  %v7111_v26 = vunpack.i.l.s16 %v8563_v58  ;;  %v1963_v31 = vmul.f32 1.442695, %v8565_v23  ;;  %2184 = vperm.xlu1 %4719, %v7107_v44   ;;  %v8567_v27 = vunpack.c.0.s8 %v6193_v6  ;;  %v2193_v56 = vsub.f32 %v5819_v21, %v2045_v38  ;;  %v4725_v19 = vpop.eup %4724 }
 0x310   : > { %8559 = vst [vmem:[#allocation140_spill] sm:$0xff] %v7100_v29  ;;  %v1965_v48 = vmul.f32 1.442695, %v8566_v39  ;;  %4726 = vpow2.f32 %v2347_v49  ;;  %v2194_v37 = vsub.f32 %v5823_v0, %v2045_v38  ;;  %v8568_v43 = vunpack.c.1.s8 %v6193_v6 }
 0x311   : > { %8561 = vst [vmem:[#allocation141_spill] sm:$0xff] %v7104_v40  ;;  %v7130_v24 = vunpack.i.l.s16 %v8567_v27  ;;  %v8569_v23 = vunpack.c.0.s8 %v6467_v42  ;;  %v8571_v35 = vunpack.c.1.s8 %v6467_v42  ;;  %4728 = vpow2.f32 %v2349_v2 }
 0x312   : > { %8564 = vst [vmem:[#allocation143_spill] sm:$0xff] %v7111_v26  ;;  %v7136_v58 = vunpack.i.l.s16 %v8568_v43  ;;  %v8573_v49 = vunpack.c.0.s8 %v6481_v28  ;;  %4730 = vpow2.f32 %v1963_v31  ;;  %v2254_v21 = vpack.c.bf16 %v2194_v37, %v2193_v56 }
 0x313   : > { %3837 = vst.msk [vmem:[#allocation2 + $0xf8] sm:$0xff] %vm3051_vm15, %v7107_v44  ;;  %v7140_v39 = vunpack.i.l.s16 %v8569_v23  ;;  %v7144_v44 = vunpack.i.l.s16 %v8571_v35  ;;  %v2476_v0 = vpack.c.bf16 %v4725_v19, %v4723_v53  ;;  %v8574_v6 = vunpack.c.1.s8 %v6481_v28  ;;  %v2070_v53 = vpop.permute.xlu0 %2069  ;;  %v2040_v19 = vpop.permute.xlu2 %2039 }
 0x314   : > { %v7148_v27 = vunpack.i.l.s16 %v8573_v49  ;;  %v8575_v2 = vunpack.c.0.s8 %v6531_v62  ;;  %v8576_v38 = vunpack.c.1.s8 %v6531_v62  ;;  %4732 = vpow2.f32 %v1965_v48 }
 0x315   : > { %8570 = vst [vmem:[#allocation144_spill] sm:$0xff] %v7140_v39  ;;  %v7158_v42 = vunpack.i.l.s16 %v8574_v6  ;;  %v2289_v56 = vunpack.c.l.bf16 %v2254_v21  ;;  %v2290_v51 = vunpack.c.h.bf16 %v2254_v21  ;;  %v2203_v37 = vsub.f32 %v5998_v47, %v2070_v53 }
 0x316   : > { %8572 = vst [vmem:[#allocation145_spill] sm:$0xff] %v7144_v44  ;;  %v7162_v35 = vunpack.i.l.s16 %v8575_v2  ;;  %v7166_v31 = vunpack.i.l.s16 %v8576_v38  ;;  %v2204_v25 = vsub.f32 %v6002_v5, %v2070_v53  ;;  %v2191_v28 = vsub.f32 %v5833_v8, %v2040_v19  ;;  %v4727_v62 = vpop.eup %4726  ;;  %v2055_v5 = vpop.permute.xlu1 %2054  ;;  %v8585_v44 = vld [vmem:[#allocation19_spill] sm:$0xff] }
 0x317   : > { %v2192_v43 = vsub.f32 %v5837_v22, %v2040_v19  ;;  %v7174_v23 = vsel %vm2552_vm12, %v2476_v0, 0  ;;  %v2359_v49 = vmul.f32 1.442695, %v2289_v56  ;;  %v2361_v48 = vmul.f32 1.442695, %v2290_v51  ;;  %v4729_v47 = vpop.eup %4728 }
 0x318   : > { %8577 = vst [vmem:[#allocation146_spill] sm:$0xff] %v7166_v31  ;;  %v2259_v6 = vpack.c.bf16 %v2204_v25, %v2203_v37  ;;  %v3342_v2 = vunpack.c.l.b16 %v7174_v23  ;;  %v2861_v8 = vunpack.c.l.bf16 %v7174_v23  ;;  %v2862_v22 = vunpack.c.h.bf16 %v7174_v23  ;;  %v7181_v38 = vpop.eup %4730 }
 0x319   : > { %v2253_v21 = vpack.c.bf16 %v2192_v43, %v2191_v28  ;;  %8578 = vst [vmem:[#allocation147_spill] sm:$0xff] %v7181_v38  ;;  %v2197_v56 = vsub.f32 %v5903_v11, %v2055_v5  ;;  %v3343_v51 = vunpack.c.h.b16 %v7174_v23  ;;  %4734 = vpow2.f32 %v2359_v49  ;;  %v8580_v28 = vld [vmem:[#allocation21_spill] sm:$0xff]  ;;  %v8584_v38 = vld [vmem:[#allocation32_spill] sm:$0xff] }
 0x31a   : > { %v2299_v0 = vunpack.c.l.bf16 %v2259_v6  ;;  %v2300_v53 = vunpack.c.h.bf16 %v2259_v6  ;;  %v7185_v37 = vpop.eup %4732  ;;  %v2198_v43 = vsub.f32 %v8580_v28, %v2055_v5  ;;  %4736 = vpow2.f32 %v2361_v48 }
 0x31b   : > { %8579 = vst [vmem:[#allocation148_spill] sm:$0xff] %v7185_v37  ;;  %v2287_v25 = vunpack.c.l.bf16 %v2253_v21  ;;  %v2288_v19 = vunpack.c.h.bf16 %v2253_v21  ;;  %v2475_v6 = vpack.c.bf16 %v4729_v47, %v4727_v62  ;;  %vm2564_vm13 = vcmp.ne.s32.totalorder %v6916_v4, %v5794_v10  ;;  %v2085_v5 = vpop.permute.xlu0 %2084 }
 0x31c   : > { %v2379_v11 = vmul.f32 1.442695, %v2299_v0  ;;  %v2381_v23 = vmul.f32 1.442695, %v2300_v53  ;;  %v2256_v50 = vpack.c.bf16 %v2198_v43, %v2197_v56  ;;  %v7202_v28 = vadd.f32 %v2862_v22, %v2861_v8  ;;  %v2050_v0 = vpop.permute.xlu2 %2049  ;;  %v8586_v56 = vld [vmem:[#allocation20_spill] sm:$0xff]  ;;  %vm7229_vm2 = vmpackc.low %vm2565_vm0, %vm2564_vm13 }
 0x31d   : > { %v2355_v49 = vmul.f32 1.442695, %v2287_v25  ;;  %v2357_v21 = vmul.f32 1.442695, %v2288_v19  ;;  %v2209_v37 = vsub.f32 %v8583_v57, %v2085_v5  ;;  %v2210_v48 = vsub.f32 %v8584_v38, %v2085_v5 }
 0x31e   : > { %4738 = vpow2.f32 %v2379_v11  ;;  %v2763_v62 = vsel %vm7194_vm10, %v2475_v6, 0  ;;  %v2293_v47 = vunpack.c.l.bf16 %v2256_v50  ;;  %v2294_v53 = vunpack.c.h.bf16 %v2256_v50  ;;  %v2065_v38 = vpop.permute.xlu1 %2064 }
 0x31f   : > { %4740 = vpow2.f32 %v2381_v23  ;;  %v2195_v39 = vsub.f32 %v8585_v44, %v2050_v0  ;;  %v2262_v25 = vpack.c.bf16 %v2210_v48, %v2209_v37  ;;  %v2196_v19 = vsub.f32 %v8586_v56, %v2050_v0  ;;  %v4735_v22 = vpop.eup %4734  ;;  %v8587_v44 = vld [vmem:[#allocation25_spill] sm:$0xff]  ;;  %v8588_v56 = vld [vmem:[#allocation26_spill] sm:$0xff] }
 0x320   : > { %4742 = vpow2.f32 %v2355_v49  ;;  %v2859_v8 = vunpack.c.l.bf16 %v2763_v62  ;;  %v2367_v43 = vmul.f32 1.442695, %v2293_v47  ;;  %v2369_v11 = vmul.f32 1.442695, %v2294_v53  ;;  %v4737_v5 = vpop.eup %4736 }
 0x321   : > { %4744 = vpow2.f32 %v2357_v21  ;;  %v2860_v57 = vunpack.c.h.bf16 %v2763_v62  ;;  %v2305_v29 = vunpack.c.l.bf16 %v2262_v25  ;;  %v2306_v32 = vunpack.c.h.bf16 %v2262_v25 }
 0x322   : > { %v2255_v6 = vpack.c.bf16 %v2196_v19, %v2195_v39  ;;  %v3340_v23 = vunpack.c.l.b16 %v2763_v62  ;;  %4746 = vpow2.f32 %v2367_v43  ;;  %v3341_v26 = vunpack.c.h.b16 %v2763_v62  ;;  %2927 = vadd.xlane.f32.xlu2 %v7202_v28 }
 0x323   : > { %v2923_v50 = vadd.f32 %v2860_v57, %v2859_v8  ;;  %v2201_v49 = vsub.f32 %v8587_v44, %v2065_v38  ;;  %4748 = vpow2.f32 %v2369_v11  ;;  %v2391_v48 = vmul.f32 1.442695, %v2305_v29  ;;  %v2100_v62 = vpop.permute.xlu0 %2099  ;;  %v8589_v11 = vld [vmem:[#allocation37_spill] sm:$0xff]  ;;  %v8590_v57 = vld [vmem:[#allocation38_spill] sm:$0xff] }
 0x324   : > { %v7211_v37 = vpop.eup %4738  ;;  %v2393_v0 = vmul.f32 1.442695, %v2306_v32  ;;  %v2291_v21 = vunpack.c.l.bf16 %v2255_v6  ;;  %v2292_v53 = vunpack.c.h.bf16 %v2255_v6  ;;  %v3404_v39 = vpack.c.b16 %v3342_v2, %v3340_v23  ;;  %v2060_v44 = vpop.permute.xlu2 %2059  ;;  %v8591_v2 = vld [vmem:[#allocation23_spill] sm:$0xff]  ;;  %v8594_v23 = vld [vmem:[#allocation24_spill] sm:$0xff] }
 0x325   : > { %v7215_v47 = vpop.eup %4740  ;;  %2924 = vadd.xlane.f32.xlu0 %v2923_v50  ;;  %v3405_v25 = vpack.c.b16 %v3343_v51, %v3341_v26  ;;  %v2202_v19 = vsub.f32 %v8588_v56, %v2065_v38  ;;  %4750 = vpow2.f32 %v2391_v48  ;;  %v2215_v29 = vsub.f32 %v8589_v11, %v2100_v62 }
 0x326   : > { %v7218_v8 = vpop.eup %4742  ;;  %v2363_v43 = vmul.f32 1.442695, %v2291_v21  ;;  %v2216_v32 = vsub.f32 %v8590_v57, %v2100_v62  ;;  %4752 = vpow2.f32 %v2393_v0  ;;  %v2365_v31 = vmul.f32 1.442695, %v2292_v53  ;;  %3572 = vmatmul.bf16.vlgmr.msra.gmra.mxu0 %v3404_v39  ;;  %v2080_v0 = vpop.permute.xlu1 %2079 }
 0x327   : > { %v4745_v40 = vpop.eup %4744  ;;  %3661 = vmatmul.bf16.vlgmr.msra.gmra.mxu1 %v3405_v25  ;;  %v2258_v6 = vpack.c.bf16 %v2202_v19, %v2201_v49  ;;  %v2199_v26 = vsub.f32 %v8591_v2, %v2060_v44  ;;  %vm2571_vm3 = vcmp.ne.s32.totalorder %v6939_v30, %v5794_v10  ;;  %vm2572_vm8 = vcmp.ne.s32.totalorder %v6943_v12, %v5797_v3  ;;  %v8596_v2 = vld [vmem:[#allocation30_spill] sm:$0xff] }
 0x328   : > { %4754 = vpow2.f32 %v2363_v43  ;;  %v2265_v38 = vpack.c.bf16 %v2216_v32, %v2215_v29  ;;  %v2200_v50 = vsub.f32 %v8594_v23, %v2060_v44  ;;  %v2478_v49 = vpack.c.bf16 %v4737_v5, %v4735_v22  ;;  %v7238_v48 = vpop.eup %4746  ;;  %v8595_v44 = vld [vmem:[#allocation29_spill] sm:$0xff]  ;;  %vm7270_vm13 = vmpackc.low %vm2572_vm8, %vm2571_vm3 }
 0x329   : > { %4756 = vpow2.f32 %v2365_v31  ;;  %v2297_v4 = vunpack.c.l.bf16 %v2258_v6  ;;  %v2298_v18 = vunpack.c.h.bf16 %v2258_v6  ;;  %v2477_v21 = vpack.c.bf16 %v4745_v40, %v7218_v8  ;;  %v7241_v53 = vpop.eup %4748 }
 0x32a   : > { %v2311_v39 = vunpack.c.l.bf16 %v2265_v38  ;;  %v2312_v25 = vunpack.c.h.bf16 %v2265_v38  ;;  %v2257_v56 = vpack.c.bf16 %v2200_v50, %v2199_v26  ;;  %v2766_v19 = vsel %vm7229_vm2, %v2478_v49, 0 }
 0x32b   : > { %v2375_v62 = vmul.f32 1.442695, %v2297_v4  ;;  %v2377_v43 = vmul.f32 1.442695, %v2298_v18  ;;  %v2865_v11 = vunpack.c.l.bf16 %v2766_v19  ;;  %v2866_v22 = vunpack.c.h.bf16 %v2766_v19  ;;  %v7245_v5 = vpop.eup %4750  ;;  %v8597_v4 = vld [vmem:[#allocation27_spill] sm:$0xff] }
 0x32c   : > { %v2403_v31 = vmul.f32 1.442695, %v2311_v39  ;;  %v2405_v29 = vmul.f32 1.442695, %v2312_v25  ;;  %v2295_v57 = vunpack.c.l.bf16 %v2257_v56  ;;  %v2296_v32 = vunpack.c.h.bf16 %v2257_v56  ;;  %v7248_v40 = vpop.eup %4752  ;;  %v2075_v50 = vpop.permute.xlu2 %2074  ;;  %v8598_v39 = vld [vmem:[#allocation28_spill] sm:$0xff] }
 0x32d   : > { %vm2592_vm12 = vcmp.ne.s32.totalorder %v6964_v36, %v5794_v10  ;;  %vm2593_vm14 = vcmp.ne.s32.totalorder %v6968_v20, %v5797_v3  ;;  %4758 = vpow2.f32 %v2375_v62  ;;  %v2932_v8 = vadd.f32 %v2866_v22, %v2865_v11 }
 0x32e   : > { %v2207_v6 = vsub.f32 %v8595_v44, %v2080_v0  ;;  %v2208_v26 = vsub.f32 %v8596_v2, %v2080_v0  ;;  %v4755_v51 = vpop.eup %4754  ;;  %4760 = vpow2.f32 %v2377_v43  ;;  %v2371_v38 = vmul.f32 1.442695, %v2295_v57  ;;  %v2095_v22 = vpop.permute.xlu1 %2094  ;;  %vm7292_vm0 = vmpackc.low %vm2593_vm14, %vm2592_vm12 }
 0x32f   : > { %v2373_v23 = vmul.f32 1.442695, %v2296_v32  ;;  %vm2558_vm7 = vcmp.ne.s32.totalorder %v6935_v1, %v5797_v3  ;;  %v4757_v28 = vpop.eup %4756  ;;  %4762 = vpow2.f32 %v2403_v31  ;;  %2933 = vadd.xlane.f32.xlu0 %v2932_v8  ;;  %v2205_v18 = vsub.f32 %v8597_v4, %v2075_v50  ;;  %v8599_v32 = vld [vmem:[#allocation35_spill] sm:$0xff] }
 0x330   : > { %v2261_v49 = vpack.c.bf16 %v2208_v26, %v2207_v6  ;;  %v2206_v25 = vsub.f32 %v8598_v39, %v2075_v50  ;;  %vm2559_vm10 = vmpackc.low %vm2558_vm7, %vm2557_vm11  ;;  %4764 = vpow2.f32 %v2405_v29  ;;  %v3346_v56 = vunpack.c.l.b16 %v2766_v19 }
 0x331   : > { %v2765_v0 = vsel %vm2559_vm10, %v2477_v21, 0  ;;  %v3347_v62 = vunpack.c.h.b16 %v2766_v19  ;;  %4766 = vpow2.f32 %v2371_v38  ;;  %v2213_v8 = vsub.f32 %v8599_v32, %v2095_v22 }
 0x332   : > { %v2303_v43 = vunpack.c.l.bf16 %v2261_v49  ;;  %v2304_v11 = vunpack.c.h.bf16 %v2261_v49  ;;  %v2260_v1 = vpack.c.bf16 %v2206_v25, %v2205_v18  ;;  %4768 = vpow2.f32 %v2373_v23  ;;  %v8602_v23 = vld [vmem:[#allocation36_spill] sm:$0xff] }
 0x333   : > { %v3344_v31 = vunpack.c.l.b16 %v2765_v0  ;;  %v3345_v57 = vunpack.c.h.b16 %v2765_v0  ;;  %v4759_v44 = vpop.eup %4758  ;;  %v2214_v50 = vsub.f32 %v8602_v23, %v2095_v22  ;;  %v2479_v49 = vpack.c.bf16 %v4757_v28, %v4755_v51 }
 0x334   : > { %v2387_v21 = vmul.f32 1.442695, %v2303_v43  ;;  %v2389_v19 = vmul.f32 1.442695, %v2304_v11  ;;  %v2301_v29 = vunpack.c.l.bf16 %v2260_v1  ;;  %v2302_v6 = vunpack.c.h.bf16 %v2260_v1  ;;  %v4761_v2 = vpop.eup %4760  ;;  %v2090_v11 = vpop.permute.xlu2 %2089  ;;  %v8603_v1 = vld [vmem:[#allocation33_spill] sm:$0xff] }
 0x335   : > { %v3406_v26 = vpack.c.b16 %v3346_v56, %v3344_v31  ;;  %v3407_v38 = vpack.c.b16 %v3347_v62, %v3345_v57  ;;  %v7275_v4 = vpop.eup %4762  ;;  %v2863_v12 = vunpack.c.l.bf16 %v2765_v0  ;;  %v2264_v25 = vpack.c.bf16 %v2214_v50, %v2213_v8  ;;  %v8606_v8 = vld [vmem:[#allocation34_spill] sm:$0xff] }
 0x336   : > { %4770 = vpow2.f32 %v2387_v21  ;;  %v2383_v30 = vmul.f32 1.442695, %v2301_v29  ;;  %v2385_v18 = vmul.f32 1.442695, %v2302_v6  ;;  %v7277_v39 = vpop.eup %4764  ;;  %v7281_v43 = vsel %vm7270_vm13, %v2479_v49, 0 }
 0x337   : > { %4772 = vpow2.f32 %v2389_v19  ;;  %v2864_v56 = vunpack.c.h.bf16 %v2765_v0  ;;  %v4767_v62 = vpop.eup %4766  ;;  %3577 = vmatmul.bf16.gmra.mxu0 %v3406_v26  ;;  %3666 = vmatmul.bf16.gmra.mxu1 %v3407_v38  ;;  %v2867_v51 = vunpack.c.l.bf16 %v7281_v43  ;;  %v2868_v28 = vunpack.c.h.bf16 %v7281_v43 }
 0x338   : > { %4774 = vpow2.f32 %v2383_v30  ;;  %v2211_v22 = vsub.f32 %v8603_v1, %v2090_v11  ;;  %v4769_v31 = vpop.eup %4768  ;;  %v2309_v0 = vunpack.c.l.bf16 %v2264_v25  ;;  %v2310_v32 = vunpack.c.h.bf16 %v2264_v25  ;;  %v8608_v1 = vld [vmem:[#allocation40_spill] sm:$0xff] }
 0x339   : > { %4776 = vpow2.f32 %v2385_v18  ;;  %v2212_v16 = vsub.f32 %v8606_v8, %v2090_v11  ;;  %v2935_v21 = vadd.f32 %v2868_v28, %v2867_v51  ;;  %v2929_v19 = vadd.f32 %v2864_v56, %v2863_v12  ;;  %v8607_v51 = vld [vmem:[#allocation39_spill] sm:$0xff] }
 0x33a   : > { %v2482_v29 = vpack.c.bf16 %v4761_v2, %v4759_v44  ;;  %v2481_v6 = vpack.c.bf16 %v4769_v31, %v4767_v62  ;;  %v2399_v26 = vmul.f32 1.442695, %v2309_v0  ;;  %v2401_v38 = vmul.f32 1.442695, %v2310_v32 }
 0x33b   : > { %v2263_v23 = vpack.c.bf16 %v2212_v16, %v2211_v22  ;;  %vm2585_vm11 = vcmp.ne.s32.totalorder %v6955_v13, %v5794_v10  ;;  %2936 = vadd.xlane.f32.xlu2 %v2935_v21  ;;  %2930 = vadd.xlane.f32.xlu1 %v2929_v19  ;;  %vm2586_vm2 = vcmp.ne.s32.totalorder %v6959_v17, %v5797_v3  ;;  %v3348_v57 = vunpack.c.l.b16 %v7281_v43 }
 0x33c   : > { %v4771_v36 = vpop.eup %4770  ;;  %v7301_v20 = vsel %vm7292_vm0, %v2482_v29, 0  ;;  %v2480_v44 = vpack.c.bf16 %v7241_v53, %v7238_v48  ;;  %vm2578_vm3 = vcmp.ne.s32.totalorder %v6947_v41, %v5794_v10  ;;  %4778 = vpow2.f32 %v2399_v26  ;;  %vm2587_vm8 = vmpackc.low %vm2586_vm2, %vm2585_vm11  ;;  %v2105_v56 = vpop.permute.xlu2 %2104 }
 0x33d   : > { %v4773_v2 = vpop.eup %4772  ;;  %v2307_v50 = vunpack.c.l.bf16 %v2263_v23  ;;  %v2308_v13 = vunpack.c.h.bf16 %v2263_v23  ;;  %v2873_v49 = vunpack.c.l.bf16 %v7301_v20  ;;  %4780 = vpow2.f32 %v2401_v38 }
 0x33e   : > { %v4775_v30 = vpop.eup %4774  ;;  %v2874_v18 = vunpack.c.h.bf16 %v7301_v20  ;;  %v7311_v12 = vsel %vm2587_vm8, %v2481_v6, 0  ;;  %vm2579_vm12 = vcmp.ne.s32.totalorder %v6951_v55, %v5797_v3  ;;  %v2217_v28 = vsub.f32 %v8607_v51, %v2105_v56 }
 0x33f   : > { %v4777_v17 = vpop.eup %4776  ;;  %v2395_v48 = vmul.f32 1.442695, %v2307_v50  ;;  %v2397_v53 = vmul.f32 1.442695, %v2308_v13  ;;  %v2871_v25 = vunpack.c.l.bf16 %v7311_v12  ;;  %v2872_v11 = vunpack.c.h.bf16 %v7311_v12  ;;  %vm2580_vm14 = vmpackc.low %vm2579_vm12, %vm2578_vm3 }
 0x340   : > { %v2944_v62 = vadd.f32 %v2874_v18, %v2873_v49  ;;  %v2218_v22 = vsub.f32 %v8608_v1, %v2105_v56  ;;  %v2768_v31 = vsel %vm2580_vm14, %v2480_v44, 0  ;;  %v3349_v8 = vunpack.c.h.b16 %v7281_v43  ;;  %v8610_v43 = vld [vmem:[#allocation13_spill] sm:$0xff] }
 0x341   : > { %4782 = vpow2.f32 %v2395_v48  ;;  %v2941_v55 = vadd.f32 %v2872_v11, %v2871_v25  ;;  %v3350_v0 = vunpack.c.l.b16 %v2768_v31  ;;  %v3351_v16 = vunpack.c.h.b16 %v2768_v31  ;;  %v2115_v11 = vpop.permute.xlu0 %2114 }
 0x342   : > { %4784 = vpow2.f32 %v2397_v53  ;;  %v2266_v32 = vpack.c.bf16 %v2218_v22, %v2217_v28  ;;  %v4779_v21 = vpop.eup %4778  ;;  %v2869_v19 = vunpack.c.l.bf16 %v2768_v31  ;;  %v2870_v29 = vunpack.c.h.bf16 %v2768_v31  ;;  %v8613_v31 = vld [vmem:[#allocation41_spill] sm:$0xff] }
 0x343   : > { %2942 = vadd.xlane.f32.xlu0 %v2941_v55  ;;  %v3408_v41 = vpack.c.b16 %v3350_v0, %v3348_v57  ;;  %v2485_v6 = vpack.c.bf16 %v4773_v2, %v4771_v36  ;;  %v4781_v26 = vpop.eup %4780  ;;  %2945 = vadd.xlane.f32.xlu2 %v2944_v62  ;;  %v3409_v44 = vpack.c.b16 %v3351_v16, %v3349_v8  ;;  %v8611_v62 = vld [vmem:[#allocation11_spill] sm:$0xff]  ;;  %v8615_v57 = vld [vmem:[#allocation48_spill] sm:$0xff]  ;;  %v8616_v8 = vld [vmem:[#allocation49_spill] sm:$0xff] }
 0x344   : > { %v2313_v38 = vunpack.c.l.bf16 %v2266_v32  ;;  %v2314_v23 = vunpack.c.h.bf16 %v2266_v32  ;;  %v2484_v50 = vpack.c.bf16 %v4777_v17, %v4775_v30  ;;  %v2938_v13 = vadd.f32 %v2870_v29, %v2869_v19  ;;  %v2120_v17 = vpop.permute.xlu2 %2119 }
 0x345   : > { %v7326_v18 = vsel %vm5839_vm4, %v2485_v6, 0  ;;  %vm2606_vm7 = vcmp.ne.s32.totalorder %v8610_v43, %v5794_v10  ;;  %vm2607_vm10 = vcmp.ne.s32.totalorder %v6990_v60, %v5797_v3  ;;  %v2483_v56 = vpack.c.bf16 %v7215_v47, %v7211_v37  ;;  %v8612_v60 = vld [vmem:[#allocation12_spill] sm:$0xff]  ;;  %v8614_v37 = vld [vmem:[#allocation42_spill] sm:$0xff] }
 0x346   : > { %v2407_v48 = vmul.f32 1.442695, %v2313_v38  ;;  %v2409_v53 = vmul.f32 1.442695, %v2314_v23  ;;  %v2879_v36 = vunpack.c.l.bf16 %v7326_v18  ;;  %v2880_v2 = vunpack.c.h.bf16 %v7326_v18  ;;  %vm2608_vm13 = vmpackc.low %vm2607_vm10, %vm2606_vm7  ;;  %2939 = vadd.xlane.f32.xlu1 %v2938_v13 }
 0x347   : > { %v4783_v25 = vpop.eup %4782  ;;  %v7334_v30 = vsel %vm2608_vm13, %v2484_v50, 0  ;;  %vm2599_vm4 = vcmp.ne.s32.totalorder %v8611_v62, %v5794_v10  ;;  %vm2600_vm0 = vcmp.ne.s32.totalorder %v8612_v60, %v5797_v3  ;;  %3582 = vmatmul.bf16.gmra.mxu0 %v3408_v41  ;;  %3671 = vmatmul.bf16.gmra.mxu1 %v3409_v44  ;;  %v2223_v55 = vsub.f32 %v8613_v31, %v2120_v17 }
 0x348   : > { %v4785_v51 = vpop.eup %4784  ;;  %4786 = vpow2.f32 %v2407_v48  ;;  %v2953_v28 = vadd.f32 %v2880_v2, %v2879_v36  ;;  %v2877_v1 = vunpack.c.l.bf16 %v7334_v30  ;;  %v2878_v22 = vunpack.c.h.bf16 %v7334_v30  ;;  %vm2601_vm11 = vmpackc.low %vm2600_vm0, %vm2599_vm4 }
 0x349   : > { %4788 = vpow2.f32 %v2409_v53  ;;  %v2224_v47 = vsub.f32 %v8614_v37, %v2120_v17  ;;  %v2221_v0 = vsub.f32 %v8615_v57, %v2115_v11  ;;  %v2222_v16 = vsub.f32 %v8616_v8, %v2115_v11  ;;  %v2130_v60 = vpop.permute.xlu0 %2129  ;;  %v8619_v37 = vld [vmem:[#allocation44_spill] sm:$0xff] }
 0x34a   : > { %v2950_v32 = vadd.f32 %v2878_v22, %v2877_v1  ;;  %v7348_v19 = vsel %vm2601_vm11, %v2483_v56, 0  ;;  %v2488_v41 = vpack.c.bf16 %v4781_v26, %v4779_v21  ;;  %v2487_v23 = vpack.c.bf16 %v4785_v51, %v4783_v25  ;;  %v8618_v22 = vld [vmem:[#allocation43_spill] sm:$0xff]  ;;  %v8620_v57 = vld [vmem:[#allocation52_spill] sm:$0xff] }
 0x34b   : > { %v2269_v29 = vpack.c.bf16 %v2224_v47, %v2223_v55  ;;  %v2875_v6 = vunpack.c.l.bf16 %v7348_v19  ;;  %v2876_v38 = vunpack.c.h.bf16 %v7348_v19  ;;  %2954 = vadd.xlane.f32.xlu2 %v2953_v28  ;;  %v2268_v44 = vpack.c.bf16 %v2222_v16, %v2221_v0 }
 0x34c   : > { %2951 = vadd.xlane.f32.xlu0 %v2950_v32  ;;  %v7354_v13 = vsel %vm5952_vm9, %v2488_v41, 0  ;;  %vm2627_vm2 = vcmp.ne.s32.totalorder %v7002_v33, %v5794_v10  ;;  %vm2628_vm3 = vcmp.ne.s32.totalorder %v7006_v45, %v5797_v3  ;;  %v2135_v62 = vpop.permute.xlu2 %2134  ;;  %v2227_v0 = vsub.f32 %v8620_v57, %v2130_v60  ;;  %v8621_v32 = vld [vmem:[#allocation53_spill] sm:$0xff]  ;;  %v8626_v57 = vld [vmem:[#allocation56_spill] sm:$0xff] }
 0x34d   : > { %v2319_v21 = vunpack.c.l.bf16 %v2269_v29  ;;  %v2320_v26 = vunpack.c.h.bf16 %v2269_v29  ;;  %v2947_v49 = vadd.f32 %v2876_v38, %v2875_v6  ;;  %v2885_v43 = vunpack.c.l.bf16 %v7354_v13  ;;  %vm2629_vm8 = vmpackc.low %vm2628_vm3, %vm2627_vm2 }
 0x34e   : > { %v7361_v48 = vpop.eup %4786  ;;  %v2317_v53 = vunpack.c.l.bf16 %v2268_v44  ;;  %v2318_v36 = vunpack.c.h.bf16 %v2268_v44  ;;  %v2886_v2 = vunpack.c.h.bf16 %v7354_v13  ;;  %v7364_v25 = vsel %vm2629_vm8, %v2487_v23, 0 }
 0x34f   : > { %v4789_v17 = vpop.eup %4788  ;;  %v2419_v11 = vmul.f32 1.442695, %v2319_v21  ;;  %v2421_v33 = vmul.f32 1.442695, %v2320_v26  ;;  %2948 = vadd.xlane.f32.xlu1 %v2947_v49  ;;  %v2883_v45 = vunpack.c.l.bf16 %v7364_v25  ;;  %v2884_v56 = vunpack.c.h.bf16 %v7364_v25 }
 0x350   : > { %v2415_v51 = vmul.f32 1.442695, %v2317_v53  ;;  %v2417_v28 = vmul.f32 1.442695, %v2318_v36  ;;  %v2962_v1 = vadd.f32 %v2886_v2, %v2885_v43  ;;  %v2229_v31 = vsub.f32 %v8618_v22, %v2135_v62  ;;  %v8622_v43 = vld [vmem:[#allocation16_spill] sm:$0xff] }
 0x351   : > { %4790 = vpow2.f32 %v2419_v11  ;;  %v2959_v55 = vadd.f32 %v2884_v56, %v2883_v45  ;;  %v2230_v47 = vsub.f32 %v8619_v37, %v2135_v62  ;;  %v2228_v8 = vsub.f32 %v8621_v32, %v2130_v60  ;;  %v2145_v62 = vpop.permute.xlu0 %2144  ;;  %v8627_v32 = vld [vmem:[#allocation57_spill] sm:$0xff] }
 0x352   : > { %4792 = vpow2.f32 %v2421_v33  ;;  %v3352_v16 = vunpack.c.l.b16 %v7311_v12  ;;  %v3354_v41 = vunpack.c.l.b16 %v7301_v20  ;;  %v3353_v6 = vunpack.c.h.b16 %v7311_v12 }
 0x353   : > { %4794 = vpow2.f32 %v2415_v51  ;;  %v2272_v29 = vpack.c.bf16 %v2230_v47, %v2229_v31  ;;  %v3355_v38 = vunpack.c.h.b16 %v7301_v20  ;;  %2963 = vadd.xlane.f32.xlu2 %v2962_v1  ;;  %v2271_v23 = vpack.c.bf16 %v2228_v8, %v2227_v0 }
 0x354   : > { %4796 = vpow2.f32 %v2417_v28  ;;  %2960 = vadd.xlane.f32.xlu0 %v2959_v55  ;;  %v3410_v44 = vpack.c.b16 %v3354_v41, %v3352_v16  ;;  %v2486_v50 = vpack.c.bf16 %v7248_v40, %v7245_v5  ;;  %vm2620_vm9 = vcmp.ne.s32.totalorder %v8622_v43, %v5794_v10  ;;  %v8623_v5 = vld [vmem:[#allocation134_spill] sm:$0xff]  ;;  %v2150_v40 = vpop.permute.xlu2 %2149 }
 0x355   : > { %v2325_v21 = vunpack.c.l.bf16 %v2272_v29  ;;  %v2326_v26 = vunpack.c.h.bf16 %v2272_v29  ;;  %v3411_v49 = vpack.c.b16 %v3355_v38, %v3353_v6  ;;  %v2323_v53 = vunpack.c.l.bf16 %v2271_v23  ;;  %v8625_v55 = vld [vmem:[#allocation46_spill] sm:$0xff]  ;;  %v2110_v29 = vpop.permute.xlu1 %2109 }
 0x356   : > { %v2324_v36 = vunpack.c.h.bf16 %v2271_v23  ;;  %vm2621_vm12 = vcmp.ne.s32.totalorder %v6998_v15, %v5797_v3  ;;  %v2490_v20 = vpack.c.bf16 %v4789_v17, %v7361_v48  ;;  %vm2648_vm7 = vcmp.ne.s32.totalorder %v7021_v63, %v5794_v10  ;;  %v8624_v48 = vld [vmem:[#allocation45_spill] sm:$0xff]  ;;  %v8628_v23 = vld [vmem:[#allocation60_spill] sm:$0xff] }
 0x357   : > { %v7383_v12 = vpop.eup %4790  ;;  %v2431_v2 = vmul.f32 1.442695, %v2325_v21  ;;  %v2433_v11 = vmul.f32 1.442695, %v2326_v26  ;;  %vm2622_vm14 = vmpackc.low %vm2621_vm12, %vm2620_vm9  ;;  %vm2649_vm10 = vcmp.ne.s32.totalorder %v8623_v5, %v5797_v3  ;;  %v2427_v45 = vmul.f32 1.442695, %v2323_v53  ;;  %3587 = vmatmul.bf16.gmra.mxu0 %v3410_v44  ;;  %3676 = vmatmul.bf16.gmra.mxu1 %v3411_v49 }
 0x358   : > { %v4793_v33 = vpop.eup %4792  ;;  %v2429_v56 = vmul.f32 1.442695, %v2324_v36  ;;  %v7389_v15 = vsel %vm2622_vm14, %v2486_v50, 0  ;;  %vm2650_vm13 = vmpackc.low %vm2649_vm10, %vm2648_vm7  ;;  %v2235_v17 = vsub.f32 %v8624_v48, %v2150_v40  ;;  %v2236_v37 = vsub.f32 %v8625_v55, %v2150_v40  ;;  %v8629_v50 = vld [vmem:[#allocation61_spill] sm:$0xff]  ;;  %v8631_v53 = vld [vmem:[#allocation132_spill] sm:$0xff] }
 0x359   : > { %v7392_v60 = vpop.eup %4794  ;;  %4798 = vpow2.f32 %v2431_v2  ;;  %v2881_v63 = vunpack.c.l.bf16 %v7389_v15  ;;  %v2882_v51 = vunpack.c.h.bf16 %v7389_v15  ;;  %v7396_v28 = vsel %vm2650_vm13, %v2490_v20, 0  ;;  %v8630_v26 = vld [vmem:[#allocation17_spill] sm:$0xff]  ;;  %v8633_v48 = vld [vmem:[#allocation136_spill] sm:$0xff] }
 0x35a   : > { %v7398_v1 = vpop.eup %4796  ;;  %4800 = vpow2.f32 %v2433_v11  ;;  %v2889_v22 = vunpack.c.l.bf16 %v7396_v28  ;;  %v2890_v31 = vunpack.c.h.bf16 %v7396_v28  ;;  %v2233_v0 = vsub.f32 %v8626_v57, %v2145_v62  ;;  %v8632_v11 = vld [vmem:[#allocation135_spill] sm:$0xff] }
 0x35b   : > { %4802 = vpow2.f32 %v2427_v45  ;;  %v2956_v47 = vadd.f32 %v2882_v51, %v2881_v63  ;;  %v2234_v8 = vsub.f32 %v8627_v32, %v2145_v62  ;;  %v2275_v41 = vpack.c.bf16 %v2236_v37, %v2235_v17 }
 0x35c   : > { %4804 = vpow2.f32 %v2429_v56  ;;  %v2968_v16 = vadd.f32 %v2890_v31, %v2889_v22  ;;  %v2489_v6 = vpack.c.bf16 %v7277_v39, %v7275_v4  ;;  %v2219_v44 = vsub.f32 %v8628_v23, %v2110_v29  ;;  %v2165_v51 = vpop.permute.xlu2 %2164 }
 0x35d   : > { %2957 = vadd.xlane.f32.xlu1 %v2956_v47  ;;  %v2274_v38 = vpack.c.bf16 %v2234_v8, %v2233_v0  ;;  %v2220_v21 = vsub.f32 %v8629_v50, %v2110_v29  ;;  %vm2641_vm4 = vcmp.ne.s32.totalorder %v8630_v26, %v5794_v10  ;;  %v2331_v49 = vunpack.c.l.bf16 %v2275_v41  ;;  %v2160_v47 = vpop.permute.xlu0 %2159 }
 0x35e   : > { %2969 = vadd.xlane.f32.xlu0 %v2968_v16  ;;  %v2332_v43 = vunpack.c.h.bf16 %v2275_v41  ;;  %vm2642_vm0 = vcmp.ne.s32.totalorder %v8631_v53, %v5797_v3  ;;  %v2493_v36 = vpack.c.bf16 %v4793_v33, %v7383_v12  ;;  %vm2669_vm2 = vcmp.ne.s32.totalorder %v8632_v11, %v5794_v10  ;;  %v8634_v41 = vld [vmem:[#allocation50_spill] sm:$0xff] }
 0x35f   : > { %v7414_v20 = vpop.eup %4798  ;;  %v2329_v4 = vunpack.c.l.bf16 %v2274_v38  ;;  %v2330_v39 = vunpack.c.h.bf16 %v2274_v38  ;;  %v2267_v2 = vpack.c.bf16 %v2220_v21, %v2219_v44  ;;  %vm2643_vm11 = vmpackc.low %vm2642_vm0, %vm2641_vm4  ;;  %v2443_v40 = vmul.f32 1.442695, %v2331_v49  ;;  %v8635_v38 = vld [vmem:[#allocation51_spill] sm:$0xff]  ;;  %v8636_v44 = vld [vmem:[#allocation62_spill] sm:$0xff] }
 0x360   : > { %v7418_v5 = vpop.eup %4800  ;;  %v2445_v45 = vmul.f32 1.442695, %v2332_v43  ;;  %v7420_v56 = vsel %vm2643_vm11, %v2489_v6, 0  ;;  %vm2670_vm3 = vcmp.ne.s32.totalorder %v8633_v48, %v5797_v3  ;;  %v2241_v29 = vsub.f32 %v8634_v41, %v2165_v51  ;;  %v2125_v6 = vpop.permute.xlu1 %2124  ;;  %v8637_v21 = vld [vmem:[#allocation63_spill] sm:$0xff] }
 0x361   : > { %v7424_v17 = vpop.eup %4802  ;;  %v2439_v12 = vmul.f32 1.442695, %v2329_v4  ;;  %v2441_v33 = vmul.f32 1.442695, %v2330_v39  ;;  %v2315_v62 = vunpack.c.l.bf16 %v2267_v2  ;;  %v2316_v63 = vunpack.c.h.bf16 %v2267_v2  ;;  %vm2671_vm8 = vmpackc.low %vm2670_vm3, %vm2669_vm2 }
 0x362   : > { %v7426_v22 = vpop.eup %4804  ;;  %4806 = vpow2.f32 %v2443_v40  ;;  %v2887_v31 = vunpack.c.l.bf16 %v7420_v56  ;;  %v2888_v55 = vunpack.c.h.bf16 %v7420_v56  ;;  %v7430_v37 = vsel %vm2671_vm8, %v2493_v36, 0 }
 0x363   : > { %4808 = vpow2.f32 %v2445_v45  ;;  %v2411_v57 = vmul.f32 1.442695, %v2315_v62  ;;  %v2413_v0 = vmul.f32 1.442695, %v2316_v63  ;;  %v2895_v32 = vunpack.c.l.bf16 %v7430_v37  ;;  %v8638_v45 = vld [vmem:[#allocation58_spill] sm:$0xff] }
 0x364   : > { %4810 = vpow2.f32 %v2439_v12  ;;  %v2965_v8 = vadd.f32 %v2888_v55, %v2887_v31  ;;  %v2896_v16 = vunpack.c.h.bf16 %v7430_v37  ;;  %v2242_v23 = vsub.f32 %v8635_v38, %v2165_v51  ;;  %v8639_v12 = vld [vmem:[#allocation59_spill] sm:$0xff] }
 0x365   : > { %4812 = vpow2.f32 %v2441_v33  ;;  %v2239_v50 = vsub.f32 %v8636_v44, %v2160_v47  ;;  %v2240_v26 = vsub.f32 %v8637_v21, %v2160_v47  ;;  %v3356_v43 = vunpack.c.l.b16 %v7348_v19 }
 0x366   : > { %4814 = vpow2.f32 %v2411_v57  ;;  %2966 = vadd.xlane.f32.xlu1 %v2965_v8  ;;  %v2977_v49 = vadd.f32 %v2896_v16, %v2895_v32  ;;  %v3358_v53 = vunpack.c.l.b16 %v7334_v30  ;;  %v2278_v36 = vpack.c.bf16 %v2242_v23, %v2241_v29 }
 0x367   : > { %4816 = vpow2.f32 %v2413_v0  ;;  %v2277_v4 = vpack.c.bf16 %v2240_v26, %v2239_v50  ;;  %v3357_v39 = vunpack.c.h.b16 %v7348_v19  ;;  %v3359_v40 = vunpack.c.h.b16 %v7334_v30  ;;  %v8640_v50 = vld [vmem:[#allocation137_spill] sm:$0xff] }
 0x368   : > { %v7441_v2 = vpop.eup %4806  ;;  %2978 = vadd.xlane.f32.xlu0 %v2977_v49  ;;  %v3412_v11 = vpack.c.b16 %v3358_v53, %v3356_v43  ;;  %v2225_v48 = vsub.f32 %v8638_v45, %v2125_v6  ;;  %v2226_v33 = vsub.f32 %v8639_v12, %v2125_v6  ;;  %v2337_v63 = vunpack.c.l.bf16 %v2278_v36  ;;  %v8641_v43 = vld [vmem:[#allocation54_spill] sm:$0xff] }
 0x369   : > { %v7446_v62 = vpop.eup %4808  ;;  %v2338_v51 = vunpack.c.h.bf16 %v2278_v36  ;;  %v2335_v31 = vunpack.c.l.bf16 %v2277_v4  ;;  %v2336_v55 = vunpack.c.h.bf16 %v2277_v4  ;;  %v3413_v19 = vpack.c.b16 %v3359_v40, %v3357_v39  ;;  %v8643_v40 = vld [vmem:[#allocation64_spill] sm:$0xff] }
 0x36a   : > { %v7448_v47 = vpop.eup %4810  ;;  %3592 = vmatmul.bf16.gmra.mxu0 %v3412_v11  ;;  %v2270_v57 = vpack.c.bf16 %v2226_v33, %v2225_v48  ;;  %v2492_v0 = vpack.c.bf16 %v7398_v1, %v7392_v60  ;;  %vm2662_vm9 = vcmp.ne.s32.totalorder %v7076_v7, %v5794_v10  ;;  %v2455_v32 = vmul.f32 1.442695, %v2337_v63  ;;  %v2180_v1 = vpop.permute.xlu2 %2179  ;;  %v8644_v48 = vld [vmem:[#allocation65_spill] sm:$0xff] }
 0x36b   : > { %v7454_v30 = vpop.eup %4812  ;;  %v2457_v8 = vmul.f32 1.442695, %v2338_v51  ;;  %v2451_v16 = vmul.f32 1.442695, %v2335_v31  ;;  %vm2663_vm12 = vcmp.ne.s32.totalorder %v7080_v9, %v5797_v3  ;;  %v2453_v29 = vmul.f32 1.442695, %v2336_v55  ;;  %3681 = vmatmul.bf16.gmra.mxu1 %v3413_v19  ;;  %v2140_v7 = vpop.permute.xlu1 %2139 }
 0x36c   : > { %v7458_v41 = vpop.eup %4814  ;;  %v2321_v6 = vunpack.c.l.bf16 %v2270_v57  ;;  %v2322_v38 = vunpack.c.h.bf16 %v2270_v57  ;;  %vm2664_vm14 = vmpackc.low %vm2663_vm12, %vm2662_vm9  ;;  %v2496_v60 = vpack.c.bf16 %v7418_v5, %v7414_v20  ;;  %4818 = vpow2.f32 %v2455_v32  ;;  %v2175_v20 = vpop.permute.xlu0 %2174  ;;  %v8645_v51 = vld [vmem:[#allocation67_spill] sm:$0xff]  ;;  %v8646_v57 = vld [vmem:[#allocation68_spill] sm:$0xff] }
 0x36d   : > { %v7462_v23 = vpop.eup %4816  ;;  %v7464_v44 = vsel %vm2664_vm14, %v2492_v0, 0  ;;  %vm2690_vm7 = vcmp.ne.s32.totalorder %v8640_v50, %v5794_v10  ;;  %vm2691_vm10 = vcmp.ne.s32.totalorder %v7050_v54, %v5797_v3  ;;  %4820 = vpow2.f32 %v2457_v8  ;;  %v8642_v54 = vld [vmem:[#allocation55_spill] sm:$0xff] }
 0x36e   : > { %v2423_v9 = vmul.f32 1.442695, %v2321_v6  ;;  %v2425_v21 = vmul.f32 1.442695, %v2322_v38  ;;  %v2893_v26 = vunpack.c.l.bf16 %v7464_v44  ;;  %vm2692_vm13 = vmpackc.low %vm2691_vm10, %vm2690_vm7  ;;  %4822 = vpow2.f32 %v2451_v16 }
 0x36f   : > { %v2894_v5 = vunpack.c.h.bf16 %v7464_v44  ;;  %v7472_v49 = vsel %vm2692_vm13, %v2496_v60, 0  ;;  %v2247_v53 = vsub.f32 %v8641_v43, %v2180_v1  ;;  %4824 = vpow2.f32 %v2453_v29 }
 0x370   : > { %v2901_v36 = vunpack.c.l.bf16 %v7472_v49  ;;  %v2902_v4 = vunpack.c.h.bf16 %v7472_v49  ;;  %v2248_v39 = vsub.f32 %v8642_v54, %v2180_v1  ;;  %4826 = vpow2.f32 %v2423_v9 }
 0x371   : > { %v2974_v11 = vadd.f32 %v2894_v5, %v2893_v26  ;;  %v2245_v45 = vsub.f32 %v8643_v40, %v2175_v20  ;;  %v2246_v12 = vsub.f32 %v8644_v48, %v2175_v20  ;;  %4828 = vpow2.f32 %v2425_v21 }
 0x372   : > { %v2986_v33 = vadd.f32 %v2902_v4, %v2901_v36  ;;  %v2281_v63 = vpack.c.bf16 %v2248_v39, %v2247_v53  ;;  %v2231_v31 = vsub.f32 %v8645_v51, %v2140_v7  ;;  %v7481_v55 = vpop.eup %4818  ;;  %v2232_v0 = vsub.f32 %v8646_v57, %v2140_v7  ;;  %v8657_v57 = vld [vmem:[#allocation141_spill] sm:$0xff] }
 0x373   : > { %2975 = vadd.xlane.f32.xlu1 %v2974_v11  ;;  %v2280_v19 = vpack.c.bf16 %v2246_v12, %v2245_v45  ;;  %v2495_v32 = vpack.c.bf16 %v7426_v22, %v7424_v17  ;;  %vm2683_vm4 = vcmp.ne.s32.totalorder %v7070_v59, %v5794_v10  ;;  %v7488_v8 = vpop.eup %4820  ;;  %vm2684_vm0 = vcmp.ne.s32.totalorder %v7084_v34, %v5797_v3  ;;  %v2155_v34 = vpop.permute.xlu1 %2154 }
 0x374   : > { %2987 = vadd.xlane.f32.xlu0 %v2986_v33  ;;  %v2343_v16 = vunpack.c.l.bf16 %v2281_v63  ;;  %v2344_v29 = vunpack.c.h.bf16 %v2281_v63  ;;  %v2499_v6 = vpack.c.bf16 %v7446_v62, %v7441_v2  ;;  %v7494_v38 = vpop.eup %4822  ;;  %v2273_v7 = vpack.c.bf16 %v2232_v0, %v2231_v31  ;;  %vm2685_vm11 = vmpackc.low %vm2684_vm0, %vm2683_vm4 }
 0x375   : > { %v2341_v60 = vunpack.c.l.bf16 %v2280_v19  ;;  %v2342_v1 = vunpack.c.h.bf16 %v2280_v19  ;;  %vm2711_vm2 = vcmp.ne.s32.totalorder %v7054_v61, %v5794_v10  ;;  %v7498_v59 = vpop.eup %4824  ;;  %v7500_v50 = vsel %vm2685_vm11, %v2495_v32, 0  ;;  %v8649_v32 = vld [vmem:[#allocation71_spill] sm:$0xff] }
 0x376   : > { %v2467_v17 = vmul.f32 1.442695, %v2343_v16  ;;  %v2469_v22 = vmul.f32 1.442695, %v2344_v29  ;;  %vm2712_vm3 = vcmp.ne.s32.totalorder %v7058_v52, %v5797_v3  ;;  %v7504_v2 = vpop.eup %4826  ;;  %vm2676_vm8 = vcmp.ne.s32.totalorder %v7130_v24, %v5794_v10 }
 0x377   : > { %vm2677_vm9 = vcmp.ne.s32.totalorder %v7136_v58, %v5797_v3  ;;  %v2463_v62 = vmul.f32 1.442695, %v2341_v60  ;;  %v2465_v61 = vmul.f32 1.442695, %v2342_v1  ;;  %v2327_v9 = vunpack.c.l.bf16 %v2273_v7  ;;  %vm2713_vm12 = vmpackc.low %vm2712_vm3, %vm2711_vm2  ;;  %v7510_v26 = vpop.eup %4828 }
 0x378   : > { %v2328_v21 = vunpack.c.h.bf16 %v2273_v7  ;;  %4830 = vpow2.f32 %v2467_v17  ;;  %v2899_v20 = vunpack.c.l.bf16 %v7500_v50  ;;  %v2900_v52 = vunpack.c.h.bf16 %v7500_v50  ;;  %vm7560_vm0 = vmpackc.low %vm2677_vm9, %vm2676_vm8 }
 0x379   : > { %v7514_v5 = vsel %vm2713_vm12, %v2499_v6, 0  ;;  %4832 = vpow2.f32 %v2469_v22  ;;  %v2435_v43 = vmul.f32 1.442695, %v2327_v9  ;;  %v3360_v39 = vunpack.c.l.b16 %v7326_v18 }
 0x37a   : > { %v2437_v53 = vmul.f32 1.442695, %v2328_v21  ;;  %v2907_v36 = vunpack.c.l.bf16 %v7514_v5  ;;  %4834 = vpow2.f32 %v2463_v62  ;;  %v2983_v4 = vadd.f32 %v2900_v52, %v2899_v20  ;;  %v8653_v21 = vld [vmem:[#allocation15_spill] sm:$0xff] }
 0x37b   : > { %v2908_v54 = vunpack.c.h.bf16 %v7514_v5  ;;  %4836 = vpow2.f32 %v2465_v61  ;;  %v3362_v11 = vunpack.c.l.b16 %v7389_v15  ;;  %v3361_v40 = vunpack.c.h.b16 %v7326_v18 }
 0x37c   : > { %v3363_v45 = vunpack.c.h.b16 %v7389_v15  ;;  %4838 = vpow2.f32 %v2435_v43  ;;  %2984 = vadd.xlane.f32.xlu1 %v2983_v4  ;;  %v2491_v12 = vpack.c.bf16 %v7462_v23, %v7458_v41  ;;  %v3374_v33 = vunpack.c.l.b16 %v7464_v44  ;;  %v8648_v15 = vld [vmem:[#allocation70_spill] sm:$0xff]  ;;  %v8654_v43 = vld [vmem:[#allocation73_spill] sm:$0xff] }
 0x37d   : > { %v2995_v48 = vadd.f32 %v2908_v54, %v2907_v36  ;;  %4840 = vpow2.f32 %v2437_v53  ;;  %v3414_v63 = vpack.c.b16 %v3362_v11, %v3360_v39  ;;  %v3375_v31 = vunpack.c.h.b16 %v7464_v44  ;;  %v8655_v39 = vld [vmem:[#allocation74_spill] sm:$0xff] }
 0x37e   : > { %v3415_v51 = vpack.c.b16 %v3363_v45, %v3361_v40  ;;  %v7526_v19 = vpop.eup %4830  ;;  %v2779_v18 = vsel %vm6332_vm5, %v2491_v12, 0  ;;  %v2237_v0 = vsub.f32 %v8648_v15, %v2155_v34  ;;  %v2238_v16 = vsub.f32 %v8649_v32, %v2155_v34  ;;  %v8658_v32 = vld [vmem:[#allocation143_spill] sm:$0xff] }
 0x37f   : > { %2996 = vadd.xlane.f32.xlu0 %v2995_v48  ;;  %v2498_v41 = vpack.c.bf16 %v7454_v30, %v7448_v47  ;;  %v7534_v23 = vpop.eup %4832  ;;  %3597 = vmatmul.bf16.gmra.mxu0 %v3414_v63  ;;  %v2891_v29 = vunpack.c.l.bf16 %v2779_v18  ;;  %v2892_v6 = vunpack.c.h.bf16 %v2779_v18  ;;  %v3372_v44 = vunpack.c.l.b16 %v2779_v18  ;;  %v2170_v30 = vpop.permute.xlu1 %2169 }
 0x380   : > { %3686 = vmatmul.bf16.gmra.mxu1 %v3415_v51  ;;  %v3373_v60 = vunpack.c.h.b16 %v2779_v18  ;;  %v7536_v1 = vpop.eup %4834  ;;  %v2276_v7 = vpack.c.bf16 %v2238_v16, %v2237_v0  ;;  %vm2704_vm5 = vcmp.ne.s32.totalorder %v7088_v14, %v5794_v10  ;;  %vm2705_vm14 = vcmp.ne.s32.totalorder %v7092_v46, %v5797_v3  ;;  %v8650_v14 = vld [vmem:[#allocation14_spill] sm:$0xff] }
 0x381   : > { %v2502_v47 = vpack.c.bf16 %v7488_v8, %v7481_v55  ;;  %v7544_v17 = vpop.eup %4836  ;;  %vm2697_vm7 = vcmp.ne.s32.totalorder %v7148_v27, %v5794_v10  ;;  %vm2698_vm10 = vcmp.ne.s32.totalorder %v7158_v42, %v5797_v3  ;;  %v2971_v22 = vadd.f32 %v2892_v6, %v2891_v29  ;;  %vm2706_vm13 = vmpackc.low %vm2705_vm14, %vm2704_vm5  ;;  %v8660_v29 = vld [vmem:[#allocation140_spill] sm:$0xff] }
 0x382   : > { %v3420_v34 = vpack.c.b16 %v3374_v33, %v3372_v44  ;;  %v3421_v62 = vpack.c.b16 %v3375_v31, %v3373_v60  ;;  %vm2732_vm4 = vcmp.ne.s32.totalorder %v8650_v14, %v5794_v10  ;;  %v7552_v46 = vpop.eup %4838  ;;  %v2333_v8 = vunpack.c.l.bf16 %v2276_v7 }
 0x383   : > { %v2334_v61 = vunpack.c.h.bf16 %v2276_v7  ;;  %v7564_v9 = vsel %vm2706_vm13, %v2498_v41, 0  ;;  %vm2733_vm11 = vcmp.ne.s32.totalorder %v8653_v21, %v5797_v3  ;;  %v7568_v20 = vpop.eup %4840  ;;  %2972 = vadd.xlane.f32.xlu2 %v2971_v22  ;;  %v2494_v58 = vpack.c.bf16 %v7510_v26, %v7504_v2  ;;  %v8656_v2 = vld [vmem:[#allocation146_spill] sm:$0xff]  ;;  %v8659_v41 = vld [vmem:[#allocation139_spill] sm:$0xff] }
 0x384   : > { %3612 = vmatmul.bf16.vlgmr.msra.gmra.mxu2 %v3420_v34  ;;  %v2905_v24 = vunpack.c.l.bf16 %v7564_v9  ;;  %v2906_v52 = vunpack.c.h.bf16 %v7564_v9  ;;  %vm2734_vm2 = vmpackc.low %vm2733_vm11, %vm2732_vm4  ;;  %v2243_v53 = vsub.f32 %v8654_v43, %v2170_v30  ;;  %3701 = vmatmul.bf16.vlgmr.msra.gmra.mxu3 %v3421_v62  ;;  %v2447_v36 = vmul.f32 1.442695, %v2333_v8  ;;  %v8672_v22 = vld [vmem:[#allocation147_spill] sm:$0xff] }
 0x385   : > { %v2449_v4 = vmul.f32 1.442695, %v2334_v61  ;;  %v7575_v54 = vsel %vm2734_vm2, %v2502_v47, 0  ;;  %v2244_v11 = vsub.f32 %v8655_v39, %v2170_v30  ;;  %v7582_v12 = vsel %vm7560_vm0, %v2494_v58, 0  ;;  %vm7617_vm0 = vmpackc.low %vm2698_vm10, %vm2697_vm7  ;;  %v8664_v39 = vld [vmem:[#allocation81_spill] sm:$0xff] }
 0x386   : > { %v2992_v40 = vadd.f32 %v2906_v52, %v2905_v24  ;;  %v2913_v45 = vunpack.c.l.bf16 %v7575_v54  ;;  %v2914_v48 = vunpack.c.h.bf16 %v7575_v54  ;;  %vm2718_vm3 = vcmp.ne.s32.totalorder %v7162_v35, %v5794_v10 }
 0x387   : > { %vm2719_vm8 = vcmp.ne.s32.totalorder %v8656_v2, %v5797_v3  ;;  %4842 = vpow2.f32 %v2447_v36  ;;  %v2897_v26 = vunpack.c.l.bf16 %v7582_v12  ;;  %v2898_v33 = vunpack.c.h.bf16 %v7582_v12  ;;  %v2185_v55 = vpop.permute.xlu1 %2184 }
 0x388   : > { %v2279_v63 = vpack.c.bf16 %v2244_v11, %v2243_v53  ;;  %4844 = vpow2.f32 %v2449_v4  ;;  %2993 = vadd.xlane.f32.xlu1 %v2992_v40  ;;  %v3004_v51 = vadd.f32 %v2914_v48, %v2913_v45  ;;  %v2501_v31 = vpack.c.bf16 %v7498_v59, %v7494_v38  ;;  %vm7644_vm7 = vmpackc.low %vm2719_vm8, %vm2718_vm3  ;;  %v8667_v40 = vld [vmem:[#allocation72_spill] sm:$0xff]  ;;  %v8668_v45 = vld [vmem:[#allocation75_spill] sm:$0xff] }
 0x389   : > { %vm2725_vm9 = vcmp.ne.s32.totalorder %v8657_v57, %v5794_v10  ;;  %v2980_v18 = vadd.f32 %v2898_v33, %v2897_v26  ;;  %vm2726_vm12 = vcmp.ne.s32.totalorder %v8658_v32, %v5797_v3  ;;  %v2505_v16 = vpack.c.bf16 %v7534_v23, %v7526_v19 }
 0x38a   : > { %v2339_v15 = vunpack.c.l.bf16 %v2279_v63  ;;  %v2340_v0 = vunpack.c.h.bf16 %v2279_v63  ;;  %3005 = vadd.xlane.f32.xlu0 %v3004_v51  ;;  %vm2727_vm5 = vmpackc.low %vm2726_vm12, %vm2725_vm9  ;;  %vm2753_vm14 = vcmp.ne.s32.totalorder %v8659_v41, %v5794_v10  ;;  %vm2754_vm13 = vcmp.ne.s32.totalorder %v8660_v29, %v5797_v3  ;;  %v8670_v63 = vld [vmem:[#allocation144_spill] sm:$0xff] }
 0x38b   : > { %v3364_v38 = vunpack.c.l.b16 %v7364_v25  ;;  %v7603_v44 = vsel %vm2727_vm5, %v2501_v31, 0  ;;  %vm2755_vm4 = vmpackc.low %vm2754_vm13, %vm2753_vm14  ;;  %v3366_v60 = vunpack.c.l.b16 %v7354_v13  ;;  %2981 = vadd.xlane.f32.xlu2 %v2980_v18  ;;  %v3365_v47 = vunpack.c.h.b16 %v7364_v25  ;;  %v8671_v31 = vld [vmem:[#allocation145_spill] sm:$0xff] }
 0x38c   : > { %v2459_v59 = vmul.f32 1.442695, %v2339_v15  ;;  %v2461_v6 = vmul.f32 1.442695, %v2340_v0  ;;  %v2911_v7 = vunpack.c.l.bf16 %v7603_v44  ;;  %v2912_v19 = vunpack.c.h.bf16 %v7603_v44 }
 0x38d   : > { %v7608_v23 = vsel %vm2755_vm4, %v2505_v16, 0  ;;  %v4843_v30 = vpop.eup %4842  ;;  %v3416_v14 = vpack.c.b16 %v3366_v60, %v3364_v38  ;;  %v3367_v61 = vunpack.c.h.b16 %v7354_v13  ;;  %v2497_v27 = vpack.c.bf16 %v7568_v20, %v7552_v46  ;;  %v8663_v13 = vld [vmem:[#allocation80_spill] sm:$0xff] }
 0x38e   : > { %4846 = vpow2.f32 %v2459_v59  ;;  %v2919_v34 = vunpack.c.l.bf16 %v7608_v23  ;;  %v2920_v62 = vunpack.c.h.bf16 %v7608_v23  ;;  %v4845_v8 = vpop.eup %4844  ;;  %v3001_v25 = vadd.f32 %v2912_v19, %v2911_v7  ;;  %v2795_v59 = vld [vmem:[#allocation3] sm:$0xff] }
 0x38f   : > { %4848 = vpow2.f32 %v2461_v6  ;;  %v3376_v21 = vunpack.c.l.b16 %v7430_v37  ;;  %v3378_v24 = vunpack.c.l.b16 %v7582_v12  ;;  %v3377_v52 = vunpack.c.h.b16 %v7430_v37  ;;  %3602 = vmatmul.bf16.gmra.mxu0 %v3416_v14 }
 0x390   : > { %v3013_v42 = vadd.f32 %v2920_v62, %v2919_v34  ;;  %3002 = vadd.xlane.f32.xlu1 %v3001_v25  ;;  %v3417_v58 = vpack.c.b16 %v3367_v61, %v3365_v47  ;;  %v7631_v43 = vsel %vm7617_vm0, %v2497_v27, 0  ;;  %v3379_v53 = vunpack.c.h.b16 %v7582_v12  ;;  %v2796_v27 = vld [vmem:[#allocation3 + $0x8] sm:$0xff] }
 0x391   : > { %v2249_v36 = vsub.f32 %v8663_v13, %v2185_v55  ;;  %v2903_v46 = vunpack.c.l.bf16 %v7631_v43  ;;  %v2904_v20 = vunpack.c.h.bf16 %v7631_v43  ;;  %v3422_v4 = vpack.c.b16 %v3378_v24, %v3376_v21  ;;  %v8689_v62 = vld [vmem:[#allocation83_spill] sm:$0xff] }
 0x392   : > { %v2250_v11 = vsub.f32 %v8664_v39, %v2185_v55  ;;  %v8669_v48 = vsub.f32 %v8667_v40, %v8668_v45  ;;  %3014 = vadd.xlane.f32.xlu0 %v3013_v42  ;;  %3691 = vmatmul.bf16.gmra.mxu1 %v3417_v58  ;;  %v3423_v26 = vpack.c.b16 %v3379_v53, %v3377_v52  ;;  %v3368_v15 = vunpack.c.l.b16 %v7420_v56  ;;  %v2798_v39 = vld [vmem:[#allocation3 + $0x18] sm:$0xff]  ;;  %v8679_v45 = vld [vmem:[#allocation82_spill] sm:$0xff] }
 0x393   : > { %v2504_v33 = vpack.c.bf16 %v7544_v17, %v7536_v1  ;;  %vm2746_vm10 = vcmp.ne.s32.totalorder %v8670_v63, %v5794_v10  ;;  %v2989_v51 = vadd.f32 %v2904_v20, %v2903_v46  ;;  %vm2747_vm11 = vcmp.ne.s32.totalorder %v8671_v31, %v5797_v3  ;;  %v8675_v46 = vld [vmem:[#allocation78_spill] sm:$0xff]  ;;  %v8678_v40 = vld [vmem:[#allocation77_spill] sm:$0xff] }
 0x394   : > { %v1969_v12 = vmul.f32 1.442695, %v8669_v48  ;;  %v4847_v35 = vpop.eup %4846  ;;  %v2282_v2 = vpack.c.bf16 %v2250_v11, %v2249_v36  ;;  %v2500_v57 = vpack.c.bf16 %v4845_v8, %v4843_v30  ;;  %3617 = vmatmul.bf16.gmra.mxu2 %v3422_v4  ;;  %vm2748_vm2 = vmpackc.low %vm2747_vm11, %vm2746_vm10  ;;  %v3370_v0 = vunpack.c.l.b16 %v7396_v28  ;;  %3706 = vmatmul.bf16.gmra.mxu3 %v3423_v26  ;;  %v8674_v36 = vld [vmem:[#allocation76_spill] sm:$0xff] }
 0x395   : > { %v4849_v18 = vpop.eup %4848  ;;  %v3369_v32 = vunpack.c.h.b16 %v7420_v56  ;;  %v3371_v1 = vunpack.c.h.b16 %v7396_v28  ;;  %2990 = vadd.xlane.f32.xlu2 %v2989_v51  ;;  %v7661_v16 = vsel %vm2748_vm2, %v2504_v33, 0  ;;  %v2827_v34 = vmul.f32 %v8672_v22, %v2795_v59  ;;  %v8677_v11 = vld [vmem:[#allocation148_spill] sm:$0xff]  ;;  %v2928_v63 = vpop.xlane.xlu2 %2927 }
 0x396   : > { %v2345_v10 = vunpack.c.l.bf16 %v2282_v2  ;;  %v2346_v17 = vunpack.c.h.bf16 %v2282_v2  ;;  %v7665_v3 = vsel %vm7644_vm7, %v2500_v57, 0  ;;  %v2917_v41 = vunpack.c.l.bf16 %v7661_v16  ;;  %v2801_v51 = vld [vmem:[#allocation3 + $0x30] sm:$0xff] }
 0x397   : > { %v2918_v29 = vunpack.c.h.bf16 %v7661_v16  ;;  %v2909_v38 = vunpack.c.l.bf16 %v7665_v3  ;;  %v2910_v56 = vunpack.c.h.bf16 %v7665_v3  ;;  %v3418_v60 = vpack.c.b16 %v3370_v0, %v3368_v15 }
 0x398   : > { %v2471_v28 = vmul.f32 1.442695, %v2345_v10  ;;  %v2473_v6 = vmul.f32 1.442695, %v2346_v17  ;;  %v3419_v7 = vpack.c.b16 %v3371_v1, %v3369_v32  ;;  %4850 = vpow2.f32 %v1969_v12  ;;  %v2925_v55 = vpop.xlane.xlu0 %2924  ;;  %v8682_v17 = vld [vmem:[#allocation84_spill] sm:$0xff] }
 0x399   : > { %v3010_v19 = vadd.f32 %v2918_v29, %v2917_v41  ;;  %v2503_v47 = vpack.c.bf16 %v4849_v18, %v4847_v35  ;;  %v2998_v30 = vadd.f32 %v2910_v56, %v2909_v38  ;;  %v3019_v8 = vadd.f32 %v2925_v55, %v2827_v34  ;;  %v8683_v41 = vld [vmem:[#allocation86_spill] sm:$0xff]  ;;  %v8688_v34 = vld [vmem:[#allocation79_spill] sm:$0xff] }
 0x39a   : > { %4852 = vpow2.f32 %v2471_v28  ;;  %v3380_v21 = vunpack.c.l.b16 %v7500_v50  ;;  %v3382_v24 = vunpack.c.l.b16 %v7472_v49  ;;  %v3381_v58 = vunpack.c.h.b16 %v7500_v50  ;;  %v8685_v28 = vld [vmem:[#allocation85_spill] sm:$0xff] }
 0x39b   : > { %4854 = vpow2.f32 %v2473_v6  ;;  %3011 = vadd.xlane.f32.xlu1 %v3010_v19  ;;  %v7674_v14 = vsel %vm6533_vm1, %v2503_v47, 0  ;;  %3052 = vst.msk [vmem:[#allocation3] sm:$0xff] %vm3051_vm15, %v3019_v8  ;;  %v3383_v53 = vunpack.c.h.b16 %v7472_v49  ;;  %v8676_v20 = vsub.f32 %v8674_v36, %v8675_v46  ;;  %v8686_v6 = vld [vmem:[#allocation88_spill] sm:$0xff]  ;;  %v2799_v47 = vld [vmem:[#allocation3 + $0x20] sm:$0xff] }
 0x39c   : > { %v2915_v25 = vunpack.c.l.bf16 %v7674_v14  ;;  %v2916_v61 = vunpack.c.h.bf16 %v7674_v14  ;;  %v2828_v37 = vmul.f32 %v8677_v11, %v2796_v27  ;;  %v8680_v48 = vsub.f32 %v8678_v40, %v8679_v45 }
 0x39d   : > { %2999 = vadd.xlane.f32.xlu2 %v2998_v30  ;;  %v1967_v4 = vmul.f32 1.442695, %v8676_v20  ;;  %v3424_v50 = vpack.c.b16 %v3382_v24, %v3380_v21  ;;  %v3425_v49 = vpack.c.b16 %v3383_v53, %v3381_v58  ;;  %v8684_v29 = vsub.f32 %v8682_v17, %v8683_v41  ;;  %v2797_v30 = vld [vmem:[#allocation3 + $0x10] sm:$0xff] }
 0x39e   : > { %v4851_v42 = vpop.eup %4850  ;;  %v1971_v12 = vmul.f32 1.442695, %v8680_v48  ;;  %v3007_v26 = vadd.f32 %v2916_v61, %v2915_v25  ;;  %v3020_v35 = vadd.f32 %v2928_v63, %v2828_v37  ;;  %v8690_v55 = vsub.f32 %v8688_v34, %v8689_v62  ;;  %v8703_v62 = vld [vmem:[#allocation97_spill] sm:$0xff] }
 0x39f   : > { %3607 = vmatmul.bf16.gmra.mxu0 %v3418_v60  ;;  %v2830_v31 = vmul.f32 %v4851_v42, %v2798_v39  ;;  %4856 = vpow2.f32 %v1967_v4  ;;  %v1975_v38 = vmul.f32 1.442695, %v8684_v29  ;;  %v8687_v60 = vsub.f32 %v8685_v28, %v8686_v6  ;;  %v8691_v39 = vld [vmem:[#allocation90_spill] sm:$0xff] }
 0x3a0   : > { %v4853_v52 = vpop.eup %4852  ;;  %3053 = vst.msk [vmem:[#allocation3 + $0x8] sm:$0xff] %vm3051_vm15, %v3020_v35  ;;  %4858 = vpow2.f32 %v1971_v12  ;;  %v1973_v8 = vmul.f32 1.442695, %v8690_v55  ;;  %v3394_v25 = vunpack.c.l.b16 %v7575_v54  ;;  %v3395_v61 = vunpack.c.h.b16 %v7575_v54  ;;  %v8704_v55 = vld [vmem:[#allocation100_spill] sm:$0xff] }
 0x3a1   : > { %v4855_v13 = vpop.eup %4854  ;;  %4860 = vpow2.f32 %v1975_v38  ;;  %v3392_v27 = vunpack.c.l.b16 %v7603_v44  ;;  %v3393_v21 = vunpack.c.h.b16 %v7603_v44  ;;  %v3384_v24 = vunpack.c.l.b16 %v7631_v43 }
 0x3a2   : > { %v2506_v33 = vpack.c.bf16 %v4855_v13, %v4853_v52  ;;  %3696 = vmatmul.bf16.gmra.mxu1 %v3419_v7  ;;  %v2934_v57 = vpop.xlane.xlu0 %2933  ;;  %v1977_v7 = vmul.f32 1.442695, %v8687_v60  ;;  %v3385_v36 = vunpack.c.h.b16 %v7631_v43  ;;  %v3386_v44 = vunpack.c.l.b16 %v7564_v9  ;;  %v8694_v43 = vld [vmem:[#allocation91_spill] sm:$0xff]  ;;  %v8700_v60 = vld [vmem:[#allocation96_spill] sm:$0xff] }
 0x3a3   : > { %v3022_v0 = vadd.f32 %v2934_v57, %v2830_v31  ;;  %v3573_v32 = vpop.f32.mrf.mxu0  ;;  %v7721_v54 = vpack.c.b16 %v3394_v25, %v3392_v27  ;;  %v7723_v20 = vpack.c.b16 %v3395_v61, %v3393_v21  ;;  %v3387_v45 = vunpack.c.h.b16 %v7564_v9  ;;  %v2802_v57 = vld [vmem:[#allocation3 + $0x38] sm:$0xff]  ;;  %v8697_v9 = vld [vmem:[#allocation87_spill] sm:$0xff] }
 0x3a4   : > { %v7692_v2 = vsel %vm6564_vm6, %v2506_v33, 0  ;;  %3622 = vmatmul.bf16.gmra.mxu2 %v3424_v50  ;;  %3711 = vmatmul.bf16.gmra.mxu3 %v3425_v49  ;;  %v3662_v1 = vpop.f32.mrf.mxu1  ;;  %4862 = vpow2.f32 %v1977_v7  ;;  %v3426_v50 = vpack.c.b16 %v3386_v44, %v3384_v24  ;;  %v8701_v7 = vld [vmem:[#allocation98_spill] sm:$0xff] }
 0x3a5   : > { %3008 = vadd.xlane.f32.xlu2 %v3007_v26  ;;  %v2921_v18 = vunpack.c.l.bf16 %v7692_v2  ;;  %v2922_v15 = vunpack.c.h.bf16 %v7692_v2  ;;  %3055 = vst.msk [vmem:[#allocation3 + $0x18] sm:$0xff] %vm3051_vm15, %v3022_v0  ;;  %v7699_v10 = vadd.f32 %v3662_v1, %v3573_v32  ;;  %v7704_v59 = vpop.eup %4856  ;;  %4864 = vpow2.f32 %v1973_v8  ;;  %v8695_v26 = vld [vmem:[#allocation94_spill] sm:$0xff] }
 0x3a6   : > { %3123 = vperm.xlu0 %4720, %v8677_v11   ;;  %v4859_v19 = vpop.eup %4858  ;;  %v2829_v13 = vmul.f32 %v7704_v59, %v2797_v30  ;;  %v8692_v11 = vld [vmem:[#allocation92_spill] sm:$0xff]  ;;  %v8696_v33 = vsub.f32 %v8694_v43, %v8695_v26  ;;  %v3427_v49 = vpack.c.b16 %v3387_v45, %v3385_v36  ;;  %v8705_v8 = vsub.f32 %v8703_v62, %v8704_v55  ;;  %v8707_v43 = vld [vmem:[#allocation95_spill] sm:$0xff] }
 0x3a7   : > { %v3016_v56 = vadd.f32 %v2922_v15, %v2921_v18  ;;  %v2831_v53 = vmul.f32 %v4859_v19, %v2799_v47  ;;  %v8693_v37 = vsub.f32 %v8691_v39, %v8692_v11  ;;  %v4861_v35 = vpop.eup %4860  ;;  %v8698_v18 = vld [vmem:[#allocation89_spill] sm:$0xff]  ;;  %v8702_v47 = vsub.f32 %v8700_v60, %v8701_v7 }
 0x3a8   : > { %v1983_v63 = vmul.f32 1.442695, %v8696_v33  ;;  %v8699_v15 = vsub.f32 %v8697_v9, %v8698_v18  ;;  %v2833_v17 = vmul.f32 %v4861_v35, %v2801_v51  ;;  %v1989_v25 = vmul.f32 1.442695, %v8705_v8  ;;  %v8710_v9 = vld [vmem:[#allocation103_spill] sm:$0xff] }
 0x3a9   : > { %v1981_v40 = vmul.f32 1.442695, %v8693_v37  ;;  %v1987_v30 = vmul.f32 1.442695, %v8702_v47  ;;  %v2803_v37 = vld [vmem:[#allocation3 + $0x40] sm:$0xff]  ;;  %v3399_v60 = vunpack.c.h.b16 %v7661_v16 }
 0x3aa   : > { %v4863_v31 = vpop.eup %4862  ;;  %v1979_v0 = vmul.f32 1.442695, %v8699_v15 }
 0x3ab   : > { %v3575_v52 = vpop.f32.mrf.mxu0  ;;  %4866 = vpow2.f32 %v1981_v40  ;;  %v7739_v32 = vpop.eup %4864  ;;  %v2834_v38 = vmul.f32 %v4863_v31, %v2802_v57  ;;  %v3388_v40 = vunpack.c.l.b16 %v7514_v5  ;;  %v8709_v57 = vld [vmem:[#allocation102_spill] sm:$0xff] }
 0x3ac   : > { %v3664_v58 = vpop.f32.mrf.mxu1  ;;  %4868 = vpow2.f32 %v1983_v63  ;;  %v3389_v63 = vunpack.c.h.b16 %v7514_v5  ;;  %v8711_v18 = vsub.f32 %v8709_v57, %v8710_v9  ;;  %v2809_v9 = vld [vmem:[#allocation3 + $0x70] sm:$0xff] }
 0x3ad   : > { %3017 = vadd.xlane.f32.xlu2 %v3016_v56  ;;  %v7719_v46 = vadd.f32 %v3664_v58, %v3575_v52  ;;  %v2800_v56 = vld [vmem:[#allocation3 + $0x28] sm:$0xff]  ;;  %4870 = vpow2.f32 %v1979_v0 }
 0x3ae   : > { %3133 = vperm.xlu0 %4720, %v4851_v42   ;;  %v2937_v4 = vpop.xlane.xlu2 %2936  ;;  %v2931_v42 = vpop.xlane.xlu1 %2930  ;;  %v2832_v61 = vmul.f32 %v7739_v32, %v2800_v56  ;;  %v2804_v58 = vld [vmem:[#allocation3 + $0x48] sm:$0xff]  ;;  %4872 = vpow2.f32 %v1987_v30  ;;  %v1993_v15 = vmul.f32 1.442695, %v8711_v18  ;;  %v3396_v56 = vunpack.c.l.b16 %v7674_v14  ;;  %v8724_v18 = vld [vmem:[#allocation124_spill] sm:$0xff] }
 0x3af   : > { %v3023_v48 = vadd.f32 %v2937_v4, %v2831_v53  ;;  %v3021_v12 = vadd.f32 %v2931_v42, %v2829_v13  ;;  %v2805_v53 = vld [vmem:[#allocation3 + $0x50] sm:$0xff]  ;;  %4874 = vpow2.f32 %v1989_v25  ;;  %v3390_v13 = vunpack.c.l.b16 %v7665_v3 }
 0x3b1   : > { %3056 = vst.msk [vmem:[#allocation3 + $0x20] sm:$0xff] %vm3051_vm15, %v3023_v48  ;;  %v4867_v27 = vpop.eup %4866 }
 0x3b2   : > { %3054 = vst.msk [vmem:[#allocation3 + $0x10] sm:$0xff] %vm3051_vm15, %v3021_v12  ;;  %v4869_v24 = vpop.eup %4868  ;;  %v2836_v39 = vmul.f32 %v4867_v27, %v2804_v58  ;;  %v8706_v12 = vld [vmem:[#allocation93_spill] sm:$0xff] }
 0x3b3   : > { %v7754_v4 = vpop.eup %4870  ;;  %v2837_v11 = vmul.f32 %v4869_v24, %v2805_v53  ;;  %v8708_v26 = vsub.f32 %v8706_v12, %v8707_v43  ;;  %v8716_v58 = vld [vmem:[#allocation101_spill] sm:$0xff] }
 0x3b4   : > { %3118 = vperm.xlu1 %4719, %v8672_v22   ;;  %3627 = vmatmul.bf16.gmra.mxu2 %v3426_v50  ;;  %v3578_v22 = vpop.f32.mrf.mxu0  ;;  %v3667_v1 = vpop.f32.mrf.mxu1 }
 0x3b5   : > { %3716 = vmatmul.bf16.gmra.mxu3 %v3427_v49  ;;  %v7741_v41 = vadd.f32 %v3667_v1, %v3578_v22  ;;  %v1985_v33 = vmul.f32 1.442695, %v8708_v26  ;;  %v3428_v49 = vpack.c.b16 %v3390_v13, %v3388_v40  ;;  %v4873_v51 = vpop.eup %4872  ;;  %v8719_v40 = vld [vmem:[#allocation121_spill] sm:$0xff] }
 0x3b6   : > { %3148 = vperm.xlu0 %4720, %v4861_v35   ;;  %v2943_v29 = vpop.xlane.xlu0 %2942  ;;  %v2946_v6 = vpop.xlane.xlu2 %2945 }
 0x3b7   : > { %v3025_v28 = vadd.f32 %v2943_v29, %v2833_v17  ;;  %v3026_v34 = vadd.f32 %v2946_v6, %v2834_v38  ;;  %v4875_v1 = vpop.eup %4874  ;;  %v2807_v17 = vld [vmem:[#allocation3 + $0x60] sm:$0xff]  ;;  %v2808_v29 = vld [vmem:[#allocation3 + $0x68] sm:$0xff]  ;;  %4876 = vpow2.f32 %v1985_v33  ;;  %v3397_v6 = vunpack.c.h.b16 %v7674_v14 }
 0x3b8   : > { %4878 = vpow2.f32 %v1993_v15  ;;  %v2839_v47 = vmul.f32 %v4873_v51, %v2807_v17  ;;  %v2840_v30 = vmul.f32 %v4875_v1, %v2808_v29  ;;  %v8725_v15 = vld [vmem:[#allocation125_spill] sm:$0xff] }
 0x3b9   : > { %3058 = vst.msk [vmem:[#allocation3 + $0x30] sm:$0xff] %vm3051_vm15, %v3025_v28  ;;  %v2940_v21 = vpop.xlane.xlu1 %2939  ;;  %v3398_v28 = vunpack.c.l.b16 %v7661_v16  ;;  %v7780_v55 = vpack.c.b16 %v3399_v60, %v3397_v6  ;;  %v8715_v16 = vld [vmem:[#allocation99_spill] sm:$0xff] }
 0x3ba   : > { %3059 = vst.msk [vmem:[#allocation3 + $0x38] sm:$0xff] %vm3051_vm15, %v3026_v34  ;;  %v3024_v52 = vadd.f32 %v2940_v21, %v2832_v61  ;;  %v8713_v21 = vld [vmem:[#allocation105_spill] sm:$0xff]  ;;  %v8717_v53 = vsub.f32 %v8715_v16, %v8716_v58  ;;  %v8737_v16 = vld [vmem:[#allocation115_spill] sm:$0xff] }
 0x3bb   : > { %v7778_v62 = vpack.c.b16 %v3398_v28, %v3396_v56  ;;  %v8731_v56 = vld [vmem:[#allocation109_spill] sm:$0xff] }
 0x3bc   : > { %3138 = vperm.xlu1 %4719, %v4859_v19   ;;  %3057 = vst.msk [vmem:[#allocation3 + $0x28] sm:$0xff] %vm3051_vm15, %v3024_v52  ;;  %v3580_v36 = vpop.f32.mrf.mxu0  ;;  %v3669_v44 = vpop.f32.mrf.mxu1  ;;  %v3391_v19 = vunpack.c.h.b16 %v7665_v3  ;;  %v2835_v3 = vmul.f32 %v7754_v4, %v2803_v37  ;;  %v1991_v13 = vmul.f32 1.442695, %v8717_v53 }
 0x3bd   : > { %v7757_v42 = vadd.f32 %v3669_v44, %v3580_v36  ;;  %v4877_v61 = vpop.eup %4876  ;;  %v2806_v44 = vld [vmem:[#allocation3 + $0x58] sm:$0xff] }
 0x3be   : > { %3163 = vperm.xlu0 %4720, %v4867_v27   ;;  %v2955_v48 = vpop.xlane.xlu2 %2954  ;;  %v3429_v0 = vpack.c.b16 %v3391_v19, %v3389_v63  ;;  %v8712_v27 = vld [vmem:[#allocation104_spill] sm:$0xff]  ;;  %v4879_v36 = vpop.eup %4878  ;;  %v2838_v12 = vmul.f32 %v4877_v61, %v2806_v44  ;;  %v8740_v44 = vld [vmem:[#allocation113_spill] sm:$0xff] }
 0x3bf   : > { %v2952_v45 = vpop.xlane.xlu0 %2951  ;;  %v3029_v35 = vadd.f32 %v2955_v48, %v2837_v11  ;;  %v8714_v52 = vsub.f32 %v8712_v27, %v8713_v21  ;;  %v2810_v11 = vld [vmem:[#allocation3 + $0x78] sm:$0xff] }
 0x3c0   : > { %v3028_v50 = vadd.f32 %v2952_v45, %v2836_v39  ;;  %v2842_v26 = vmul.f32 %v4879_v36, %v2810_v11 }
 0x3c1   : > { %3062 = vst.msk [vmem:[#allocation3 + $0x50] sm:$0xff] %vm3051_vm15, %v3029_v35  ;;  %v1999_v14 = vmul.f32 1.442695, %v8714_v52 }
 0x3c2   : > { %3061 = vst.msk [vmem:[#allocation3 + $0x48] sm:$0xff] %vm3051_vm15, %v3028_v50  ;;  %v2949_v22 = vpop.xlane.xlu1 %2948  ;;  %v8721_v50 = vld [vmem:[#allocation106_spill] sm:$0xff] }
 0x3c3   : > { %v3027_v5 = vadd.f32 %v2949_v22, %v2835_v3  ;;  %4880 = vpow2.f32 %v1999_v14  ;;  %v8736_v14 = vld [vmem:[#allocation114_spill] sm:$0xff] }
 0x3c4   : > { %3153 = vperm.xlu1 %4719, %v4863_v31   ;;  %3632 = vmatmul.bf16.gmra.mxu2 %v3428_v49  ;;  %v3583_v38 = vpop.f32.mrf.mxu0  ;;  %v3672_v31 = vpop.f32.mrf.mxu1  ;;  %4882 = vpow2.f32 %v1991_v13  ;;  %v8738_v58 = vsub.f32 %v8736_v14, %v8737_v16  ;;  %v2811_v16 = vld [vmem:[#allocation3 + $0x80] sm:$0xff] }
 0x3c5   : > { %3128 = vperm.xlu2 %4721, %v7704_v59   ;;  %3721 = vmatmul.bf16.gmra.mxu3 %v3429_v0  ;;  %3060 = vst.msk [vmem:[#allocation3 + $0x40] sm:$0xff] %vm3051_vm15, %v3027_v5  ;;  %v7776_v7 = vadd.f32 %v3672_v31, %v3583_v38  ;;  %v8726_v0 = vsub.f32 %v8724_v18, %v8725_v15  ;;  %v8727_v5 = vld [vmem:[#allocation110_spill] sm:$0xff] }
 0x3c6   : > { %3178 = vperm.xlu0 %4720, %v4873_v51   ;;  %v2964_v34 = vpop.xlane.xlu2 %2963  ;;  %v2003_v53 = vmul.f32 1.442695, %v8738_v58  ;;  %v2815_v15 = vld [vmem:[#allocation3 + $0xa0] sm:$0xff] }
 0x3c7   : > { %v2961_v59 = vpop.xlane.xlu0 %2960  ;;  %v3032_v25 = vadd.f32 %v2964_v34, %v2840_v30  ;;  %v2001_v22 = vmul.f32 1.442695, %v8726_v0 }
 0x3c8   : > { %v3031_v8 = vadd.f32 %v2961_v59, %v2839_v47 }
 0x3c9   : > { %3065 = vst.msk [vmem:[#allocation3 + $0x68] sm:$0xff] %vm3051_vm15, %v3032_v25  ;;  %v4881_v51 = vpop.eup %4880  ;;  %v8734_v25 = vld [vmem:[#allocation129_spill] sm:$0xff] }
 0x3ca   : > { %3064 = vst.msk [vmem:[#allocation3 + $0x60] sm:$0xff] %vm3051_vm15, %v3031_v8  ;;  %v4883_v57 = vpop.eup %4882  ;;  %v8733_v8 = vld [vmem:[#allocation128_spill] sm:$0xff] }
 0x3cb   : > { %v2841_v38 = vmul.f32 %v4883_v57, %v2809_v9  ;;  %v8735_v27 = vsub.f32 %v8733_v8, %v8734_v25  ;;  %v3401_v8 = vunpack.c.h.b16 %v7608_v23 }
 0x3cc   : > { %3168 = vperm.xlu1 %4719, %v4869_v24   ;;  %v3585_v19 = vpop.f32.mrf.mxu0  ;;  %v3674_v39 = vpop.f32.mrf.mxu1  ;;  %v8718_v24 = vld [vmem:[#allocation120_spill] sm:$0xff] }
 0x3cd   : > { %3143 = vperm.xlu2 %4721, %v7739_v32   ;;  %v7791_v37 = vadd.f32 %v3674_v39, %v3585_v19  ;;  %v8720_v45 = vsub.f32 %v8718_v24, %v8719_v40  ;;  %v8722_v32 = vld [vmem:[#allocation107_spill] sm:$0xff]  ;;  %v2007_v21 = vmul.f32 1.442695, %v8735_v27 }
 0x3ce   : > { %3193 = vperm.xlu0 %4720, %v4879_v36   ;;  %v8723_v35 = vsub.f32 %v8721_v50, %v8722_v32  ;;  %v8739_v36 = vld [vmem:[#allocation112_spill] sm:$0xff]  ;;  %v2812_v24 = vld [vmem:[#allocation3 + $0x88] sm:$0xff] }
 0x3cf   : > { %v1995_v48 = vmul.f32 1.442695, %v8720_v45  ;;  %v8741_v19 = vsub.f32 %v8739_v36, %v8740_v44  ;;  %v2816_v40 = vld [vmem:[#allocation3 + $0xa8] sm:$0xff] }
 0x3d0   : > { %v2958_v43 = vpop.xlane.xlu1 %2957  ;;  %v2005_v49 = vmul.f32 1.442695, %v8723_v35 }
 0x3d1   : > { %v3030_v33 = vadd.f32 %v2958_v43, %v2838_v12  ;;  %v2970_v63 = vpop.xlane.xlu0 %2969  ;;  %4884 = vpow2.f32 %v1995_v48  ;;  %v2017_v39 = vmul.f32 1.442695, %v8741_v19 }
 0x3d2   : > { %v3034_v3 = vadd.f32 %v2970_v63, %v2842_v26  ;;  %4886 = vpow2.f32 %v2005_v49  ;;  %v8742_v26 = vld [vmem:[#allocation130_spill] sm:$0xff] }
 0x3d3   : > { %3063 = vst.msk [vmem:[#allocation3 + $0x58] sm:$0xff] %vm3051_vm15, %v3030_v33  ;;  %4888 = vpow2.f32 %v2001_v22  ;;  %v8743_v33 = vld [vmem:[#allocation131_spill] sm:$0xff]  ;;  %v8748_v22 = vld [vmem:[#allocation118_spill] sm:$0xff] }
 0x3d4   : > { %3183 = vperm.xlu1 %4719, %v4875_v1   ;;  %3637 = vmatmul.bf16.gmra.mxu2 %v7721_v54  ;;  %3067 = vst.msk [vmem:[#allocation3 + $0x78] sm:$0xff] %vm3051_vm15, %v3034_v3  ;;  %v2813_v1 = vld [vmem:[#allocation3 + $0x90] sm:$0xff]  ;;  %v8728_v54 = vld [vmem:[#allocation111_spill] sm:$0xff]  ;;  %v7826_v13 = vpop.f32.mrf.mxu0  ;;  %v7832_v11 = vpop.f32.mrf.mxu1  ;;  %v8744_v63 = vsub.f32 %v8742_v26, %v8743_v33 }
 0x3d5   : > { %3158 = vperm.xlu2 %4721, %v7754_v4   ;;  %3726 = vmatmul.bf16.gmra.mxu3 %v7723_v20  ;;  %v8729_v17 = vsub.f32 %v8727_v5, %v8728_v54  ;;  %v8730_v20 = vld [vmem:[#allocation108_spill] sm:$0xff]  ;;  %v2845_v47 = vmul.f32 %v4881_v51, %v2813_v1  ;;  %v8749_v1 = vld [vmem:[#allocation119_spill] sm:$0xff] }
 0x3d6   : > { %3208 = vperm.xlu0 %4720, %v4881_v51   ;;  %v8732_v28 = vsub.f32 %v8730_v20, %v8731_v56  ;;  %v2013_v50 = vmul.f32 1.442695, %v8744_v63  ;;  %v8746_v51 = vld [vmem:[#allocation117_spill] sm:$0xff]  ;;  %v8750_v5 = vsub.f32 %v8748_v22, %v8749_v1  ;;  %v3403_v20 = vunpack.c.h.b16 %v7692_v2  ;;  %v8751_v56 = vld [vmem:[#allocation10_spill] sm:$0xff]  ;;  %v8761_v22 = vld [vmem:[#allocation127_spill] sm:$0xff] }
 0x3d7   : > { %v1997_v29 = vmul.f32 1.442695, %v8729_v17  ;;  %v7810_v31 = vpop.eup %4884  ;;  %v2822_v63 = vld [vmem:[#allocation3 + $0xd8] sm:$0xff] }
 0x3d8   : > { %v2011_v6 = vmul.f32 1.442695, %v8732_v28  ;;  %v4887_v59 = vpop.eup %4886  ;;  %v2009_v54 = vmul.f32 1.442695, %v8750_v5  ;;  %v8752_v28 = vld [vmem:[#allocation133_spill] sm:$0xff]  ;;  %v3435_v14 = vpack.c.b16 %v3403_v20, %v3401_v8  ;;  %v2843_v19 = vmul.f32 %v7810_v31, %v2811_v16  ;;  %v2825_v20 = vld [vmem:[#allocation3 + $0xf0] sm:$0xff] }
 0x3d9   : > { %v2967_v4 = vpop.xlane.xlu1 %2966  ;;  %4890 = vpow2.f32 %v1997_v29  ;;  %v7821_v52 = vpop.eup %4888  ;;  %v2848_v43 = vmul.f32 %v4887_v59, %v2816_v40  ;;  %v2819_v29 = vld [vmem:[#allocation3 + $0xc0] sm:$0xff] }
 0x3da   : > { %v3033_v60 = vadd.f32 %v2967_v4, %v2841_v38  ;;  %4892 = vpow2.f32 %v2011_v6  ;;  %v3402_v38 = vunpack.c.l.b16 %v7692_v2  ;;  %v8753_v6 = vsub.f32 %v8751_v56, %v8752_v28 }
 0x3db   : > { %v2979_v30 = vpop.xlane.xlu0 %2978  ;;  %4894 = vpow2.f32 %v2007_v21 }
 0x3dc   : > { %3198 = vperm.xlu1 %4719, %v7810_v31   ;;  %3066 = vst.msk [vmem:[#allocation3 + $0x70] sm:$0xff] %vm3051_vm15, %v3033_v60  ;;  %v3037_v34 = vadd.f32 %v2979_v30, %v2845_v47  ;;  %4896 = vpow2.f32 %v2003_v53  ;;  %v7847_v18 = vpop.f32.mrf.mxu0  ;;  %v7852_v17 = vpop.f32.mrf.mxu1  ;;  %v2019_v60 = vmul.f32 1.442695, %v8753_v6  ;;  %v3400_v30 = vunpack.c.l.b16 %v7608_v23  ;;  %v8754_v53 = vld [vmem:[#allocation122_spill] sm:$0xff] }
 0x3dd   : > { %3173 = vperm.xlu2 %4721, %v4877_v61   ;;  %4898 = vpow2.f32 %v2017_v39 }
 0x3de   : > { %3223 = vperm.xlu0 %4720, %v4887_v59   ;;  %3070 = vst.msk [vmem:[#allocation3 + $0x90] sm:$0xff] %vm3051_vm15, %v3037_v34  ;;  %4900 = vpow2.f32 %v2013_v50  ;;  %v3434_v21 = vpack.c.b16 %v3402_v38, %v3400_v30 }
 0x3df   : > { %v4891_v61 = vpop.eup %4890 }
 0x3e0   : > { %v4893_v45 = vpop.eup %4892  ;;  %v2844_v48 = vmul.f32 %v4891_v61, %v2812_v24 }
 0x3e1   : > { %v7839_v3 = vpop.eup %4894  ;;  %v2851_v34 = vmul.f32 %v4893_v45, %v2819_v29  ;;  %v2821_v29 = vld [vmem:[#allocation3 + $0xd0] sm:$0xff] }
 0x3e2   : > { %v4897_v9 = vpop.eup %4896 }
 0x3e3   : > { %v4899_v0 = vpop.eup %4898  ;;  %v2847_v4 = vmul.f32 %v4897_v9, %v2815_v15  ;;  %v8760_v15 = vld [vmem:[#allocation126_spill] sm:$0xff] }
 0x3e4   : > { %3213 = vperm.xlu1 %4719, %v7821_v52   ;;  %3642 = vmatmul.bf16.gmra.mxu2 %v7778_v62  ;;  %v8745_v62 = vld [vmem:[#allocation116_spill] sm:$0xff]  ;;  %v7861_v25 = vpop.eup %4900  ;;  %v8762_v1 = vsub.f32 %v8760_v15, %v8761_v22  ;;  %v3087_v22 = vld [vmem:[#allocation4 + $0x18] sm:$0xff] }
 0x3e5   : > { %3188 = vperm.xlu2 %4721, %v4883_v57   ;;  %3731 = vmatmul.bf16.gmra.mxu3 %v7780_v55  ;;  %v8747_v55 = vsub.f32 %v8745_v62, %v8746_v51  ;;  %v2854_v62 = vmul.f32 %v4899_v0, %v2822_v63 }
 0x3e6   : > { %3238 = vperm.xlu0 %4720, %v4893_v45   ;;  %v2976_v12 = vpop.xlane.xlu1 %2975  ;;  %v2818_v45 = vld [vmem:[#allocation3 + $0xb8] sm:$0xff]  ;;  %v2021_v5 = vmul.f32 1.442695, %v8762_v1 }
 0x3e7   : > { %v3036_v32 = vadd.f32 %v2976_v12, %v2844_v48  ;;  %v2988_v35 = vpop.xlane.xlu0 %2987  ;;  %v2023_v57 = vmul.f32 1.442695, %v8747_v55  ;;  %v7869_v23 = vpop.f32.mrf.mxu0  ;;  %v8757_v48 = vld [vmem:[#allocation138_spill] sm:$0xff] }
 0x3e8   : > { %v3040_v49 = vadd.f32 %v2988_v35, %v2848_v43  ;;  %v7872_v24 = vpop.f32.mrf.mxu1  ;;  %v8758_v12 = vld [vmem:[#allocation142_spill] sm:$0xff]  ;;  %v2814_v35 = vld [vmem:[#allocation3 + $0x98] sm:$0xff] }
 0x3e9   : > { %3069 = vst.msk [vmem:[#allocation3 + $0x88] sm:$0xff] %vm3051_vm15, %v3036_v32  ;;  %4902 = vpow2.f32 %v2023_v57  ;;  %v8759_v43 = vsub.f32 %v8757_v48, %v8758_v12  ;;  %v2846_v57 = vmul.f32 %v7821_v52, %v2814_v35 }
 0x3ea   : > { %3073 = vst.msk [vmem:[#allocation3 + $0xa8] sm:$0xff] %vm3051_vm15, %v3040_v49  ;;  %4904 = vpow2.f32 %v2009_v54 }
 0x3eb   : > { %4906 = vpow2.f32 %v2019_v60  ;;  %v2025_v26 = vmul.f32 1.442695, %v8759_v43 }
 0x3ec   : > { %3228 = vperm.xlu1 %4719, %v7839_v3  }
 0x3ed   : > { %3203 = vperm.xlu2 %4721, %v4891_v61   ;;  %v8755_v61 = vld [vmem:[#allocation123_spill] sm:$0xff] }
 0x3ee   : > { %3253 = vperm.xlu0 %4720, %v4899_v0   ;;  %v8756_v36 = vsub.f32 %v8754_v53, %v8755_v61  ;;  %v2824_v53 = vld [vmem:[#allocation3 + $0xe8] sm:$0xff] }
 0x3ef   : > { %v2985_v47 = vpop.xlane.xlu1 %2984  ;;  %v4903_v58 = vpop.eup %4902 }
 0x3f0   : > { %v3039_v59 = vadd.f32 %v2985_v47, %v2847_v4  ;;  %v2015_v44 = vmul.f32 1.442695, %v8756_v36  ;;  %v4905_v39 = vpop.eup %4904  ;;  %v7886_v38 = vpop.f32.mrf.mxu0  ;;  %v2857_v60 = vmul.f32 %v4903_v58, %v2825_v20  ;;  %v2817_v47 = vld [vmem:[#allocation3 + $0xb0] sm:$0xff] }
 0x3f1   : > { %v7877_v50 = vpop.eup %4906  ;;  %v2850_v32 = vmul.f32 %v4905_v39, %v2818_v45  ;;  %v7889_v0 = vpop.f32.mrf.mxu1 }
 0x3f2   : > { %v2997_v27 = vpop.xlane.xlu0 %2996  ;;  %3072 = vst.msk [vmem:[#allocation3 + $0xa0] sm:$0xff] %vm3051_vm15, %v3039_v59  ;;  %4908 = vpow2.f32 %v2015_v44  ;;  %v2820_v44 = vld [vmem:[#allocation3 + $0xc8] sm:$0xff] }
 0x3f3   : > { %v3043_v2 = vadd.f32 %v2997_v27, %v2851_v34  ;;  %4910 = vpow2.f32 %v2025_v26  ;;  %v2849_v34 = vmul.f32 %v7839_v3, %v2817_v47  ;;  %v3090_v47 = vld [vmem:[#allocation4 + $0x30] sm:$0xff] }
 0x3f4   : > { %3243 = vperm.xlu1 %4719, %v7861_v25   ;;  %3647 = vmatmul.bf16.gmra.mxu2 %v3434_v21  ;;  %4912 = vpow2.f32 %v2021_v5 }
 0x3f5   : > { %3076 = vst.msk [vmem:[#allocation3 + $0xc0] sm:$0xff] %vm3051_vm15, %v3043_v2  ;;  %3218 = vperm.xlu2 %4721, %v4897_v9   ;;  %3736 = vmatmul.bf16.gmra.mxu3 %v3435_v14 }
 0x3f6   : > { %3268 = vperm.xlu0 %4720, %v4903_v58   ;;  %v2973_v40 = vpop.xlane.xlu2 %2972 }
 0x3f7   : > { %v3035_v33 = vadd.f32 %v2973_v40, %v2843_v19 }
 0x3f8   : > { %v4909_v9 = vpop.eup %4908 }
 0x3f9   : > { %3068 = vst.msk [vmem:[#allocation3 + $0x80] sm:$0xff] %vm3051_vm15, %v3035_v33  ;;  %v4911_v56 = vpop.eup %4910  ;;  %v2853_v28 = vmul.f32 %v4909_v9, %v2821_v29  ;;  %v2823_v33 = vld [vmem:[#allocation3 + $0xe0] sm:$0xff] }
 0x3fa   : > { %v4913_v2 = vpop.eup %4912 }
 0x3fb   : > { %v2994_v31 = vpop.xlane.xlu1 %2993  ;;  %v2856_v36 = vmul.f32 %v4913_v2, %v2824_v53 }
 0x3fc   : > { %3258 = vperm.xlu1 %4719, %v7877_v50   ;;  %v3042_v49 = vadd.f32 %v2994_v31, %v2850_v32  ;;  %v7897_v61 = vpop.f32.mrf.mxu0  ;;  %v3085_v32 = vld [vmem:[#allocation4] sm:$0xff]  ;;  %v2855_v31 = vmul.f32 %v7877_v50, %v2823_v33 }
 0x3fd   : > { %v3006_v51 = vpop.xlane.xlu0 %3005  ;;  %3233 = vperm.xlu2 %4721, %v4905_v39   ;;  %v7899_v58 = vpop.f32.mrf.mxu1  ;;  %v2852_v39 = vmul.f32 %v7861_v25, %v2820_v44 }
 0x3fe   : > { %3075 = vst.msk [vmem:[#allocation3 + $0xb8] sm:$0xff] %vm3051_vm15, %v3042_v49  ;;  %v3046_v55 = vadd.f32 %v3006_v51, %v2854_v62  ;;  %v2982_v54 = vpop.xlane.xlu2 %2981 }
 0x3ff   : > { %v3038_v4 = vadd.f32 %v2982_v54, %v2846_v57 }
 0x400   : > { %3079 = vst.msk [vmem:[#allocation3 + $0xd8] sm:$0xff] %vm3051_vm15, %v3046_v55 }
 0x401   : > { %3071 = vst.msk [vmem:[#allocation3 + $0x98] sm:$0xff] %vm3051_vm15, %v3038_v4 }
 0x403   : > { %v3003_v52 = vpop.xlane.xlu1 %3002 }
 0x404   : > { %3273 = vperm.xlu1 %4719, %v4911_v56   ;;  %v3045_v6 = vadd.f32 %v3003_v52, %v2853_v28  ;;  %v7907_v26 = vpop.f32.mrf.mxu0 }
 0x405   : > { %v3015_v30 = vpop.xlane.xlu0 %3014  ;;  %3248 = vperm.xlu2 %4721, %v4909_v9   ;;  %v7909_v63 = vpop.f32.mrf.mxu1  ;;  %v2826_v9 = vld [vmem:[#allocation3 + $0xf8] sm:$0xff] }
 0x406   : > { %3078 = vst.msk [vmem:[#allocation3 + $0xd0] sm:$0xff] %vm3051_vm15, %v3045_v6  ;;  %v3049_v59 = vadd.f32 %v3015_v30, %v2857_v60  ;;  %v2858_v5 = vmul.f32 %v4911_v56, %v2826_v9  ;;  %v3086_v30 = vld [vmem:[#allocation4 + $0xd8] sm:$0xff] }
 0x407   : > { %v3613_v8 = vpop.f32.mrf.mxu2  ;;  %v3702_v21 = vpop.f32.mrf.mxu3 }
 0x408   : > { %3082 = vst.msk [vmem:[#allocation3 + $0xf0] sm:$0xff] %vm3051_vm15, %v3049_v59  ;;  %v2991_v27 = vpop.xlane.xlu2 %2990  ;;  %v7895_v16 = vadd.f32 %v3702_v21, %v3613_v8 }
 0x409   : > { %v3041_v14 = vadd.f32 %v2991_v27, %v2849_v34  ;;  %v3678_v27 = vadd.f32 %v7832_v11, %v7826_v13 }
 0x40b   : > { %3074 = vst.msk [vmem:[#allocation3 + $0xb0] sm:$0xff] %vm3051_vm15, %v3041_v14 }
 0x40c   : > { %v7918_v15 = vpop.f32.mrf.mxu0 }
 0x40d   : > { %3263 = vperm.xlu2 %4721, %v4913_v2  }
 0x40e   : > { %v3012_v19 = vpop.xlane.xlu1 %3011 }
 0x40f   : > { %v3048_v3 = vadd.f32 %v3012_v19, %v2856_v36  ;;  %v3615_v40 = vpop.f32.mrf.mxu2  ;;  %v3704_v48 = vpop.f32.mrf.mxu3  ;;  %v3088_v19 = vld [vmem:[#allocation4 + $0x50] sm:$0xff] }
 0x410   : > { %v3000_v45 = vpop.xlane.xlu2 %2999  ;;  %v7904_v43 = vadd.f32 %v3704_v48, %v3615_v40  ;;  %v3692_v1 = vpop.f32.mrf.mxu1  ;;  %v3089_v40 = vld [vmem:[#allocation4 + $0x68] sm:$0xff] }
 0x411   : > { %3081 = vst.msk [vmem:[#allocation3 + $0xe8] sm:$0xff] %vm3051_vm15, %v3048_v3  ;;  %v3044_v12 = vadd.f32 %v3000_v45, %v2852_v39  ;;  %v3093_v39 = vld [vmem:[#allocation4 + $0x88] sm:$0xff] }
 0x413   : > { %3077 = vst.msk [vmem:[#allocation3 + $0xc8] sm:$0xff] %vm3051_vm15, %v3044_v12  ;;  %v3685_v12 = vadd.f32 %v7889_v0, %v7886_v38  ;;  %v3092_v38 = vld [vmem:[#allocation4 + $0x80] sm:$0xff] }
 0x414   : > { %v7933_v14 = vpop.f32.mrf.mxu0 }
 0x417   : > { %v7912_v35 = vpop.f32.mrf.mxu2  ;;  %v7914_v55 = vpop.f32.mrf.mxu3 }
 0x418   : > { %v3124_v25 = vpop.permute.xlu0 %3123  ;;  %v3009_v49 = vpop.xlane.xlu2 %3008 }
 0x419   : > { %v3277_v62 = vmul.f32 %v3124_v25, %v3085_v32  ;;  %v3047_v51 = vadd.f32 %v3009_v49, %v2855_v31  ;;  %v7935_v53 = vpop.f32.mrf.mxu1  ;;  %v3091_v49 = vld [vmem:[#allocation4 + $0x48] sm:$0xff] }
 0x41b   : > { %v3743_v57 = vadd.f32 %v7719_v46, %v3277_v62  ;;  %3080 = vst.msk [vmem:[#allocation3 + $0xe0] sm:$0xff] %vm3051_vm15, %v3047_v51  ;;  %v3084_v46 = vld [vmem:[#allocation4 + $0xb0] sm:$0xff] }
 0x41c   : > { %v3608_v62 = vpop.f32.mrf.mxu0 }
 0x41d   : > { %3775 = vst [vmem:[#allocation4] sm:$0xff] %v3743_v57 }
 0x41f   : > { %v7920_v50 = vpop.f32.mrf.mxu2  ;;  %v7922_v28 = vpop.f32.mrf.mxu3 }
 0x420   : > { %v3134_v54 = vpop.permute.xlu0 %3133  ;;  %v3018_v29 = vpop.xlane.xlu2 %3017 }
 0x421   : > { %v3279_v4 = vmul.f32 %v3134_v54, %v3087_v22  ;;  %v3050_v20 = vadd.f32 %v3018_v29, %v2858_v5  ;;  %v3697_v51 = vpop.f32.mrf.mxu1  ;;  %v3096_v22 = vld [vmem:[#allocation4 + $0x60] sm:$0xff] }
 0x423   : > { %v3745_v52 = vadd.f32 %v7757_v42, %v3279_v4  ;;  %3083 = vst.msk [vmem:[#allocation3 + $0xf8] sm:$0xff] %vm3051_vm15, %v3050_v20  ;;  %v3693_v4 = vadd.f32 %v3692_v1, %v7918_v15 }
 0x425   : > { %3777 = vst [vmem:[#allocation4 + $0x18] sm:$0xff] %v3745_v52 }
 0x426   : > { %v3119_v6 = vpop.permute.xlu1 %3118 }
 0x427   : > { %v3276_v60 = vmul.f32 %v3119_v6, %v3084_v46  ;;  %v7926_v59 = vpop.f32.mrf.mxu2  ;;  %v7931_v42 = vpop.f32.mrf.mxu3  ;;  %v3094_v6 = vld [vmem:[#allocation4 + $0xe8] sm:$0xff] }
 0x428   : > { %v3149_v34 = vpop.permute.xlu0 %3148  ;;  %v3129_v8 = vpop.permute.xlu2 %3128 }
 0x429   : > { %v3742_v56 = vadd.f32 %v7699_v10, %v3276_v60  ;;  %v3282_v21 = vmul.f32 %v3149_v34, %v3090_v47  ;;  %v3278_v2 = vmul.f32 %v3129_v8, %v3086_v30  ;;  %v3688_v47 = vadd.f32 %v7899_v58, %v7897_v61  ;;  %v3610_v30 = vpop.f32.mrf.mxu0 }
 0x42b   : > { %3774 = vst [vmem:[#allocation4 + $0xb0] sm:$0xff] %v3742_v56  ;;  %v3748_v36 = vadd.f32 %v3678_v27, %v3282_v21  ;;  %v3744_v44 = vadd.f32 %v7741_v41, %v3278_v2  ;;  %v3699_v56 = vpop.f32.mrf.mxu1  ;;  %v3690_v21 = vadd.f32 %v7909_v63, %v7907_v26 }
 0x42c   : > { %v3700_v2 = vadd.f32 %v3699_v56, %v3610_v30  ;;  %v3713_v56 = vadd.f32 %v7931_v42, %v7926_v59 }
 0x42d   : > { %3780 = vst [vmem:[#allocation4 + $0x30] sm:$0xff] %v3748_v36 }
 0x42e   : > { %v3139_v10 = vpop.permute.xlu1 %3138  ;;  %3776 = vst [vmem:[#allocation4 + $0xd8] sm:$0xff] %v3744_v44 }
 0x42f   : > { %v3280_v3 = vmul.f32 %v3139_v10, %v3088_v19  ;;  %v7938_v13 = vpop.f32.mrf.mxu2  ;;  %v7943_v31 = vpop.f32.mrf.mxu3  ;;  %v3097_v10 = vld [vmem:[#allocation4 + $0xf0] sm:$0xff] }
 0x430   : > { %v3164_v45 = vpop.permute.xlu0 %3163  ;;  %v3144_v48 = vpop.permute.xlu2 %3143 }
 0x431   : > { %v3746_v11 = vadd.f32 %v7776_v7, %v3280_v3  ;;  %v3285_v33 = vmul.f32 %v3164_v45, %v3093_v39  ;;  %v3281_v32 = vmul.f32 %v3144_v48, %v3089_v40  ;;  %v3680_v7 = vadd.f32 %v7852_v17, %v7847_v18  ;;  %v3098_v45 = vld [vmem:[#allocation4 + $0x8] sm:$0xff] }
 0x432   : > { %v3695_v39 = vadd.f32 %v7935_v53, %v7933_v14 }
 0x433   : > { %3778 = vst [vmem:[#allocation4 + $0x50] sm:$0xff] %v3746_v11  ;;  %v3751_v41 = vadd.f32 %v3685_v12, %v3285_v33  ;;  %v3747_v25 = vadd.f32 %v7791_v37, %v3281_v32  ;;  %v3683_v37 = vadd.f32 %v7872_v24, %v7869_v23  ;;  %v3099_v23 = vld [vmem:[#allocation4 + $0x78] sm:$0xff]  ;;  %v3102_v11 = vld [vmem:[#allocation4 + $0x40] sm:$0xff]  ;;  %v3708_v33 = vadd.f32 %v7914_v55, %v7912_v35 }
 0x434   : > { %v3095_v24 = vld [vmem:[#allocation4 + $0xb8] sm:$0xff]  ;;  %v3698_v32 = vadd.f32 %v3697_v51, %v3608_v62  ;;  %v3715_v35 = vadd.f32 %v7943_v31, %v7938_v13 }
 0x435   : > { %3783 = vst [vmem:[#allocation4 + $0x88] sm:$0xff] %v3751_v41 }
 0x436   : > { %v3154_v57 = vpop.permute.xlu1 %3153  ;;  %3779 = vst [vmem:[#allocation4 + $0x68] sm:$0xff] %v3747_v25 }
 0x437   : > { %v3283_v9 = vmul.f32 %v3154_v57, %v3091_v49  ;;  %v7948_v0 = vpop.f32.mrf.mxu2 }
 0x438   : > { %v3179_v54 = vpop.permute.xlu0 %3178  ;;  %v3159_v29 = vpop.permute.xlu2 %3158 }
 0x439   : > { %v3749_v5 = vadd.f32 %v3680_v7, %v3283_v9  ;;  %v3288_v20 = vmul.f32 %v3179_v54, %v3096_v22  ;;  %v3284_v52 = vmul.f32 %v3159_v29, %v3092_v38  ;;  %v7953_v46 = vpop.f32.mrf.mxu3  ;;  %v3100_v9 = vld [vmem:[#allocation4 + $0x38] sm:$0xff]  ;;  %v3105_v22 = vld [vmem:[#allocation4 + $0x90] sm:$0xff] }
 0x43a   : > { %v3101_v38 = vld [vmem:[#allocation4 + $0x58] sm:$0xff] }
 0x43b   : > { %3781 = vst [vmem:[#allocation4 + $0x48] sm:$0xff] %v3749_v5  ;;  %v3754_v18 = vadd.f32 %v3693_v4, %v3288_v20  ;;  %v3750_v17 = vadd.f32 %v3683_v37, %v3284_v52  ;;  %v3103_v52 = vld [vmem:[#allocation4 + $0xc8] sm:$0xff] }
 0x43d   : > { %3786 = vst [vmem:[#allocation4 + $0x60] sm:$0xff] %v3754_v18 }
 0x43e   : > { %v3169_v60 = vpop.permute.xlu1 %3168  ;;  %3782 = vst [vmem:[#allocation4 + $0x80] sm:$0xff] %v3750_v17  ;;  %v3710_v17 = vadd.f32 %v7922_v28, %v7920_v50  ;;  %v3718_v28 = vadd.f32 %v7953_v46, %v7948_v0 }
 0x43f   : > { %v3286_v34 = vmul.f32 %v3169_v60, %v3094_v6  ;;  %v7957_v15 = vpop.f32.mrf.mxu2  ;;  %v3108_v6 = vld [vmem:[#allocation4 + $0xa8] sm:$0xff]  ;;  %v3104_v60 = vld [vmem:[#allocation4 + $0xe0] sm:$0xff] }
 0x440   : > { %v3194_v8 = vpop.permute.xlu0 %3193  ;;  %v3174_v27 = vpop.permute.xlu2 %3173 }
 0x441   : > { %v3752_v1 = vadd.f32 %v3688_v47, %v3286_v34  ;;  %v3291_v36 = vmul.f32 %v3194_v8, %v3099_v23  ;;  %v3287_v44 = vmul.f32 %v3174_v27, %v3095_v24  ;;  %v7961_v19 = vpop.f32.mrf.mxu3  ;;  %v3106_v27 = vld [vmem:[#allocation4 + $0x70] sm:$0xff] }
 0x443   : > { %3784 = vst [vmem:[#allocation4 + $0xe8] sm:$0xff] %v3752_v1  ;;  %v3757_v61 = vadd.f32 %v3700_v2, %v3291_v36  ;;  %v3753_v58 = vadd.f32 %v3690_v21, %v3287_v44  ;;  %v3107_v2 = vld [vmem:[#allocation4 + $0xc0] sm:$0xff]  ;;  %v3111_v36 = vld [vmem:[#allocation4 + $0x28] sm:$0xff] }
 0x445   : > { %3789 = vst [vmem:[#allocation4 + $0x78] sm:$0xff] %v3757_v61 }
 0x446   : > { %v3184_v3 = vpop.permute.xlu1 %3183  ;;  %3785 = vst [vmem:[#allocation4 + $0xb8] sm:$0xff] %v3753_v58  ;;  %v3720_v58 = vadd.f32 %v7961_v19, %v7957_v15 }
 0x447   : > { %v3289_v40 = vmul.f32 %v3184_v3, %v3097_v10  ;;  %v3633_v48 = vpop.f32.mrf.mxu2 }
 0x448   : > { %v3209_v63 = vpop.permute.xlu0 %3208  ;;  %v3189_v12 = vpop.permute.xlu2 %3188 }
 0x449   : > { %v3755_v26 = vadd.f32 %v3695_v39, %v3289_v40  ;;  %v3294_v41 = vmul.f32 %v3209_v63, %v3102_v11  ;;  %v3290_v25 = vmul.f32 %v3189_v12, %v3098_v45  ;;  %v3722_v49 = vpop.f32.mrf.mxu3  ;;  %v3109_v45 = vld [vmem:[#allocation4 + $0xd0] sm:$0xff] }
 0x44a   : > { %v3723_v34 = vadd.f32 %v3722_v49, %v3633_v48  ;;  %v3110_v63 = vld [vmem:[#allocation4 + $0x10] sm:$0xff]  ;;  %v3112_v49 = vld [vmem:[#allocation4 + $0xa0] sm:$0xff] }
 0x44b   : > { %3787 = vst [vmem:[#allocation4 + $0xf0] sm:$0xff] %v3755_v26  ;;  %v3760_v57 = vadd.f32 %v3708_v33, %v3294_v41  ;;  %v3756_v7 = vadd.f32 %v3698_v32, %v3290_v25 }
 0x44d   : > { %3792 = vst [vmem:[#allocation4 + $0x40] sm:$0xff] %v3760_v57 }
 0x44e   : > { %v3199_v14 = vpop.permute.xlu1 %3198  ;;  %3788 = vst [vmem:[#allocation4 + $0x8] sm:$0xff] %v3756_v7 }
 0x44f   : > { %v3292_v53 = vmul.f32 %v3199_v14, %v3100_v9  ;;  %v3635_v5 = vpop.f32.mrf.mxu2  ;;  %v3113_v14 = vld [vmem:[#allocation4 + $0xf8] sm:$0xff] }
 0x450   : > { %v3224_v29 = vpop.permute.xlu0 %3223  ;;  %v3204_v37 = vpop.permute.xlu2 %3203 }
 0x451   : > { %v3758_v54 = vadd.f32 %v7895_v16, %v3292_v53  ;;  %v3297_v55 = vmul.f32 %v3224_v29, %v3105_v22  ;;  %v3293_v62 = vmul.f32 %v3204_v37, %v3101_v38  ;;  %v3724_v51 = vpop.f32.mrf.mxu3 }
 0x452   : > { %v3725_v46 = vadd.f32 %v3724_v51, %v3635_v5 }
 0x453   : > { %3790 = vst [vmem:[#allocation4 + $0x38] sm:$0xff] %v3758_v54  ;;  %v3763_v4 = vadd.f32 %v3715_v35, %v3297_v55  ;;  %v3759_v20 = vadd.f32 %v7904_v43, %v3293_v62  ;;  %v3114_v35 = vld [vmem:[#allocation4 + $0x20] sm:$0xff] }
 0x455   : > { %3795 = vst [vmem:[#allocation4 + $0x90] sm:$0xff] %v3763_v4 }
 0x456   : > { %v3214_v18 = vpop.permute.xlu1 %3213  ;;  %3791 = vst [vmem:[#allocation4 + $0x58] sm:$0xff] %v3759_v20 }
 0x457   : > { %v3295_v16 = vmul.f32 %v3214_v18, %v3103_v52  ;;  %v3638_v47 = vpop.f32.mrf.mxu2  ;;  %v3115_v18 = vld [vmem:[#allocation4 + $0x98] sm:$0xff] }
 0x458   : > { %v3239_v13 = vpop.permute.xlu0 %3238  ;;  %v3219_v31 = vpop.permute.xlu2 %3218 }
 0x459   : > { %v3761_v30 = vadd.f32 %v3710_v17, %v3295_v16  ;;  %v3300_v23 = vmul.f32 %v3239_v13, %v3108_v6  ;;  %v3296_v43 = vmul.f32 %v3219_v31, %v3104_v60  ;;  %v3727_v24 = vpop.f32.mrf.mxu3 }
 0x45a   : > { %v3728_v41 = vadd.f32 %v3727_v24, %v3638_v47 }
 0x45b   : > { %3793 = vst [vmem:[#allocation4 + $0xc8] sm:$0xff] %v3761_v30  ;;  %v3766_v1 = vadd.f32 %v3723_v34, %v3300_v23  ;;  %v3762_v8 = vadd.f32 %v3713_v56, %v3296_v43 }
 0x45d   : > { %3798 = vst [vmem:[#allocation4 + $0xa8] sm:$0xff] %v3766_v1 }
 0x45e   : > { %v3229_v50 = vpop.permute.xlu1 %3228  ;;  %3794 = vst [vmem:[#allocation4 + $0xe0] sm:$0xff] %v3762_v8 }
 0x45f   : > { %v3298_v21 = vmul.f32 %v3229_v50, %v3106_v27  ;;  %v3640_v44 = vpop.f32.mrf.mxu2 }
 0x460   : > { %v3254_v59 = vpop.permute.xlu0 %3253  ;;  %v3234_v42 = vpop.permute.xlu2 %3233 }
 0x461   : > { %v3764_v61 = vadd.f32 %v3718_v28, %v3298_v21  ;;  %v3299_v10 = vmul.f32 %v3234_v42, %v3107_v2  ;;  %v3729_v3 = vpop.f32.mrf.mxu3  ;;  %v3303_v39 = vmul.f32 %v3254_v59, %v3111_v36 }
 0x462   : > { %v3730_v40 = vadd.f32 %v3729_v3, %v3640_v44 }
 0x463   : > { %3796 = vst [vmem:[#allocation4 + $0x70] sm:$0xff] %v3764_v61  ;;  %v3765_v11 = vadd.f32 %v3720_v58, %v3299_v10 }
 0x464   : > { %v3769_v48 = vadd.f32 %v3730_v40, %v3303_v39 }
 0x465   : > { %3797 = vst [vmem:[#allocation4 + $0xc0] sm:$0xff] %v3765_v11 }
 0x466   : > { %v3244_v0 = vpop.permute.xlu1 %3243  ;;  %3801 = vst [vmem:[#allocation4 + $0x28] sm:$0xff] %v3769_v48 }
 0x467   : > { %v3301_v26 = vmul.f32 %v3244_v0, %v3109_v45  ;;  %v3643_v12 = vpop.f32.mrf.mxu2 }
 0x468   : > { %v3249_v32 = vpop.permute.xlu2 %3248  ;;  %v3269_v55 = vpop.permute.xlu0 %3268 }
 0x469   : > { %v3767_v33 = vadd.f32 %v3725_v46, %v3301_v26  ;;  %v3302_v25 = vmul.f32 %v3249_v32, %v3110_v63  ;;  %v3732_v15 = vpop.f32.mrf.mxu3  ;;  %v3306_v4 = vmul.f32 %v3269_v55, %v3114_v35 }
 0x46a   : > { %v3733_v57 = vadd.f32 %v3732_v15, %v3643_v12 }
 0x46b   : > { %3799 = vst [vmem:[#allocation4 + $0xd0] sm:$0xff] %v3767_v33  ;;  %v3768_v19 = vadd.f32 %v3728_v41, %v3302_v25 }
 0x46d   : > { %3800 = vst [vmem:[#allocation4 + $0x10] sm:$0xff] %v3768_v19 }
 0x46e   : > { %v3259_v7 = vpop.permute.xlu1 %3258 }
 0x46f   : > { %v3304_v9 = vmul.f32 %v3259_v7, %v3112_v49  ;;  %v3645_v53 = vpop.f32.mrf.mxu2 }
 0x470   : > { %v3264_v38 = vpop.permute.xlu2 %3263 }
 0x471   : > { %v3770_v22 = vadd.f32 %v3733_v57, %v3304_v9  ;;  %v3305_v5 = vmul.f32 %v3264_v38, %v3113_v14  ;;  %v3734_v54 = vpop.f32.mrf.mxu3 }
 0x472   : > { %v3735_v29 = vadd.f32 %v3734_v54, %v3645_v53 }
 0x473   : > { %3802 = vst [vmem:[#allocation4 + $0xa0] sm:$0xff] %v3770_v22 }
 0x474   : > { %v3771_v37 = vadd.f32 %v3735_v29, %v3305_v5 }
 0x476   : > { %3803 = vst [vmem:[#allocation4 + $0xf8] sm:$0xff] %v3771_v37  ;;  %v3274_v17 = vpop.permute.xlu1 %3273 }
 0x477   : > { %v3648_v62 = vpop.f32.mrf.mxu2  ;;  %v3307_v60 = vmul.f32 %v3274_v17, %v3115_v18 }
 0x479   : > { %v3737_v51 = vpop.f32.mrf.mxu3 }
 0x47a   : > { %v3738_v20 = vadd.f32 %v3737_v51, %v3648_v62 }
 0x47c   : > { %v3772_v52 = vadd.f32 %v3738_v20, %v3306_v4 }
 0x47e   : > { %3804 = vst [vmem:[#allocation4 + $0x20] sm:$0xff] %v3772_v52 }
 0x47f   : > { %v3650_v16 = vpop.f32.mrf.mxu2 }
 0x481   : > { %v3739_v6 = vpop.f32.mrf.mxu3 }
 0x482   : > { %v3740_v47 = vadd.f32 %v3739_v6, %v3650_v16 }
 0x484   : > { %v3773_v30 = vadd.f32 %v3740_v47, %v3307_v60 }
 0x486   : > { %3805 = vst [vmem:[#allocation4 + $0x98] sm:$0xff] %v3773_v30 }
 0x487 PF: > { %p4522_p11 = scmp.ne.s32.totalorder %s5046_s14, 3 }
 0x488   : > { %s8763_s0 = sld [smem:[#allocation153_spill]] (!%p4522_p11) }
 0x489   : > { %3841 = sbr.rel (%p4522_p11) target bundleno = 1378 (0x562), region = 97 }
 0x48e   : > { %v3846_v13 = vld [vmem:[#allocation3 + $0x20] sm:$0xff]  ;;  %v3844_v31 = vld [vmem:[#allocation3 + $0x10] sm:$0xff]  ;;  %v5070_v34 = vmov 0   ;;  %v3847_v23 = vld [vmem:[#allocation3 + $0x28] sm:$0xff] }
 0x48f   : > { %v3842_v56 = vld [vmem:[#allocation3] sm:$0xff]  ;;  %4916 = vset.pattern.permute.xlu2 %v5070_v34  ;;  %4915 = vset.pattern.permute.xlu1 %v5070_v34  ;;  %4918 = vrcp.f32 %v3846_v13  ;;  %v3845_v43 = vld [vmem:[#allocation3 + $0x18] sm:$0xff]  ;;  %v3843_v24 = vld [vmem:[#allocation3 + $0x8] sm:$0xff] }
 0x490   : > { %4914 = vset.pattern.permute.xlu0 %v5070_v34  ;;  %4920 = vrcp.f32 %v3844_v31  ;;  %v3850_v50 = vld [vmem:[#allocation3 + $0x40] sm:$0xff]  ;;  %v3849_v21 = vld [vmem:[#allocation3 + $0x38] sm:$0xff]  ;;  %v3848_v36 = vld [vmem:[#allocation3 + $0x30] sm:$0xff] }
 0x491   : > { %4922 = vrcp.f32 %v3842_v56  ;;  %v3853_v61 = vld [vmem:[#allocation3 + $0x58] sm:$0xff]  ;;  %v3852_v42 = vld [vmem:[#allocation3 + $0x50] sm:$0xff]  ;;  %v3851_v10 = vld [vmem:[#allocation3 + $0x48] sm:$0xff] }
 0x492   : > { %4924 = vrcp.f32 %v3847_v23  ;;  %v3856_v39 = vld [vmem:[#allocation3 + $0x70] sm:$0xff]  ;;  %v3855_v11 = vld [vmem:[#allocation3 + $0x68] sm:$0xff]  ;;  %v3854_v48 = vld [vmem:[#allocation3 + $0x60] sm:$0xff] }
 0x493   : > { %4926 = vrcp.f32 %v3845_v43  ;;  %v3859_v46 = vld [vmem:[#allocation3 + $0x88] sm:$0xff]  ;;  %v3858_v63 = vld [vmem:[#allocation3 + $0x80] sm:$0xff]  ;;  %v3857_v33 = vld [vmem:[#allocation3 + $0x78] sm:$0xff] }
 0x494   : > { %4928 = vrcp.f32 %v3843_v24  ;;  %v3862_v41 = vld [vmem:[#allocation3 + $0xa0] sm:$0xff]  ;;  %v3861_v15 = vld [vmem:[#allocation3 + $0x98] sm:$0xff]  ;;  %v3860_v49 = vld [vmem:[#allocation3 + $0x90] sm:$0xff] }
 0x495   : > { %v4919_v1 = vpop.eup %4918  ;;  %4930 = vrcp.f32 %v3850_v50  ;;  %v3865_v7 = vld [vmem:[#allocation3 + $0xb8] sm:$0xff]  ;;  %v3864_v14 = vld [vmem:[#allocation3 + $0xb0] sm:$0xff]  ;;  %v3863_v22 = vld [vmem:[#allocation3 + $0xa8] sm:$0xff] }
 0x496   : > { %v4921_v8 = vpop.eup %4920  ;;  %3960 = vperm.xlu2 %4916, %v4919_v1   ;;  %4932 = vrcp.f32 %v3849_v21  ;;  %v3868_v5 = vld [vmem:[#allocation3 + $0xd0] sm:$0xff]  ;;  %v3867_v29 = vld [vmem:[#allocation3 + $0xc8] sm:$0xff]  ;;  %v3866_v35 = vld [vmem:[#allocation3 + $0xc0] sm:$0xff] }
 0x497   : > { %v4923_v27 = vpop.eup %4922  ;;  %3950 = vperm.xlu1 %4915, %v4921_v8   ;;  %4934 = vrcp.f32 %v3848_v36  ;;  %v3871_v62 = vld [vmem:[#allocation3 + $0xe8] sm:$0xff]  ;;  %v3870_v4 = vld [vmem:[#allocation3 + $0xe0] sm:$0xff]  ;;  %v3869_v52 = vld [vmem:[#allocation3 + $0xd8] sm:$0xff] }
 0x498   : > { %3940 = vperm.xlu0 %4914, %v4923_v27   ;;  %v4925_v28 = vpop.eup %4924  ;;  %4936 = vrcp.f32 %v3853_v61  ;;  %v3873_v16 = vld [vmem:[#allocation3 + $0xf8] sm:$0xff]  ;;  %v3872_v60 = vld [vmem:[#allocation3 + $0xf0] sm:$0xff]  ;;  %v3911_v23 = vld [vmem:[#allocation4 + $0x68] sm:$0xff] }
 0x499   : > { %v4927_v2 = vpop.eup %4926  ;;  %4938 = vrcp.f32 %v3852_v42  ;;  %v3910_v56 = vld [vmem:[#allocation4 + $0x50] sm:$0xff]  ;;  %v7983_v43 = vld [vmem:[%s8763_s0] ss:$0 sm:$0xff]  ;;  %v3908_v36 = vld [vmem:[#allocation4 + $0xd8] sm:$0xff] }
 0x49a   : > { %v4929_v44 = vpop.eup %4928  ;;  %4940 = vrcp.f32 %v3851_v10  ;;  %v3909_v61 = vld [vmem:[#allocation4 + $0x18] sm:$0xff]  ;;  %v3907_v42 = vld [vmem:[#allocation4] sm:$0xff] }
 0x49b   : > { %v4931_v59 = vpop.eup %4930  ;;  %4942 = vrcp.f32 %v3856_v39 }
 0x49c   : > { %v4933_v58 = vpop.eup %4932  ;;  %4944 = vrcp.f32 %v3855_v11 }
 0x49d   : > { %v4935_v3 = vpop.eup %4934  ;;  %4946 = vrcp.f32 %v3854_v48 }
 0x49e   : > { %3965 = vperm.xlu2 %4916, %v4925_v28   ;;  %v4937_v40 = vpop.eup %4936  ;;  %4948 = vrcp.f32 %v3859_v46 }
 0x49f   : > { %3955 = vperm.xlu1 %4915, %v4927_v2   ;;  %v4939_v45 = vpop.eup %4938  ;;  %4950 = vrcp.f32 %v3858_v63 }
 0x4a0   : > { %3945 = vperm.xlu0 %4914, %v4929_v44   ;;  %v4941_v0 = vpop.eup %4940  ;;  %4952 = vrcp.f32 %v3857_v33  ;;  %v3906_v44 = vld [vmem:[#allocation4 + $0xb0] sm:$0xff] }
 0x4a1   : > { %v4943_v26 = vpop.eup %4942  ;;  %4954 = vrcp.f32 %v3862_v41  ;;  %v3912_v33 = vld [vmem:[#allocation4 + $0x30] sm:$0xff] }
 0x4a2   : > { %v4945_v12 = vpop.eup %4944  ;;  %4956 = vrcp.f32 %v3861_v15 }
 0x4a3   : > { %v4947_v32 = vpop.eup %4946  ;;  %4958 = vrcp.f32 %v3860_v49 }
 0x4a4   : > { %v4949_v25 = vpop.eup %4948  ;;  %4960 = vrcp.f32 %v3865_v7 }
 0x4a5   : > { %v4951_v19 = vpop.eup %4950  ;;  %4962 = vrcp.f32 %v3864_v14 }
 0x4a6   : > { %3980 = vperm.xlu2 %4916, %v4931_v59   ;;  %v4953_v57 = vpop.eup %4952  ;;  %4964 = vrcp.f32 %v3863_v22 }
 0x4a7   : > { %3975 = vperm.xlu1 %4915, %v4933_v58   ;;  %v4955_v9 = vpop.eup %4954  ;;  %4966 = vrcp.f32 %v3868_v5 }
 0x4a8   : > { %3970 = vperm.xlu0 %4914, %v4935_v3   ;;  %v4957_v53 = vpop.eup %4956  ;;  %4968 = vrcp.f32 %v3867_v29 }
 0x4a9   : > { %v4959_v38 = vpop.eup %4958  ;;  %4970 = vrcp.f32 %v3866_v35 }
 0x4aa   : > { %v4961_v54 = vpop.eup %4960  ;;  %4972 = vrcp.f32 %v3871_v62 }
 0x4ab   : > { %v4963_v37 = vpop.eup %4962  ;;  %4974 = vrcp.f32 %v3870_v4 }
 0x4ac   : > { %v4965_v55 = vpop.eup %4964  ;;  %4976 = vrcp.f32 %v3869_v52 }
 0x4ad   : > { %v4967_v51 = vpop.eup %4966  ;;  %4978 = vrcp.f32 %v3873_v16  ;;  %v3918_v16 = vld [vmem:[#allocation4 + $0x60] sm:$0xff] }
 0x4ae   : > { %3995 = vperm.xlu2 %4916, %v4937_v40   ;;  %v4969_v20 = vpop.eup %4968  ;;  %4980 = vrcp.f32 %v3872_v60 }
 0x4af   : > { %3990 = vperm.xlu1 %4915, %v4939_v45   ;;  %v4971_v18 = vpop.eup %4970 }
 0x4b0   : > { %3985 = vperm.xlu0 %4914, %v4941_v0   ;;  %v4973_v17 = vpop.eup %4972 }
 0x4b1   : > { %v4975_v6 = vpop.eup %4974 }
 0x4b2   : > { %v4977_v47 = vpop.eup %4976 }
 0x4b3   : > { %v4979_v30 = vpop.eup %4978 }
 0x4b4   : > { %v4981_v13 = vpop.eup %4980 }
 0x4b6   : > { %4010 = vperm.xlu2 %4916, %v4943_v26  }
 0x4b7   : > { %4005 = vperm.xlu1 %4915, %v4945_v12   ;;  %v3913_v12 = vld [vmem:[#allocation4 + $0x48] sm:$0xff] }
 0x4b8   : > { %4000 = vperm.xlu0 %4914, %v4947_v32  }
 0x4be   : > { %4025 = vperm.xlu2 %4916, %v4949_v25  }
 0x4bf   : > { %4020 = vperm.xlu1 %4915, %v4951_v19  }
 0x4c0   : > { %4015 = vperm.xlu0 %4914, %v4953_v57   ;;  %v3917_v57 = vld [vmem:[#allocation4 + $0xb8] sm:$0xff] }
 0x4c6   : > { %4040 = vperm.xlu2 %4916, %v4955_v9   ;;  %v3914_v9 = vld [vmem:[#allocation4 + $0x80] sm:$0xff] }
 0x4c7   : > { %4035 = vperm.xlu1 %4915, %v4957_v53   ;;  %v3916_v53 = vld [vmem:[#allocation4 + $0xe8] sm:$0xff] }
 0x4c8   : > { %4030 = vperm.xlu0 %4914, %v4959_v38   ;;  %v3915_v38 = vld [vmem:[#allocation4 + $0x88] sm:$0xff] }
 0x4ce   : > { %4055 = vperm.xlu2 %4916, %v4961_v54  }
 0x4cf   : > { %4050 = vperm.xlu1 %4915, %v4963_v37  }
 0x4d0   : > { %4045 = vperm.xlu0 %4914, %v4965_v55  }
 0x4d6   : > { %4070 = vperm.xlu2 %4916, %v4967_v51  }
 0x4d7   : > { %4065 = vperm.xlu1 %4915, %v4969_v20  }
 0x4d8   : > { %4060 = vperm.xlu0 %4914, %v4971_v18  }
 0x4de   : > { %4085 = vperm.xlu2 %4916, %v4973_v17   ;;  %v3919_v17 = vld [vmem:[#allocation4 + $0xf0] sm:$0xff] }
 0x4df   : > { %4080 = vperm.xlu1 %4915, %v4975_v6  }
 0x4e0   : > { %4075 = vperm.xlu0 %4914, %v4977_v47  }
 0x4e7   : > { %4095 = vperm.xlu1 %4915, %v4979_v30  }
 0x4e8   : > { %4090 = vperm.xlu0 %4914, %v4981_v13  }
 0x4f0   : > { %v3961_v31 = vpop.permute.xlu2 %3960 }
 0x4f1   : > { %v4102_v34 = vmul.f32 %v3961_v31, %v3910_v56  ;;  %v3923_v31 = vld [vmem:[#allocation4 + $0x58] sm:$0xff] }
 0x4f3   : > { %v4138_v1 = vadd.f32 %v7983_v43, %v4102_v34  ;;  %v3920_v34 = vld [vmem:[#allocation4 + $0x8] sm:$0xff] }
 0x4f8   : > { %v3966_v24 = vpop.permute.xlu2 %3965 }
 0x4f9   : > { %v4103_v8 = vmul.f32 %v3966_v24, %v3911_v23 }
 0x4fb   : > { %v4139_v27 = vadd.f32 %v7983_v43, %v4103_v8 }
 0x4fd   : > { %v4555_v50 = vpack.c.bf16 %v4139_v27, %v4138_v1  ;;  %v3922_v1 = vld [vmem:[#allocation4 + $0x38] sm:$0xff] }
 0x4fe   : > { %v3921_v27 = vld [vmem:[#allocation4 + $0x78] sm:$0xff] }
 0x4ff   : > { %4623 = vst [vmem:[%s5289_s9 + $0x10] sm:$0xff] %v4555_v50  }
 0x500   : > { %v3981_v28 = vpop.permute.xlu2 %3980 }
 0x501   : > { %v4106_v5 = vmul.f32 %v3981_v28, %v3914_v9 }
 0x503   : > { %v4142_v51 = vadd.f32 %v7983_v43, %v4106_v5 }
 0x508   : > { %v3996_v58 = vpop.permute.xlu2 %3995 }
 0x509   : > { %v3951_v21 = vpop.permute.xlu1 %3950  ;;  %v4109_v22 = vmul.f32 %v3996_v58, %v3917_v57 }
 0x50a   : > { %v3941_v2 = vpop.permute.xlu0 %3940  ;;  %v4100_v59 = vmul.f32 %v3951_v21, %v3908_v36 }
 0x50b   : > { %v4098_v10 = vmul.f32 %v3941_v2, %v3906_v44  ;;  %v4145_v55 = vadd.f32 %v7983_v43, %v4109_v22 }
 0x50c   : > { %v4136_v45 = vadd.f32 %v7983_v43, %v4100_v59 }
 0x50d   : > { %v4134_v0 = vadd.f32 %v7983_v43, %v4098_v10 }
 0x510   : > { %v4011_v15 = vpop.permute.xlu2 %4010 }
 0x511   : > { %v3956_v3 = vpop.permute.xlu1 %3955  ;;  %v4112_v50 = vmul.f32 %v4011_v15, %v3920_v34 }
 0x512   : > { %v4101_v39 = vmul.f32 %v3956_v3, %v3909_v61  ;;  %v3946_v40 = vpop.permute.xlu0 %3945  ;;  %v3925_v3 = vld [vmem:[#allocation4 + $0xc8] sm:$0xff] }
 0x513   : > { %v4099_v11 = vmul.f32 %v3946_v40, %v3907_v42  ;;  %v4148_v59 = vadd.f32 %v7983_v43, %v4112_v50 }
 0x514   : > { %v4137_v48 = vadd.f32 %v7983_v43, %v4101_v39  ;;  %v3924_v39 = vld [vmem:[#allocation4 + $0x40] sm:$0xff] }
 0x515   : > { %v4135_v46 = vadd.f32 %v7983_v43, %v4099_v11 }
 0x516   : > { %v4550_v26 = vpack.c.bf16 %v4137_v48, %v4136_v45 }
 0x517   : > { %v4545_v63 = vpack.c.bf16 %v4135_v46, %v4134_v0 }
 0x518   : > { %4622 = vst [vmem:[%s5289_s9 + $0x8] sm:$0xff] %v4550_v26   ;;  %v4026_v4 = vpop.permute.xlu2 %4025  ;;  %v3929_v26 = vld [vmem:[#allocation4 + $0xc0] sm:$0xff] }
 0x519   : > { %4546 = vst [vmem:[%s5289_s9] sm:$0xff] %v4545_v63   ;;  %v3976_v32 = vpop.permute.xlu1 %3975  ;;  %v4115_v8 = vmul.f32 %v4026_v4, %v3923_v31 }
 0x51a   : > { %v4105_v41 = vmul.f32 %v3976_v32, %v3913_v12  ;;  %v3971_v25 = vpop.permute.xlu0 %3970  ;;  %v3926_v12 = vld [vmem:[#allocation4 + $0xe0] sm:$0xff]  ;;  %v3928_v32 = vld [vmem:[#allocation4 + $0x70] sm:$0xff] }
 0x51b   : > { %v4104_v19 = vmul.f32 %v3971_v25, %v3912_v33  ;;  %v4151_v44 = vadd.f32 %v7983_v43, %v4115_v8  ;;  %v3927_v25 = vld [vmem:[#allocation4 + $0x90] sm:$0xff] }
 0x51c   : > { %v4141_v49 = vadd.f32 %v7983_v43, %v4105_v41 }
 0x51d   : > { %v4140_v7 = vadd.f32 %v7983_v43, %v4104_v19 }
 0x51f   : > { %v4560_v14 = vpack.c.bf16 %v4141_v49, %v4140_v7 }
 0x520   : > { %v4041_v23 = vpop.permute.xlu2 %4040 }
 0x521   : > { %4624 = vst [vmem:[%s5289_s9 + $0x18] sm:$0xff] %v4560_v14   ;;  %v3991_v54 = vpop.permute.xlu1 %3990  ;;  %v4118_v15 = vmul.f32 %v4041_v23, %v3926_v12 }
 0x522   : > { %v4108_v29 = vmul.f32 %v3991_v54, %v3916_v53  ;;  %v3986_v37 = vpop.permute.xlu0 %3985 }
 0x523   : > { %v4107_v35 = vmul.f32 %v3986_v37, %v3915_v38  ;;  %v4154_v22 = vadd.f32 %v7983_v43, %v4118_v15  ;;  %v3930_v37 = vld [vmem:[#allocation4 + $0xa8] sm:$0xff] }
 0x524   : > { %v4144_v62 = vadd.f32 %v7983_v43, %v4108_v29  ;;  %v3931_v29 = vld [vmem:[#allocation4 + $0xd0] sm:$0xff] }
 0x525   : > { %v4143_v20 = vadd.f32 %v7983_v43, %v4107_v35 }
 0x526   : > { %v4570_v52 = vpack.c.bf16 %v4145_v55, %v4144_v62 }
 0x527   : > { %v4565_v18 = vpack.c.bf16 %v4143_v20, %v4142_v51  ;;  %v3935_v20 = vld [vmem:[#allocation4 + $0xf8] sm:$0xff] }
 0x528   : > { %4626 = vst [vmem:[%s5289_s9 + $0x28] sm:$0xff] %v4570_v52   ;;  %v4056_v40 = vpop.permute.xlu2 %4055 }
 0x529   : > { %4625 = vst [vmem:[%s5289_s9 + $0x20] sm:$0xff] %v4565_v18   ;;  %v4006_v6 = vpop.permute.xlu1 %4005  ;;  %v4121_v41 = vmul.f32 %v4056_v40, %v3929_v26 }
 0x52a   : > { %v4111_v60 = vmul.f32 %v4006_v6, %v3919_v17  ;;  %v4001_v47 = vpop.permute.xlu0 %4000  ;;  %v3932_v17 = vld [vmem:[#allocation4 + $0x10] sm:$0xff]  ;;  %v3934_v6 = vld [vmem:[#allocation4 + $0xa0] sm:$0xff] }
 0x52b   : > { %v4110_v30 = vmul.f32 %v4001_v47, %v3918_v16  ;;  %v4157_v14 = vadd.f32 %v7983_v43, %v4121_v41  ;;  %v3933_v47 = vld [vmem:[#allocation4 + $0x28] sm:$0xff] }
 0x52c   : > { %v4147_v13 = vadd.f32 %v7983_v43, %v4111_v60 }
 0x52d   : > { %v4146_v56 = vadd.f32 %v7983_v43, %v4110_v30 }
 0x52f   : > { %v4575_v24 = vpack.c.bf16 %v4147_v13, %v4146_v56 }
 0x530   : > { %v4071_v7 = vpop.permute.xlu2 %4070 }
 0x531   : > { %4627 = vst [vmem:[%s5289_s9 + $0x30] sm:$0xff] %v4575_v24   ;;  %v4021_v28 = vpop.permute.xlu1 %4020  ;;  %v4124_v30 = vmul.f32 %v4071_v7, %v3932_v17 }
 0x532   : > { %v4114_v21 = vmul.f32 %v4021_v28, %v3922_v1  ;;  %v4016_v2 = vpop.permute.xlu0 %4015  ;;  %v3937_v28 = vld [vmem:[#allocation4 + $0x98] sm:$0xff] }
 0x533   : > { %v4113_v36 = vmul.f32 %v4016_v2, %v3921_v27  ;;  %v4160_v1 = vadd.f32 %v7983_v43, %v4124_v30 }
 0x534   : > { %v4150_v61 = vadd.f32 %v7983_v43, %v4114_v21  ;;  %v3936_v21 = vld [vmem:[#allocation4 + $0x20] sm:$0xff] }
 0x535   : > { %v4149_v42 = vadd.f32 %v7983_v43, %v4113_v36 }
 0x536   : > { %v4585_v58 = vpack.c.bf16 %v4151_v44, %v4150_v61 }
 0x537   : > { %v4580_v10 = vpack.c.bf16 %v4149_v42, %v4148_v59 }
 0x538   : > { %4629 = vst [vmem:[%s5289_s9 + $0x40] sm:$0xff] %v4585_v58   ;;  %v4086_v52 = vpop.permute.xlu2 %4085 }
 0x539   : > { %4628 = vst [vmem:[%s5289_s9 + $0x38] sm:$0xff] %v4580_v10   ;;  %v4036_v11 = vpop.permute.xlu1 %4035  ;;  %v4127_v60 = vmul.f32 %v4086_v52, %v3935_v20 }
 0x53a   : > { %v4117_v45 = vmul.f32 %v4036_v11, %v3925_v3  ;;  %v4031_v48 = vpop.permute.xlu0 %4030 }
 0x53b   : > { %v4116_v0 = vmul.f32 %v4031_v48, %v3924_v39  ;;  %v4163_v23 = vadd.f32 %v7983_v43, %v4127_v60 }
 0x53c   : > { %v4153_v46 = vadd.f32 %v7983_v43, %v4117_v45 }
 0x53d   : > { %v4152_v63 = vadd.f32 %v7983_v43, %v4116_v0 }
 0x53f   : > { %v4590_v33 = vpack.c.bf16 %v4153_v46, %v4152_v63 }
 0x541   : > { %4630 = vst [vmem:[%s5289_s9 + $0x48] sm:$0xff] %v4590_v33   ;;  %v4051_v19 = vpop.permute.xlu1 %4050 }
 0x542   : > { %v4120_v49 = vmul.f32 %v4051_v19, %v3928_v32  ;;  %v4046_v57 = vpop.permute.xlu0 %4045 }
 0x543   : > { %v4119_v9 = vmul.f32 %v4046_v57, %v3927_v25 }
 0x544   : > { %v4156_v53 = vadd.f32 %v7983_v43, %v4120_v49 }
 0x545   : > { %v4155_v38 = vadd.f32 %v7983_v43, %v4119_v9 }
 0x546   : > { %v4600_v5 = vpack.c.bf16 %v4157_v14, %v4156_v53 }
 0x547   : > { %v4595_v54 = vpack.c.bf16 %v4155_v38, %v4154_v22 }
 0x548   : > { %4632 = vst [vmem:[%s5289_s9 + $0x58] sm:$0xff] %v4600_v5  }
 0x549   : > { %4631 = vst [vmem:[%s5289_s9 + $0x50] sm:$0xff] %v4595_v54   ;;  %v4066_v35 = vpop.permute.xlu1 %4065 }
 0x54a   : > { %v4123_v55 = vmul.f32 %v4066_v35, %v3931_v29  ;;  %v4061_v62 = vpop.permute.xlu0 %4060 }
 0x54b   : > { %v4122_v51 = vmul.f32 %v4061_v62, %v3930_v37 }
 0x54c   : > { %v4159_v4 = vadd.f32 %v7983_v43, %v4123_v55 }
 0x54d   : > { %v4158_v18 = vadd.f32 %v7983_v43, %v4122_v51 }
 0x54f   : > { %v4605_v16 = vpack.c.bf16 %v4159_v4, %v4158_v18 }
 0x551   : > { %4633 = vst [vmem:[%s5289_s9 + $0x60] sm:$0xff] %v4605_v16   ;;  %v4081_v13 = vpop.permute.xlu1 %4080 }
 0x552   : > { %v4126_v31 = vmul.f32 %v4081_v13, %v3934_v6  ;;  %v4076_v56 = vpop.permute.xlu0 %4075 }
 0x553   : > { %v4125_v34 = vmul.f32 %v4076_v56, %v3933_v47 }
 0x554   : > { %v4162_v24 = vadd.f32 %v7983_v43, %v4126_v31 }
 0x555   : > { %v4161_v8 = vadd.f32 %v7983_v43, %v4125_v34 }
 0x556   : > { %v4615_v27 = vpack.c.bf16 %v4163_v23, %v4162_v24 }
 0x557   : > { %v4610_v50 = vpack.c.bf16 %v4161_v8, %v4160_v1 }
 0x558   : > { %4635 = vst [vmem:[%s5289_s9 + $0x70] sm:$0xff] %v4615_v27  }
 0x559   : > { %4634 = vst [vmem:[%s5289_s9 + $0x68] sm:$0xff] %v4610_v50   ;;  %v4096_v2 = vpop.permute.xlu1 %4095 }
 0x55a   : > { %v4129_v36 = vmul.f32 %v4096_v2, %v3937_v28  ;;  %v4091_v44 = vpop.permute.xlu0 %4090 }
 0x55b   : > { %v4128_v61 = vmul.f32 %v4091_v44, %v3936_v21 }
 0x55c   : > { %v4165_v59 = vadd.f32 %v7983_v43, %v4129_v36 }
 0x55d   : > { %v4164_v42 = vadd.f32 %v7983_v43, %v4128_v61 }
 0x55f   : > { %v4620_v58 = vpack.c.bf16 %v4165_v59, %v4164_v42 }
 0x561   : > { %4636 = vst [vmem:[%s5289_s9 + $0x78] sm:$0xff] %v4620_v58  }
 0x562 PF: > { %s31_s16 = sadd.s32 1, %s5062_s16   ;;  %s8764_s12 = smov %s5042_s13 }
 0x563   : > { %p28_p12 = scmp.ge.s32.totalorder %s31_s16, 18   ;;  %s8765_s13 = smov %s5191_s2 }
 0x564   : > { %s8766_s14 = smov %s5054_s15  ;;  %s8767_s0 = smov %s5058_s1 }
 0x565   : > { %s8768_s15 = smov %s8777_s17  ;;  %s8769_s1 = smov %s8773_s18 }
 0x566   :  { %30 = sbr.rel (!%p28_p12) target bundleno = 16 (0x10), region = 144 }

// kernel: structure_ae_forward.5
= control target key start
LH: loop header
LB: loop body
LE: loop exit
PB: predicated region body
PF: predicated region fallthrough
CT: control target
= control target key end

     0   :  { %s2780_s9 = smov 0   ;;  %s2782_s10 = smov 0   ;;  %s4134_s0 = inlined_call_operand.vmem [shape: bf16[1024,128], index: 0, kind: input, shape index: {}, may-alias: {0,1}]   ;;  %s4135_s1 = inlined_call_operand.vmem [shape: bf16[1024,128], index: 1, kind: input, shape index: {}, may-alias: {0,1}]   ;;  %s4136_s2 = inlined_call_operand.vmem [shape: bf16[1024,1024], index: 2, kind: output, shape index: {}]  }
   0x1   :  { %s2784_s11 = smov 0   ;;  %s2786_s12 = smov 0  }
   0x2   :  { %s2788_s13 = smov 0   ;;  %s2790_s14 = smov 0  }
   0x3   :  { %s2792_s15 = smov 0  }
   0x4 LB: > { %s21_s16 = sadd.s32 1, %s2755_s13  ;;  %s24_s17 = sadd.s32 1, %s2759_s14  ;;  %s2763_s15 = sphi %s2792_s15, %s12_s15   ;;  %s2759_s14 = sphi %s2790_s14, %s4277_s14   ;;  %s2755_s13 = sphi %s2788_s13, %s4276_s13   ;;  %s2751_s12 = sphi %s2786_s12, %s4275_s12   ;;  %s2747_s11 = sphi %s2784_s11, %s4274_s11   ;;  %s2743_s10 = sphi %s2782_s10, %s4273_s10   ;;  %s2739_s9 = sphi %s2780_s9, %s4272_s9  }
   0x5   : > { %p22_p0 = scmp.ge.s32.totalorder %s21_s16, 4  ;;  %s2139_s18 = sadd.s32 4294967295, %s2763_s15  }
   0x6   : > { %p95_p1 = scmp.ne.s32.totalorder %s2743_s10, %s2739_s9  ;;  %p96_p2 = scmp.eq.s32.totalorder %s2139_s18, 15 }
   0x7   : > { %s4279_s16 = smov (%p22_p0, %s21_s16), 0  ;;  %s4281_s17 = smov (!%p22_p0, %s24_s17), %s2759_s14 }
   0x8   : > { %s81_s19 = ssub.s32 %s2755_s13, %s4279_s16  ;;  %p26_p3 = scmp.ge.s32.totalorder %s4281_s17, 4 }
   0x9   : > { %p2143_p4 = scmp.ge.s32.totalorder %s2763_s15, 1  ;;  %p2826_p5 = por %p96_p2, %p95_p1 }
   0xa   : > { %p138_p6 = scmp.lt.s32.totalorder %s2763_s15, 17  ;;  %s4283_s17 = smov (%p26_p3, %s4281_s17), 0 }
   0xb   : > { %s80_s21 = ssub.s32 %s2759_s14, %s4283_s17  ;;  %s85_s23 = sadd.s32 1, %s2743_s10 }
   0xc   : > { %p139_p7 = pnand %p2143_p4, %p138_p6  ;;  %s82_s22 = sor.u32 %s81_s19, %s80_s21 }
   0xd   : > { %p83_p8 = scmp.eq.s32.totalorder %s82_s22, 0  ;;  %s2147_s25 = sshll.u32 (!%p139_p7), %s2747_s11, 5 }
   0xe   : > { %142 = sbr.rel (%p139_p7) target bundleno = 502 (0x1f6), region = 28  ;;  %p171_p9 = scmp.lt.s32.totalorder (!%p139_p7), %s2147_s25, 127 }
   0xf   : > { %s2837_s24 = scalar_select %p83_p8, %s2743_s10, %s85_s23  }
  0x10   : > { %s2145_s30 = sshll.u32 (!%p139_p7), %s2751_s12, 5  ;;  %s161_s7 = sand.u32 (!%p139_p7), 1, %s2739_s9  }
  0x11   : > { %p165_p10 = scmp.lt.s32.totalorder (!%p139_p7), %s2145_s30, 127  ;;  %s2144_s8 = sshll.u32 (!%p139_p7), %s161_s7, 8 }
  0x12   : > { %s2943_s9 = scalar_lea.vmem (!%p139_p7), [#allocation2], %s2144_s8 }
  0x13   : > { %s4285_s25 = smov (!%p171_p9, %s2147_s25), 127  ;;  %s4287_s30 = smov (!%p165_p10, %s2145_s30), 127 }
  0x14   : > { %s2148_s26 = sshll.u32 %s4285_s25, 2  ;;  %s2146_s3 = sshll.u32 %s4287_s30, 2 }
  0x15   : > { %s2843_s29 = scalar_lea.vmem %s4135_s1, %s2148_s26  ;;  %s2865_s6 = scalar_lea.vmem %s4134_s0, %s2146_s3 }
  0x16   : > { %v2371_v0 = vld [vmem:[%s2843_s29 + $0x38] sm:$0xff]  ;;  %v2370_v2 = vld [vmem:[%s2843_s29 + $0x30] sm:$0xff]  ;;  %v2369_v4 = vld [vmem:[%s2843_s29 + $0x28] sm:$0xff]  ;;  %s2343_s18 = sshll.u32 (%p2826_p5), %s2747_s11, 1  ;;  %s2380_s19 = sshll.u32 (%p2826_p5), %s2751_s12, 8 }
  0x17   : > { %v2379_v1 = vld [vmem:[%s2843_s29 + $0x78] sm:$0xff]  ;;  %434 = vmatpush.bf16.xpose.msra.mxu0 %v2371_v0  ;;  %2381 = vmatpush.bf16.xpose.msra.mxu2 %v2371_v0  ;;  %v2378_v3 = vld [vmem:[%s2843_s29 + $0x70] sm:$0xff]  ;;  %v2377_v5 = vld [vmem:[%s2843_s29 + $0x68] sm:$0xff]  ;;  %s1902_s21 = sadd.s32 (%p2826_p5), %s2380_s19, %s2343_s18 }
  0x18   : > { %523 = vmatpush.bf16.xpose.msra.mxu1 %v2379_v1  ;;  %2389 = vmatpush.bf16.xpose.msra.mxu3 %v2379_v1  ;;  %v2368_v6 = vld [vmem:[%s2843_s29 + $0x20] sm:$0xff]  ;;  %v2367_v8 = vld [vmem:[%s2843_s29 + $0x18] sm:$0xff]  ;;  %v2366_v10 = vld [vmem:[%s2843_s29 + $0x10] sm:$0xff]  ;;  %s2345_s22 = sshll.u32 (%p2826_p5), %s1902_s21, 2 }
  0x19   : > { %v2376_v7 = vld [vmem:[%s2843_s29 + $0x60] sm:$0xff]  ;;  %v2375_v9 = vld [vmem:[%s2843_s29 + $0x58] sm:$0xff]  ;;  %v2374_v11 = vld [vmem:[%s2843_s29 + $0x50] sm:$0xff]  ;;  %s4049_s25 = scalar_lea.vmem (%p2826_p5), %s4136_s2, %s2345_s22 }
  0x1a   : > { %v2365_v12 = vld [vmem:[%s2843_s29 + $0x8] sm:$0xff]  ;;  %v2364_v14 = vld [vmem:[%s2843_s29] sm:$0xff]  ;;  %v2350_v20 = vld [vmem:[%s2865_s6 + $0x10] sm:$0xff] }
  0x1b   : > { %v2373_v13 = vld [vmem:[%s2843_s29 + $0x48] sm:$0xff]  ;;  %v2372_v15 = vld [vmem:[%s2843_s29 + $0x40] sm:$0xff]  ;;  %v2358_v21 = vld [vmem:[%s2865_s6 + $0x50] sm:$0xff] }
  0x1c   : > { %v2348_v16 = vld [vmem:[%s2865_s6] sm:$0xff]  ;;  %v2349_v18 = vld [vmem:[%s2865_s6 + $0x8] sm:$0xff]  ;;  %v2351_v22 = vld [vmem:[%s2865_s6 + $0x18] sm:$0xff] }
  0x1d   : > { %v2356_v17 = vld [vmem:[%s2865_s6 + $0x40] sm:$0xff]  ;;  %v2357_v19 = vld [vmem:[%s2865_s6 + $0x48] sm:$0xff]  ;;  %v2359_v23 = vld [vmem:[%s2865_s6 + $0x58] sm:$0xff] }
  0x1e   : > { %v2352_v24 = vld [vmem:[%s2865_s6 + $0x20] sm:$0xff]  ;;  %v2353_v26 = vld [vmem:[%s2865_s6 + $0x28] sm:$0xff]  ;;  %v2354_v28 = vld [vmem:[%s2865_s6 + $0x30] sm:$0xff] }
  0x1f   : > { %435 = vmatpush.bf16.xpose.msra.mxu0 %v2370_v2  ;;  %2382 = vmatpush.bf16.xpose.msra.mxu2 %v2370_v2  ;;  %v2360_v25 = vld [vmem:[%s2865_s6 + $0x60] sm:$0xff]  ;;  %v2361_v27 = vld [vmem:[%s2865_s6 + $0x68] sm:$0xff]  ;;  %v2362_v29 = vld [vmem:[%s2865_s6 + $0x70] sm:$0xff] }
  0x20   : > { %524 = vmatpush.bf16.xpose.msra.mxu1 %v2378_v3  ;;  %2390 = vmatpush.bf16.xpose.msra.mxu3 %v2378_v3  ;;  %v2355_v30 = vld [vmem:[%s2865_s6 + $0x38] sm:$0xff] }
  0x21   : > { %v2363_v31 = vld [vmem:[%s2865_s6 + $0x78] sm:$0xff] }
  0x27   : > { %436 = vmatpush.bf16.xpose.msra.mxu0 %v2369_v4  ;;  %2383 = vmatpush.bf16.xpose.msra.mxu2 %v2369_v4 }
  0x28   : > { %525 = vmatpush.bf16.xpose.msra.mxu1 %v2377_v5  ;;  %2391 = vmatpush.bf16.xpose.msra.mxu3 %v2377_v5 }
  0x2f   : > { %437 = vmatpush.bf16.xpose.msra.mxu0 %v2368_v6  ;;  %2384 = vmatpush.bf16.xpose.msra.mxu2 %v2368_v6 }
  0x30   : > { %526 = vmatpush.bf16.xpose.msra.mxu1 %v2376_v7  ;;  %2392 = vmatpush.bf16.xpose.msra.mxu3 %v2376_v7 }
  0x37   : > { %438 = vmatpush.bf16.xpose.msra.mxu0 %v2367_v8  ;;  %2385 = vmatpush.bf16.xpose.msra.mxu2 %v2367_v8 }
  0x38   : > { %527 = vmatpush.bf16.xpose.msra.mxu1 %v2375_v9  ;;  %2393 = vmatpush.bf16.xpose.msra.mxu3 %v2375_v9 }
  0x3f   : > { %439 = vmatpush.bf16.xpose.msra.mxu0 %v2366_v10  ;;  %2386 = vmatpush.bf16.xpose.msra.mxu2 %v2366_v10 }
  0x40   : > { %528 = vmatpush.bf16.xpose.msra.mxu1 %v2374_v11  ;;  %2394 = vmatpush.bf16.xpose.msra.mxu3 %v2374_v11 }
  0x47   : > { %440 = vmatpush.bf16.xpose.msra.mxu0 %v2365_v12  ;;  %2387 = vmatpush.bf16.xpose.msra.mxu2 %v2365_v12 }
  0x48   : > { %529 = vmatpush.bf16.xpose.msra.mxu1 %v2373_v13  ;;  %2395 = vmatpush.bf16.xpose.msra.mxu3 %v2373_v13 }
  0x4f   : > { %441 = vmatpush.bf16.xpose.msra.mxu0 %v2364_v14  ;;  %2388 = vmatpush.bf16.xpose.msra.mxu2 %v2364_v14 }
  0x50   : > { %530 = vmatpush.bf16.xpose.msra.mxu1 %v2372_v15  ;;  %2396 = vmatpush.bf16.xpose.msra.mxu3 %v2372_v15 }
  0x56   : > { %442 = vmatmul.bf16.vlgmr.msra.gmra.mxu0 %v2348_v16  ;;  %482 = vmatmul.bf16.vlgmr.msra.gmra.mxu2 %v2356_v17 }
  0x57   : > { %531 = vmatmul.bf16.vlgmr.msra.gmra.mxu1 %v2348_v16  ;;  %571 = vmatmul.bf16.vlgmr.msra.gmra.mxu3 %v2356_v17 }
  0x66   : > { %447 = vmatmul.bf16.gmra.mxu0 %v2349_v18  ;;  %487 = vmatmul.bf16.gmra.mxu2 %v2357_v19 }
  0x67   : > { %536 = vmatmul.bf16.gmra.mxu1 %v2349_v18  ;;  %576 = vmatmul.bf16.gmra.mxu3 %v2357_v19 }
  0x76   : > { %452 = vmatmul.bf16.gmra.mxu0 %v2350_v20  ;;  %492 = vmatmul.bf16.gmra.mxu2 %v2358_v21 }
  0x77   : > { %541 = vmatmul.bf16.gmra.mxu1 %v2350_v20  ;;  %581 = vmatmul.bf16.gmra.mxu3 %v2358_v21 }
  0x86   : > { %457 = vmatmul.bf16.gmra.mxu0 %v2351_v22  ;;  %497 = vmatmul.bf16.gmra.mxu2 %v2359_v23 }
  0x87   : > { %546 = vmatmul.bf16.gmra.mxu1 %v2351_v22  ;;  %586 = vmatmul.bf16.gmra.mxu3 %v2359_v23 }
  0x96   : > { %462 = vmatmul.bf16.gmra.mxu0 %v2352_v24  ;;  %502 = vmatmul.bf16.gmra.mxu2 %v2360_v25 }
  0x97   : > { %551 = vmatmul.bf16.gmra.mxu1 %v2352_v24  ;;  %591 = vmatmul.bf16.gmra.mxu3 %v2360_v25 }
  0xa6   : > { %467 = vmatmul.bf16.gmra.mxu0 %v2353_v26  ;;  %507 = vmatmul.bf16.gmra.mxu2 %v2361_v27 }
  0xa7   : > { %556 = vmatmul.bf16.gmra.mxu1 %v2353_v26  ;;  %596 = vmatmul.bf16.gmra.mxu3 %v2361_v27 }
  0xb6   : > { %472 = vmatmul.bf16.gmra.mxu0 %v2354_v28  ;;  %512 = vmatmul.bf16.gmra.mxu2 %v2362_v29 }
  0xb7   : > { %561 = vmatmul.bf16.gmra.mxu1 %v2354_v28  ;;  %601 = vmatmul.bf16.gmra.mxu3 %v2362_v29 }
  0xc6   : > { %477 = vmatmul.bf16.gmra.mxu0 %v2355_v30  ;;  %517 = vmatmul.bf16.gmra.mxu2 %v2363_v31 }
  0xc7   : > { %566 = vmatmul.bf16.gmra.mxu1 %v2355_v30  ;;  %606 = vmatmul.bf16.gmra.mxu3 %v2363_v31 }
  0xd3   : > { %v443_v32 = vpop.f32.mrf.mxu0 }
  0xd4   : > { %v2277_v33 = vmul.f32 -1.442695, %v443_v32  ;;  %v532_v34 = vpop.f32.mrf.mxu1 }
  0xd5   : > { %v2278_v35 = vmul.f32 -1.442695, %v532_v34 }
  0xd6   : > { %2453 = vpow2.f32 %v2277_v33 }
  0xd7   : > { %2455 = vpow2.f32 %v2278_v35 }
  0xd9   : > { %v483_v36 = vpop.f32.mrf.mxu2 }
  0xda   : > { %v2309_v37 = vmul.f32 -1.442695, %v483_v36  ;;  %v572_v38 = vpop.f32.mrf.mxu3 }
  0xdb   : > { %v2310_v39 = vmul.f32 -1.442695, %v572_v38  ;;  %v445_v40 = vpop.f32.mrf.mxu0 }
  0xdc   : > { %v2454_v41 = vpop.eup %2453  ;;  %2457 = vpow2.f32 %v2309_v37  ;;  %v2279_v42 = vmul.f32 -1.442695, %v445_v40  ;;  %v534_v43 = vpop.f32.mrf.mxu1 }
  0xdd   : > { %v2456_v44 = vpop.eup %2455  ;;  %v804_v45 = vadd.f32 1.0, %v2454_v41  ;;  %2459 = vpow2.f32 %v2310_v39  ;;  %v2280_v46 = vmul.f32 -1.442695, %v534_v43 }
  0xde   : > { %v2883_v47 = vadd.f32 1.0, %v2456_v44  ;;  %2461 = vpow2.f32 %v2279_v42 }
  0xdf   : > { %2463 = vrcp.f32 %v804_v45  ;;  %v877_v50 = vand.u32 2147483647, %v804_v45  ;;  %v879_v51 = vand.u32 2147483648, %v804_v45  ;;  %vm873_vm0 = vweird.f32 %v804_v45 }
  0xe0   : > { %2465 = vrcp.f32 %v2883_v47  ;;  %v892_v53 = vand.u32 2147483647, %v2883_v47  ;;  %v894_v54 = vand.u32 2147483648, %v2883_v47  ;;  %vm888_vm1 = vweird.f32 %v2883_v47 }
  0xe1   : > { %2467 = vpow2.f32 %v2280_v46  ;;  %v485_v48 = vpop.f32.mrf.mxu2  ;;  %vm2894_vm2 = vcmp.eq.f32.partialorder %v877_v50, 8.507059e+37  ;;  %v880_v0 = vor.u32 1.1754944e-38, %v879_v51 }
  0xe2   : > { %v2458_v49 = vpop.eup %2457  ;;  %v2311_v56 = vmul.f32 -1.442695, %v485_v48  ;;  %v574_v60 = vpop.f32.mrf.mxu3  ;;  %vm2900_vm3 = vcmp.eq.f32.partialorder %v892_v53, 8.507059e+37  ;;  %v895_v5 = vor.u32 1.1754944e-38, %v894_v54 }
  0xe3   : > { %v2460_v52 = vpop.eup %2459  ;;  %v2888_v55 = vadd.f32 1.0, %v2458_v49  ;;  %v448_v1 = vpop.f32.mrf.mxu0  ;;  %v2312_v9 = vmul.f32 -1.442695, %v574_v60 }
  0xe4   : > { %v2462_v57 = vpop.eup %2461  ;;  %v2890_v58 = vadd.f32 1.0, %v2460_v52  ;;  %v2910_v13 = vmul.f32 -1.442695, %v448_v1  ;;  %v537_v18 = vpop.f32.mrf.mxu1 }
  0xe5   : > { %v2464_v59 = vpop.eup %2463  ;;  %2469 = vrcp.f32 %v2888_v55  ;;  %v1357_v7 = vand.u32 2147483647, %v2888_v55  ;;  %v2905_v8 = vadd.f32 1.0, %v2462_v57  ;;  %v1359_v11 = vand.u32 2147483648, %v2888_v55 }
  0xe6   : > { %v2466_v61 = vpop.eup %2465  ;;  %v869_v62 = vmul.f32 %v2464_v59, %v804_v45  ;;  %2471 = vrcp.f32 %v2890_v58  ;;  %vm874_vm4 = vweird.f32 %v2464_v59  ;;  %vm1353_vm5 = vweird.f32 %v2888_v55 }
  0xe7   : > { %v2468_v2 = vpop.eup %2467  ;;  %v884_v3 = vmul.f32 %v2466_v61, %v2883_v47  ;;  %2473 = vpow2.f32 %v2311_v56  ;;  %vm889_vm6 = vweird.f32 %v2466_v61  ;;  %vm1368_vm7 = vweird.f32 %v2890_v58  ;;  %vm875_vm9 = vmor %vm873_vm0, %vm874_vm4 }
  0xe8   : > { %v870_v6 = vsub.f32 1.0, %v869_v62  ;;  %v2908_v12 = vadd.f32 1.0, %v2468_v2  ;;  %2475 = vrcp.f32 %v2905_v8  ;;  %v1372_v17 = vand.u32 2147483647, %v2890_v58  ;;  %vm890_vm10 = vmor %vm888_vm1, %vm889_vm6 }
  0xe9   : > { %v885_v10 = vsub.f32 1.0, %v884_v3  ;;  %vm2918_vm8 = vcmp.eq.f32.partialorder %v1357_v7, 8.507059e+37  ;;  %v1360_v25 = vor.u32 1.1754944e-38, %v1359_v11  ;;  %v1374_v29 = vand.u32 2147483648, %v2890_v58  ;;  %v488_v53 = vpop.f32.mrf.mxu2 }
  0xea   : > { %v871_v14 = vmul.f32 %v2464_v59, %v870_v6  ;;  %2477 = vrcp.f32 %v2908_v12  ;;  %v2282_v30 = vmul.f32 -1.442695, %v537_v18  ;;  %vm2932_vm11 = vcmp.eq.f32.partialorder %v1372_v17, 8.507059e+37 }
  0xeb   : > { %v2470_v15 = vpop.eup %2469  ;;  %v886_v16 = vmul.f32 %v2466_v61, %v885_v10  ;;  %2479 = vpow2.f32 %v2312_v9  ;;  %v1375_v44 = vor.u32 1.1754944e-38, %v1374_v29  ;;  %vm903_vm14 = vweird.f32 %v2905_v8  ;;  %v450_v3 = vpop.f32.mrf.mxu0 }
  0xec   : > { %v2472_v19 = vpop.eup %2471  ;;  %v872_v20 = vadd.f32 %v2464_v59, %v871_v14  ;;  %v1349_v21 = vmul.f32 %v2470_v15, %v2888_v55  ;;  %vm1354_vm12 = vweird.f32 %v2470_v15  ;;  %v907_v48 = vand.u32 2147483647, %v2905_v8 }
  0xed   : > { %v2474_v23 = vpop.eup %2473  ;;  %v887_v24 = vadd.f32 %v2466_v61, %v886_v16  ;;  %v1364_v26 = vmul.f32 %v2472_v19, %v2890_v58  ;;  %vm1369_vm13 = vweird.f32 %v2472_v19  ;;  %vm1355_vm15 = vmor %vm1353_vm5, %vm1354_vm12  ;;  %v909_v51 = vand.u32 2147483648, %v2905_v8 }
  0xee   : > { %v876_v27 = vsel %vm875_vm9, %v2464_v59, %v872_v20  ;;  %v1350_v28 = vsub.f32 1.0, %v1349_v21  ;;  %v2476_v35 = vpop.eup %2475  ;;  %v2938_v38 = vadd.f32 1.0, %v2474_v23  ;;  %vm1370_vm0 = vmor %vm1368_vm7, %vm1369_vm13  ;;  %v922_v52 = vand.u32 2147483647, %v2908_v12 }
  0xef   : > { %v881_v31 = vsel %vm2894_vm2, %v880_v0, %v876_v27  ;;  %v891_v32 = vsel %vm890_vm10, %v2466_v61, %v887_v24  ;;  %v1365_v33 = vsub.f32 1.0, %v1364_v26  ;;  %v899_v41 = vmul.f32 %v2476_v35, %v2905_v8  ;;  %v577_v0 = vpop.f32.mrf.mxu3  ;;  %v539_v8 = vpop.f32.mrf.mxu1 }
  0xf0   : > { %v896_v36 = vsel %vm2900_vm3, %v895_v5, %v891_v32  ;;  %v1351_v37 = vmul.f32 %v2470_v15, %v1350_v28  ;;  %v2478_v42 = vpop.eup %2477  ;;  %2481 = vrcp.f32 %v2938_v38  ;;  %vm904_vm1 = vweird.f32 %v2476_v35 }
  0xf1   : > { %v1828_v39 = vpack.c.bf16 %v896_v36, %v881_v31  ;;  %v1366_v40 = vmul.f32 %v2472_v19, %v1365_v33  ;;  %v2480_v45 = vpop.eup %2479  ;;  %v900_v47 = vsub.f32 1.0, %v899_v41  ;;  %v914_v49 = vmul.f32 %v2478_v42, %v2908_v12  ;;  %vm905_vm3 = vmor %vm903_vm14, %vm904_vm1  ;;  %v490_v26 = vpop.f32.mrf.mxu2 }
  0xf2   : > { %v1352_v43 = vadd.f32 %v2470_v15, %v1351_v37  ;;  %vm919_vm2 = vweird.f32 %v2478_v42  ;;  %v924_v58 = vand.u32 2147483648, %v2908_v12  ;;  %v2960_v60 = vadd.f32 1.0, %v2480_v45 }
  0xf3   : > { %1860 = vst [vmem:[%s2943_s9] sm:$0xff] %v1828_v39  ;;  %v1367_v46 = vadd.f32 %v2472_v19, %v1366_v40  ;;  %v901_v56 = vmul.f32 %v2476_v35, %v900_v47  ;;  %v915_v57 = vsub.f32 1.0, %v914_v49  ;;  %2483 = vpow2.f32 %v2910_v13  ;;  %v453_v39 = vpop.f32.mrf.mxu0 }
  0xf4   : > { %v1356_v50 = vsel %vm1355_vm15, %v2470_v15, %v1352_v43  ;;  %vm908_vm4 = vcmp.eq.f32.partialorder %v907_v48, 8.507059e+37  ;;  %v910_v2 = vor.u32 1.1754944e-38, %v909_v51  ;;  %2485 = vrcp.f32 %v2960_v60 }
  0xf5   : > { %v1361_v54 = vsel %vm2918_vm8, %v1360_v25, %v1356_v50  ;;  %v1371_v55 = vsel %vm1370_vm0, %v2472_v19, %v1367_v46  ;;  %v902_v62 = vadd.f32 %v2476_v35, %v901_v56  ;;  %v916_v63 = vmul.f32 %v2478_v42, %v915_v57 }
  0xf6   : > { %v1376_v59 = vsel %vm2932_vm11, %v1375_v44, %v1371_v55  ;;  %v2963_v1 = vpop.eup %2481  ;;  %vm918_vm5 = vweird.f32 %v2908_v12  ;;  %vm923_vm7 = vcmp.eq.f32.partialorder %v922_v52, 8.507059e+37  ;;  %v925_v9 = vor.u32 1.1754944e-38, %v924_v58 }
  0xf7   : > { %v1844_v61 = vpack.c.bf16 %v1376_v59, %v1361_v54  ;;  %v906_v4 = vsel %vm905_vm3, %v2476_v35, %v902_v62  ;;  %v917_v5 = vadd.f32 %v2478_v42, %v916_v63  ;;  %v1379_v6 = vmul.f32 %v2963_v1, %v2938_v38  ;;  %vm920_vm6 = vmor %vm918_vm5, %vm919_vm2  ;;  %v579_v35 = vpop.f32.mrf.mxu3  ;;  %v542_v48 = vpop.f32.mrf.mxu1 }
  0xf8   : > { %v911_v7 = vsel %vm908_vm4, %v910_v2, %v906_v4  ;;  %2487 = vpow2.f32 %v2282_v30  ;;  %v2313_v13 = vmul.f32 -1.442695, %v488_v53  ;;  %v2314_v14 = vmul.f32 -1.442695, %v577_v0 }
  0xf9   : > { %1876 = vst [vmem:[%s2943_s9 + $0x80] sm:$0xff] %v1844_v61  ;;  %v921_v10 = vsel %vm920_vm6, %v2478_v42, %v917_v5  ;;  %v1380_v11 = vsub.f32 1.0, %v1379_v6  ;;  %v1387_v16 = vand.u32 2147483647, %v2938_v38  ;;  %v1389_v12 = vand.u32 2147483648, %v2938_v38  ;;  %v2484_v18 = vpop.eup %2483 }
  0xfa   : > { %v926_v15 = vsel %vm923_vm7, %v925_v9, %v921_v10  ;;  %v1402_v17 = vand.u32 2147483647, %v2960_v60  ;;  %2489 = vpow2.f32 %v2313_v13  ;;  %v2283_v21 = vmul.f32 -1.442695, %v450_v3  ;;  %v2486_v22 = vpop.eup %2485 }
  0xfb   : > { %v1829_v19 = vpack.c.bf16 %v926_v15, %v911_v7  ;;  %v1381_v20 = vmul.f32 %v2963_v1, %v1380_v11  ;;  %v1404_v23 = vand.u32 2147483648, %v2960_v60  ;;  %v2979_v24 = vadd.f32 1.0, %v2484_v18 }
  0xfc   : > { %2491 = vpow2.f32 %v2314_v14  ;;  %v2284_v25 = vmul.f32 -1.442695, %v539_v8  ;;  %vm1384_vm8 = vweird.f32 %v2963_v1  ;;  %v1394_v28 = vmul.f32 %v2486_v22, %v2960_v60 }
  0xfd   : > { %1861 = vst [vmem:[%s2943_s9 + $0x8] sm:$0xff] %v1829_v19  ;;  %v1382_v27 = vadd.f32 %v2963_v1, %v1381_v20  ;;  %vm1383_vm9 = vweird.f32 %v2938_v38  ;;  %vm2986_vm10 = vcmp.eq.f32.partialorder %v1387_v16, 8.507059e+37  ;;  %v1390_v31 = vor.u32 1.1754944e-38, %v1389_v12 }
  0xfe   : > { %v2488_v29 = vpop.eup %2487  ;;  %2493 = vrcp.f32 %v2979_v24  ;;  %v1395_v32 = vsub.f32 1.0, %v1394_v28  ;;  %v2315_v34 = vmul.f32 -1.442695, %v490_v26  ;;  %vm2993_vm11 = vmor %vm1383_vm9, %vm1384_vm8  ;;  %vm1398_vm12 = vweird.f32 %v2960_v60 }
  0xff   : > { %v2991_v33 = vadd.f32 1.0, %v2488_v29  ;;  %2495 = vpow2.f32 %v2283_v21  ;;  %vm2998_vm13 = vcmp.eq.f32.partialorder %v1402_v17, 8.507059e+37  ;;  %v1405_v38 = vor.u32 1.1754944e-38, %v1404_v23 }
 0x100   : > { %2497 = vpow2.f32 %v2284_v25  ;;  %v2490_v40 = vpop.eup %2489  ;;  %v1386_v41 = vsel %vm2993_vm11, %v2963_v1, %v1382_v27  ;;  %v1396_v42 = vmul.f32 %v2486_v22, %v1395_v32  ;;  %vm1399_vm14 = vweird.f32 %v2486_v22 }
 0x101   : > { %2499 = vrcp.f32 %v2991_v33  ;;  %v937_v44 = vand.u32 2147483647, %v2979_v24  ;;  %v939_v45 = vand.u32 2147483648, %v2979_v24  ;;  %v3008_v46 = vadd.f32 1.0, %v2490_v40  ;;  %vm1400_vm15 = vmor %vm1398_vm12, %vm1399_vm14 }
 0x102   : > { %v2492_v43 = vpop.eup %2491  ;;  %v2316_v47 = vmul.f32 -1.442695, %v579_v35  ;;  %v1397_v49 = vadd.f32 %v2486_v22, %v1396_v42  ;;  %2501 = vpow2.f32 %v2315_v34  ;;  %v2285_v51 = vmul.f32 -1.442695, %v453_v39 }
 0x103   : > { %v3010_v50 = vadd.f32 1.0, %v2492_v43  ;;  %v1391_v53 = vsel %vm2986_vm10, %v1390_v31, %v1386_v41  ;;  %v952_v54 = vand.u32 2147483647, %v2991_v33  ;;  %v954_v55 = vand.u32 2147483648, %v2991_v33 }
 0x104   : > { %v2494_v52 = vpop.eup %2493  ;;  %2503 = vrcp.f32 %v3008_v46  ;;  %v1401_v57 = vsel %vm1400_vm15, %v2486_v22, %v1397_v49  ;;  %vm933_vm0 = vweird.f32 %v2979_v24  ;;  %v3021_v58 = vmul.f32 -1.442695, %v542_v48 }
 0x105   : > { %v2496_v56 = vpop.eup %2495  ;;  %v929_v59 = vmul.f32 %v2494_v52, %v2979_v24  ;;  %v1406_v60 = vsel %vm2998_vm13, %v1405_v38, %v1401_v57  ;;  %vm3025_vm1 = vcmp.eq.f32.partialorder %v937_v44, 8.507059e+37  ;;  %v940_v63 = vor.u32 1.1754944e-38, %v939_v45  ;;  %v493_v57 = vpop.f32.mrf.mxu2 }
 0x106   : > { %v2498_v61 = vpop.eup %2497  ;;  %2505 = vrcp.f32 %v3010_v50  ;;  %v1845_v1 = vpack.c.bf16 %v1406_v60, %v1391_v53  ;;  %vm948_vm2 = vweird.f32 %v2991_v33  ;;  %vm3032_vm3 = vcmp.eq.f32.partialorder %v952_v54, 8.507059e+37 }
 0x107   : > { %v2500_v0 = vpop.eup %2499  ;;  %v930_v2 = vsub.f32 1.0, %v929_v59  ;;  %2507 = vpow2.f32 %v2316_v47  ;;  %v955_v5 = vor.u32 1.1754944e-38, %v954_v55  ;;  %v3036_v6 = vadd.f32 1.0, %v2496_v56 }
 0x108   : > { %v944_v3 = vmul.f32 %v2500_v0, %v2991_v33  ;;  %2509 = vpow2.f32 %v2285_v51  ;;  %v2502_v7 = vpop.eup %2501  ;;  %1877 = vst [vmem:[%s2943_s9 + $0x88] sm:$0xff] %v1845_v1  ;;  %vm934_vm4 = vweird.f32 %v2494_v52  ;;  %v1417_v8 = vand.u32 2147483647, %v3008_v46 }
 0x109   : > { %v931_v9 = vmul.f32 %v2494_v52, %v930_v2  ;;  %v3040_v10 = vadd.f32 1.0, %v2498_v61  ;;  %v1419_v14 = vand.u32 2147483648, %v3008_v46  ;;  %v1432_v15 = vand.u32 2147483647, %v3010_v50  ;;  %vm3049_vm7 = vmor %vm933_vm0, %vm934_vm4 }
 0x10a   : > { %v2504_v11 = vpop.eup %2503  ;;  %v945_v13 = vsub.f32 1.0, %v944_v3  ;;  %2511 = vrcp.f32 %v3036_v6  ;;  %vm949_vm5 = vweird.f32 %v2500_v0  ;;  %vm1413_vm6 = vweird.f32 %v3008_v46 }
 0x10b   : > { %v932_v16 = vadd.f32 %v2494_v52, %v931_v9  ;;  %v1409_v12 = vmul.f32 %v2504_v11, %v3008_v46  ;;  %v1434_v20 = vand.u32 2147483648, %v3010_v50  ;;  %2513 = vrcp.f32 %v3040_v10  ;;  %vm950_vm11 = vmor %vm948_vm2, %vm949_vm5 }
 0x10c   : > { %v2506_v17 = vpop.eup %2505  ;;  %v946_v19 = vmul.f32 %v2500_v0, %v945_v13  ;;  %v3055_v21 = vadd.f32 1.0, %v2502_v7  ;;  %vm3059_vm8 = vcmp.eq.f32.partialorder %v1417_v8, 8.507059e+37  ;;  %v1420_v29 = vor.u32 1.1754944e-38, %v1419_v14  ;;  %v544_v13 = vpop.f32.mrf.mxu1 }
 0x10d   : > { %v2508_v22 = vpop.eup %2507  ;;  %v936_v23 = vsel %vm3049_vm7, %v2494_v52, %v932_v16  ;;  %v1410_v25 = vsub.f32 1.0, %v1409_v12  ;;  %v1424_v24 = vmul.f32 %v2506_v17, %v3010_v50  ;;  %vm1428_vm9 = vweird.f32 %v3010_v50 }
 0x10e   : > { %v2510_v27 = vpop.eup %2509  ;;  %v947_v28 = vadd.f32 %v2500_v0, %v946_v19  ;;  %vm3065_vm10 = vcmp.eq.f32.partialorder %v1432_v15, 8.507059e+37  ;;  %v941_v31 = vsel %vm3025_vm1, %v940_v63, %v936_v23  ;;  %vm1414_vm12 = vweird.f32 %v2504_v11 }
 0x10f   : > { %v1411_v32 = vmul.f32 %v2504_v11, %v1410_v25  ;;  %v1425_v34 = vsub.f32 1.0, %v1424_v24  ;;  %vm1429_vm13 = vweird.f32 %v2506_v17  ;;  %v1435_v37 = vor.u32 1.1754944e-38, %v1434_v20  ;;  %vm1415_vm14 = vmor %vm1413_vm6, %vm1414_vm12 }
 0x110   : > { %v2512_v35 = vpop.eup %2511  ;;  %v951_v36 = vsel %vm950_vm11, %v2500_v0, %v947_v28  ;;  %2515 = vrcp.f32 %v3055_v21  ;;  %vm963_vm15 = vweird.f32 %v3036_v6  ;;  %v967_v43 = vand.u32 2147483647, %v3036_v6  ;;  %vm1430_vm0 = vmor %vm1428_vm9, %vm1429_vm13 }
 0x111   : > { %v956_v38 = vsel %vm3032_vm3, %v955_v5, %v951_v36  ;;  %v1412_v39 = vadd.f32 %v2504_v11, %v1411_v32  ;;  %v1426_v40 = vmul.f32 %v2506_v17, %v1425_v34  ;;  %v959_v41 = vmul.f32 %v2512_v35, %v3036_v6  ;;  %v2514_v42 = vpop.eup %2513  ;;  %v582_v5 = vpop.f32.mrf.mxu3 }
 0x112   : > { %v1830_v33 = vpack.c.bf16 %v956_v38, %v941_v31  ;;  %v969_v44 = vand.u32 2147483648, %v3036_v6  ;;  %v974_v49 = vmul.f32 %v2514_v42, %v3040_v10  ;;  %vm964_vm1 = vweird.f32 %v2512_v35 }
 0x113   : > { %v1416_v45 = vsel %vm1415_vm14, %v2504_v11, %v1412_v39  ;;  %v1427_v47 = vadd.f32 %v2506_v17, %v1426_v40  ;;  %v960_v48 = vsub.f32 1.0, %v959_v41  ;;  %v982_v46 = vand.u32 2147483647, %v3040_v10  ;;  %vm965_vm3 = vmor %vm963_vm15, %vm964_vm1  ;;  %v455_v11 = vpop.f32.mrf.mxu0 }
 0x114   : > { %1862 = vst [vmem:[%s2943_s9 + $0x10] sm:$0xff] %v1830_v33  ;;  %v1421_v51 = vsel %vm3059_vm8, %v1420_v29, %v1416_v45  ;;  %v984_v52 = vand.u32 2147483648, %v3040_v10  ;;  %v975_v55 = vsub.f32 1.0, %v974_v49  ;;  %v3092_v56 = vadd.f32 1.0, %v2508_v22 }
 0x115   : > { %v1431_v53 = vsel %vm1430_vm0, %v2506_v17, %v1427_v47  ;;  %v961_v54 = vmul.f32 %v2512_v35, %v960_v48  ;;  %vm979_vm2 = vweird.f32 %v2514_v42  ;;  %v3098_v50 = vadd.f32 1.0, %v2510_v27  ;;  %v495_v27 = vpop.f32.mrf.mxu2 }
 0x116   : > { %v3094_v59 = vpop.eup %2515  ;;  %v1436_v61 = vsel %vm3065_vm10, %v1435_v37, %v1431_v53  ;;  %2517 = vpow2.f32 %v3021_v58  ;;  %v976_v63 = vmul.f32 %v2514_v42, %v975_v55  ;;  %v970_v1 = vor.u32 1.1754944e-38, %v969_v44 }
 0x117   : > { %v1846_v60 = vpack.c.bf16 %v1436_v61, %v1421_v51  ;;  %v962_v62 = vadd.f32 %v2512_v35, %v961_v54  ;;  %v1439_v0 = vmul.f32 %v3094_v59, %v3055_v21  ;;  %vm978_vm4 = vweird.f32 %v3040_v10 }
 0x118   : > { %2519 = vrcp.f32 %v3092_v56  ;;  %v2317_v2 = vmul.f32 -1.442695, %v493_v57  ;;  %vm968_vm5 = vcmp.eq.f32.partialorder %v967_v43, 8.507059e+37  ;;  %v977_v58 = vadd.f32 %v2514_v42, %v976_v63  ;;  %vm980_vm6 = vmor %vm978_vm4, %vm979_vm2 }
 0x119   : > { %1878 = vst [vmem:[%s2943_s9 + $0x90] sm:$0xff] %v1846_v60  ;;  %v966_v3 = vsel %vm965_vm3, %v2512_v35, %v962_v62  ;;  %v1440_v4 = vsub.f32 1.0, %v1439_v0  ;;  %v985_v9 = vor.u32 1.1754944e-38, %v984_v52  ;;  %2521 = vrcp.f32 %v3098_v50 }
 0x11a   : > { %v971_v7 = vsel %vm968_vm5, %v970_v1, %v966_v3  ;;  %v981_v6 = vsel %vm980_vm6, %v2514_v42, %v977_v58  ;;  %vm983_vm7 = vcmp.eq.f32.partialorder %v982_v46, 8.507059e+37  ;;  %v1447_v10 = vand.u32 2147483647, %v3055_v21  ;;  %v584_v42 = vpop.f32.mrf.mxu3 }
 0x11b   : > { %v1441_v8 = vmul.f32 %v3094_v59, %v1440_v4  ;;  %v986_v15 = vsel %vm983_vm7, %v985_v9, %v981_v6  ;;  %v1449_v16 = vand.u32 2147483648, %v3055_v21  ;;  %2523 = vpow2.f32 %v2317_v2  ;;  %v458_v46 = vpop.f32.mrf.mxu0  ;;  %v547_v2 = vpop.f32.mrf.mxu1 }
 0x11c   : > { %v2518_v14 = vpop.eup %2517  ;;  %v2318_v12 = vmul.f32 -1.442695, %v582_v5  ;;  %v1831_v17 = vpack.c.bf16 %v986_v15, %v971_v7  ;;  %vm1444_vm8 = vweird.f32 %v3094_v59  ;;  %v1462_v18 = vand.u32 2147483647, %v3092_v56 }
 0x11d   : > { %v3116_v19 = vadd.f32 1.0, %v2518_v14  ;;  %v1442_v22 = vadd.f32 %v3094_v59, %v1441_v8  ;;  %v2287_v23 = vmul.f32 -1.442695, %v455_v11  ;;  %v2288_v25 = vmul.f32 -1.442695, %v544_v13  ;;  %v498_v5 = vpop.f32.mrf.mxu2 }
 0x11e   : > { %v2520_v20 = vpop.eup %2519  ;;  %2525 = vpow2.f32 %v2318_v12  ;;  %1863 = vst [vmem:[%s2943_s9 + $0x18] sm:$0xff] %v1831_v17  ;;  %vm1443_vm9 = vweird.f32 %v3055_v21  ;;  %vm3121_vm10 = vcmp.eq.f32.partialorder %v1447_v10, 8.507059e+37  ;;  %v1450_v29 = vor.u32 1.1754944e-38, %v1449_v16 }
 0x11f   : > { %v1454_v24 = vmul.f32 %v2520_v20, %v3092_v56  ;;  %2527 = vrcp.f32 %v3116_v19  ;;  %v3127_v28 = vpop.eup %2521  ;;  %vm1458_vm11 = vweird.f32 %v3092_v56  ;;  %v1464_v30 = vand.u32 2147483648, %v3092_v56  ;;  %vm3134_vm12 = vmor %vm1443_vm9, %vm1444_vm8 }
 0x120   : > { %v997_v31 = vand.u32 2147483647, %v3098_v50  ;;  %vm3138_vm13 = vcmp.eq.f32.partialorder %v1462_v18, 8.507059e+37  ;;  %v989_v35 = vmul.f32 %v3127_v28, %v3098_v50  ;;  %2529 = vpow2.f32 %v2287_v23 }
 0x121   : > { %v1455_v32 = vsub.f32 1.0, %v1454_v24  ;;  %v2524_v36 = vpop.eup %2523  ;;  %v1446_v37 = vsel %vm3134_vm12, %v3094_v59, %v1442_v22  ;;  %vm993_vm14 = vweird.f32 %v3098_v50  ;;  %2531 = vpow2.f32 %v2288_v25 }
 0x122   : > { %v2319_v38 = vmul.f32 -1.442695, %v495_v27  ;;  %vm1459_vm15 = vweird.f32 %v2520_v20  ;;  %v990_v40 = vsub.f32 1.0, %v989_v35  ;;  %v3148_v41 = vadd.f32 1.0, %v2524_v36 }
 0x123   : > { %v1456_v39 = vmul.f32 %v2520_v20, %v1455_v32  ;;  %v1465_v43 = vor.u32 1.1754944e-38, %v1464_v30  ;;  %vm3150_vm0 = vcmp.eq.f32.partialorder %v997_v31, 8.507059e+37  ;;  %v999_v45 = vand.u32 2147483648, %v3098_v50  ;;  %vm1460_vm1 = vmor %vm1458_vm11, %vm1459_vm15 }
 0x124   : > { %v2526_v33 = vpop.eup %2525  ;;  %2533 = vpow2.f32 %v2319_v38  ;;  %v991_v49 = vmul.f32 %v3127_v28, %v990_v40  ;;  %v1012_v51 = vand.u32 2147483647, %v3116_v19  ;;  %v1451_v52 = vsel %vm3121_vm10, %v1450_v29, %v1446_v37 }
 0x125   : > { %v2528_v47 = vpop.eup %2527  ;;  %v1457_v48 = vadd.f32 %v2520_v20, %v1456_v39  ;;  %2535 = vrcp.f32 %v3148_v41  ;;  %vm994_vm2 = vweird.f32 %v3127_v28  ;;  %v2320_v54 = vmul.f32 -1.442695, %v584_v42 }
 0x126   : > { %v1004_v53 = vmul.f32 %v2528_v47, %v3116_v19  ;;  %v2530_v55 = vpop.eup %2529  ;;  %v992_v59 = vadd.f32 %v3127_v28, %v991_v49  ;;  %v1014_v61 = vand.u32 2147483648, %v3116_v19  ;;  %v3167_v60 = vadd.f32 1.0, %v2526_v33  ;;  %vm3175_vm3 = vmor %vm993_vm14, %vm994_vm2  ;;  %v587_v33 = vpop.f32.mrf.mxu3 }
 0x127   : > { %v1461_v57 = vsel %vm1460_vm1, %v2520_v20, %v1457_v48  ;;  %v2532_v62 = vpop.eup %2531  ;;  %v1000_v0 = vor.u32 1.1754944e-38, %v999_v45  ;;  %v2289_v1 = vmul.f32 -1.442695, %v458_v46  ;;  %vm1008_vm4 = vweird.f32 %v3116_v19  ;;  %v460_v49 = vpop.f32.mrf.mxu0 }
 0x128   : > { %v1466_v63 = vsel %vm3138_vm13, %v1465_v43, %v1461_v57  ;;  %v1005_v56 = vsub.f32 1.0, %v1004_v53  ;;  %vm3180_vm5 = vcmp.eq.f32.partialorder %v1012_v51, 8.507059e+37  ;;  %2537 = vrcp.f32 %v3167_v60 }
 0x129   : > { %v1847_v3 = vpack.c.bf16 %v1466_v63, %v1451_v52  ;;  %v996_v9 = vsel %vm3175_vm3, %v3127_v28, %v992_v59  ;;  %vm1009_vm6 = vweird.f32 %v2528_v47  ;;  %2539 = vpow2.f32 %v2320_v54 }
 0x12a   : > { %v2534_v7 = vpop.eup %2533  ;;  %v1006_v6 = vmul.f32 %v2528_v47, %v1005_v56  ;;  %v1015_v8 = vor.u32 1.1754944e-38, %v1014_v61  ;;  %v3191_v10 = vadd.f32 1.0, %v2530_v55  ;;  %v3193_v11 = vadd.f32 1.0, %v2532_v62  ;;  %vm1010_vm7 = vmor %vm1008_vm4, %vm1009_vm6 }
 0x12b   : > { %v3188_v50 = vpop.eup %2535  ;;  %1879 = vst [vmem:[%s2943_s9 + $0x98] sm:$0xff] %v1847_v3  ;;  %v3195_v13 = vmul.f32 -1.442695, %v547_v2  ;;  %2541 = vpow2.f32 %v2289_v1  ;;  %v3199_v16 = vmul.f32 -1.442695, %v498_v5  ;;  %v1001_v12 = vsel %vm3150_vm0, %v1000_v0, %v996_v9 }
 0x12c   : > { %v1007_v14 = vadd.f32 %v2528_v47, %v1006_v6  ;;  %v1469_v15 = vmul.f32 %v3188_v50, %v3148_v41  ;;  %v1477_v17 = vand.u32 2147483647, %v3148_v41  ;;  %2543 = vrcp.f32 %v3191_v10 }
 0x12d   : > { %v3207_v18 = vadd.f32 1.0, %v2534_v7  ;;  %v1479_v23 = vand.u32 2147483648, %v3148_v41  ;;  %2545 = vrcp.f32 %v3193_v11  ;;  %vm1474_vm8 = vweird.f32 %v3188_v50 }
 0x12e   : > { %v1011_v20 = vsel %vm1010_vm7, %v2528_v47, %v1007_v14  ;;  %v1470_v22 = vsub.f32 1.0, %v1469_v15  ;;  %v2538_v25 = vpop.eup %2537  ;;  %v1492_v19 = vand.u32 2147483647, %v3167_v60  ;;  %v1494_v24 = vand.u32 2147483648, %v3167_v60  ;;  %v549_v15 = vpop.f32.mrf.mxu1 }
 0x12f   : > { %v1016_v26 = vsel %vm3180_vm5, %v1015_v8, %v1011_v20  ;;  %v2540_v27 = vpop.eup %2539  ;;  %v1484_v30 = vmul.f32 %v2538_v25, %v3167_v60  ;;  %v1027_v31 = vand.u32 2147483647, %v3191_v10  ;;  %vm1473_vm9 = vweird.f32 %v3148_v41 }
 0x130   : > { %v1832_v28 = vpack.c.bf16 %v1016_v26, %v1001_v12  ;;  %v1471_v29 = vmul.f32 %v3188_v50, %v1470_v22  ;;  %vm3220_vm10 = vcmp.eq.f32.partialorder %v1477_v17, 8.507059e+37  ;;  %v1029_v32 = vand.u32 2147483648, %v3191_v10  ;;  %vm3231_vm12 = vmor %vm1473_vm9, %vm1474_vm8  ;;  %v500_v22 = vpop.f32.mrf.mxu2 }
 0x131   : > { %2547 = vrcp.f32 %v3207_v18  ;;  %v2542_v34 = vpop.eup %2541  ;;  %v1480_v36 = vor.u32 1.1754944e-38, %v1479_v23  ;;  %v1485_v37 = vsub.f32 1.0, %v1484_v30  ;;  %vm1488_vm11 = vweird.f32 %v3167_v60  ;;  %v589_v23 = vpop.f32.mrf.mxu3 }
 0x132   : > { %1864 = vst [vmem:[%s2943_s9 + $0x20] sm:$0xff] %v1832_v28  ;;  %v1472_v35 = vadd.f32 %v3188_v50, %v1471_v29  ;;  %v2544_v38 = vpop.eup %2543  ;;  %vm3235_vm13 = vcmp.eq.f32.partialorder %v1492_v19, 8.507059e+37  ;;  %v1495_v41 = vor.u32 1.1754944e-38, %v1494_v24  ;;  %vm1023_vm14 = vweird.f32 %v3191_v10  ;;  %v463_v19 = vpop.f32.mrf.mxu0 }
 0x133   : > { %v3240_v42 = vadd.f32 1.0, %v2540_v27  ;;  %v2546_v43 = vpop.eup %2545  ;;  %v1486_v45 = vmul.f32 %v2538_v25, %v1485_v37  ;;  %vm1489_vm15 = vweird.f32 %v2538_v25  ;;  %v1019_v47 = vmul.f32 %v2544_v38, %v3191_v10 }
 0x134   : > { %v1476_v44 = vsel %vm3231_vm12, %v3188_v50, %v1472_v35  ;;  %vm3246_vm0 = vcmp.eq.f32.partialorder %v1027_v31, 8.507059e+37  ;;  %v1030_v51 = vor.u32 1.1754944e-38, %v1029_v32  ;;  %v1034_v46 = vmul.f32 %v2546_v43, %v3193_v11  ;;  %vm1490_vm2 = vmor %vm1488_vm11, %vm1489_vm15 }
 0x135   : > { %vm1038_vm1 = vweird.f32 %v3193_v11  ;;  %v1042_v52 = vand.u32 2147483647, %v3193_v11  ;;  %v1487_v53 = vadd.f32 %v2538_v25, %v1486_v45  ;;  %v1020_v54 = vsub.f32 1.0, %v1019_v47 }
 0x136   : > { %2549 = vrcp.f32 %v3240_v42  ;;  %v3254_v55 = vadd.f32 1.0, %v2542_v34  ;;  %v1481_v59 = vsel %vm3220_vm10, %v1480_v36, %v1476_v44  ;;  %v1035_v61 = vsub.f32 1.0, %v1034_v46  ;;  %v552_v46 = vpop.f32.mrf.mxu1 }
 0x137   : > { %v3256_v57 = vpop.eup %2547  ;;  %v1044_v62 = vand.u32 2147483648, %v3193_v11  ;;  %v1507_v63 = vand.u32 2147483647, %v3207_v18  ;;  %v1491_v0 = vsel %vm1490_vm2, %v2538_v25, %v1487_v53  ;;  %v1021_v56 = vmul.f32 %v2544_v38, %v1020_v54 }
 0x138   : > { %vm1024_vm3 = vweird.f32 %v2544_v38  ;;  %v1499_v1 = vmul.f32 %v3256_v57, %v3207_v18  ;;  %v1496_v2 = vsel %vm3235_vm13, %v1495_v41, %v1491_v0  ;;  %v1036_v3 = vmul.f32 %v2546_v43, %v1035_v61 }
 0x139   : > { %vm1039_vm4 = vweird.f32 %v2546_v43  ;;  %v1509_v60 = vand.u32 2147483648, %v3207_v18  ;;  %v1848_v58 = vpack.c.bf16 %v1496_v2, %v1481_v59  ;;  %v1022_v4 = vadd.f32 %v2544_v38, %v1021_v56  ;;  %vm1025_vm5 = vmor %vm1023_vm14, %vm1024_vm3  ;;  %v592_v59 = vpop.f32.mrf.mxu3 }
 0x13a   : > { %v1500_v5 = vsub.f32 1.0, %v1499_v1  ;;  %2551 = vrcp.f32 %v3254_v55  ;;  %v1037_v7 = vadd.f32 %v2546_v43, %v1036_v3  ;;  %vm3272_vm6 = vcmp.eq.f32.partialorder %v1042_v52, 8.507059e+37  ;;  %vm1040_vm8 = vmor %vm1038_vm1, %vm1039_vm4  ;;  %v465_v0 = vpop.f32.mrf.mxu0 }
 0x13b   : > { %v1045_v6 = vor.u32 1.1754944e-38, %v1044_v62  ;;  %vm1503_vm7 = vweird.f32 %v3207_v18  ;;  %1880 = vst [vmem:[%s2943_s9 + $0xa0] sm:$0xff] %v1848_v58  ;;  %v1026_v8 = vsel %vm1025_vm5, %v2544_v38, %v1022_v4  ;;  %2553 = vpow2.f32 %v3195_v13 }
 0x13c   : > { %v2550_v50 = vpop.eup %2549  ;;  %v1501_v14 = vmul.f32 %v3256_v57, %v1500_v5  ;;  %v2322_v10 = vmul.f32 -1.442695, %v587_v33  ;;  %v1031_v12 = vsel %vm3246_vm0, %v1030_v51, %v1026_v8  ;;  %v1041_v17 = vsel %vm1040_vm8, %v2546_v43, %v1037_v7 }
 0x13d   : > { %vm1504_vm9 = vweird.f32 %v3256_v57  ;;  %v1514_v20 = vmul.f32 %v2550_v50, %v3240_v42  ;;  %v1046_v11 = vsel %vm3272_vm6, %v1045_v6, %v1041_v17  ;;  %vm3289_vm10 = vcmp.eq.f32.partialorder %v1507_v63, 8.507059e+37 }
 0x13e   : > { %v1502_v25 = vadd.f32 %v3256_v57, %v1501_v14  ;;  %v1510_v26 = vor.u32 1.1754944e-38, %v1509_v60  ;;  %v1833_v24 = vpack.c.bf16 %v1046_v11, %v1031_v12  ;;  %2555 = vpow2.f32 %v3199_v16  ;;  %vm3298_vm11 = vmor %vm1503_vm7, %vm1504_vm9 }
 0x13f   : > { %v1515_v27 = vsub.f32 1.0, %v1514_v20  ;;  %v2291_v28 = vmul.f32 -1.442695, %v460_v49  ;;  %v1522_v31 = vand.u32 2147483647, %v3240_v42  ;;  %v1524_v21 = vand.u32 2147483648, %v3240_v42 }
 0x140   : > { %v3294_v29 = vpop.eup %2551  ;;  %2557 = vpow2.f32 %v2322_v10  ;;  %v2292_v32 = vmul.f32 -1.442695, %v549_v15  ;;  %1865 = vst [vmem:[%s2943_s9 + $0x28] sm:$0xff] %v1833_v24  ;;  %v1506_v16 = vsel %vm3298_vm11, %v3256_v57, %v1502_v25  ;;  %vm1519_vm12 = vweird.f32 %v2550_v50  ;;  %v503_v57 = vpop.f32.mrf.mxu2 }
 0x141   : > { %v1516_v34 = vmul.f32 %v2550_v50, %v1515_v27  ;;  %v1049_v18 = vmul.f32 %v3294_v29, %v3254_v55  ;;  %v2554_v35 = vpop.eup %2553  ;;  %vm1518_vm13 = vweird.f32 %v3240_v42  ;;  %v1057_v36 = vand.u32 2147483647, %v3254_v55 }
 0x142   : > { %2559 = vpow2.f32 %v2291_v28  ;;  %v2323_v37 = vmul.f32 -1.442695, %v500_v22  ;;  %v3312_v40 = vadd.f32 1.0, %v2554_v35  ;;  %v1511_v41 = vsel %vm3289_vm10, %v1510_v26, %v1506_v16  ;;  %vm1520_vm14 = vmor %vm1518_vm13, %vm1519_vm12 }
 0x143   : > { %v1517_v38 = vadd.f32 %v2550_v50, %v1516_v34  ;;  %v1050_v39 = vsub.f32 1.0, %v1049_v18  ;;  %2561 = vpow2.f32 %v2292_v32  ;;  %vm1523_vm15 = vcmp.eq.f32.partialorder %v1522_v31, 8.507059e+37 }
 0x144   : > { %v1525_v33 = vor.u32 1.1754944e-38, %v1524_v21  ;;  %v2556_v43 = vpop.eup %2555  ;;  %v1059_v42 = vand.u32 2147483648, %v3254_v55  ;;  %2563 = vrcp.f32 %v3312_v40  ;;  %vm1053_vm0 = vweird.f32 %v3254_v55 }
 0x145   : > { %v1521_v44 = vsel %vm1520_vm14, %v2550_v50, %v1517_v38  ;;  %v1051_v45 = vmul.f32 %v3294_v29, %v1050_v39  ;;  %v3320_v49 = vadd.f32 1.0, %v2556_v43  ;;  %v2324_v51 = vmul.f32 -1.442695, %v589_v23 }
 0x146   : > { %v2558_v47 = vpop.eup %2557  ;;  %v1526_v48 = vsel %vm1523_vm15, %v1525_v33, %v1521_v44  ;;  %vm3322_vm1 = vcmp.eq.f32.partialorder %v1057_v36, 8.507059e+37  ;;  %2565 = vpow2.f32 %v2323_v37  ;;  %vm1054_vm2 = vweird.f32 %v3294_v29 }
 0x147   : > { %v1849_v52 = vpack.c.bf16 %v1526_v48, %v1511_v41  ;;  %v3326_v54 = vadd.f32 1.0, %v2558_v47  ;;  %v1052_v62 = vadd.f32 %v3294_v29, %v1051_v45  ;;  %2567 = vrcp.f32 %v3320_v49  ;;  %vm3345_vm3 = vmor %vm1053_vm0, %vm1054_vm2 }
 0x148   : > { %v2560_v61 = vpop.eup %2559  ;;  %v2293_v63 = vmul.f32 -1.442695, %v463_v19  ;;  %v1060_v1 = vor.u32 1.1754944e-38, %v1059_v42  ;;  %v1072_v2 = vand.u32 2147483647, %v3312_v40  ;;  %v1074_v60 = vand.u32 2147483648, %v3312_v40  ;;  %v505_v12 = vpop.f32.mrf.mxu2 }
 0x149   : > { %v2562_v56 = vpop.eup %2561  ;;  %1881 = vst [vmem:[%s2943_s9 + $0xa8] sm:$0xff] %v1849_v52  ;;  %2569 = vrcp.f32 %v3326_v54  ;;  %v3334_v3 = vmul.f32 -1.442695, %v552_v46  ;;  %v3337_v58 = vmul.f32 -1.442695, %v503_v57  ;;  %v3350_v6 = vadd.f32 1.0, %v2560_v61 }
 0x14a   : > { %2571 = vpow2.f32 %v2324_v51  ;;  %v3339_v4 = vmul.f32 -1.442695, %v592_v59  ;;  %v2564_v5 = vpop.eup %2563  ;;  %v1537_v9 = vand.u32 2147483647, %v3320_v49  ;;  %v3352_v50 = vadd.f32 1.0, %v2562_v56 }
 0x14b   : > { %v3354_v8 = vmul.f32 -1.442695, %v465_v0  ;;  %v1056_v14 = vsel %vm3345_vm3, %v3294_v29, %v1052_v62  ;;  %v1064_v10 = vmul.f32 %v2564_v5, %v3312_v40  ;;  %vm1068_vm4 = vweird.f32 %v3312_v40 }
 0x14c   : > { %v1539_v55 = vand.u32 2147483648, %v3320_v49  ;;  %v2566_v15 = vpop.eup %2565  ;;  %vm3362_vm5 = vcmp.eq.f32.partialorder %v1072_v2, 8.507059e+37  ;;  %v1552_v17 = vand.u32 2147483647, %v3326_v54  ;;  %v1554_v20 = vand.u32 2147483648, %v3326_v54  ;;  %v554_v2 = vpop.f32.mrf.mxu1 }
 0x14d   : > { %2573 = vrcp.f32 %v3350_v6  ;;  %v2568_v22 = vpop.eup %2567  ;;  %v1065_v23 = vsub.f32 1.0, %v1064_v10  ;;  %v1075_v11 = vor.u32 1.1754944e-38, %v1074_v60  ;;  %vm1533_vm6 = vweird.f32 %v3320_v49 }
 0x14e   : > { %2575 = vrcp.f32 %v3352_v50  ;;  %v1061_v13 = vsel %vm3322_vm1, %v1060_v1, %v1056_v14  ;;  %v1529_v26 = vmul.f32 %v2568_v22, %v3320_v49  ;;  %vm3374_vm7 = vcmp.eq.f32.partialorder %v1537_v9, 8.507059e+37 }
 0x14f   : > { %v2570_v25 = vpop.eup %2569  ;;  %vm1548_vm8 = vweird.f32 %v3326_v54  ;;  %v1066_v27 = vmul.f32 %v2564_v5, %v1065_v23  ;;  %vm1069_vm9 = vweird.f32 %v2564_v5  ;;  %v1540_v28 = vor.u32 1.1754944e-38, %v1539_v55  ;;  %v594_v23 = vpop.f32.mrf.mxu3 }
 0x150   : > { %v2572_v24 = vpop.eup %2571  ;;  %v1544_v29 = vmul.f32 %v2570_v25, %v3326_v54  ;;  %v1530_v30 = vsub.f32 1.0, %v1529_v26  ;;  %vm3380_vm10 = vcmp.eq.f32.partialorder %v1552_v17, 8.507059e+37  ;;  %v1555_v21 = vor.u32 1.1754944e-38, %v1554_v20  ;;  %vm1070_vm12 = vmor %vm1068_vm4, %vm1069_vm9 }
 0x151   : > { %v3384_v32 = vadd.f32 1.0, %v2566_v15  ;;  %v1067_v16 = vadd.f32 %v2564_v5, %v1066_v27  ;;  %vm1083_vm11 = vweird.f32 %v3350_v6  ;;  %v1087_v18 = vand.u32 2147483647, %v3350_v6 }
 0x152   : > { %v1545_v34 = vsub.f32 1.0, %v1544_v29  ;;  %2577 = vpow2.f32 %v2293_v63  ;;  %v1531_v36 = vmul.f32 %v2568_v22, %v1530_v30  ;;  %vm1534_vm13 = vweird.f32 %v2568_v22 }
 0x153   : > { %v2574_v35 = vpop.eup %2573  ;;  %2579 = vrcp.f32 %v3384_v32  ;;  %v3391_v37 = vadd.f32 1.0, %v2572_v24  ;;  %v1071_v39 = vsel %vm1070_vm12, %v2564_v5, %v1067_v16  ;;  %vm1549_vm14 = vweird.f32 %v2570_v25  ;;  %vm1535_vm15 = vmor %vm1533_vm6, %vm1534_vm13 }
 0x154   : > { %v2576_v38 = vpop.eup %2575  ;;  %v1546_v41 = vmul.f32 %v2570_v25, %v1545_v34  ;;  %v1079_v33 = vmul.f32 %v2574_v35, %v3350_v6  ;;  %v1076_v43 = vsel %vm3362_vm5, %v1075_v11, %v1071_v39  ;;  %v1532_v44 = vadd.f32 %v2568_v22, %v1531_v36  ;;  %vm1550_vm0 = vmor %vm1548_vm8, %vm1549_vm14  ;;  %v468_v34 = vpop.f32.mrf.mxu0 }
 0x155   : > { %v1089_v40 = vand.u32 2147483648, %v3350_v6  ;;  %v1094_v45 = vmul.f32 %v2576_v38, %v3352_v50  ;;  %v1834_v42 = vpack.c.bf16 %v1076_v43, %v1061_v13  ;;  %v1102_v51 = vand.u32 2147483647, %v3352_v50 }
 0x156   : > { %v1547_v47 = vadd.f32 %v2570_v25, %v1546_v41  ;;  %v1080_v48 = vsub.f32 1.0, %v1079_v33  ;;  %v1536_v46 = vsel %vm1535_vm15, %v2568_v22, %v1532_v44  ;;  %v1104_v53 = vand.u32 2147483648, %v3352_v50  ;;  %v557_v33 = vpop.f32.mrf.mxu1 }
 0x157   : > { %v1095_v52 = vsub.f32 1.0, %v1094_v45  ;;  %2581 = vrcp.f32 %v3391_v37  ;;  %1866 = vst [vmem:[%s2943_s9 + $0x30] sm:$0xff] %v1834_v42  ;;  %v1541_v59 = vsel %vm3374_vm7, %v1540_v28, %v1536_v46  ;;  %vm1084_vm1 = vweird.f32 %v2574_v35  ;;  %v508_v42 = vpop.f32.mrf.mxu2 }
 0x158   : > { %v2578_v57 = vpop.eup %2577  ;;  %v1551_v49 = vsel %vm1550_vm0, %v2570_v25, %v1547_v47  ;;  %v1081_v61 = vmul.f32 %v2574_v35, %v1080_v48  ;;  %vm1098_vm2 = vweird.f32 %v3352_v50  ;;  %vm1099_vm3 = vweird.f32 %v2576_v38  ;;  %vm1085_vm5 = vmor %vm1083_vm11, %vm1084_vm1 }
 0x159   : > { %v2580_v62 = vpop.eup %2579  ;;  %v1556_v63 = vsel %vm3380_vm10, %v1555_v21, %v1551_v49  ;;  %v1096_v54 = vmul.f32 %v2576_v38, %v1095_v52  ;;  %vm1088_vm4 = vcmp.eq.f32.partialorder %v1087_v18, 8.507059e+37  ;;  %v1090_v60 = vor.u32 1.1754944e-38, %v1089_v40  ;;  %vm1100_vm7 = vmor %vm1098_vm2, %vm1099_vm3  ;;  %v597_v52 = vpop.f32.mrf.mxu3 }
 0x15a   : > { %v1850_v0 = vpack.c.bf16 %v1556_v63, %v1541_v59  ;;  %v1082_v56 = vadd.f32 %v2574_v35, %v1081_v61  ;;  %v1559_v1 = vmul.f32 %v2580_v62, %v3384_v32  ;;  %vm1103_vm6 = vcmp.eq.f32.partialorder %v1102_v51, 8.507059e+37 }
 0x15b   : > { %v1097_v5 = vadd.f32 %v2576_v38, %v1096_v54  ;;  %v3414_v7 = vadd.f32 1.0, %v2578_v57  ;;  %v1105_v14 = vor.u32 1.1754944e-38, %v1104_v53  ;;  %2583 = vpow2.f32 %v3334_v3 }
 0x15c   : > { %1882 = vst [vmem:[%s2943_s9 + $0xb0] sm:$0xff] %v1850_v0  ;;  %v1086_v9 = vsel %vm1085_vm5, %v2574_v35, %v1082_v56  ;;  %v1560_v50 = vsub.f32 1.0, %v1559_v1  ;;  %vm1563_vm8 = vweird.f32 %v3384_v32  ;;  %v2296_v6 = vmul.f32 -1.442695, %v554_v2 }
 0x15d   : > { %v2582_v10 = vpop.eup %2581  ;;  %v1091_v55 = vsel %vm1088_vm4, %v1090_v60, %v1086_v9  ;;  %v1101_v15 = vsel %vm1100_vm7, %v2576_v38, %v1097_v5  ;;  %vm1564_vm9 = vweird.f32 %v2580_v62  ;;  %v1567_v25 = vand.u32 2147483647, %v3384_v32 }
 0x15e   : > { %v1106_v17 = vsel %vm1103_vm6, %v1105_v14, %v1101_v15  ;;  %v1561_v20 = vmul.f32 %v2580_v62, %v1560_v50  ;;  %v1574_v22 = vmul.f32 %v2582_v10, %v3391_v37  ;;  %v1569_v13 = vand.u32 2147483648, %v3384_v32  ;;  %vm3428_vm10 = vmor %vm1563_vm8, %vm1564_vm9 }
 0x15f   : > { %v1835_v11 = vpack.c.bf16 %v1106_v17, %v1091_v55  ;;  %2585 = vrcp.f32 %v3414_v7  ;;  %v1582_v19 = vand.u32 2147483647, %v3391_v37  ;;  %v1584_v27 = vand.u32 2147483648, %v3391_v37 }
 0x160   : > { %v1562_v3 = vadd.f32 %v2580_v62, %v1561_v20  ;;  %v1575_v26 = vsub.f32 1.0, %v1574_v22  ;;  %2587 = vpow2.f32 %v3337_v58  ;;  %v2327_v28 = vmul.f32 -1.442695, %v505_v12  ;;  %v510_v22 = vpop.f32.mrf.mxu2 }
 0x161   : > { %1867 = vst [vmem:[%s2943_s9 + $0x38] sm:$0xff] %v1835_v11  ;;  %2589 = vpow2.f32 %v3339_v4  ;;  %v2584_v29 = vpop.eup %2583  ;;  %vm1579_vm11 = vweird.f32 %v2582_v10  ;;  %vm1568_vm12 = vcmp.eq.f32.partialorder %v1567_v25, 8.507059e+37  ;;  %v1570_v58 = vor.u32 1.1754944e-38, %v1569_v13 }
 0x162   : > { %v1566_v30 = vsel %vm3428_vm10, %v2580_v62, %v1562_v3  ;;  %v1576_v31 = vmul.f32 %v2582_v10, %v1575_v26  ;;  %2591 = vpow2.f32 %v3354_v8  ;;  %vm1578_vm13 = vweird.f32 %v3391_v37 }
 0x163   : > { %v3438_v21 = vadd.f32 1.0, %v2584_v29  ;;  %vm3440_vm14 = vcmp.eq.f32.partialorder %v1582_v19, 8.507059e+37  ;;  %2593 = vpow2.f32 %v2296_v6  ;;  %v2328_v4 = vmul.f32 -1.442695, %v594_v23  ;;  %vm1580_vm15 = vmor %vm1578_vm13, %vm1579_vm11 }
 0x164   : > { %v1577_v32 = vadd.f32 %v2582_v10, %v1576_v31  ;;  %v1571_v35 = vsel %vm1568_vm12, %v1570_v58, %v1566_v30  ;;  %v1585_v36 = vor.u32 1.1754944e-38, %v1584_v27  ;;  %v1119_v8 = vand.u32 2147483648, %v3414_v7 }
 0x165   : > { %v3444_v18 = vpop.eup %2585  ;;  %2595 = vrcp.f32 %v3438_v21  ;;  %v1117_v41 = vand.u32 2147483647, %v3414_v7  ;;  %vm1113_vm0 = vweird.f32 %v3414_v7  ;;  %v2297_v45 = vmul.f32 -1.442695, %v468_v34 }
 0x166   : > { %v2588_v37 = vpop.eup %2587  ;;  %v1581_v38 = vsel %vm1580_vm15, %v2582_v10, %v1577_v32  ;;  %v1109_v39 = vmul.f32 %v3444_v18, %v3414_v7  ;;  %2597 = vpow2.f32 %v2327_v28  ;;  %v1120_v53 = vor.u32 1.1754944e-38, %v1119_v8 }
 0x167   : > { %v2590_v43 = vpop.eup %2589  ;;  %v1586_v44 = vsel %vm3440_vm14, %v1585_v36, %v1581_v38  ;;  %v3454_v40 = vadd.f32 1.0, %v2588_v37  ;;  %2599 = vpow2.f32 %v2328_v4  ;;  %v1132_v57 = vand.u32 2147483647, %v3438_v21 }
 0x168   : > { %v2592_v47 = vpop.eup %2591  ;;  %v1851_v48 = vpack.c.bf16 %v1586_v44, %v1571_v35  ;;  %v1110_v51 = vsub.f32 1.0, %v1109_v39  ;;  %v3456_v46 = vadd.f32 1.0, %v2590_v43  ;;  %v3460_v59 = vmul.f32 -1.442695, %v557_v33 }
 0x169   : > { %2601 = vrcp.f32 %v3454_v40  ;;  %v2594_v49 = vpop.eup %2593  ;;  %vm3464_vm1 = vcmp.eq.f32.partialorder %v1117_v41, 8.507059e+37  ;;  %v1134_v63 = vand.u32 2147483648, %v3438_v21  ;;  %v3470_v54 = vmul.f32 -1.442695, %v508_v42 }
 0x16a   : > { %1883 = vst [vmem:[%s2943_s9 + $0xb8] sm:$0xff] %v1851_v48  ;;  %v1111_v61 = vmul.f32 %v3444_v18, %v1110_v51  ;;  %2603 = vrcp.f32 %v3456_v46  ;;  %vm1128_vm2 = vweird.f32 %v3438_v21  ;;  %v1599_v56 = vand.u32 2147483648, %v3454_v40 }
 0x16b   : > { %v2596_v0 = vpop.eup %2595  ;;  %v3474_v1 = vadd.f32 1.0, %v2592_v47  ;;  %v3476_v2 = vmul.f32 -1.442695, %v597_v52  ;;  %vm1114_vm3 = vweird.f32 %v3444_v18  ;;  %v1597_v14 = vand.u32 2147483647, %v3454_v40 }
 0x16c   : > { %v2598_v60 = vpop.eup %2597  ;;  %v1112_v5 = vadd.f32 %v3444_v18, %v1111_v61  ;;  %v1124_v9 = vmul.f32 %v2596_v0, %v3438_v21  ;;  %vm3482_vm4 = vcmp.eq.f32.partialorder %v1132_v57, 8.507059e+37  ;;  %v1612_v10 = vand.u32 2147483647, %v3456_v46  ;;  %vm3493_vm5 = vmor %vm1113_vm0, %vm1114_vm3  ;;  %v470_v21 = vpop.f32.mrf.mxu0 }
 0x16d   : > { %v1614_v55 = vand.u32 2147483648, %v3456_v46  ;;  %2605 = vrcp.f32 %v3474_v1  ;;  %v2600_v15 = vpop.eup %2599  ;;  %v1135_v12 = vor.u32 1.1754944e-38, %v1134_v63  ;;  %v3489_v17 = vadd.f32 1.0, %v2594_v49 }
 0x16e   : > { %v1125_v6 = vsub.f32 1.0, %v1124_v9  ;;  %2607 = vpow2.f32 %v2297_v45  ;;  %vm1593_vm6 = vweird.f32 %v3454_v40  ;;  %v1600_v23 = vor.u32 1.1754944e-38, %v1599_v56 }
 0x16f   : > { %v2602_v20 = vpop.eup %2601  ;;  %vm1608_vm7 = vweird.f32 %v3456_v46  ;;  %v3499_v11 = vadd.f32 1.0, %v2598_v60  ;;  %v1116_v13 = vsel %vm3493_vm5, %v3444_v18, %v1112_v5  ;;  %vm1129_vm8 = vweird.f32 %v2596_v0 }
 0x170   : > { %v2604_v25 = vpop.eup %2603  ;;  %v1126_v3 = vmul.f32 %v2596_v0, %v1125_v6  ;;  %v1589_v7 = vmul.f32 %v2602_v20, %v3454_v40  ;;  %vm3505_vm9 = vcmp.eq.f32.partialorder %v1597_v14, 8.507059e+37  ;;  %vm3510_vm10 = vcmp.eq.f32.partialorder %v1612_v10, 8.507059e+37  ;;  %vm1130_vm11 = vmor %vm1128_vm2, %vm1129_vm8 }
 0x171   : > { %v1604_v19 = vmul.f32 %v2604_v25, %v3456_v46  ;;  %v1615_v27 = vor.u32 1.1754944e-38, %v1614_v55  ;;  %2609 = vrcp.f32 %v3489_v17  ;;  %v1147_v30 = vand.u32 2147483647, %v3474_v1 }
 0x172   : > { %v1127_v28 = vadd.f32 %v2596_v0, %v1126_v3  ;;  %v1590_v29 = vsub.f32 1.0, %v1589_v7  ;;  %v1149_v31 = vand.u32 2147483648, %v3474_v1  ;;  %v1121_v32 = vsel %vm3464_vm1, %v1120_v53, %v1116_v13 }
 0x173   : > { %v3517_v58 = vpop.eup %2605  ;;  %v1605_v16 = vsub.f32 1.0, %v1604_v19  ;;  %2611 = vrcp.f32 %v3499_v11  ;;  %v3524_v4 = vadd.f32 1.0, %v2600_v15  ;;  %vm1594_vm12 = vweird.f32 %v2602_v20 }
 0x174   : > { %v2608_v34 = vpop.eup %2607  ;;  %v1131_v18 = vsel %vm1130_vm11, %v2596_v0, %v1127_v28  ;;  %v1591_v35 = vmul.f32 %v2602_v20, %v1590_v29  ;;  %v1139_v36 = vmul.f32 %v3517_v58, %v3474_v1  ;;  %vm1609_vm13 = vweird.f32 %v2604_v25  ;;  %vm1595_vm0 = vmor %vm1593_vm6, %vm1594_vm12  ;;  %v473_v3 = vpop.f32.mrf.mxu0 }
 0x175   : > { %v1136_v8 = vsel %vm3482_vm4, %v1135_v12, %v1131_v18  ;;  %v1606_v37 = vmul.f32 %v2604_v25, %v1605_v16  ;;  %vm1143_vm14 = vweird.f32 %v3474_v1  ;;  %vm3531_vm15 = vcmp.eq.f32.partialorder %v1147_v30, 8.507059e+37  ;;  %vm1610_vm2 = vmor %vm1608_vm7, %vm1609_vm13 }
 0x176   : > { %v1836_v38 = vpack.c.bf16 %v1136_v8, %v1121_v32  ;;  %v1592_v39 = vadd.f32 %v2602_v20, %v1591_v35  ;;  %v1140_v41 = vsub.f32 1.0, %v1139_v36  ;;  %v1150_v45 = vor.u32 1.1754944e-38, %v1149_v31 }
 0x177   : > { %v2610_v43 = vpop.eup %2609  ;;  %v1607_v44 = vadd.f32 %v2604_v25, %v1606_v37  ;;  %vm1158_vm1 = vweird.f32 %v3489_v17  ;;  %2613 = vrcp.f32 %v3524_v4  ;;  %vm1144_vm3 = vweird.f32 %v3517_v58 }
 0x178   : > { %1868 = vst [vmem:[%s2943_s9 + $0x40] sm:$0xff] %v1836_v38  ;;  %v1596_v42 = vsel %vm1595_vm0, %v2602_v20, %v1592_v39  ;;  %v1141_v47 = vmul.f32 %v3517_v58, %v1140_v41  ;;  %v1154_v48 = vmul.f32 %v2610_v43, %v3489_v17  ;;  %v1162_v53 = vand.u32 2147483647, %v3489_v17  ;;  %vm3556_vm4 = vmor %vm1143_vm14, %vm1144_vm3  ;;  %v559_v20 = vpop.f32.mrf.mxu1 }
 0x179   : > { %v2612_v40 = vpop.eup %2611  ;;  %v1601_v51 = vsel %vm3505_vm9, %v1600_v23, %v1596_v42  ;;  %v1611_v52 = vsel %vm1610_vm2, %v2604_v25, %v1607_v44  ;;  %v1164_v57 = vand.u32 2147483648, %v3489_v17  ;;  %vm1159_vm5 = vweird.f32 %v2610_v43  ;;  %v513_v42 = vpop.f32.mrf.mxu2 }
 0x17a   : > { %v1616_v46 = vsel %vm3510_vm10, %v1615_v27, %v1611_v52  ;;  %v1142_v49 = vadd.f32 %v3517_v58, %v1141_v47  ;;  %v1155_v61 = vsub.f32 1.0, %v1154_v48  ;;  %v1619_v62 = vmul.f32 %v2612_v40, %v3499_v11  ;;  %vm1160_vm9 = vmor %vm1158_vm1, %vm1159_vm5 }
 0x17b   : > { %v1852_v63 = vpack.c.bf16 %v1616_v46, %v1601_v51  ;;  %vm1623_vm6 = vweird.f32 %v3499_v11  ;;  %v1627_v56 = vand.u32 2147483647, %v3499_v11  ;;  %v3565_v14 = vadd.f32 1.0, %v2608_v34 }
 0x17c   : > { %v1146_v60 = vsel %vm3556_vm4, %v3517_v58, %v1142_v49  ;;  %v1156_v5 = vmul.f32 %v2610_v43, %v1155_v61  ;;  %v1620_v9 = vsub.f32 1.0, %v1619_v62  ;;  %vm3568_vm7 = vcmp.eq.f32.partialorder %v1162_v53, 8.507059e+37  ;;  %v475_v51 = vpop.f32.mrf.mxu0 }
 0x17d   : > { %v2614_v50 = vpop.eup %2613  ;;  %1884 = vst [vmem:[%s2943_s9 + $0xc0] sm:$0xff] %v1852_v63  ;;  %v1165_v10 = vor.u32 1.1754944e-38, %v1164_v57  ;;  %vm1624_vm8 = vweird.f32 %v2612_v40  ;;  %2615 = vpow2.f32 %v3460_v59  ;;  %v2299_v12 = vmul.f32 -1.442695, %v470_v21  ;;  %v599_v59 = vpop.f32.mrf.mxu3 }
 0x17e   : > { %v1157_v55 = vadd.f32 %v2610_v43, %v1156_v5  ;;  %v1621_v15 = vmul.f32 %v2612_v40, %v1620_v9  ;;  %v1634_v6 = vmul.f32 %v2614_v50, %v3524_v4  ;;  %v1151_v23 = vsel %vm3531_vm15, %v1150_v45, %v1146_v60  ;;  %vm3588_vm10 = vmor %vm1623_vm6, %vm1624_vm8 }
 0x17f   : > { %v1629_v25 = vand.u32 2147483648, %v3499_v11  ;;  %v1644_v13 = vand.u32 2147483648, %v3524_v4  ;;  %2617 = vrcp.f32 %v3565_v14  ;;  %vm1639_vm11 = vweird.f32 %v2614_v50 }
 0x180   : > { %v1161_v7 = vsel %vm1160_vm9, %v2610_v43, %v1157_v55  ;;  %v1622_v26 = vadd.f32 %v2612_v40, %v1621_v15  ;;  %v1635_v19 = vsub.f32 1.0, %v1634_v6  ;;  %2619 = vpow2.f32 %v3470_v54  ;;  %v562_v45 = vpop.f32.mrf.mxu1 }
 0x181   : > { %v1166_v24 = vsel %vm3568_vm7, %v1165_v10, %v1161_v7  ;;  %v1642_v27 = vand.u32 2147483647, %v3524_v4  ;;  %2621 = vpow2.f32 %v3476_v2  ;;  %vm1628_vm12 = vcmp.eq.f32.partialorder %v1627_v56, 8.507059e+37 }
 0x182   : > { %v1837_v28 = vpack.c.bf16 %v1166_v24, %v1151_v23  ;;  %v1626_v29 = vsel %vm3588_vm10, %v2612_v40, %v1622_v26  ;;  %v1636_v54 = vmul.f32 %v2614_v50, %v1635_v19  ;;  %2623 = vpow2.f32 %v2299_v12 }
 0x183   : > { %v2616_v30 = vpop.eup %2615  ;;  %v1630_v31 = vor.u32 1.1754944e-38, %v1629_v25  ;;  %v2300_v58 = vmul.f32 -1.442695, %v559_v20  ;;  %vm1638_vm13 = vweird.f32 %v3524_v4  ;;  %v1645_v32 = vor.u32 1.1754944e-38, %v1644_v13 }
 0x184   : > { %1869 = vst [vmem:[%s2943_s9 + $0x48] sm:$0xff] %v1837_v28  ;;  %v1637_v11 = vadd.f32 %v2614_v50, %v1636_v54  ;;  %v3598_v16 = vadd.f32 1.0, %v2616_v30  ;;  %vm1640_vm14 = vmor %vm1638_vm13, %vm1639_vm11  ;;  %v1179_v18 = vand.u32 2147483648, %v3565_v14  ;;  %v2331_v35 = vmul.f32 -1.442695, %v510_v22 }
 0x185   : > { %v3600_v34 = vpop.eup %2617  ;;  %v1631_v2 = vsel %vm1628_vm12, %v1630_v31, %v1626_v29  ;;  %2625 = vpow2.f32 %v2300_v58  ;;  %vm1643_vm15 = vcmp.eq.f32.partialorder %v1642_v27, 8.507059e+37  ;;  %v1177_v38 = vand.u32 2147483647, %v3565_v14  ;;  %v602_v40 = vpop.f32.mrf.mxu3 }
 0x186   : > { %v2620_v36 = vpop.eup %2619  ;;  %v1641_v8 = vsel %vm1640_vm14, %v2614_v50, %v1637_v11  ;;  %v1169_v37 = vmul.f32 %v3600_v34, %v3565_v14  ;;  %2627 = vrcp.f32 %v3598_v16  ;;  %vm1173_vm0 = vweird.f32 %v3565_v14 }
 0x187   : > { %v2622_v4 = vpop.eup %2621  ;;  %v1646_v21 = vsel %vm1643_vm15, %v1645_v32, %v1641_v8  ;;  %v3608_v43 = vadd.f32 1.0, %v2620_v36  ;;  %v1180_v47 = vor.u32 1.1754944e-38, %v1179_v18  ;;  %2629 = vpow2.f32 %v2331_v35 }
 0x188   : > { %v2624_v39 = vpop.eup %2623  ;;  %v1853_v41 = vpack.c.bf16 %v1646_v21, %v1631_v2  ;;  %v1170_v33 = vsub.f32 1.0, %v1169_v37  ;;  %v3610_v44 = vadd.f32 1.0, %v2622_v4  ;;  %v1192_v53 = vand.u32 2147483647, %v3598_v16 }
 0x189   : > { %v3613_v48 = vadd.f32 1.0, %v2624_v39  ;;  %2631 = vrcp.f32 %v3608_v43  ;;  %v2332_v57 = vmul.f32 -1.442695, %v599_v59  ;;  %vm3619_vm1 = vcmp.eq.f32.partialorder %v1177_v38, 8.507059e+37 }
 0x18a   : > { %1885 = vst [vmem:[%s2943_s9 + $0xc8] sm:$0xff] %v1853_v41  ;;  %v1171_v52 = vmul.f32 %v3600_v34, %v1170_v33  ;;  %v1194_v61 = vand.u32 2147483648, %v3598_v16  ;;  %2633 = vrcp.f32 %v3610_v44  ;;  %v3625_v62 = vmul.f32 -1.442695, %v473_v3 }
 0x18b   : > { %v2626_v46 = vpop.eup %2625  ;;  %v3627_v63 = vmul.f32 -1.442695, %v562_v45  ;;  %2635 = vrcp.f32 %v3613_v48  ;;  %v3630_v56 = vmul.f32 -1.442695, %v513_v42  ;;  %v3632_v60 = vmul.f32 -1.442695, %v602_v40 }
 0x18c   : > { %v2628_v0 = vpop.eup %2627  ;;  %v3634_v5 = vmul.f32 -1.442695, %v475_v51  ;;  %v1172_v9 = vadd.f32 %v3600_v34, %v1171_v52  ;;  %vm1174_vm2 = vweird.f32 %v3600_v34  ;;  %v1657_v1 = vand.u32 2147483647, %v3608_v43 }
 0x18d   : > { %v1184_v50 = vmul.f32 %v2628_v0, %v3598_v16  ;;  %vm1188_vm3 = vweird.f32 %v3598_v16  ;;  %vm3641_vm4 = vcmp.eq.f32.partialorder %v1192_v53, 8.507059e+37  ;;  %v1659_v55 = vand.u32 2147483648, %v3608_v43  ;;  %v2630_v6 = vpop.eup %2629  ;;  %vm3652_vm5 = vmor %vm1173_vm0, %vm1174_vm2  ;;  %v564_v16 = vpop.f32.mrf.mxu1 }
 0x18e   : > { %v1672_v15 = vand.u32 2147483647, %v3610_v44  ;;  %v1195_v20 = vor.u32 1.1754944e-38, %v1194_v61  ;;  %v1674_v22 = vand.u32 2147483648, %v3610_v44  ;;  %v3648_v23 = vadd.f32 1.0, %v2626_v46  ;;  %v604_v13 = vpop.f32.mrf.mxu3 }
 0x18f   : > { %v1185_v12 = vsub.f32 1.0, %v1184_v50  ;;  %v2632_v25 = vpop.eup %2631  ;;  %vm1653_vm6 = vweird.f32 %v3608_v43  ;;  %vm1668_vm7 = vweird.f32 %v3610_v44  ;;  %v3658_v59 = vadd.f32 1.0, %v2630_v6  ;;  %v515_v6 = vpop.f32.mrf.mxu2 }
 0x190   : > { %2637 = vpow2.f32 %v2332_v57  ;;  %v2634_v3 = vpop.eup %2633  ;;  %v1176_v7 = vsel %vm3652_vm5, %v3600_v34, %v1172_v9  ;;  %vm1189_vm8 = vweird.f32 %v2628_v0  ;;  %v1649_v14 = vmul.f32 %v2632_v25, %v3608_v43 }
 0x191   : > { %v1186_v26 = vmul.f32 %v2628_v0, %v1185_v12  ;;  %vm3664_vm9 = vcmp.eq.f32.partialorder %v1657_v1, 8.507059e+37  ;;  %v3668_v24 = vpop.eup %2635  ;;  %v1660_v17 = vor.u32 1.1754944e-38, %v1659_v55  ;;  %v1664_v27 = vmul.f32 %v2634_v3, %v3610_v44  ;;  %vm1190_vm11 = vmor %vm1188_vm3, %vm1189_vm8 }
 0x192   : > { %vm3671_vm10 = vcmp.eq.f32.partialorder %v1672_v15, 8.507059e+37  ;;  %2639 = vrcp.f32 %v3648_v23  ;;  %v1650_v54 = vsub.f32 1.0, %v1649_v14  ;;  %v1675_v30 = vor.u32 1.1754944e-38, %v1674_v22 }
 0x193   : > { %v1187_v29 = vadd.f32 %v2628_v0, %v1186_v26  ;;  %v1199_v31 = vmul.f32 %v3668_v24, %v3613_v48  ;;  %v1181_v58 = vsel %vm3619_vm1, %v1180_v47, %v1176_v7  ;;  %v1665_v11 = vsub.f32 1.0, %v1664_v27 }
 0x194   : > { %v1207_v32 = vand.u32 2147483647, %v3613_v48  ;;  %2641 = vrcp.f32 %v3658_v59  ;;  %v1651_v2 = vmul.f32 %v2632_v25, %v1650_v54  ;;  %vm1654_vm12 = vweird.f32 %v2632_v25 }
 0x195   : > { %v1191_v34 = vsel %vm1190_vm11, %v2628_v0, %v1187_v29  ;;  %v1200_v18 = vsub.f32 1.0, %v1199_v31  ;;  %v1666_v8 = vmul.f32 %v2634_v3, %v1665_v11  ;;  %vm1669_vm13 = vweird.f32 %v2634_v3  ;;  %vm1655_vm15 = vmor %vm1653_vm6, %vm1654_vm12 }
 0x196   : > { %v2638_v35 = vpop.eup %2637  ;;  %v1196_v36 = vsel %vm3641_vm4, %v1195_v20, %v1191_v34  ;;  %vm1203_vm14 = vweird.f32 %v3613_v48  ;;  %v1652_v4 = vadd.f32 %v2632_v25, %v1651_v2  ;;  %v1209_v38 = vand.u32 2147483648, %v3613_v48  ;;  %vm1670_vm1 = vmor %vm1668_vm7, %vm1669_vm13 }
 0x197   : > { %v1838_v37 = vpack.c.bf16 %v1196_v36, %v1181_v58  ;;  %v1201_v21 = vmul.f32 %v3668_v24, %v1200_v18  ;;  %v1667_v41 = vadd.f32 %v2634_v3, %v1666_v8  ;;  %vm3691_vm0 = vcmp.eq.f32.partialorder %v1207_v32, 8.507059e+37 }
 0x198   : > { %v2640_v39 = vpop.eup %2639  ;;  %v3695_v45 = vadd.f32 1.0, %v2638_v35  ;;  %2643 = vpow2.f32 %v3625_v62  ;;  %v1656_v42 = vsel %vm1655_vm15, %v2632_v25, %v1652_v4  ;;  %vm1204_vm2 = vweird.f32 %v3668_v24 }
 0x199   : > { %1870 = vst [vmem:[%s2943_s9 + $0x50] sm:$0xff] %v1838_v37  ;;  %v1202_v47 = vadd.f32 %v3668_v24, %v1201_v21  ;;  %v1214_v43 = vmul.f32 %v2640_v39, %v3648_v23  ;;  %v1661_v51 = vsel %vm3664_vm9, %v1660_v17, %v1656_v42  ;;  %v1671_v52 = vsel %vm1670_vm1, %v2634_v3, %v1667_v41  ;;  %vm3716_vm3 = vmor %vm1203_vm14, %vm1204_vm2  ;;  %v478_v3 = vpop.f32.mrf.mxu0  ;;  %v607_v42 = vpop.f32.mrf.mxu3 }
 0x19a   : > { %v3705_v40 = vpop.eup %2641  ;;  %v1224_v53 = vand.u32 2147483648, %v3648_v23  ;;  %v2304_v57 = vmul.f32 -1.442695, %v564_v16  ;;  %v1676_v44 = vsel %vm3671_vm10, %v1675_v30, %v1671_v52  ;;  %v1210_v46 = vor.u32 1.1754944e-38, %v1209_v38  ;;  %v518_v38 = vpop.f32.mrf.mxu2 }
 0x19b   : > { %v1215_v49 = vsub.f32 1.0, %v1214_v43  ;;  %v1679_v61 = vmul.f32 %v3705_v40, %v3658_v59  ;;  %v1854_v62 = vpack.c.bf16 %v1676_v44, %v1661_v51  ;;  %v1222_v9 = vand.u32 2147483647, %v3648_v23 }
 0x19c   : > { %v1687_v50 = vand.u32 2147483647, %v3658_v59  ;;  %2645 = vrcp.f32 %v3695_v45  ;;  %v1206_v1 = vsel %vm3716_vm3, %v3668_v24, %v1202_v47  ;;  %vm1219_vm4 = vweird.f32 %v2640_v39 }
 0x19d   : > { %v1216_v10 = vmul.f32 %v2640_v39, %v1215_v49  ;;  %v1680_v55 = vsub.f32 1.0, %v1679_v61  ;;  %1886 = vst [vmem:[%s2943_s9 + $0xd0] sm:$0xff] %v1854_v62  ;;  %vm1218_vm5 = vweird.f32 %v3648_v23  ;;  %v1225_v48 = vor.u32 1.1754944e-38, %v1224_v53 }
 0x19e   : > { %v2644_v15 = vpop.eup %2643  ;;  %vm1683_vm6 = vweird.f32 %v3658_v59  ;;  %2647 = vpow2.f32 %v3627_v63  ;;  %v1689_v22 = vand.u32 2147483648, %v3658_v59  ;;  %v1211_v7 = vsel %vm3691_vm0, %v1210_v46, %v1206_v1  ;;  %vm1220_vm7 = vmor %vm1218_vm5, %vm1219_vm4  ;;  %v567_v63 = vpop.f32.mrf.mxu1 }
 0x19f   : > { %v1217_v12 = vadd.f32 %v2640_v39, %v1216_v10  ;;  %v1681_v20 = vmul.f32 %v3705_v40, %v1680_v55  ;;  %v3732_v25 = vadd.f32 1.0, %v2644_v15  ;;  %v1702_v23 = vand.u32 2147483647, %v3695_v45 }
 0x1a0   : > { %v1704_v26 = vand.u32 2147483648, %v3695_v45  ;;  %2649 = vpow2.f32 %v3630_v56  ;;  %vm1223_vm8 = vcmp.eq.f32.partialorder %v1222_v9, 8.507059e+37  ;;  %vm3740_vm9 = vcmp.eq.f32.partialorder %v1687_v50, 8.507059e+37 }
 0x1a1   : > { %v1221_v14 = vsel %vm1220_vm7, %v2640_v39, %v1217_v12  ;;  %2651 = vrcp.f32 %v3732_v25  ;;  %v1682_v27 = vadd.f32 %v3705_v40, %v1681_v20  ;;  %vm1684_vm10 = vweird.f32 %v3705_v40  ;;  %v480_v47 = vpop.f32.mrf.mxu0 }
 0x1a2   : > { %v2646_v24 = vpop.eup %2645  ;;  %v1226_v17 = vsel %vm1223_vm8, %v1225_v48, %v1221_v14  ;;  %2653 = vpow2.f32 %v3632_v60  ;;  %v1690_v56 = vor.u32 1.1754944e-38, %v1689_v22  ;;  %vm1698_vm11 = vweird.f32 %v3695_v45  ;;  %vm3757_vm13 = vmor %vm1683_vm6, %vm1684_vm10 }
 0x1a3   : > { %v1839_v28 = vpack.c.bf16 %v1226_v17, %v1211_v7  ;;  %v1694_v29 = vmul.f32 %v2646_v24, %v3695_v45  ;;  %vm3750_vm12 = vcmp.eq.f32.partialorder %v1702_v23, 8.507059e+37  ;;  %v1705_v31 = vor.u32 1.1754944e-38, %v1704_v26 }
 0x1a4   : > { %v2648_v54 = vpop.eup %2647  ;;  %v2335_v58 = vmul.f32 -1.442695, %v515_v6  ;;  %v2336_v11 = vmul.f32 -1.442695, %v604_v13  ;;  %2655 = vpow2.f32 %v3634_v5  ;;  %v3764_v2 = vmul.f32 -1.442695, %v478_v3 }
 0x1a5   : > { %1871 = vst [vmem:[%s2943_s9 + $0x58] sm:$0xff] %v1839_v28  ;;  %v1695_v60 = vsub.f32 1.0, %v1694_v29  ;;  %v3761_v34 = vadd.f32 1.0, %v2648_v54  ;;  %v1686_v35 = vsel %vm3757_vm13, %v3705_v40, %v1682_v27  ;;  %v1239_v36 = vand.u32 2147483648, %v3732_v25 }
 0x1a6   : > { %v2650_v18 = vpop.eup %2649  ;;  %2657 = vpow2.f32 %v2304_v57  ;;  %v3770_v59 = vmul.f32 -1.442695, %v567_v63  ;;  %vm1699_vm14 = vweird.f32 %v2646_v24  ;;  %vm1233_vm15 = vweird.f32 %v3732_v25  ;;  %v569_v52 = vpop.f32.mrf.mxu1 }
 0x1a7   : > { %v3772_v8 = vpop.eup %2651  ;;  %v1696_v16 = vmul.f32 %v2646_v24, %v1695_v60  ;;  %2659 = vrcp.f32 %v3761_v34  ;;  %v1237_v4 = vand.u32 2147483647, %v3732_v25  ;;  %v3779_v21 = vadd.f32 1.0, %v2650_v18  ;;  %vm1700_vm0 = vmor %vm1698_vm11, %vm1699_vm14 }
 0x1a8   : > { %v2654_v5 = vpop.eup %2653  ;;  %v1229_v37 = vmul.f32 %v3772_v8, %v3732_v25  ;;  %2661 = vpow2.f32 %v2335_v58  ;;  %v1691_v39 = vsel %vm3740_vm9, %v1690_v56, %v1686_v35  ;;  %v1240_v40 = vor.u32 1.1754944e-38, %v1239_v36 }
 0x1a9   : > { %v1697_v41 = vadd.f32 %v2646_v24, %v1696_v16  ;;  %v3783_v33 = vadd.f32 1.0, %v2654_v5  ;;  %2663 = vpow2.f32 %v2336_v11  ;;  %v1252_v51 = vand.u32 2147483647, %v3761_v34 }
 0x1aa   : > { %v1230_v43 = vsub.f32 1.0, %v1229_v37  ;;  %2665 = vrcp.f32 %v3779_v21  ;;  %v2656_v53 = vpop.eup %2655  ;;  %v1254_v44 = vand.u32 2147483648, %v3761_v34  ;;  %v3792_v46 = vmul.f32 -1.442695, %v518_v38 }
 0x1ab   : > { %v1701_v57 = vsel %vm1700_vm0, %v2646_v24, %v1697_v41  ;;  %2667 = vrcp.f32 %v3783_v33  ;;  %vm3797_vm1 = vcmp.eq.f32.partialorder %v1237_v4, 8.507059e+37  ;;  %v3801_v0 = vmul.f32 -1.442695, %v607_v42 }
 0x1ac   : > { %v2658_v49 = vpop.eup %2657  ;;  %v1706_v45 = vsel %vm3750_vm12, %v1705_v31, %v1701_v57  ;;  %v1231_v61 = vmul.f32 %v3772_v8, %v1230_v43  ;;  %v3803_v9 = vmul.f32 -1.442695, %v480_v47  ;;  %vm1248_vm2 = vweird.f32 %v3761_v34 }
 0x1ad   : > { %v2660_v50 = vpop.eup %2659  ;;  %v1855_v1 = vpack.c.bf16 %v1706_v45, %v1691_v39  ;;  %v1717_v10 = vand.u32 2147483647, %v3779_v21  ;;  %v3807_v55 = vmul.f32 -1.442695, %v569_v52  ;;  %vm1234_vm3 = vweird.f32 %v3772_v8 }
 0x1ae   : > { %v2662_v15 = vpop.eup %2661  ;;  %v1232_v48 = vadd.f32 %v3772_v8, %v1231_v61  ;;  %v1244_v6 = vmul.f32 %v2660_v50, %v3761_v34  ;;  %vm3812_vm4 = vcmp.eq.f32.partialorder %v1252_v51, 8.507059e+37  ;;  %v1255_v22 = vor.u32 1.1754944e-38, %v1254_v44  ;;  %vm3829_vm7 = vmor %vm1233_vm15, %vm1234_vm3 }
 0x1af   : > { %v2664_v20 = vpop.eup %2663  ;;  %1887 = vst [vmem:[%s2943_s9 + $0xd8] sm:$0xff] %v1855_v1  ;;  %v1719_v13 = vand.u32 2147483648, %v3779_v21  ;;  %v3818_v3 = vadd.f32 1.0, %v2656_v53  ;;  %v3820_v7 = vadd.f32 1.0, %v2658_v49  ;;  %vm1713_vm5 = vweird.f32 %v3779_v21 }
 0x1b0   : > { %v2666_v23 = vpop.eup %2665  ;;  %v1245_v26 = vsub.f32 1.0, %v1244_v6  ;;  %vm1728_vm6 = vweird.f32 %v3783_v33  ;;  %v1732_v63 = vand.u32 2147483647, %v3783_v33  ;;  %vm1249_vm8 = vweird.f32 %v2660_v50 }
 0x1b1   : > { %v2668_v14 = vpop.eup %2667  ;;  %v1709_v24 = vmul.f32 %v2666_v23, %v3779_v21  ;;  %vm3834_vm9 = vcmp.eq.f32.partialorder %v1717_v10, 8.507059e+37  ;;  %2669 = vrcp.f32 %v3818_v3  ;;  %v1236_v27 = vsel %vm3829_vm7, %v3772_v8, %v1232_v48  ;;  %vm1250_vm11 = vmor %vm1248_vm2, %vm1249_vm8 }
 0x1b2   : > { %v1246_v28 = vmul.f32 %v2660_v50, %v1245_v26  ;;  %v1724_v25 = vmul.f32 %v2668_v14, %v3783_v33  ;;  %v3843_v56 = vadd.f32 1.0, %v2662_v15  ;;  %v1720_v54 = vor.u32 1.1754944e-38, %v1719_v13 }
 0x1b3   : > { %v1710_v29 = vsub.f32 1.0, %v1709_v24  ;;  %v1734_v30 = vand.u32 2147483648, %v3783_v33  ;;  %2671 = vrcp.f32 %v3820_v7  ;;  %vm3847_vm10 = vcmp.eq.f32.partialorder %v1732_v63, 8.507059e+37 }
 0x1b4   : > { %v1247_v31 = vadd.f32 %v2660_v50, %v1246_v28  ;;  %v1725_v58 = vsub.f32 1.0, %v1724_v25  ;;  %v3851_v32 = vadd.f32 1.0, %v2664_v20  ;;  %v1241_v60 = vsel %vm3797_vm1, %v1240_v40, %v1236_v27  ;;  %v2013_v25 = vld [vmem:[%s2943_s9 + $0x48] sm:$0xff] (%p2826_p5) }
 0x1b5   : > { %v1711_v18 = vmul.f32 %v2666_v23, %v1710_v29  ;;  %vm1714_vm12 = vweird.f32 %v2666_v23  ;;  %2673 = vpow2.f32 %v3764_v2  ;;  %vm1729_vm13 = vweird.f32 %v2668_v14  ;;  %2014 = vst [vmem:[%s4049_s25 + $0x120] sm:$0xff] (%p2826_p5), %v2013_v25 }
 0x1b6   : > { %v1251_v35 = vsel %vm1250_vm11, %v2660_v50, %v1247_v31  ;;  %v1726_v36 = vmul.f32 %v2668_v14, %v1725_v58  ;;  %2675 = vrcp.f32 %v3843_v56  ;;  %v1735_v37 = vor.u32 1.1754944e-38, %v1734_v30  ;;  %vm1715_vm14 = vmor %vm1713_vm5, %vm1714_vm12 }
 0x1b7   : > { %v2670_v8 = vpop.eup %2669  ;;  %v1256_v16 = vsel %vm3812_vm4, %v1255_v22, %v1251_v35  ;;  %v1712_v5 = vadd.f32 %v2666_v23, %v1711_v18  ;;  %v1267_v4 = vand.u32 2147483647, %v3818_v3  ;;  %vm1263_vm15 = vweird.f32 %v3818_v3  ;;  %vm1730_vm0 = vmor %vm1728_vm6, %vm1729_vm13 }
 0x1b8   : > { %v1840_v34 = vpack.c.bf16 %v1256_v16, %v1241_v60  ;;  %v1727_v38 = vadd.f32 %v2668_v14, %v1726_v36  ;;  %v1259_v2 = vmul.f32 %v2670_v8, %v3818_v3  ;;  %v1269_v42 = vand.u32 2147483648, %v3818_v3 }
 0x1b9   : > { %v2672_v39 = vpop.eup %2671  ;;  %v1716_v41 = vsel %vm1715_vm14, %v2666_v23, %v1712_v5  ;;  %vm1278_vm1 = vweird.f32 %v3820_v7  ;;  %2677 = vrcp.f32 %v3851_v32  ;;  %vm3878_vm2 = vcmp.eq.f32.partialorder %v1267_v4, 8.507059e+37  ;;  %v609_v4 = vpop.f32.mrf.mxu3 }
 0x1ba   : > { %1872 = vst [vmem:[%s2943_s9 + $0x60] sm:$0xff] %v1840_v34  ;;  %v1721_v21 = vsel %vm3834_vm9, %v1720_v54, %v1716_v41  ;;  %v1731_v47 = vsel %vm1730_vm0, %v2668_v14, %v1727_v38  ;;  %v1260_v43 = vsub.f32 1.0, %v1259_v2  ;;  %v1274_v40 = vmul.f32 %v2672_v39, %v3820_v7  ;;  %v520_v54 = vpop.f32.mrf.mxu2 }
 0x1bb   : > { %v2674_v51 = vpop.eup %2673  ;;  %v1736_v33 = vsel %vm3847_vm10, %v1735_v37, %v1731_v47  ;;  %v1282_v53 = vand.u32 2147483647, %v3820_v7  ;;  %v1284_v57 = vand.u32 2147483648, %v3820_v7  ;;  %vm1264_vm3 = vweird.f32 %v2670_v8 }
 0x1bc   : > { %v2676_v44 = vpop.eup %2675  ;;  %v1856_v49 = vpack.c.bf16 %v1736_v33, %v1721_v21  ;;  %v1261_v45 = vmul.f32 %v2670_v8, %v1260_v43  ;;  %v1275_v61 = vsub.f32 1.0, %v1274_v40  ;;  %v1270_v62 = vor.u32 1.1754944e-38, %v1269_v42  ;;  %vm1265_vm5 = vmor %vm1263_vm15, %vm1264_vm3 }
 0x1bd   : > { %vm1279_vm4 = vweird.f32 %v2672_v39  ;;  %v1739_v50 = vmul.f32 %v2676_v44, %v3843_v56  ;;  %v1747_v1 = vand.u32 2147483647, %v3843_v56  ;;  %v3887_v48 = vadd.f32 1.0, %v2674_v51 }
 0x1be   : > { %1888 = vst [vmem:[%s2943_s9 + $0xe0] sm:$0xff] %v1856_v49  ;;  %v1262_v10 = vadd.f32 %v2670_v8, %v1261_v45  ;;  %v1276_v15 = vmul.f32 %v2672_v39, %v1275_v61  ;;  %2679 = vpow2.f32 %v3770_v59  ;;  %vm3892_vm6 = vcmp.eq.f32.partialorder %v1282_v53, 8.507059e+37  ;;  %vm1280_vm7 = vmor %vm1278_vm1, %vm1279_vm4 }
 0x1bf   : > { %v2678_v6 = vpop.eup %2677  ;;  %v1285_v20 = vor.u32 1.1754944e-38, %v1284_v57  ;;  %v1740_v22 = vsub.f32 1.0, %v1739_v50  ;;  %2681 = vpow2.f32 %v3792_v46  ;;  %v1749_v26 = vand.u32 2147483648, %v3843_v56 }
 0x1c0   : > { %v1266_v13 = vsel %vm1265_vm5, %v2670_v8, %v1262_v10  ;;  %v1277_v23 = vadd.f32 %v2672_v39, %v1276_v15  ;;  %v1754_v63 = vmul.f32 %v2678_v6, %v3851_v32  ;;  %vm1744_vm8 = vweird.f32 %v2676_v44 }
 0x1c1   : > { %v1271_v59 = vsel %vm3878_vm2, %v1270_v62, %v1266_v13  ;;  %v1741_v3 = vmul.f32 %v2676_v44, %v1740_v22  ;;  %2683 = vrcp.f32 %v3887_v48  ;;  %vm1743_vm9 = vweird.f32 %v3843_v56 }
 0x1c2   : > { %v1281_v14 = vsel %vm1280_vm7, %v2672_v39, %v1277_v23  ;;  %vm3906_vm10 = vcmp.eq.f32.partialorder %v1747_v1, 8.507059e+37  ;;  %v1755_v19 = vsub.f32 1.0, %v1754_v63  ;;  %v1764_v7 = vand.u32 2147483648, %v3851_v32  ;;  %vm3914_vm11 = vmor %vm1743_vm9, %vm1744_vm8 }
 0x1c3   : > { %v1286_v24 = vsel %vm3892_vm6, %v1285_v20, %v1281_v14  ;;  %v1742_v17 = vadd.f32 %v2676_v44, %v1741_v3  ;;  %2685 = vpow2.f32 %v3801_v0  ;;  %vm1759_vm12 = vweird.f32 %v2678_v6 }
 0x1c4   : > { %v2680_v27 = vpop.eup %2679  ;;  %v1841_v28 = vpack.c.bf16 %v1286_v24, %v1271_v59  ;;  %v1756_v56 = vmul.f32 %v2678_v6, %v1755_v19  ;;  %v1762_v29 = vand.u32 2147483647, %v3851_v32  ;;  %v1750_v58 = vor.u32 1.1754944e-38, %v1749_v26 }
 0x1c5   : > { %v2682_v30 = vpop.eup %2681  ;;  %v1746_v31 = vsel %vm3914_vm11, %v2676_v44, %v1742_v17  ;;  %v3921_v11 = vadd.f32 1.0, %v2680_v27  ;;  %2687 = vpow2.f32 %v3803_v9  ;;  %vm1758_vm13 = vweird.f32 %v3851_v32 }
 0x1c6   : > { %1873 = vst [vmem:[%s2943_s9 + $0x68] sm:$0xff] %v1841_v28  ;;  %v1757_v0 = vadd.f32 %v2678_v6, %v1756_v56  ;;  %v3926_v60 = vadd.f32 1.0, %v2682_v30  ;;  %2689 = vpow2.f32 %v3807_v55  ;;  %v1751_v35 = vsel %vm3906_vm10, %v1750_v58, %v1746_v31  ;;  %vm1760_vm14 = vmor %vm1758_vm13, %vm1759_vm12  ;;  %v2011_v28 = vld [vmem:[%s2943_s9 + $0x40] sm:$0xff] (%p2826_p5) }
 0x1c7   : > { %v3929_v18 = vpop.eup %2683  ;;  %v1765_v36 = vor.u32 1.1754944e-38, %v1764_v7  ;;  %2691 = vrcp.f32 %v3921_v11  ;;  %v2339_v9 = vmul.f32 -1.442695, %v520_v54  ;;  %vm1763_vm15 = vcmp.eq.f32.partialorder %v1762_v29, 8.507059e+37  ;;  %2012 = vst [vmem:[%s4049_s25 + $0x100] sm:$0xff] (%p2826_p5), %v2011_v28 }
 0x1c8   : > { %v1761_v8 = vsel %vm1760_vm14, %v2678_v6, %v1757_v0  ;;  %v1289_v32 = vmul.f32 %v3929_v18, %v3887_v48  ;;  %2693 = vrcp.f32 %v3926_v60  ;;  %v1297_v38 = vand.u32 2147483647, %v3887_v48  ;;  %v2029_v0 = vld [vmem:[%s2943_s9 + $0x88] sm:$0xff] (%p2826_p5) }
 0x1c9   : > { %v2686_v55 = vpop.eup %2685  ;;  %v1766_v16 = vsel %vm1763_vm15, %v1765_v36, %v1761_v8  ;;  %2695 = vpow2.f32 %v2339_v9  ;;  %v1299_v42 = vand.u32 2147483648, %v3887_v48  ;;  %v1312_v21 = vand.u32 2147483647, %v3921_v11  ;;  %2030 = vst [vmem:[%s4049_s25 + $0x220] sm:$0xff] (%p2826_p5), %v2029_v0 }
 0x1ca   : > { %v1857_v5 = vpack.c.bf16 %v1766_v16, %v1751_v35  ;;  %v1290_v37 = vsub.f32 1.0, %v1289_v32  ;;  %v3939_v2 = vadd.f32 1.0, %v2686_v55  ;;  %vm1293_vm0 = vweird.f32 %v3887_v48 }
 0x1cb   : > { %v2688_v34 = vpop.eup %2687  ;;  %v1314_v40 = vand.u32 2147483648, %v3921_v11  ;;  %v2340_v51 = vmul.f32 -1.442695, %v609_v4  ;;  %vm1294_vm1 = vweird.f32 %v3929_v18  ;;  %vm3954_vm2 = vcmp.eq.f32.partialorder %v1297_v38, 8.507059e+37 }
 0x1cc   : > { %v2690_v39 = vpop.eup %2689  ;;  %1889 = vst [vmem:[%s2943_s9 + $0xe8] sm:$0xff] %v1857_v5  ;;  %v1291_v41 = vmul.f32 %v3929_v18, %v1290_v37  ;;  %v3945_v47 = vadd.f32 1.0, %v2688_v34  ;;  %2697 = vrcp.f32 %v3939_v2  ;;  %v1300_v49 = vor.u32 1.1754944e-38, %v1299_v42  ;;  %vm3966_vm5 = vmor %vm1293_vm0, %vm1294_vm1 }
 0x1cd   : > { %v2692_v43 = vpop.eup %2691  ;;  %vm1308_vm3 = vweird.f32 %v3921_v11  ;;  %vm3960_vm4 = vcmp.eq.f32.partialorder %v1312_v21, 8.507059e+37  ;;  %v1315_v1 = vor.u32 1.1754944e-38, %v1314_v40  ;;  %v3970_v15 = vadd.f32 1.0, %v2690_v39 }
 0x1ce   : > { %v2694_v33 = vpop.eup %2693  ;;  %v1292_v52 = vadd.f32 %v3929_v18, %v1291_v41  ;;  %v1304_v53 = vmul.f32 %v2692_v43, %v3921_v11  ;;  %2699 = vrcp.f32 %v3945_v47  ;;  %vm1309_vm6 = vweird.f32 %v2692_v43 }
 0x1cf   : > { %v1769_v44 = vmul.f32 %v2694_v33, %v3926_v60  ;;  %v2696_v62 = vpop.eup %2695  ;;  %2701 = vpow2.f32 %v2340_v51  ;;  %v1777_v48 = vand.u32 2147483647, %v3926_v60  ;;  %v1779_v23 = vand.u32 2147483648, %v3926_v60  ;;  %vm1310_vm9 = vmor %vm1308_vm3, %vm1309_vm6 }
 0x1d0   : > { %v1305_v45 = vsub.f32 1.0, %v1304_v53  ;;  %v1296_v6 = vsel %vm3966_vm5, %v3929_v18, %v1292_v52  ;;  %v3975_v20 = vadd.f32 1.0, %v2696_v62  ;;  %2703 = vrcp.f32 %v3970_v15 }
 0x1d1   : > { %v1770_v10 = vsub.f32 1.0, %v1769_v44  ;;  %vm1773_vm7 = vweird.f32 %v3926_v60  ;;  %vm1774_vm8 = vweird.f32 %v2694_v33  ;;  %v1301_v3 = vsel %vm3954_vm2, %v1300_v49, %v1296_v6 }
 0x1d2   : > { %v1306_v12 = vmul.f32 %v2692_v43, %v1305_v45  ;;  %v2698_v22 = vpop.eup %2697  ;;  %v1792_v46 = vand.u32 2147483647, %v3939_v2  ;;  %v1794_v7 = vand.u32 2147483648, %v3939_v2  ;;  %2705 = vrcp.f32 %v3975_v20  ;;  %vm3993_vm10 = vmor %vm1773_vm7, %vm1774_vm8 }
 0x1d3   : > { %v1771_v13 = vmul.f32 %v2694_v33, %v1770_v10  ;;  %v1784_v59 = vmul.f32 %v2698_v22, %v3939_v2  ;;  %vm3997_vm11 = vcmp.eq.f32.partialorder %v1777_v48, 8.507059e+37  ;;  %v1780_v56 = vor.u32 1.1754944e-38, %v1779_v23 }
 0x1d4   : > { %v2700_v26 = vpop.eup %2699  ;;  %v1307_v63 = vadd.f32 %v2692_v43, %v1306_v12  ;;  %vm1789_vm12 = vweird.f32 %v2698_v22  ;;  %vm1788_vm13 = vweird.f32 %v3939_v2  ;;  %vm4004_vm14 = vcmp.eq.f32.partialorder %v1792_v46, 8.507059e+37  ;;  %v1999_v46 = vld [vmem:[%s2943_s9 + $0x10] sm:$0xff] (%p2826_p5) }
 0x1d5   : > { %v1772_v14 = vadd.f32 %v2694_v33, %v1771_v13  ;;  %v1319_v19 = vmul.f32 %v2700_v26, %v3945_v47  ;;  %v1785_v17 = vsub.f32 1.0, %v1784_v59  ;;  %v2702_v54 = vpop.eup %2701  ;;  %v1795_v36 = vor.u32 1.1754944e-38, %v1794_v7  ;;  %vm1790_vm0 = vmor %vm1788_vm13, %vm1789_vm12  ;;  %2000 = vst [vmem:[%s4049_s25 + $0x40] sm:$0xff] (%p2826_p5), %v1999_v46  ;;  %v2007_v7 = vld [vmem:[%s2943_s9 + $0x30] sm:$0xff] (%p2826_p5) }
 0x1d6   : > { %v1311_v24 = vsel %vm1310_vm9, %v2692_v43, %v1307_v63  ;;  %v2704_v11 = vpop.eup %2703  ;;  %v4008_v18 = vadd.f32 1.0, %v2702_v54  ;;  %vm1324_vm15 = vweird.f32 %v2700_v26  ;;  %v1329_v55 = vand.u32 2147483648, %v3945_v47  ;;  %2008 = vst [vmem:[%s4049_s25 + $0xc0] sm:$0xff] (%p2826_p5), %v2007_v7  ;;  %v2019_v54 = vld [vmem:[%s2943_s9 + $0x60] sm:$0xff] (%p2826_p5) }
 0x1d7   : > { %v1316_v27 = vsel %vm3960_vm4, %v1315_v1, %v1311_v24  ;;  %v1320_v29 = vsub.f32 1.0, %v1319_v19  ;;  %v1776_v31 = vsel %vm3993_vm10, %v2694_v33, %v1772_v14  ;;  %v1786_v58 = vmul.f32 %v2698_v22, %v1785_v17  ;;  %v1997_v14 = vld [vmem:[%s2943_s9 + $0x8] sm:$0xff] (%p2826_p5)  ;;  %v2001_v19 = vld [vmem:[%s2943_s9 + $0x18] sm:$0xff] (%p2826_p5)  ;;  %v2003_v24 = vld [vmem:[%s2943_s9 + $0x20] sm:$0xff] (%p2826_p5)  ;;  %2020 = vst [vmem:[%s4049_s25 + $0x180] sm:$0xff] (%p2826_p5), %v2019_v54 }
 0x1d8   : > { %v1842_v30 = vpack.c.bf16 %v1316_v27, %v1301_v3  ;;  %v1334_v9 = vmul.f32 %v2704_v11, %v3970_v15  ;;  %v1781_v8 = vsel %vm3997_vm11, %v1780_v56, %v1776_v31  ;;  %2707 = vrcp.f32 %v4008_v18  ;;  %v2706_v16 = vpop.eup %2705  ;;  %v1995_v3 = vld [vmem:[%s2943_s9] sm:$0xff] (%p2826_p5)  ;;  %1998 = vst [vmem:[%s4049_s25 + $0x20] sm:$0xff] (%p2826_p5), %v1997_v14  ;;  %v2005_v17 = vld [vmem:[%s2943_s9 + $0x28] sm:$0xff] (%p2826_p5)  ;;  %v2009_v27 = vld [vmem:[%s2943_s9 + $0x38] sm:$0xff] (%p2826_p5) }
 0x1d9   : > { %v1321_v60 = vmul.f32 %v2700_v26, %v1320_v29  ;;  %v1787_v35 = vadd.f32 %v2698_v22, %v1786_v58  ;;  %vm1323_vm1 = vweird.f32 %v3945_v47  ;;  %v1327_v37 = vand.u32 2147483647, %v3945_v47  ;;  %1996 = vst [vmem:[%s4049_s25] sm:$0xff] (%p2826_p5), %v1995_v3  ;;  %v2015_v56 = vld [vmem:[%s2943_s9 + $0x50] sm:$0xff] (%p2826_p5)  ;;  %v2017_v29 = vld [vmem:[%s2943_s9 + $0x58] sm:$0xff] (%p2826_p5) }
 0x1da   : > { %1874 = vst [vmem:[%s2943_s9 + $0x70] sm:$0xff] %v1842_v30  ;;  %v1335_v4 = vsub.f32 1.0, %v1334_v9  ;;  %vm4020_vm2 = vmor %vm1323_vm1, %vm1324_vm15  ;;  %v1342_v2 = vand.u32 2147483647, %v3970_v15  ;;  %v1344_v39 = vand.u32 2147483648, %v3970_v15  ;;  %v1799_v41 = vmul.f32 %v2706_v16, %v3975_v20  ;;  %v2021_v30 = vld [vmem:[%s2943_s9 + $0x68] sm:$0xff] (%p2826_p5) }
 0x1db   : > { %v1322_v32 = vadd.f32 %v2700_v26, %v1321_v60  ;;  %v1791_v5 = vsel %vm1790_vm0, %v2698_v22, %v1787_v35  ;;  %vm1339_vm3 = vweird.f32 %v2704_v11  ;;  %v1330_v47 = vor.u32 1.1754944e-38, %v1329_v55  ;;  %2002 = vst [vmem:[%s4049_s25 + $0x60] sm:$0xff] (%p2826_p5), %v2001_v19  ;;  %v2031_v60 = vld [vmem:[%s2943_s9 + $0x90] sm:$0xff] (%p2826_p5)  ;;  %v2035_v35 = vld [vmem:[%s2943_s9 + $0xa0] sm:$0xff] (%p2826_p5)  ;;  %v2045_v55 = vld [vmem:[%s2943_s9 + $0xc8] sm:$0xff] (%p2826_p5) }
 0x1dc   : > { %v1796_v34 = vsel %vm4004_vm14, %v1795_v36, %v1791_v5  ;;  %v1336_v43 = vmul.f32 %v2704_v11, %v1335_v4  ;;  %v1800_v40 = vsub.f32 1.0, %v1799_v41  ;;  %vm1328_vm4 = vcmp.eq.f32.partialorder %v1327_v37, 8.507059e+37  ;;  %2004 = vst [vmem:[%s4049_s25 + $0x80] sm:$0xff] (%p2826_p5), %v2003_v24  ;;  %v2037_v36 = vld [vmem:[%s2943_s9 + $0xa8] sm:$0xff] (%p2826_p5)  ;;  %v2039_v9 = vld [vmem:[%s2943_s9 + $0xb0] sm:$0xff] (%p2826_p5)  ;;  %v2049_v5 = vld [vmem:[%s2943_s9 + $0xd8] sm:$0xff] (%p2826_p5) }
 0x1dd   : > { %v1858_v42 = vpack.c.bf16 %v1796_v34, %v1781_v8  ;;  %v1326_v21 = vsel %vm4020_vm2, %v2700_v26, %v1322_v32  ;;  %vm1338_vm5 = vweird.f32 %v3970_v15  ;;  %v1345_v53 = vor.u32 1.1754944e-38, %v1344_v39  ;;  %2006 = vst [vmem:[%s4049_s25 + $0xa0] sm:$0xff] (%p2826_p5), %v2005_v17  ;;  %v2041_v8 = vld [vmem:[%s2943_s9 + $0xb8] sm:$0xff] (%p2826_p5)  ;;  %v2043_v32 = vld [vmem:[%s2943_s9 + $0xc0] sm:$0xff] (%p2826_p5)  ;;  %v2053_v4 = vld [vmem:[%s2943_s9 + $0xe8] sm:$0xff] (%p2826_p5) }
 0x1de   : > { %v1337_v51 = vadd.f32 %v2704_v11, %v1336_v43  ;;  %v2708_v33 = vpop.eup %2707  ;;  %v1331_v52 = vsel %vm1328_vm4, %v1330_v47, %v1326_v21  ;;  %vm1340_vm6 = vmor %vm1338_vm5, %vm1339_vm3  ;;  %v1801_v57 = vmul.f32 %v2706_v16, %v1800_v40  ;;  %vm1343_vm7 = vcmp.eq.f32.partialorder %v1342_v2, 8.507059e+37  ;;  %2010 = vst [vmem:[%s4049_s25 + $0xe0] sm:$0xff] (%p2826_p5), %v2009_v27  ;;  %v2051_v37 = vld [vmem:[%s2943_s9 + $0xe0] sm:$0xff] (%p2826_p5) }
 0x1df   : > { %1890 = vst [vmem:[%s2943_s9 + $0xf0] sm:$0xff] %v1858_v42  ;;  %vm1804_vm8 = vweird.f32 %v2706_v16  ;;  %v1814_v49 = vmul.f32 %v2708_v33, %v4008_v18  ;;  %v1809_v62 = vand.u32 2147483648, %v3975_v20  ;;  %vm1803_vm9 = vweird.f32 %v3975_v20 }
 0x1e0   : > { %v1341_v44 = vsel %vm1340_vm6, %v2704_v11, %v1337_v51  ;;  %v1802_v61 = vadd.f32 %v2706_v16, %v1801_v57  ;;  %v1807_v1 = vand.u32 2147483647, %v3975_v20  ;;  %vm1805_vm10 = vmor %vm1803_vm9, %vm1804_vm8  ;;  %v1824_v15 = vand.u32 2147483648, %v4008_v18  ;;  %2016 = vst [vmem:[%s4049_s25 + $0x140] sm:$0xff] (%p2826_p5), %v2015_v56  ;;  %v2027_v11 = vld [vmem:[%s2943_s9 + $0x80] sm:$0xff] (%p2826_p5) }
 0x1e1   : > { %v1346_v45 = vsel %vm1343_vm7, %v1345_v53, %v1341_v44  ;;  %v1815_v10 = vsub.f32 1.0, %v1814_v49  ;;  %vm1819_vm11 = vweird.f32 %v2708_v33  ;;  %v1822_v22 = vand.u32 2147483647, %v4008_v18  ;;  %2018 = vst [vmem:[%s4049_s25 + $0x160] sm:$0xff] (%p2826_p5), %v2017_v29  ;;  %v2023_v31 = vld [vmem:[%s2943_s9 + $0x70] sm:$0xff] (%p2826_p5) }
 0x1e2   : > { %v1843_v50 = vpack.c.bf16 %v1346_v45, %v1331_v52  ;;  %v1806_v6 = vsel %vm1805_vm10, %v2706_v16, %v1802_v61  ;;  %v1810_v13 = vor.u32 1.1754944e-38, %v1809_v62  ;;  %vm1808_vm12 = vcmp.eq.f32.partialorder %v1807_v1, 8.507059e+37  ;;  %2022 = vst [vmem:[%s4049_s25 + $0x1a0] sm:$0xff] (%p2826_p5), %v2021_v30  ;;  %v2047_v16 = vld [vmem:[%s2943_s9 + $0xd0] sm:$0xff] (%p2826_p5) }
 0x1e3   : > { %v1816_v12 = vmul.f32 %v2708_v33, %v1815_v10  ;;  %vm1818_vm13 = vweird.f32 %v4008_v18  ;;  %v1825_v26 = vor.u32 1.1754944e-38, %v1824_v15  ;;  %vm1823_vm15 = vcmp.eq.f32.partialorder %v1822_v22, 8.507059e+37  ;;  %2024 = vst [vmem:[%s4049_s25 + $0x1c0] sm:$0xff] (%p2826_p5), %v2023_v31  ;;  %v2033_v18 = vld [vmem:[%s2943_s9 + $0x98] sm:$0xff] (%p2826_p5) }
 0x1e4   : > { %1875 = vst [vmem:[%s2943_s9 + $0x78] sm:$0xff] %v1843_v50  ;;  %v1811_v23 = vsel %vm1808_vm12, %v1810_v13, %v1806_v6  ;;  %vm1820_vm14 = vmor %vm1818_vm13, %vm1819_vm11 }
 0x1e5   : > { %v1817_v48 = vadd.f32 %v2708_v33, %v1816_v12  ;;  %2028 = vst [vmem:[%s4049_s25 + $0x200] sm:$0xff] (%p2826_p5), %v2027_v11 }
 0x1e6   : > { %2032 = vst [vmem:[%s4049_s25 + $0x240] sm:$0xff] (%p2826_p5), %v2031_v60  ;;  %v2055_v34 = vld [vmem:[%s2943_s9 + $0xf0] sm:$0xff] (%p2826_p5) }
 0x1e7   : > { %v1821_v20 = vsel %vm1820_vm14, %v2708_v33, %v1817_v48  ;;  %1898 = sbr.rel (!%p2826_p5) target bundleno = 502 (0x1f6), region = 32  ;;  %2034 = vst [vmem:[%s4049_s25 + $0x260] sm:$0xff] (%p2826_p5), %v2033_v18 }
 0x1e8   : > { %v1826_v63 = vsel %vm1823_vm15, %v1825_v26, %v1821_v20  ;;  %2036 = vst [vmem:[%s4049_s25 + $0x280] sm:$0xff] (%p2826_p5), %v2035_v35 }
 0x1e9   : > { %v1859_v59 = vpack.c.bf16 %v1826_v63, %v1811_v23  ;;  %2038 = vst [vmem:[%s4049_s25 + $0x2a0] sm:$0xff] (%p2826_p5), %v2037_v36 }
 0x1ea   : > { %2040 = vst [vmem:[%s4049_s25 + $0x2c0] sm:$0xff] (%p2826_p5), %v2039_v9 }
 0x1eb   : > { %1891 = vst [vmem:[%s2943_s9 + $0xf8] sm:$0xff] %v1859_v59  ;;  %v2025_v58 = vld [vmem:[%s2943_s9 + $0x78] sm:$0xff] (%p2826_p5) }
 0x1ec   : > { %2026 = vst [vmem:[%s4049_s25 + $0x1e0] sm:$0xff] %v2025_v58 }
 0x1ed   : > { %2042 = vst [vmem:[%s4049_s25 + $0x2e0] sm:$0xff] %v2041_v8 }
 0x1ee   : > { %2044 = vst [vmem:[%s4049_s25 + $0x300] sm:$0xff] %v2043_v32 }
 0x1ef   : > { %2046 = vst [vmem:[%s4049_s25 + $0x320] sm:$0xff] %v2045_v55 }
 0x1f0   : > { %2048 = vst [vmem:[%s4049_s25 + $0x340] sm:$0xff] %v2047_v16 }
 0x1f1   : > { %2050 = vst [vmem:[%s4049_s25 + $0x360] sm:$0xff] %v2049_v5 }
 0x1f2   : > { %2052 = vst [vmem:[%s4049_s25 + $0x380] sm:$0xff] %v2051_v37  ;;  %v2057_v38 = vld [vmem:[%s2943_s9 + $0xf8] sm:$0xff] }
 0x1f3   : > { %2054 = vst [vmem:[%s4049_s25 + $0x3a0] sm:$0xff] %v2053_v4 }
 0x1f4   : > { %2056 = vst [vmem:[%s4049_s25 + $0x3c0] sm:$0xff] %v2055_v34 }
 0x1f5   : > { %2058 = vst [vmem:[%s4049_s25 + $0x3e0] sm:$0xff] %v2057_v38 }
 0x1f6 PF: > { %s12_s15 = sadd.s32 1, %s2763_s15   ;;  %s4272_s9 = smov %s2743_s10 }
 0x1f7   : > { %p9_p11 = scmp.ge.s32.totalorder %s12_s15, 18   ;;  %s4273_s10 = smov %s2837_s24 }
 0x1f8   : > { %s4274_s11 = smov %s2755_s13  ;;  %s4275_s12 = smov %s2759_s14 }
 0x1f9   : > { %s4276_s13 = smov %s4279_s16  ;;  %s4277_s14 = smov %s4283_s17 }
 0x1fa   :  { %11 = sbr.rel (!%p9_p11) target bundleno = 4 (0x4), region = 99 }

</bundles_post_ra>
